<compile_context>
chip_gen: v7x
topology: tpu7x:2x2x1
jax: 0.10.0
libtpu: 0.0.40
codegen_flags: <defaults>
</compile_context>

<pallas_src>
from functools import partial

import jax
import jax.numpy as jnp
from jax import lax
from jax.experimental import pallas as pl
from jax.experimental.pallas import tpu as pltpu


# ----------------------------------------------------------------------------
# config (mirrors the PyTorch module with arch='litnet')
# ----------------------------------------------------------------------------
ARCH = "litnet"
MID = 128          # litnet => mid_planes = 128 (deconv in/out channels)
HEAD_CONV = 64
NUM_CLASS = 4
USE_OFFSET = True
BN_EPS = 1e-5


def _round_up(x, m):
    return ((x + m - 1) // m) * m


# ----------------------------------------------------------------------------
# Pallas kernels
# ----------------------------------------------------------------------------
def _mm_bias_act_kernel(x_ref, w_ref, b_ref, o_ref, *, relu):
    """o = act(x @ w + b): bf16 operands on the MXU, f32 accumulate/epilogue."""
    acc = jnp.dot(x_ref[...], w_ref[...], preferred_element_type=jnp.float32)
    acc = acc + b_ref[...]
    if relu:
        acc = jnp.maximum(acc, 0.0)
    o_ref[...] = acc.astype(o_ref.dtype)


def _fused_heads_kernel(x_ref, w1_ref, b1_ref, w2_ref, b2_ref, o_ref):
    """All three detection heads in one kernel:
       h = relu(cols @ W1 + b1)   (3x3 conv, Cout = 3 heads x 64 = 192)
       o = h @ W2 + b2            (block-diagonal 1x1 convs, padded to 128 lanes)
    """
    h = jnp.dot(x_ref[...], w1_ref[...], preferred_element_type=jnp.float32)
    h = jnp.maximum(h + b1_ref[...], 0.0)
    y = jnp.dot(h.astype(jnp.bfloat16), w2_ref[...],
                preferred_element_type=jnp.float32)
    o_ref[...] = (y + b2_ref[...]).astype(o_ref.dtype)


def _tiles_for(M, max_tm=1024):
    # >=2 grid steps so both v7x TensorCores get work; sublane-aligned tiles;
    # cap rows so VMEM stays well under the 32 MiB scoped budget everywhere.
    grid_m = max(2, pl.cdiv(M, max_tm))
    tm = _round_up(pl.cdiv(M, grid_m), 8)
    return tm, grid_m, tm * grid_m


_COMPILER_PARAMS = pltpu.CompilerParams(
    dimension_semantics=("parallel",),
    vmem_limit_bytes=32 * 1024 * 1024,
)


def matmul_bias_act(x, w, b, *, relu, out_dtype=jnp.bfloat16):
    """y = act(x @ w + b).  x:(M,K), w:(K,N) fed as bf16; b:(N,) f32."""
    M, K = x.shape
    K2, N = w.shape
    assert K == K2
    x = x.astype(jnp.bfloat16)
    w = w.astype(jnp.bfloat16)
    b = jnp.asarray(b, jnp.float32).reshape(1, N)

    tm, grid_m, Mp = _tiles_for(M)
    if Mp != M:
        x = jnp.pad(x, ((0, Mp - M), (0, 0)))

    y = pl.pallas_call(
        partial(_mm_bias_act_kernel, relu=relu),
        out_shape=jax.ShapeDtypeStruct((Mp, N), out_dtype),
        grid_spec=pltpu.PrefetchScalarGridSpec(
            num_scalar_prefetch=0,
            grid=(grid_m,),
            in_specs=[
                pl.BlockSpec((tm, K), lambda i: (i, 0)),
                pl.BlockSpec((K, N), lambda i: (0, 0)),
                pl.BlockSpec((1, N), lambda i: (0, 0)),
            ],
            out_specs=pl.BlockSpec((tm, N), lambda i: (i, 0)),
        ),
        compiler_params=_COMPILER_PARAMS,
    )(x, w, b)
    return y[:M] if Mp != M else y


def fused_heads(cols, w1, b1, w2, b2):
    """cols:(M, 9*128) bf16 -> (M, 128) f32 (hm|wh|offset channels + zero pad)."""
    M, K = cols.shape
    _, H1 = w1.shape
    _, NP = w2.shape
    cols = cols.astype(jnp.bfloat16)

    tm, grid_m, Mp = _tiles_for(M)
    if Mp != M:
        cols = jnp.pad(cols, ((0, Mp - M), (0, 0)))

    y = pl.pallas_call(
        _fused_heads_kernel,
        out_shape=jax.ShapeDtypeStruct((Mp, NP), jnp.float32),
        grid_spec=pltpu.PrefetchScalarGridSpec(
            num_scalar_prefetch=0,
            grid=(grid_m,),
            in_specs=[
                pl.BlockSpec((tm, K), lambda i: (i, 0)),
                pl.BlockSpec((K, H1), lambda i: (0, 0)),
                pl.BlockSpec((1, H1), lambda i: (0, 0)),
                pl.BlockSpec((H1, NP), lambda i: (0, 0)),
                pl.BlockSpec((1, NP), lambda i: (0, 0)),
            ],
            out_specs=pl.BlockSpec((tm, NP), lambda i: (i, 0)),
        ),
        compiler_params=_COMPILER_PARAMS,
    )(cols, w1, b1, w2, b2)
    return y[:M] if Mp != M else y


# ----------------------------------------------------------------------------
# JAX-side layout plumbing (NHWC only, cheap shifted-window gathers)
# ----------------------------------------------------------------------------
def _window_cols(x, taps, pad_hw):
    """x:(N,H,W,C) NHWC -> (N*H*W, len(taps)*C).  Lane dim (C) stays contiguous;
    no NCHW<->NHWC transposes and no 9x-dilated patch tensors."""
    N, H, W, C = x.shape
    xp = jnp.pad(x, ((0, 0), pad_hw[0], pad_hw[1], (0, 0)))
    cols = jnp.concatenate([xp[:, dy:dy + H, dx:dx + W, :] for (dy, dx) in taps],
                           axis=-1)
    return cols.reshape(N * H * W, len(taps) * C)


_DECONV_TAPS = ((0, 0), (0, 1), (1, 0), (1, 1))       # 2x2 window, pad bottom/right
_CONV3_TAPS = tuple((ky, kx) for ky in range(3) for kx in range(3))


def deconv_stage(x, wd, shift):
    """Sub-pixel ConvTranspose2d(k3,s2,p1,op1) + folded BN + ReLU.
    x:(N,H,W,Cin) bf16 -> (N,2H,2W,Cout) bf16."""
    N, H, W, _ = x.shape
    Cout = wd.shape[1] // 4
    cols = _window_cols(x, _DECONV_TAPS, ((0, 1), (0, 1)))
    y = matmul_bias_act(cols, wd, shift, relu=True, out_dtype=jnp.bfloat16)
    # output columns are (phase_y, phase_x, Cout); interleave phases into 2x map
    y = y.reshape(N, H, W, 2, 2, Cout).transpose(0, 1, 3, 2, 4, 5)
    return y.reshape(N, 2 * H, 2 * W, Cout)


def centernet_forward(x_nchw, prep):
    """x_nchw: backbone feature map (N, 128, h, w).  Returns NCHW head maps."""
    feat = jnp.transpose(x_nchw, (0, 2, 3, 1)).astype(jnp.bfloat16)   # -> NHWC
    for wd, shift in prep["deconv"]:
        feat = deconv_stage(feat, wd, shift)

    N, Hf, Wf, _ = feat.shape
    cols = _window_cols(feat, _CONV3_TAPS, ((1, 1), (1, 1)))          # (M, 1152)
    y = fused_heads(cols, prep["w1"], prep["b1"], prep["w2"], prep["b2"])
    y = y.reshape(N, Hf, Wf, -1)

    def nchw(t):
        return jnp.transpose(t, (0, 3, 1, 2))

    rst = {"hm": nchw(y[..., :NUM_CLASS]),
           "wh": nchw(y[..., NUM_CLASS:NUM_CLASS + 2])}
    if USE_OFFSET:
        rst["offset"] = nchw(y[..., NUM_CLASS + 2:NUM_CLASS + 4])
    return rst


# ----------------------------------------------------------------------------
# parameters (deterministic, synthetic, PyTorch layouts) + hoisted prep
# ----------------------------------------------------------------------------
def init_params(key):
    ks = iter(jax.random.split(key, 64))
    p = {"deconv": []}
    # deconv neck: 3 x (ConvTranspose2d 128->128 k3 s2, BN, ReLU)
    for _ in range(3):
        wt = 0.05 * jax.random.normal(next(ks), (MID, MID, 3, 3), jnp.float32)
        gamma = 1.0 + 0.1 * jax.random.normal(next(ks), (MID,), jnp.float32)
        beta = 0.1 * jax.random.normal(next(ks), (MID,), jnp.float32)
        mean = 0.05 * jax.random.normal(next(ks), (MID,), jnp.float32)
        var = jnp.abs(1.0 + 0.1 * jax.random.normal(next(ks), (MID,), jnp.float32))
        p["deconv"].append((wt, gamma, beta, mean, var))

    def head(out_planes):
        return {
            "w1": 0.05 * jax.random.normal(next(ks), (HEAD_CONV, MID, 3, 3), jnp.float32),
            "b1": 0.05 * jax.random.normal(next(ks), (HEAD_CONV,), jnp.float32),
            "w2": 0.05 * jax.random.normal(next(ks), (out_planes, HEAD_CONV, 1, 1), jnp.float32),
            "b2": 0.05 * jax.random.normal(next(ks), (out_planes,), jnp.float32),
        }

    p["hm"] = head(NUM_CLASS)
    p["wh"] = head(2)
    if USE_OFFSET:
        p["offset"] = head(2)
    return p


def _build_subpixel_deconv_matrix(wt, scale):
    """ConvTranspose2d weight (Cin, Cout, 3, 3) -> sub-pixel matmul weight
    (4*Cin, 4*Cout).  Row group t=dy*2+dx is the (dy,dx) tap of a 2x2 input
    window (padded bottom/right); column group p=py*2+px is the output
    sub-pixel phase.  out[2a+py, 2b+px] uses in[a+dy, b+dx] with original tap
    (ky, kx) = (py - 2*dy + 1, px - 2*dx + 1) when in range.  BN scale folded."""
    Cin, Cout = wt.shape[0], wt.shape[1]
    wd = jnp.zeros((4 * Cin, 4 * Cout), jnp.float32)
    for py in range(2):
        for px in range(2):
            p = py * 2 + px
            for dy in range(2):
                for dx in range(2):
                    ky = py - 2 * dy + 1
                    kx = px - 2 * dx + 1
                    if not (0 <= ky <= 2 and 0 <= kx <= 2):
                        continue
                    t = dy * 2 + dx
                    blk = wt[:, :, ky, kx] * scale[None, :]
                    wd = wd.at[t * Cin:(t + 1) * Cin,
                               p * Cout:(p + 1) * Cout].set(blk)
    return wd


def prepare_params(p):
    """Hoisted weight prep: BN folding, sub-pixel deconv matrices, head fusion
    (3x3 Cout concat + block-diagonal 1x1 padded to 128 lanes), bf16 casts."""
    prep = {"deconv": []}
    for wt, gamma, beta, mean, var in p["deconv"]:
        scale = gamma / jnp.sqrt(var + BN_EPS)
        shift = beta - mean * scale
        wd = _build_subpixel_deconv_matrix(wt, scale).astype(jnp.bfloat16)
        prep["deconv"].append((wd, jnp.tile(shift, 4).astype(jnp.float32)))

    names = ["hm", "wh"] + (["offset"] if USE_OFFSET else [])
    outs = [NUM_CLASS, 2] + ([2] if USE_OFFSET else [])

    def w1mat(w):  # (Cout, Cin, 3, 3) -> (9*Cin, Cout), tap-major rows
        return jnp.transpose(w, (2, 3, 1, 0)).reshape(-1, w.shape[0])

    w1 = jnp.concatenate([w1mat(p[n]["w1"]) for n in names], axis=1)
    b1 = jnp.concatenate([p[n]["b1"] for n in names])

    NP = 128   # pad fused 1x1 output (8 real channels) to a full lane width
    w2 = jnp.zeros((HEAD_CONV * len(names), NP), jnp.float32)
    b2 = jnp.zeros((NP,), jnp.float32)
    r = c = 0
    for n, o in zip(names, outs):
        w2 = w2.at[r:r + HEAD_CONV, c:c + o].set(p[n]["w2"].reshape(o, HEAD_CONV).T)
        b2 = b2.at[c:c + o].set(p[n]["b2"])
        r += HEAD_CONV
        c += o

    prep["w1"] = w1.astype(jnp.bfloat16)
    prep["b1"] = b1.reshape(1, -1).astype(jnp.float32)
    prep["w2"] = w2.astype(jnp.bfloat16)
    prep["b2"] = b2.reshape(1, -1).astype(jnp.float32)
    return prep


# ----------------------------------------------------------------------------
# pure-JAX f32 reference (XLA convs) mirroring the PyTorch module
# ----------------------------------------------------------------------------
def reference_forward(x_nchw, params):
    feat = x_nchw.astype(jnp.float32)
    for wt, gamma, beta, mean, var in params["deconv"]:
        w = jnp.transpose(jnp.flip(wt, (2, 3)), (1, 0, 2, 3))   # (Cout, Cin, 3, 3)
        y = lax.conv_general_dilated(
            feat, w, window_strides=(1, 1), padding=((1, 2), (1, 2)),
            lhs_dilation=(2, 2), dimension_numbers=("NCHW", "OIHW", "NCHW"))
        scale = gamma / jnp.sqrt(var + BN_EPS)
        shift = beta - mean * scale
        feat = jnp.maximum(y * scale[None, :, None, None]
                           + shift[None, :, None, None], 0.0)

    def head(hp):
        h = lax.conv_general_dilated(
            feat, hp["w1"], (1, 1), ((1, 1), (1, 1)),
            dimension_numbers=("NCHW", "OIHW", "NCHW"))
        h = jnp.maximum(h + hp["b1"][None, :, None, None], 0.0)
        o = lax.conv_general_dilated(
            h, hp["w2"], (1, 1), ((0, 0), (0, 0)),
            dimension_numbers=("NCHW", "OIHW", "NCHW"))
        return o + hp["b2"][None, :, None, None]

    rst = {"hm": head(params["hm"]), "wh": head(params["wh"])}
    if USE_OFFSET:
        rst["offset"] = head(params["offset"])
    return rst


if __name__ == "__main__":
    x = jax.random.normal(jax.random.PRNGKey(0), (2, MID, 4, 4), jnp.float32)
    params = init_params(jax.random.PRNGKey(42))
    prep = prepare_params(params)

    fwd = jax.jit(centernet_forward)
    out = jax.block_until_ready(fwd(x, prep))

    # shape sanity: 3 stride-2 deconv stages => 4 -> 32 spatial
    assert out["hm"].shape == (2, NUM_CLASS, 32, 32)
    assert out["wh"].shape == (2, 2, 32, 32)
    assert out["offset"].shape == (2, 2, 32, 32)

    # numerical sanity vs. f32 XLA reference (bf16 MXU path => loose tolerance)
    ref = reference_forward(x, params)
    for name in out:
        a = out[name].astype(jnp.float32)
        b = ref[name]
        err = jnp.linalg.norm((a - b).ravel()) / (jnp.linalg.norm(b.ravel()) + 1e-8)
        assert float(err) < 8e-2, (name, float(err))

    print("KERNEL_OK")
</pallas_src>

<mosaic_0001>
module attributes {stable_mosaic.version = 11 : i64} {
  func.func @_mm_bias_act_kernel(%arg0: i32, %arg1: memref<16x512xbf16, #tpu.memory_space<vmem>>, %arg2: memref<512x512xbf16, #tpu.memory_space<vmem>>, %arg3: memref<1x512xf32, #tpu.memory_space<vmem>>, %arg4: memref<16x512xbf16, #tpu.memory_space<vmem>>) attributes {dimension_semantics = [#tpu.dimension_semantics<parallel>], iteration_bounds = array<i64: 2>, scalar_prefetch = 0 : i64, scratch_operands = 0 : i64, tpu.core_type = #tpu.core_type<tc>, window_params = [{transform_indices = @transform_0, window_bounds = array<i64: 16, 512>}, {pipeline_mode = #tpu.pipeline_mode<synchronous>, transform_indices = @transform_1, window_bounds = array<i64: 512, 512>}, {pipeline_mode = #tpu.pipeline_mode<synchronous>, transform_indices = @transform_2, window_bounds = array<i64: 1, 512>}, {transform_indices = @transform_3, window_bounds = array<i64: 16, 512>}]} {
    %c0 = arith.constant 0 : index
    %c0_0 = arith.constant 0 : index
    %0 = vector.load %arg1[%c0, %c0_0] : memref<16x512xbf16, #tpu.memory_space<vmem>>, vector<16x512xbf16>
    %c0_1 = arith.constant 0 : index
    %c0_2 = arith.constant 0 : index
    %1 = vector.load %arg2[%c0_1, %c0_2] : memref<512x512xbf16, #tpu.memory_space<vmem>>, vector<512x512xbf16>
    %cst = arith.constant dense<0.000000e+00> : vector<16x512xf32>
    %2 = tpu.matmul %0, %1, %cst {dimension_numbers = #tpu.dot_dimension_numbers<[1], [0], [0], [1], [0, 0, 1, 1], [], []>} : vector<16x512xbf16>, vector<512x512xbf16>, vector<16x512xf32> -> vector<16x512xf32>
    %c0_3 = arith.constant 0 : index
    %c0_4 = arith.constant 0 : index
    %3 = vector.load %arg3[%c0_3, %c0_4] : memref<1x512xf32, #tpu.memory_space<vmem>>, vector<1x512xf32>
    %4 = vector.broadcast %3 : vector<1x512xf32> to vector<16x512xf32>
    %5 = arith.addf %2, %4 : vector<16x512xf32>
    %cst_5 = arith.constant 0.000000e+00 : f32
    %6 = vector.broadcast %cst_5 : f32 to vector<16x512xf32>
    %7 = arith.maximumf %5, %6 : vector<16x512xf32>
    %8 = arith.truncf %7 : vector<16x512xf32> to vector<16x512xbf16>
    %c0_6 = arith.constant 0 : index
    %c0_7 = arith.constant 0 : index
    %9 = vector.load %arg4[%c0_6, %c0_7] : memref<16x512xbf16, #tpu.memory_space<vmem>>, vector<16x512xbf16>
    tpu.vector_store %arg4[%c0_6, %c0_7], %8 {strides = array<i32>} : memref<16x512xbf16, #tpu.memory_space<vmem>>, vector<16x512xbf16>,
    return
  }
  func.func @transform_0(%arg0: i32) -> (i32, i32) {
    %c0_i32 = arith.constant 0 : i32
    %c0_i32_0 = arith.constant 0 : i32
    return %arg0, %c0_i32 : i32, i32
  }
  func.func @transform_1(%arg0: i32) -> (i32, i32) {
    %c0_i32 = arith.constant 0 : i32
    %c0_i32_0 = arith.constant 0 : i32
    %c0_i32_1 = arith.constant 0 : i32
    return %c0_i32, %c0_i32_0 : i32, i32
  }
  func.func @transform_2(%arg0: i32) -> (i32, i32) {
    %c0_i32 = arith.constant 0 : i32
    %c0_i32_0 = arith.constant 0 : i32
    %c0_i32_1 = arith.constant 0 : i32
    return %c0_i32, %c0_i32_0 : i32, i32
  }
  func.func @transform_3(%arg0: i32) -> (i32, i32) {
    %c0_i32 = arith.constant 0 : i32
    %c0_i32_0 = arith.constant 0 : i32
    return %arg0, %c0_i32 : i32, i32
  }
}

module attributes {stable_mosaic.version = 11 : i64} {
  func.func @_mm_bias_act_kernel(%arg0: i32, %arg1: memref<64x512xbf16, #tpu.memory_space<vmem>>, %arg2: memref<512x512xbf16, #tpu.memory_space<vmem>>, %arg3: memref<1x512xf32, #tpu.memory_space<vmem>>, %arg4: memref<64x512xbf16, #tpu.memory_space<vmem>>) attributes {dimension_semantics = [#tpu.dimension_semantics<parallel>], iteration_bounds = array<i64: 2>, scalar_prefetch = 0 : i64, scratch_operands = 0 : i64, tpu.core_type = #tpu.core_type<tc>, window_params = [{transform_indices = @transform_0, window_bounds = array<i64: 64, 512>}, {pipeline_mode = #tpu.pipeline_mode<synchronous>, transform_indices = @transform_1, window_bounds = array<i64: 512, 512>}, {pipeline_mode = #tpu.pipeline_mode<synchronous>, transform_indices = @transform_2, window_bounds = array<i64: 1, 512>}, {transform_indices = @transform_3, window_bounds = array<i64: 64, 512>}]} {
    %c0 = arith.constant 0 : index
    %c0_0 = arith.constant 0 : index
    %0 = vector.load %arg1[%c0, %c0_0] : memref<64x512xbf16, #tpu.memory_space<vmem>>, vector<64x512xbf16>
    %c0_1 = arith.constant 0 : index
    %c0_2 = arith.constant 0 : index
    %1 = vector.load %arg2[%c0_1, %c0_2] : memref<512x512xbf16, #tpu.memory_space<vmem>>, vector<512x512xbf16>
    %cst = arith.constant dense<0.000000e+00> : vector<64x512xf32>
    %2 = tpu.matmul %0, %1, %cst {dimension_numbers = #tpu.dot_dimension_numbers<[1], [0], [0], [1], [0, 0, 1, 1], [], []>} : vector<64x512xbf16>, vector<512x512xbf16>, vector<64x512xf32> -> vector<64x512xf32>
    %c0_3 = arith.constant 0 : index
    %c0_4 = arith.constant 0 : index
    %3 = vector.load %arg3[%c0_3, %c0_4] : memref<1x512xf32, #tpu.memory_space<vmem>>, vector<1x512xf32>
    %4 = vector.broadcast %3 : vector<1x512xf32> to vector<64x512xf32>
    %5 = arith.addf %2, %4 : vector<64x512xf32>
    %cst_5 = arith.constant 0.000000e+00 : f32
    %6 = vector.broadcast %cst_5 : f32 to vector<64x512xf32>
    %7 = arith.maximumf %5, %6 : vector<64x512xf32>
    %8 = arith.truncf %7 : vector<64x512xf32> to vector<64x512xbf16>
    %c0_6 = arith.constant 0 : index
    %c0_7 = arith.constant 0 : index
    %9 = vector.load %arg4[%c0_6, %c0_7] : memref<64x512xbf16, #tpu.memory_space<vmem>>, vector<64x512xbf16>
    tpu.vector_store %arg4[%c0_6, %c0_7], %8 {strides = array<i32>} : memref<64x512xbf16, #tpu.memory_space<vmem>>, vector<64x512xbf16>,
    return
  }
  func.func @transform_0(%arg0: i32) -> (i32, i32) {
    %c0_i32 = arith.constant 0 : i32
    %c0_i32_0 = arith.constant 0 : i32
    return %arg0, %c0_i32 : i32, i32
  }
  func.func @transform_1(%arg0: i32) -> (i32, i32) {
    %c0_i32 = arith.constant 0 : i32
    %c0_i32_0 = arith.constant 0 : i32
    %c0_i32_1 = arith.constant 0 : i32
    return %c0_i32, %c0_i32_0 : i32, i32
  }
  func.func @transform_2(%arg0: i32) -> (i32, i32) {
    %c0_i32 = arith.constant 0 : i32
    %c0_i32_0 = arith.constant 0 : i32
    %c0_i32_1 = arith.constant 0 : i32
    return %c0_i32, %c0_i32_0 : i32, i32
  }
  func.func @transform_3(%arg0: i32) -> (i32, i32) {
    %c0_i32 = arith.constant 0 : i32
    %c0_i32_0 = arith.constant 0 : i32
    return %arg0, %c0_i32 : i32, i32
  }
}

module attributes {stable_mosaic.version = 11 : i64} {
  func.func @_mm_bias_act_kernel(%arg0: i32, %arg1: memref<256x512xbf16, #tpu.memory_space<vmem>>, %arg2: memref<512x512xbf16, #tpu.memory_space<vmem>>, %arg3: memref<1x512xf32, #tpu.memory_space<vmem>>, %arg4: memref<256x512xbf16, #tpu.memory_space<vmem>>) attributes {dimension_semantics = [#tpu.dimension_semantics<parallel>], iteration_bounds = array<i64: 2>, scalar_prefetch = 0 : i64, scratch_operands = 0 : i64, tpu.core_type = #tpu.core_type<tc>, window_params = [{transform_indices = @transform_0, window_bounds = array<i64: 256, 512>}, {pipeline_mode = #tpu.pipeline_mode<synchronous>, transform_indices = @transform_1, window_bounds = array<i64: 512, 512>}, {pipeline_mode = #tpu.pipeline_mode<synchronous>, transform_indices = @transform_2, window_bounds = array<i64: 1, 512>}, {transform_indices = @transform_3, window_bounds = array<i64: 256, 512>}]} {
    %c0 = arith.constant 0 : index
    %c0_0 = arith.constant 0 : index
    %0 = vector.load %arg1[%c0, %c0_0] : memref<256x512xbf16, #tpu.memory_space<vmem>>, vector<256x512xbf16>
    %c0_1 = arith.constant 0 : index
    %c0_2 = arith.constant 0 : index
    %1 = vector.load %arg2[%c0_1, %c0_2] : memref<512x512xbf16, #tpu.memory_space<vmem>>, vector<512x512xbf16>
    %cst = arith.constant dense<0.000000e+00> : vector<256x512xf32>
    %2 = tpu.matmul %0, %1, %cst {dimension_numbers = #tpu.dot_dimension_numbers<[1], [0], [0], [1], [0, 0, 1, 1], [], []>} : vector<256x512xbf16>, vector<512x512xbf16>, vector<256x512xf32> -> vector<256x512xf32>
    %c0_3 = arith.constant 0 : index
    %c0_4 = arith.constant 0 : index
    %3 = vector.load %arg3[%c0_3, %c0_4] : memref<1x512xf32, #tpu.memory_space<vmem>>, vector<1x512xf32>
    %4 = vector.broadcast %3 : vector<1x512xf32> to vector<256x512xf32>
    %5 = arith.addf %2, %4 : vector<256x512xf32>
    %cst_5 = arith.constant 0.000000e+00 : f32
    %6 = vector.broadcast %cst_5 : f32 to vector<256x512xf32>
    %7 = arith.maximumf %5, %6 : vector<256x512xf32>
    %8 = arith.truncf %7 : vector<256x512xf32> to vector<256x512xbf16>
    %c0_6 = arith.constant 0 : index
    %c0_7 = arith.constant 0 : index
    %9 = vector.load %arg4[%c0_6, %c0_7] : memref<256x512xbf16, #tpu.memory_space<vmem>>, vector<256x512xbf16>
    tpu.vector_store %arg4[%c0_6, %c0_7], %8 {strides = array<i32>} : memref<256x512xbf16, #tpu.memory_space<vmem>>, vector<256x512xbf16>,
    return
  }
  func.func @transform_0(%arg0: i32) -> (i32, i32) {
    %c0_i32 = arith.constant 0 : i32
    %c0_i32_0 = arith.constant 0 : i32
    return %arg0, %c0_i32 : i32, i32
  }
  func.func @transform_1(%arg0: i32) -> (i32, i32) {
    %c0_i32 = arith.constant 0 : i32
    %c0_i32_0 = arith.constant 0 : i32
    %c0_i32_1 = arith.constant 0 : i32
    return %c0_i32, %c0_i32_0 : i32, i32
  }
  func.func @transform_2(%arg0: i32) -> (i32, i32) {
    %c0_i32 = arith.constant 0 : i32
    %c0_i32_0 = arith.constant 0 : i32
    %c0_i32_1 = arith.constant 0 : i32
    return %c0_i32, %c0_i32_0 : i32, i32
  }
  func.func @transform_3(%arg0: i32) -> (i32, i32) {
    %c0_i32 = arith.constant 0 : i32
    %c0_i32_0 = arith.constant 0 : i32
    return %arg0, %c0_i32 : i32, i32
  }
}

module attributes {stable_mosaic.version = 11 : i64} {
  func.func @_fused_heads_kernel(%arg0: i32, %arg1: memref<1024x1152xbf16, #tpu.memory_space<vmem>>, %arg2: memref<1152x192xbf16, #tpu.memory_space<vmem>>, %arg3: memref<1x192xf32, #tpu.memory_space<vmem>>, %arg4: memref<192x128xbf16, #tpu.memory_space<vmem>>, %arg5: memref<1x128xf32, #tpu.memory_space<vmem>>, %arg6: memref<1024x128xf32, #tpu.memory_space<vmem>>) attributes {dimension_semantics = [#tpu.dimension_semantics<parallel>], iteration_bounds = array<i64: 2>, scalar_prefetch = 0 : i64, scratch_operands = 0 : i64, tpu.core_type = #tpu.core_type<tc>, window_params = [{transform_indices = @transform_0, window_bounds = array<i64: 1024, 1152>}, {pipeline_mode = #tpu.pipeline_mode<synchronous>, transform_indices = @transform_1, window_bounds = array<i64: 1152, 192>}, {pipeline_mode = #tpu.pipeline_mode<synchronous>, transform_indices = @transform_2, window_bounds = array<i64: 1, 192>}, {pipeline_mode = #tpu.pipeline_mode<synchronous>, transform_indices = @transform_3, window_bounds = array<i64: 192, 128>}, {pipeline_mode = #tpu.pipeline_mode<synchronous>, transform_indices = @transform_4, window_bounds = array<i64: 1, 128>}, {transform_indices = @transform_5, window_bounds = array<i64: 1024, 128>}]} {
    %c0 = arith.constant 0 : index
    %c0_0 = arith.constant 0 : index
    %0 = vector.load %arg1[%c0, %c0_0] : memref<1024x1152xbf16, #tpu.memory_space<vmem>>, vector<1024x1152xbf16>
    %c0_1 = arith.constant 0 : index
    %c0_2 = arith.constant 0 : index
    %1 = vector.load %arg2[%c0_1, %c0_2] : memref<1152x192xbf16, #tpu.memory_space<vmem>>, vector<1152x192xbf16>
    %cst = arith.constant dense<0.000000e+00> : vector<1024x192xf32>
    %2 = tpu.matmul %0, %1, %cst {dimension_numbers = #tpu.dot_dimension_numbers<[1], [0], [0], [1], [0, 0, 1, 1], [], []>} : vector<1024x1152xbf16>, vector<1152x192xbf16>, vector<1024x192xf32> -> vector<1024x192xf32>
    %c0_3 = arith.constant 0 : index
    %c0_4 = arith.constant 0 : index
    %3 = vector.load %arg3[%c0_3, %c0_4] : memref<1x192xf32, #tpu.memory_space<vmem>>, vector<1x192xf32>
    %4 = vector.broadcast %3 : vector<1x192xf32> to vector<1024x192xf32>
    %5 = arith.addf %2, %4 : vector<1024x192xf32>
    %cst_5 = arith.constant 0.000000e+00 : f32
    %6 = vector.broadcast %cst_5 : f32 to vector<1024x192xf32>
    %7 = arith.maximumf %5, %6 : vector<1024x192xf32>
    %8 = arith.truncf %7 : vector<1024x192xf32> to vector<1024x192xbf16>
    %c0_6 = arith.constant 0 : index
    %c0_7 = arith.constant 0 : index
    %9 = vector.load %arg4[%c0_6, %c0_7] : memref<192x128xbf16, #tpu.memory_space<vmem>>, vector<192x128xbf16>
    %cst_8 = arith.constant dense<0.000000e+00> : vector<1024x128xf32>
    %10 = tpu.matmul %8, %9, %cst_8 {dimension_numbers = #tpu.dot_dimension_numbers<[1], [0], [0], [1], [0, 0, 1, 1], [], []>} : vector<1024x192xbf16>, vector<192x128xbf16>, vector<1024x128xf32> -> vector<1024x128xf32>
    %c0_9 = arith.constant 0 : index
    %c0_10 = arith.constant 0 : index
    %11 = vector.load %arg5[%c0_9, %c0_10] : memref<1x128xf32, #tpu.memory_space<vmem>>, vector<1x128xf32>
    %12 = vector.broadcast %11 : vector<1x128xf32> to vector<1024x128xf32>
    %13 = arith.addf %10, %12 : vector<1024x128xf32>
    %c0_11 = arith.constant 0 : index
    %c0_12 = arith.constant 0 : index
    %14 = vector.load %arg6[%c0_11, %c0_12] : memref<1024x128xf32, #tpu.memory_space<vmem>>, vector<1024x128xf32>
    tpu.vector_store %arg6[%c0_11, %c0_12], %13 {strides = array<i32>} : memref<1024x128xf32, #tpu.memory_space<vmem>>, vector<1024x128xf32>,
    return
  }
  func.func @transform_0(%arg0: i32) -> (i32, i32) {
    %c0_i32 = arith.constant 0 : i32
    %c0_i32_0 = arith.constant 0 : i32
    return %arg0, %c0_i32 : i32, i32
  }
  func.func @transform_1(%arg0: i32) -> (i32, i32) {
    %c0_i32 = arith.constant 0 : i32
    %c0_i32_0 = arith.constant 0 : i32
    %c0_i32_1 = arith.constant 0 : i32
    return %c0_i32, %c0_i32_0 : i32, i32
  }
  func.func @transform_2(%arg0: i32) -> (i32, i32) {
    %c0_i32 = arith.constant 0 : i32
    %c0_i32_0 = arith.constant 0 : i32
    %c0_i32_1 = arith.constant 0 : i32
    return %c0_i32, %c0_i32_0 : i32, i32
  }
  func.func @transform_3(%arg0: i32) -> (i32, i32) {
    %c0_i32 = arith.constant 0 : i32
    %c0_i32_0 = arith.constant 0 : i32
    %c0_i32_1 = arith.constant 0 : i32
    return %c0_i32, %c0_i32_0 : i32, i32
  }
  func.func @transform_4(%arg0: i32) -> (i32, i32) {
    %c0_i32 = arith.constant 0 : i32
    %c0_i32_0 = arith.constant 0 : i32
    %c0_i32_1 = arith.constant 0 : i32
    return %c0_i32, %c0_i32_0 : i32, i32
  }
  func.func @transform_5(%arg0: i32) -> (i32, i32) {
    %c0_i32 = arith.constant 0 : i32
    %c0_i32_0 = arith.constant 0 : i32
    return %arg0, %c0_i32 : i32, i32
  }
}

</mosaic_0001>

<bundles_post_ra>
// kernel: centernet_forward.4
= control target key start
LH: loop header
LB: loop body
LE: loop exit
PB: predicated region body
PF: predicated region fallthrough
CT: control target
= control target key end

     0   :  { %8 = vsyncpa [#allocation3], 0  ;;  %s1918_s0 = inlined_call_operand.vmem [shape: bf16[32,512], index: 0, kind: input, shape index: {}]   ;;  %s1919_s1 = inlined_call_operand.hbm [shape: bf16[512,512], index: 1, kind: input, shape index: {}]   ;;  %s1920_s2 = inlined_call_operand.hbm [shape: f32[1,512], index: 2, kind: input, shape index: {}]   ;;  %s1921_s3 = inlined_call_operand.vmem [shape: bf16[32,512], index: 3, kind: output, shape index: {}]  }
   0x1   :  { %9 = vsyncpa [#allocation5], 0  ;;  %s1809_s12 = smov 0  }
   0x2 LB: > { %s1309_s13 = sadd.s32 4294967295, %s1783_s12   ;;  %p1311_p0 = scmp.ge.s32.totalorder %s1783_s12, 1  ;;  %s1783_s12 = sphi %s1809_s12, %s15_s12  }
   0x3   : > { %p114_p1 = scmp.lt.s32.totalorder %s1783_s12, 3  ;;  %s1785_s14 = smov [#allocation2]  }
   0x4   : > { %s126_s15 = sshll.u32 %s1785_s14, 4  ;;  %p1823_p3 = scmp.eq.s32.totalorder %s1309_s13, 0  ;;  %s127_s15 = int_to_ptr.vmem [resolvable:$true] %s126_s15 }
   0x5   : > { %p1817_p2 = pnand %p1311_p0, %p114_p1  ;;  %s1786_s18 = smov [#allocation4]  }
   0x6   : > { %s1926_s17 = scalar_select %p1823_p3, 1, 0 }
   0x7   : > { %s1925_s16 = scalar_select %p1817_p2, 1, 0 }
   0x8   : > { %p1492_p4 = pneg %p1817_p2  ;;  %s140_s19 = sshll.u32 %s1786_s18, 4  ;;  %s1835_s19 = int_to_ptr.vmem [resolvable:$true] %s140_s19 }
   0x9   : > { %s1713_s23 = scalar_lea.hbm %s1919_s1, 16384 }
   0xa   : > { %p1831_p5 = pnand %p1823_p3, %p1492_p4  ;;  %p1714_p6 = scmp.ne.s32.totalorder %s1919_s1, %s1713_s23 }
   0xb   : > { %p1720_p10 = scmp.lt.u32.totalorder %s1713_s23, %s1919_s1 }
   0xc   : > { %p1715_p7 = pneg %p1831_p5 }
   0xe   : > { %p1716_p8 = pnand %p1715_p7, %p1714_p6 }
  0x10   : > { %p1717_p9 = pneg %p1716_p8 }
  0x12   : > { %p1722_p11 = pnand %p1720_p10, %p1717_p9 }
  0x14   : > { %1725 = shalt.err (!%p1722_p11)
}
  0x15   : > { %s1726_s28 = scalar_lea.vmem %s127_s15, 16384  ;;  %p1734_p1 = scmp.lt.s32.totalorder %s127_s15, %s127_s15 }
  0x16   : > { %p1727_p12 = scmp.ne.s32.totalorder %s127_s15, %s1726_s28  ;;  %p1735_p4 = scmp.lt.s32.totalorder %s1726_s28, %s1726_s28 }
  0x18   : > { %p1729_p13 = pnand %p1727_p12, %p1715_p7  ;;  %p1736_p3 = por %p1735_p4, %p1734_p1 }
  0x1a   : > { %p1730_p0 = pneg %p1729_p13 }
  0x1c   : > { %p1737_p2 = pnand %p1736_p3, %p1730_p0 }
  0x1e   : > { %1740 = shalt.err (!%p1737_p2)
}
  0x1f   : > { %s1787_s29 = smov 256   ;;  %s1788_s30 = smov 16  }
  0x20   : > { %1495 = dma.hbm_to_vmem [thread:$0]  (!%p1831_p5), %s1919_s1, 16384, %s127_s15, [#allocation3], %s1787_s29, %s1787_s29, %s1788_s30  }
  0x21   : > { %s1741_s8 = scalar_lea.hbm %s1920_s2, 64 }
  0x22   : > { %p1742_p6 = scmp.ne.s32.totalorder %s1920_s2, %s1741_s8  ;;  %p1748_p8 = scmp.lt.u32.totalorder %s1741_s8, %s1920_s2 }
  0x24   : > { %p1744_p2 = pnand %p1742_p6, %p1715_p7 }
  0x26   : > { %p1745_p3 = pneg %p1744_p2 }
  0x28   : > { %p1750_p9 = pnand %p1748_p8, %p1745_p3 }
  0x2a   : > { %1753 = shalt.err (!%p1750_p9)
}
  0x2b   : > { %s1754_s15 = scalar_lea.vmem %s1835_s19, 64  ;;  %p1762_p13 = scmp.lt.s32.totalorder %s1835_s19, %s1835_s19 }
  0x2c   : > { %p1755_p10 = scmp.ne.s32.totalorder %s1835_s19, %s1754_s15  ;;  %p1763_p0 = scmp.lt.s32.totalorder %s1754_s15, %s1754_s15 }
  0x2e   : > { %p1757_p11 = pnand %p1755_p10, %p1715_p7  ;;  %p1764_p1 = por %p1763_p0, %p1762_p13 }
  0x30   : > { %p1758_p12 = pneg %p1757_p11 }
  0x32   : > { %p1765_p4 = pnand %p1764_p1, %p1758_p12 }
  0x34   : > { %1768 = shalt.err (!%p1765_p4)
}
  0x35   : > { %1498 = dma.hbm_to_vmem [thread:$0]  (!%p1831_p5), %s1920_s2, 64, %s1835_s19, [#allocation5]  }
  0x36   : > { %p1928_p6 = scmp.ne.s32.totalorder %s1925_s16, 0 }
  0x37   : > { %p1929_p2 = scmp.ne.s32.totalorder (!%p1928_p6), %s1926_s17, 0 }
  0x38   : > { %163 = sbr.rel (%p1928_p6) target bundleno = 417 (0x1a1), region = 32 }
  0x3f   : > { %1774 = dma.done.wait (%p1929_p2), [#allocation3], 16384  }
  0x40   : > { %1776 = vsyncadd (%p1929_p2), [#allocation3], 4294950912 }
  0x41   : > { %1778 = dma.done.wait (%p1929_p2), [#allocation5], 64  }
  0x42   : > { %1780 = vsyncadd (%p1929_p2), [#allocation5], 4294967232  ;;  %v1515_v0 = vld [vmem:[#allocation2 + $0x4] ss:$16 sps:$4 sm:$0xff]   ;;  %v1517_v1 = vld [vmem:[#allocation2 + $0xc] ss:$16 sps:$4 sm:$0xff]  }
  0x43   : > { %1021 = vmatprep.subr.bf16.mxu0 %v1515_v0  ;;  %v1519_v2 = vld [vmem:[#allocation2] ss:$16 sps:$4 sm:$0xff]   ;;  %v1520_v3 = vld [vmem:[#allocation2 + $0x8] ss:$16 sps:$4 sm:$0xff]   ;;  %1107 = vmatprep.subr.bf16.mxu1 %v1517_v1  ;;  %v1521_v4 = vld [vmem:[#allocation2 + $0x24] ss:$16 sps:$4 sm:$0xff]  }
  0x44   : > { %1022 = vmatpush1.bf16.msra.mxu0 %v1519_v2  ;;  %1108 = vmatpush1.bf16.msra.mxu1 %v1520_v3  ;;  %v1523_v5 = vld [vmem:[#allocation2 + $0x2c] ss:$16 sps:$4 sm:$0xff]   ;;  %v1525_v6 = vld [vmem:[#allocation2 + $0x20] ss:$16 sps:$4 sm:$0xff]   ;;  %v1526_v7 = vld [vmem:[#allocation2 + $0x28] ss:$16 sps:$4 sm:$0xff]  }
  0x45   : > { %1023 = vmatprep.subr.bf16.mxu0 %v1521_v4  ;;  %1109 = vmatprep.subr.bf16.mxu1 %v1523_v5  ;;  %v1527_v8 = vld [vmem:[#allocation2 + $0x44] ss:$16 sps:$4 sm:$0xff]   ;;  %v1529_v9 = vld [vmem:[#allocation2 + $0x4c] ss:$16 sps:$4 sm:$0xff]   ;;  %v1531_v10 = vld [vmem:[#allocation2 + $0x40] ss:$16 sps:$4 sm:$0xff]  }
  0x46   : > { %v1532_v11 = vld [vmem:[#allocation2 + $0x48] ss:$16 sps:$4 sm:$0xff]   ;;  %v1533_v12 = vld [vmem:[#allocation2 + $0x64] ss:$16 sps:$4 sm:$0xff]   ;;  %v1535_v13 = vld [vmem:[#allocation2 + $0x6c] ss:$16 sps:$4 sm:$0xff]  }
  0x47   : > { %v1537_v14 = vld [vmem:[#allocation2 + $0x60] ss:$16 sps:$4 sm:$0xff]   ;;  %v1538_v15 = vld [vmem:[#allocation2 + $0x68] ss:$16 sps:$4 sm:$0xff]   ;;  %v1539_v16 = vld [vmem:[#allocation2 + $0x84] ss:$16 sps:$4 sm:$0xff]  }
  0x48   : > { %1024 = vmatpush1.bf16.msra.mxu0 %v1525_v6  ;;  %1110 = vmatpush1.bf16.msra.mxu1 %v1526_v7  ;;  %v1541_v17 = vld [vmem:[#allocation2 + $0x8c] ss:$16 sps:$4 sm:$0xff]   ;;  %v1543_v18 = vld [vmem:[#allocation2 + $0x80] ss:$16 sps:$4 sm:$0xff]   ;;  %v1544_v19 = vld [vmem:[#allocation2 + $0x88] ss:$16 sps:$4 sm:$0xff]  }
  0x49   : > { %1025 = vmatprep.subr.bf16.mxu0 %v1527_v8  ;;  %1111 = vmatprep.subr.bf16.mxu1 %v1529_v9  ;;  %v1545_v20 = vld [vmem:[#allocation2 + $0xa4] ss:$16 sps:$4 sm:$0xff]   ;;  %v1547_v21 = vld [vmem:[#allocation2 + $0xac] ss:$16 sps:$4 sm:$0xff]   ;;  %v1549_v22 = vld [vmem:[#allocation2 + $0xa0] ss:$16 sps:$4 sm:$0xff]  }
  0x4a   : > { %v1550_v23 = vld [vmem:[#allocation2 + $0xa8] ss:$16 sps:$4 sm:$0xff]   ;;  %v1551_v24 = vld [vmem:[#allocation2 + $0xc4] ss:$16 sps:$4 sm:$0xff]   ;;  %v1553_v25 = vld [vmem:[#allocation2 + $0xcc] ss:$16 sps:$4 sm:$0xff]  }
  0x4b   : > { %v1555_v26 = vld [vmem:[#allocation2 + $0xc0] ss:$16 sps:$4 sm:$0xff]   ;;  %v1556_v27 = vld [vmem:[#allocation2 + $0xc8] ss:$16 sps:$4 sm:$0xff]   ;;  %v1557_v28 = vld [vmem:[#allocation2 + $0xe4] ss:$16 sps:$4 sm:$0xff]  }
  0x4c   : > { %1026 = vmatpush1.bf16.msra.mxu0 %v1531_v10  ;;  %1112 = vmatpush1.bf16.msra.mxu1 %v1532_v11  ;;  %v1559_v29 = vld [vmem:[#allocation2 + $0xec] ss:$16 sps:$4 sm:$0xff]   ;;  %s1318_s16 = sshll.u32 %s1309_s13, 1  ;;  %v1561_v30 = vld [vmem:[#allocation2 + $0xe0] ss:$16 sps:$4 sm:$0xff]  }
  0x4d   : > { %1027 = vmatprep.subr.bf16.mxu0 %v1533_v12  ;;  %1113 = vmatprep.subr.bf16.mxu1 %v1535_v13  ;;  %v1562_v31 = vld [vmem:[#allocation2 + $0xe8] ss:$16 sps:$4 sm:$0xff]   ;;  %v1563_v32 = vld [vmem:[#allocation2 + $0x104] ss:$16 sps:$4 sm:$0xff]   ;;  %v1565_v33 = vld [vmem:[#allocation2 + $0x10c] ss:$16 sps:$4 sm:$0xff]  }
  0x4e   : > { %p194_p5 = scmp.lt.s32.totalorder %s1318_s16, 3  ;;  %v1567_v34 = vld [vmem:[#allocation2 + $0x100] ss:$16 sps:$4 sm:$0xff]   ;;  %v1568_v35 = vld [vmem:[#allocation2 + $0x108] ss:$16 sps:$4 sm:$0xff]  }
  0x4f   : > { %v1569_v36 = vld [vmem:[#allocation2 + $0x124] ss:$16 sps:$4 sm:$0xff]   ;;  %v1571_v37 = vld [vmem:[#allocation2 + $0x12c] ss:$16 sps:$4 sm:$0xff]   ;;  %v1573_v38 = vld [vmem:[#allocation2 + $0x120] ss:$16 sps:$4 sm:$0xff]  }
  0x50   : > { %1028 = vmatpush1.bf16.msra.mxu0 %v1537_v14  ;;  %1114 = vmatpush1.bf16.msra.mxu1 %v1538_v15  ;;  %s1931_s16 = smov (!%p194_p5, %s1318_s16), 3  ;;  %v1574_v39 = vld [vmem:[#allocation2 + $0x128] ss:$16 sps:$4 sm:$0xff]   ;;  %v1575_v40 = vld [vmem:[#allocation2 + $0x144] ss:$16 sps:$4 sm:$0xff]  }
  0x51   : > { %1029 = vmatprep.subr.bf16.mxu0 %v1539_v16  ;;  %1115 = vmatprep.subr.bf16.mxu1 %v1541_v17  ;;  %v1577_v41 = vld [vmem:[#allocation2 + $0x14c] ss:$16 sps:$4 sm:$0xff]   ;;  %s1462_s13 = sshll.u32 %s1931_s16, 4  ;;  %v1579_v42 = vld [vmem:[#allocation2 + $0x140] ss:$16 sps:$4 sm:$0xff]  }
  0x52   : > { %v1580_v43 = vld [vmem:[#allocation2 + $0x148] ss:$16 sps:$4 sm:$0xff]   ;;  %v1581_v44 = vld [vmem:[#allocation2 + $0x164] ss:$16 sps:$4 sm:$0xff]   ;;  %s1904_s20 = scalar_lea.vmem %s1918_s0, %s1462_s13  ;;  %v1583_v45 = vld [vmem:[#allocation2 + $0x16c] ss:$16 sps:$4 sm:$0xff]   ;;  %s205_s24 = scalar_lea.vmem %s1921_s3, %s1462_s13 }
  0x53   : > { %v1585_v46 = vld [vmem:[#allocation2 + $0x160] ss:$16 sps:$4 sm:$0xff]   ;;  %v1586_v47 = vld [vmem:[#allocation2 + $0x168] ss:$16 sps:$4 sm:$0xff]   ;;  %v1613_v48 = vld [vmem:[%s1904_s20 + $0x4] ss:$16 sps:$4 sm:$0xff]  }
  0x54   : > { %1030 = vmatpush1.bf16.msra.mxu0 %v1543_v18  ;;  %1116 = vmatpush1.bf16.msra.mxu1 %v1544_v19  ;;  %v1587_v49 = vld [vmem:[#allocation2 + $0x184] ss:$16 sps:$4 sm:$0xff]   ;;  %v1589_v50 = vld [vmem:[#allocation2 + $0x18c] ss:$16 sps:$4 sm:$0xff]   ;;  %v1591_v51 = vld [vmem:[#allocation2 + $0x180] ss:$16 sps:$4 sm:$0xff]  }
  0x55   : > { %1031 = vmatprep.subr.bf16.mxu0 %v1545_v20  ;;  %1117 = vmatprep.subr.bf16.mxu1 %v1547_v21  ;;  %v1592_v52 = vld [vmem:[#allocation2 + $0x188] ss:$16 sps:$4 sm:$0xff]   ;;  %v1593_v53 = vld [vmem:[#allocation2 + $0x1a4] ss:$16 sps:$4 sm:$0xff]   ;;  %v1595_v54 = vld [vmem:[#allocation2 + $0x1ac] ss:$16 sps:$4 sm:$0xff]  }
  0x56   : > { %1053 = vmatprep.mubr.bf16.mxu0 %v1613_v48  ;;  %1139 = vmatprep.mubr.bf16.mxu1 %v1613_v48  ;;  %v1597_v55 = vld [vmem:[#allocation2 + $0x1a0] ss:$16 sps:$4 sm:$0xff]   ;;  %v1598_v56 = vld [vmem:[#allocation2 + $0x1a8] ss:$16 sps:$4 sm:$0xff]   ;;  %v1599_v57 = vld [vmem:[#allocation2 + $0x1c4] ss:$16 sps:$4 sm:$0xff]  }
  0x57   : > { %v1601_v58 = vld [vmem:[#allocation2 + $0x1cc] ss:$16 sps:$4 sm:$0xff]   ;;  %v1603_v59 = vld [vmem:[#allocation2 + $0x1c0] ss:$16 sps:$4 sm:$0xff]   ;;  %v1604_v60 = vld [vmem:[#allocation2 + $0x1c8] ss:$16 sps:$4 sm:$0xff]  }
  0x58   : > { %1032 = vmatpush1.bf16.msra.mxu0 %v1549_v22  ;;  %1118 = vmatpush1.bf16.msra.mxu1 %v1550_v23  ;;  %v1605_v61 = vld [vmem:[#allocation2 + $0x1e4] ss:$16 sps:$4 sm:$0xff]   ;;  %v1607_v62 = vld [vmem:[#allocation2 + $0x1ec] ss:$16 sps:$4 sm:$0xff]   ;;  %v1609_v63 = vld [vmem:[#allocation2 + $0x1e0] ss:$16 sps:$4 sm:$0xff]  }
  0x59   : > { %1033 = vmatprep.subr.bf16.mxu0 %v1551_v24  ;;  %1119 = vmatprep.subr.bf16.mxu1 %v1553_v25  ;;  %v1610_v0 = vld [vmem:[#allocation2 + $0x1e8] ss:$16 sps:$4 sm:$0xff]   ;;  %v1616_v1 = vld [vmem:[#allocation2 + $0x204] ss:$16 sps:$4 sm:$0xff]   ;;  %v1619_v2 = vld [vmem:[#allocation2 + $0x20c] ss:$16 sps:$4 sm:$0xff]  }
  0x5a   : > { %v1611_v3 = vld [vmem:[%s1904_s20] ss:$16 sps:$4 sm:$0xff]   ;;  %v1617_v5 = vld [vmem:[#allocation2 + $0x208] ss:$16 sps:$4 sm:$0xff]   ;;  %v1622_v6 = vld [vmem:[#allocation2 + $0x224] ss:$16 sps:$4 sm:$0xff]  }
  0x5b   : > { %v1614_v4 = vld [vmem:[#allocation2 + $0x200] ss:$16 sps:$4 sm:$0xff]   ;;  %v1625_v7 = vld [vmem:[#allocation2 + $0x22c] ss:$16 sps:$4 sm:$0xff]   ;;  %v1623_v9 = vld [vmem:[#allocation2 + $0x228] ss:$16 sps:$4 sm:$0xff]  }
  0x5c   : > { %1034 = vmatpush1.bf16.msra.mxu0 %v1555_v26  ;;  %1120 = vmatpush1.bf16.msra.mxu1 %v1556_v27  ;;  %v1620_v8 = vld [vmem:[#allocation2 + $0x220] ss:$16 sps:$4 sm:$0xff]   ;;  %v1628_v10 = vld [vmem:[#allocation2 + $0x244] ss:$16 sps:$4 sm:$0xff]   ;;  %v1631_v11 = vld [vmem:[#allocation2 + $0x24c] ss:$16 sps:$4 sm:$0xff]  }
  0x5d   : > { %1035 = vmatprep.subr.bf16.mxu0 %v1557_v28  ;;  %1121 = vmatprep.subr.bf16.mxu1 %v1559_v29  ;;  %v1626_v12 = vld [vmem:[#allocation2 + $0x240] ss:$16 sps:$4 sm:$0xff]   ;;  %v1629_v13 = vld [vmem:[#allocation2 + $0x248] ss:$16 sps:$4 sm:$0xff]   ;;  %v1634_v14 = vld [vmem:[#allocation2 + $0x264] ss:$16 sps:$4 sm:$0xff]  }
  0x5e   : > { %v1637_v15 = vld [vmem:[#allocation2 + $0x26c] ss:$16 sps:$4 sm:$0xff]   ;;  %v1632_v16 = vld [vmem:[#allocation2 + $0x260] ss:$16 sps:$4 sm:$0xff]   ;;  %v1635_v17 = vld [vmem:[#allocation2 + $0x268] ss:$16 sps:$4 sm:$0xff]  }
  0x5f   : > { %v1640_v18 = vld [vmem:[#allocation2 + $0x284] ss:$16 sps:$4 sm:$0xff]   ;;  %v1643_v19 = vld [vmem:[#allocation2 + $0x28c] ss:$16 sps:$4 sm:$0xff]   ;;  %v1638_v20 = vld [vmem:[#allocation2 + $0x280] ss:$16 sps:$4 sm:$0xff]  }
  0x60   : > { %1036 = vmatpush1.bf16.msra.mxu0 %v1561_v30  ;;  %1122 = vmatpush1.bf16.msra.mxu1 %v1562_v31  ;;  %v1641_v21 = vld [vmem:[#allocation2 + $0x288] ss:$16 sps:$4 sm:$0xff]   ;;  %v1646_v22 = vld [vmem:[#allocation2 + $0x2a4] ss:$16 sps:$4 sm:$0xff]   ;;  %v1649_v23 = vld [vmem:[#allocation2 + $0x2ac] ss:$16 sps:$4 sm:$0xff]  }
  0x61   : > { %1037 = vmatprep.subr.bf16.mxu0 %v1563_v32  ;;  %1123 = vmatprep.subr.bf16.mxu1 %v1565_v33  ;;  %v1644_v24 = vld [vmem:[#allocation2 + $0x2a0] ss:$16 sps:$4 sm:$0xff]   ;;  %v1647_v25 = vld [vmem:[#allocation2 + $0x2a8] ss:$16 sps:$4 sm:$0xff]   ;;  %v1652_v26 = vld [vmem:[#allocation2 + $0x2c4] ss:$16 sps:$4 sm:$0xff]  }
  0x62   : > { %v1655_v27 = vld [vmem:[#allocation2 + $0x2cc] ss:$16 sps:$4 sm:$0xff]   ;;  %v1650_v29 = vld [vmem:[#allocation2 + $0x2c0] ss:$16 sps:$4 sm:$0xff]   ;;  %v1653_v30 = vld [vmem:[#allocation2 + $0x2c8] ss:$16 sps:$4 sm:$0xff]  }
  0x63   : > { %v1712_v28 = vld [vmem:[%s1904_s20 + $0xc] ss:$16 sps:$4 sm:$0xff]   ;;  %v1658_v31 = vld [vmem:[#allocation2 + $0x2e4] ss:$16 sps:$4 sm:$0xff]   ;;  %v1656_v33 = vld [vmem:[#allocation2 + $0x2e0] ss:$16 sps:$4 sm:$0xff]  }
  0x64   : > { %1038 = vmatpush1.bf16.msra.mxu0 %v1567_v34  ;;  %1124 = vmatpush1.bf16.msra.mxu1 %v1568_v35  ;;  %v1661_v32 = vld [vmem:[#allocation2 + $0x2ec] ss:$16 sps:$4 sm:$0xff]   ;;  %v1659_v34 = vld [vmem:[#allocation2 + $0x2e8] ss:$16 sps:$4 sm:$0xff]   ;;  %v1664_v35 = vld [vmem:[#allocation2 + $0x304] ss:$16 sps:$4 sm:$0xff]  }
  0x65   : > { %1039 = vmatprep.subr.bf16.mxu0 %v1569_v36  ;;  %1125 = vmatprep.subr.bf16.mxu1 %v1571_v37  ;;  %v1667_v36 = vld [vmem:[#allocation2 + $0x30c] ss:$16 sps:$4 sm:$0xff]   ;;  %v1662_v37 = vld [vmem:[#allocation2 + $0x300] ss:$16 sps:$4 sm:$0xff]  }
  0x66   : > { %v1685_v48 = vld [vmem:[#allocation2 + $0x36c] ss:$16 sps:$4 sm:$0xff]  }
  0x68   : > { %1040 = vmatpush1.bf16.msra.mxu0 %v1573_v38  ;;  %1126 = vmatpush1.bf16.msra.mxu1 %v1574_v39  ;;  %v1665_v38 = vld [vmem:[#allocation2 + $0x308] ss:$16 sps:$4 sm:$0xff]   ;;  %v1670_v39 = vld [vmem:[#allocation2 + $0x324] ss:$16 sps:$4 sm:$0xff]  }
  0x69   : > { %1041 = vmatprep.subr.bf16.mxu0 %v1575_v40  ;;  %1127 = vmatprep.subr.bf16.mxu1 %v1577_v41  ;;  %v1673_v40 = vld [vmem:[#allocation2 + $0x32c] ss:$16 sps:$4 sm:$0xff]   ;;  %v1668_v41 = vld [vmem:[#allocation2 + $0x320] ss:$16 sps:$4 sm:$0xff]  }
  0x6c   : > { %1042 = vmatpush1.bf16.msra.mxu0 %v1579_v42  ;;  %1128 = vmatpush1.bf16.msra.mxu1 %v1580_v43  ;;  %v1671_v42 = vld [vmem:[#allocation2 + $0x328] ss:$16 sps:$4 sm:$0xff]   ;;  %v1676_v43 = vld [vmem:[#allocation2 + $0x344] ss:$16 sps:$4 sm:$0xff]  }
  0x6d   : > { %1043 = vmatprep.subr.bf16.mxu0 %v1581_v44  ;;  %1129 = vmatprep.subr.bf16.mxu1 %v1583_v45  ;;  %v1679_v44 = vld [vmem:[#allocation2 + $0x34c] ss:$16 sps:$4 sm:$0xff]   ;;  %v1674_v45 = vld [vmem:[#allocation2 + $0x340] ss:$16 sps:$4 sm:$0xff]  }
  0x70   : > { %1044 = vmatpush1.bf16.msra.mxu0 %v1585_v46  ;;  %1130 = vmatpush1.bf16.msra.mxu1 %v1586_v47  ;;  %v1677_v46 = vld [vmem:[#allocation2 + $0x348] ss:$16 sps:$4 sm:$0xff]   ;;  %v1682_v47 = vld [vmem:[#allocation2 + $0x364] ss:$16 sps:$4 sm:$0xff]  }
  0x71   : > { %1045 = vmatprep.subr.bf16.mxu0 %v1587_v49  ;;  %1131 = vmatprep.subr.bf16.mxu1 %v1589_v50  ;;  %v1680_v49 = vld [vmem:[#allocation2 + $0x360] ss:$16 sps:$4 sm:$0xff]   ;;  %v1683_v50 = vld [vmem:[#allocation2 + $0x368] ss:$16 sps:$4 sm:$0xff]  }
  0x74   : > { %1046 = vmatpush1.bf16.msra.mxu0 %v1591_v51  ;;  %1132 = vmatpush1.bf16.msra.mxu1 %v1592_v52  ;;  %v1688_v51 = vld [vmem:[#allocation2 + $0x384] ss:$16 sps:$4 sm:$0xff]   ;;  %v1691_v52 = vld [vmem:[#allocation2 + $0x38c] ss:$16 sps:$4 sm:$0xff]  }
  0x75   : > { %1047 = vmatprep.subr.bf16.mxu0 %v1593_v53  ;;  %1133 = vmatprep.subr.bf16.mxu1 %v1595_v54  ;;  %v1686_v53 = vld [vmem:[#allocation2 + $0x380] ss:$16 sps:$4 sm:$0xff]   ;;  %v1689_v54 = vld [vmem:[#allocation2 + $0x388] ss:$16 sps:$4 sm:$0xff]  }
  0x78   : > { %1048 = vmatpush1.bf16.msra.mxu0 %v1597_v55  ;;  %1134 = vmatpush1.bf16.msra.mxu1 %v1598_v56  ;;  %v1694_v55 = vld [vmem:[#allocation2 + $0x3a4] ss:$16 sps:$4 sm:$0xff]   ;;  %v1697_v56 = vld [vmem:[#allocation2 + $0x3ac] ss:$16 sps:$4 sm:$0xff]  }
  0x79   : > { %1049 = vmatprep.subr.bf16.mxu0 %v1599_v57  ;;  %1135 = vmatprep.subr.bf16.mxu1 %v1601_v58  ;;  %v1692_v57 = vld [vmem:[#allocation2 + $0x3a0] ss:$16 sps:$4 sm:$0xff]   ;;  %v1695_v58 = vld [vmem:[#allocation2 + $0x3a8] ss:$16 sps:$4 sm:$0xff]  }
  0x7c   : > { %1050 = vmatpush1.bf16.msra.mxu0 %v1603_v59  ;;  %1136 = vmatpush1.bf16.msra.mxu1 %v1604_v60  ;;  %v1700_v59 = vld [vmem:[#allocation2 + $0x3c4] ss:$16 sps:$4 sm:$0xff]   ;;  %v1703_v60 = vld [vmem:[#allocation2 + $0x3cc] ss:$16 sps:$4 sm:$0xff]  }
  0x7d   : > { %1051 = vmatprep.subr.bf16.mxu0 %v1605_v61  ;;  %1137 = vmatprep.subr.bf16.mxu1 %v1607_v62  ;;  %v1698_v61 = vld [vmem:[#allocation2 + $0x3c0] ss:$16 sps:$4 sm:$0xff]   ;;  %v1701_v62 = vld [vmem:[#allocation2 + $0x3c8] ss:$16 sps:$4 sm:$0xff]  }
  0x80   : > { %1052 = vmatpush1.bf16.msra.mxu0 %v1609_v63  ;;  %1138 = vmatpush1.bf16.msra.mxu1 %v1610_v0  ;;  %v1706_v63 = vld [vmem:[#allocation2 + $0x3e4] ss:$16 sps:$4 sm:$0xff]   ;;  %v1709_v0 = vld [vmem:[#allocation2 + $0x3ec] ss:$16 sps:$4 sm:$0xff]  }
  0x81   : > { %1064 = vmatprep.subr.bf16.mxu0 %v1616_v1  ;;  %1150 = vmatprep.subr.bf16.mxu1 %v1619_v2  ;;  %v1704_v1 = vld [vmem:[#allocation2 + $0x3e0] ss:$16 sps:$4 sm:$0xff]   ;;  %v1707_v2 = vld [vmem:[#allocation2 + $0x3e8] ss:$16 sps:$4 sm:$0xff]  }
  0x83   : > { %1054 = vmatmul.mubr.bf16.vlgmr.msra.gmra.mrb[0].mxu0 %v1611_v3  ;;  %1140 = vmatmul.mubr.bf16.vlgmr.msra.gmra.mrb[0].mxu1 %v1611_v3  ;;  %v1710_v3 = vld [vmem:[%s1904_s20 + $0x8] ss:$16 sps:$4 sm:$0xff]  }
  0x84   : > { %1065 = vmatpush1.bf16.msra.mxu0 %v1614_v4  ;;  %1151 = vmatpush1.bf16.msra.mxu1 %v1617_v5  ;;  %v341_v4 = vlaneseq }
  0x85   : > { %1066 = vmatprep.subr.bf16.mxu0 %v1622_v6  ;;  %1152 = vmatprep.subr.bf16.mxu1 %v1625_v7 }
  0x86   : > { %1096 = vmatprep.mubr.bf16.mxu0 %v1712_v28  ;;  %1182 = vmatprep.mubr.bf16.mxu1 %v1712_v28  ;;  %v342_v5 = vshrl.u32 %v341_v4, 7 }
  0x88   : > { %1067 = vmatpush1.bf16.msra.mxu0 %v1620_v8  ;;  %1153 = vmatpush1.bf16.msra.mxu1 %v1623_v9  ;;  %v343_v6 = vsub.s32 0, %v342_v5  ;;  %v351_v7 = vsub.s32 2, %v342_v5  ;;  %v339_v8 = vld [vmem:[#allocation4] sm:$0xf]  ;;  %v347_v9 = vsub.s32 1, %v342_v5 }
  0x89   : > { %1068 = vmatprep.subr.bf16.mxu0 %v1628_v10  ;;  %1154 = vmatprep.subr.bf16.mxu1 %v1631_v11  ;;  %v355_v10 = vsub.s32 3, %v342_v5 }
  0x8a   : > { %v344_v11 = vrot.slane %v339_v8, %v343_v6 }
  0x8c   : > { %1069 = vmatpush1.bf16.msra.mxu0 %v1626_v12  ;;  %1155 = vmatpush1.bf16.msra.mxu1 %v1629_v13  ;;  %v352_v12 = vrot.slane %v339_v8, %v351_v7  ;;  %v348_v13 = vrot.slane %v339_v8, %v347_v9 }
  0x8d   : > { %1070 = vmatprep.subr.bf16.mxu0 %v1634_v14  ;;  %1156 = vmatprep.subr.bf16.mxu1 %v1637_v15  ;;  %v356_v14 = vrot.slane %v339_v8, %v355_v10 }
  0x90   : > { %1071 = vmatpush1.bf16.msra.mxu0 %v1632_v16  ;;  %1157 = vmatpush1.bf16.msra.mxu1 %v1635_v17 }
  0x91   : > { %1072 = vmatprep.subr.bf16.mxu0 %v1640_v18  ;;  %1158 = vmatprep.subr.bf16.mxu1 %v1643_v19 }
  0x94   : > { %1073 = vmatpush1.bf16.msra.mxu0 %v1638_v20  ;;  %1159 = vmatpush1.bf16.msra.mxu1 %v1641_v21 }
  0x95   : > { %1074 = vmatprep.subr.bf16.mxu0 %v1646_v22  ;;  %1160 = vmatprep.subr.bf16.mxu1 %v1649_v23 }
  0x98   : > { %1075 = vmatpush1.bf16.msra.mxu0 %v1644_v24  ;;  %1161 = vmatpush1.bf16.msra.mxu1 %v1647_v25 }
  0x99   : > { %1076 = vmatprep.subr.bf16.mxu0 %v1652_v26  ;;  %1162 = vmatprep.subr.bf16.mxu1 %v1655_v27 }
  0x9c   : > { %1077 = vmatpush1.bf16.msra.mxu0 %v1650_v29  ;;  %1163 = vmatpush1.bf16.msra.mxu1 %v1653_v30 }
  0x9d   : > { %1078 = vmatprep.subr.bf16.mxu0 %v1658_v31  ;;  %1164 = vmatprep.subr.bf16.mxu1 %v1661_v32 }
  0xa0   : > { %1079 = vmatpush1.bf16.msra.mxu0 %v1656_v33  ;;  %1165 = vmatpush1.bf16.msra.mxu1 %v1659_v34 }
  0xa1   : > { %1080 = vmatprep.subr.bf16.mxu0 %v1664_v35  ;;  %1166 = vmatprep.subr.bf16.mxu1 %v1667_v36 }
  0xa4   : > { %1081 = vmatpush1.bf16.msra.mxu0 %v1662_v37  ;;  %1167 = vmatpush1.bf16.msra.mxu1 %v1665_v38 }
  0xa5   : > { %1082 = vmatprep.subr.bf16.mxu0 %v1670_v39  ;;  %1168 = vmatprep.subr.bf16.mxu1 %v1673_v40 }
  0xa8   : > { %1083 = vmatpush1.bf16.msra.mxu0 %v1668_v41  ;;  %1169 = vmatpush1.bf16.msra.mxu1 %v1671_v42 }
  0xa9   : > { %1084 = vmatprep.subr.bf16.mxu0 %v1676_v43  ;;  %1170 = vmatprep.subr.bf16.mxu1 %v1679_v44 }
  0xac   : > { %1085 = vmatpush1.bf16.msra.mxu0 %v1674_v45  ;;  %1171 = vmatpush1.bf16.msra.mxu1 %v1677_v46 }
  0xad   : > { %1086 = vmatprep.subr.bf16.mxu0 %v1682_v47  ;;  %1172 = vmatprep.subr.bf16.mxu1 %v1685_v48 }
  0xb0   : > { %1087 = vmatpush1.bf16.msra.mxu0 %v1680_v49  ;;  %1173 = vmatpush1.bf16.msra.mxu1 %v1683_v50 }
  0xb1   : > { %1088 = vmatprep.subr.bf16.mxu0 %v1688_v51  ;;  %1174 = vmatprep.subr.bf16.mxu1 %v1691_v52 }
  0xb4   : > { %1089 = vmatpush1.bf16.msra.mxu0 %v1686_v53  ;;  %1175 = vmatpush1.bf16.msra.mxu1 %v1689_v54 }
  0xb5   : > { %1090 = vmatprep.subr.bf16.mxu0 %v1694_v55  ;;  %1176 = vmatprep.subr.bf16.mxu1 %v1697_v56 }
  0xb8   : > { %1091 = vmatpush1.bf16.msra.mxu0 %v1692_v57  ;;  %1177 = vmatpush1.bf16.msra.mxu1 %v1695_v58 }
  0xb9   : > { %1092 = vmatprep.subr.bf16.mxu0 %v1700_v59  ;;  %1178 = vmatprep.subr.bf16.mxu1 %v1703_v60 }
  0xbc   : > { %1093 = vmatpush1.bf16.msra.mxu0 %v1698_v61  ;;  %1179 = vmatpush1.bf16.msra.mxu1 %v1701_v62 }
  0xbd   : > { %1094 = vmatprep.subr.bf16.mxu0 %v1706_v63  ;;  %1180 = vmatprep.subr.bf16.mxu1 %v1709_v0 }
  0xc0   : > { %1095 = vmatpush1.bf16.msra.mxu0 %v1704_v1  ;;  %1181 = vmatpush1.bf16.msra.mxu1 %v1707_v2 }
  0xc3   : > { %1097 = vmatmul.mubr.bf16.vlgmr.msra.gmra.mrb[0].mxu0 %v1710_v3  ;;  %1183 = vmatmul.mubr.bf16.vlgmr.msra.gmra.mrb[0].mxu1 %v1710_v3 }
 0x196   : > { %v1098_v15 = vpop.f32.mrb[0].mxu0  ;;  %v1184_v16 = vpop.f32.mrb[0].mxu1 }
 0x197   : > { %v1468_v17 = vadd.f32 %v1098_v15, %v344_v11  ;;  %v1472_v18 = vadd.f32 %v1184_v16, %v352_v12  ;;  %v1100_v19 = vpop.f32.mrb[1].mxu0  ;;  %v1186_v20 = vpop.f32.mrb[1].mxu1 }
 0x198   : > { %v1469_v21 = vadd.f32 %v1100_v19, %v348_v13  ;;  %v1473_v22 = vadd.f32 %v1186_v20, %v356_v14  ;;  %v1102_v23 = vpop.f32.mrb[2].mxu0  ;;  %v1188_v24 = vpop.f32.mrb[2].mxu1 }
 0x199   : > { %v1193_v25 = vmax.f32 %v1468_v17, 0.0  ;;  %v1195_v26 = vmax.f32 %v1472_v18, 0.0  ;;  %v1470_v27 = vadd.f32 %v1102_v23, %v344_v11  ;;  %v1474_v28 = vadd.f32 %v1188_v24, %v352_v12  ;;  %v1104_v29 = vpop.f32.mrb[3].mxu0  ;;  %v1190_v30 = vpop.f32.mrb[3].mxu1 }
 0x19a   : > { %v1194_v31 = vmax.f32 %v1469_v21, 0.0  ;;  %v1196_v32 = vmax.f32 %v1473_v22, 0.0  ;;  %v1471_v33 = vadd.f32 %v1104_v29, %v348_v13  ;;  %v1475_v34 = vadd.f32 %v1190_v30, %v356_v14 }
 0x19b   : > { %v1197_v35 = vmax.f32 %v1470_v27, 0.0  ;;  %v1199_v36 = vmax.f32 %v1474_v28, 0.0 }
 0x19c   : > { %v1464_v37 = vpack.c.bf16 %v1194_v31, %v1193_v25  ;;  %v1465_v38 = vpack.c.bf16 %v1196_v32, %v1195_v26  ;;  %v1198_v39 = vmax.f32 %v1471_v33, 0.0  ;;  %v1200_v40 = vmax.f32 %v1475_v34, 0.0 }
 0x19e   : > { %1225 = vst [vmem:[%s205_s24] sm:$0xff] %v1464_v37  ;;  %1226 = vst [vmem:[%s205_s24 + $0x8] sm:$0xff] %v1465_v38  ;;  %v1466_v41 = vpack.c.bf16 %v1198_v39, %v1197_v35  ;;  %v1467_v42 = vpack.c.bf16 %v1200_v40, %v1199_v36 }
 0x1a0   : > { %1227 = vst [vmem:[%s205_s24 + $0x10] sm:$0xff] %v1466_v41  ;;  %1228 = vst [vmem:[%s205_s24 + $0x18] sm:$0xff] %v1467_v42 }
 0x1a1 PF: > { %s15_s12 = sadd.s32 1, %s1783_s12  }
 0x1a2   : > { %p12_p7 = scmp.ge.s32.totalorder %s15_s12, 4  }
 0x1a4   :  { %14 = sbr.rel (!%p12_p7) target bundleno = 2 (0x2), region = 71 }
 0x1ab   :  { %1253 = vsyncpa [#allocation3], 1 }
 0x1ac   :  { %1255 = vsyncpa [#allocation3 + $0x1], 1 }
 0x1ad   :  { %1256 = vsyncpa [#allocation5], 1 }

// kernel: centernet_forward.5
= control target key start
LH: loop header
LB: loop body
LE: loop exit
PB: predicated region body
PF: predicated region fallthrough
CT: control target
= control target key end

     0   :  { %8 = vsyncpa [#allocation3], 0  ;;  %s2390_s0 = inlined_call_operand.vmem [shape: bf16[128,512], index: 0, kind: input, shape index: {}]   ;;  %s2391_s1 = inlined_call_operand.hbm [shape: bf16[512,512], index: 1, kind: input, shape index: {}]   ;;  %s2392_s2 = inlined_call_operand.hbm [shape: f32[1,512], index: 2, kind: input, shape index: {}]   ;;  %s2393_s3 = inlined_call_operand.vmem [shape: bf16[128,512], index: 3, kind: output, shape index: {}]  }
   0x1   :  { %9 = vsyncpa [#allocation5], 0  ;;  %s2211_s12 = smov 0  }
   0x2 LB: > { %s1609_s13 = sadd.s32 4294967295, %s2185_s12   ;;  %p1611_p0 = scmp.ge.s32.totalorder %s2185_s12, 1  ;;  %s2185_s12 = sphi %s2211_s12, %s15_s12  }
   0x3   : > { %p114_p1 = scmp.lt.s32.totalorder %s2185_s12, 3  ;;  %s2187_s14 = smov [#allocation2]  }
   0x4   : > { %s126_s15 = sshll.u32 %s2187_s14, 4  ;;  %p2225_p3 = scmp.eq.s32.totalorder %s1609_s13, 0  ;;  %s127_s15 = int_to_ptr.vmem [resolvable:$true] %s126_s15 }
   0x5   : > { %p2219_p2 = pnand %p1611_p0, %p114_p1  ;;  %s2188_s18 = smov [#allocation4]  }
   0x6   : > { %s2398_s17 = scalar_select %p2225_p3, 1, 0 }
   0x7   : > { %s2397_s16 = scalar_select %p2219_p2, 1, 0 }
   0x8   : > { %p1876_p4 = pneg %p2219_p2  ;;  %s140_s19 = sshll.u32 %s2188_s18, 4  ;;  %s2237_s19 = int_to_ptr.vmem [resolvable:$true] %s140_s19 }
   0x9   : > { %s2115_s23 = scalar_lea.hbm %s2391_s1, 16384 }
   0xa   : > { %p2233_p5 = pnand %p2225_p3, %p1876_p4  ;;  %p2116_p6 = scmp.ne.s32.totalorder %s2391_s1, %s2115_s23 }
   0xb   : > { %p2122_p10 = scmp.lt.u32.totalorder %s2115_s23, %s2391_s1 }
   0xc   : > { %p2117_p7 = pneg %p2233_p5 }
   0xe   : > { %p2118_p8 = pnand %p2117_p7, %p2116_p6 }
  0x10   : > { %p2119_p9 = pneg %p2118_p8 }
  0x12   : > { %p2124_p11 = pnand %p2122_p10, %p2119_p9 }
  0x14   : > { %2127 = shalt.err (!%p2124_p11)
}
  0x15   : > { %s2128_s28 = scalar_lea.vmem %s127_s15, 16384  ;;  %p2136_p1 = scmp.lt.s32.totalorder %s127_s15, %s127_s15 }
  0x16   : > { %p2129_p12 = scmp.ne.s32.totalorder %s127_s15, %s2128_s28  ;;  %p2137_p4 = scmp.lt.s32.totalorder %s2128_s28, %s2128_s28 }
  0x18   : > { %p2131_p13 = pnand %p2129_p12, %p2117_p7  ;;  %p2138_p3 = por %p2137_p4, %p2136_p1 }
  0x1a   : > { %p2132_p0 = pneg %p2131_p13 }
  0x1c   : > { %p2139_p2 = pnand %p2138_p3, %p2132_p0 }
  0x1e   : > { %2142 = shalt.err (!%p2139_p2)
}
  0x1f   : > { %s2189_s29 = smov 256   ;;  %s2190_s30 = smov 16  }
  0x20   : > { %1879 = dma.hbm_to_vmem [thread:$0]  (!%p2233_p5), %s2391_s1, 16384, %s127_s15, [#allocation3], %s2189_s29, %s2189_s29, %s2190_s30  }
  0x21   : > { %s2143_s8 = scalar_lea.hbm %s2392_s2, 64 }
  0x22   : > { %p2144_p6 = scmp.ne.s32.totalorder %s2392_s2, %s2143_s8  ;;  %p2150_p8 = scmp.lt.u32.totalorder %s2143_s8, %s2392_s2 }
  0x24   : > { %p2146_p2 = pnand %p2144_p6, %p2117_p7 }
  0x26   : > { %p2147_p3 = pneg %p2146_p2 }
  0x28   : > { %p2152_p9 = pnand %p2150_p8, %p2147_p3 }
  0x2a   : > { %2155 = shalt.err (!%p2152_p9)
}
  0x2b   : > { %s2156_s15 = scalar_lea.vmem %s2237_s19, 64  ;;  %p2164_p13 = scmp.lt.s32.totalorder %s2237_s19, %s2237_s19 }
  0x2c   : > { %p2157_p10 = scmp.ne.s32.totalorder %s2237_s19, %s2156_s15  ;;  %p2165_p0 = scmp.lt.s32.totalorder %s2156_s15, %s2156_s15 }
  0x2e   : > { %p2159_p11 = pnand %p2157_p10, %p2117_p7  ;;  %p2166_p1 = por %p2165_p0, %p2164_p13 }
  0x30   : > { %p2160_p12 = pneg %p2159_p11 }
  0x32   : > { %p2167_p4 = pnand %p2166_p1, %p2160_p12 }
  0x34   : > { %2170 = shalt.err (!%p2167_p4)
}
  0x35   : > { %1882 = dma.hbm_to_vmem [thread:$0]  (!%p2233_p5), %s2392_s2, 64, %s2237_s19, [#allocation5]  }
  0x36   : > { %p2400_p6 = scmp.ne.s32.totalorder %s2397_s16, 0 }
  0x37   : > { %p2401_p2 = scmp.ne.s32.totalorder (!%p2400_p6), %s2398_s17, 0 }
  0x38   : > { %163 = sbr.rel (%p2400_p6) target bundleno = 441 (0x1b9), region = 32 }
  0x3f   : > { %2176 = dma.done.wait (%p2401_p2), [#allocation3], 16384  }
  0x40   : > { %2178 = vsyncadd (%p2401_p2), [#allocation3], 4294950912 }
  0x41   : > { %2180 = dma.done.wait (%p2401_p2), [#allocation5], 64  }
  0x42   : > { %2182 = vsyncadd (%p2401_p2), [#allocation5], 4294967232  ;;  %v1899_v0 = vld [vmem:[#allocation2 + $0x4] ss:$16 sps:$4 sm:$0xff]   ;;  %v1901_v1 = vld [vmem:[#allocation2 + $0xc] ss:$16 sps:$4 sm:$0xff]  }
  0x43   : > { %1093 = vmatprep.subr.bf16.mxu0 %v1899_v0  ;;  %v1903_v2 = vld [vmem:[#allocation2] ss:$16 sps:$4 sm:$0xff]   ;;  %v1904_v3 = vld [vmem:[#allocation2 + $0x8] ss:$16 sps:$4 sm:$0xff]   ;;  %1239 = vmatprep.subr.bf16.mxu1 %v1901_v1  ;;  %v1905_v4 = vld [vmem:[#allocation2 + $0x24] ss:$16 sps:$4 sm:$0xff]  }
  0x44   : > { %1094 = vmatpush1.bf16.msra.mxu0 %v1903_v2  ;;  %1240 = vmatpush1.bf16.msra.mxu1 %v1904_v3  ;;  %v1907_v5 = vld [vmem:[#allocation2 + $0x2c] ss:$16 sps:$4 sm:$0xff]   ;;  %v1909_v6 = vld [vmem:[#allocation2 + $0x20] ss:$16 sps:$4 sm:$0xff]   ;;  %v1910_v7 = vld [vmem:[#allocation2 + $0x28] ss:$16 sps:$4 sm:$0xff]  }
  0x45   : > { %1095 = vmatprep.subr.bf16.mxu0 %v1905_v4  ;;  %1241 = vmatprep.subr.bf16.mxu1 %v1907_v5  ;;  %v1911_v8 = vld [vmem:[#allocation2 + $0x44] ss:$16 sps:$4 sm:$0xff]   ;;  %v1913_v9 = vld [vmem:[#allocation2 + $0x4c] ss:$16 sps:$4 sm:$0xff]   ;;  %v1915_v10 = vld [vmem:[#allocation2 + $0x40] ss:$16 sps:$4 sm:$0xff]  }
  0x46   : > { %v1916_v11 = vld [vmem:[#allocation2 + $0x48] ss:$16 sps:$4 sm:$0xff]   ;;  %v1917_v12 = vld [vmem:[#allocation2 + $0x64] ss:$16 sps:$4 sm:$0xff]   ;;  %v1919_v13 = vld [vmem:[#allocation2 + $0x6c] ss:$16 sps:$4 sm:$0xff]  }
  0x47   : > { %v1921_v14 = vld [vmem:[#allocation2 + $0x60] ss:$16 sps:$4 sm:$0xff]   ;;  %v1922_v15 = vld [vmem:[#allocation2 + $0x68] ss:$16 sps:$4 sm:$0xff]   ;;  %v1923_v16 = vld [vmem:[#allocation2 + $0x84] ss:$16 sps:$4 sm:$0xff]  }
  0x48   : > { %1096 = vmatpush1.bf16.msra.mxu0 %v1909_v6  ;;  %1242 = vmatpush1.bf16.msra.mxu1 %v1910_v7  ;;  %v1925_v17 = vld [vmem:[#allocation2 + $0x8c] ss:$16 sps:$4 sm:$0xff]   ;;  %v1927_v18 = vld [vmem:[#allocation2 + $0x80] ss:$16 sps:$4 sm:$0xff]   ;;  %v1928_v19 = vld [vmem:[#allocation2 + $0x88] ss:$16 sps:$4 sm:$0xff]  }
  0x49   : > { %1097 = vmatprep.subr.bf16.mxu0 %v1911_v8  ;;  %1243 = vmatprep.subr.bf16.mxu1 %v1913_v9  ;;  %v1929_v20 = vld [vmem:[#allocation2 + $0xa4] ss:$16 sps:$4 sm:$0xff]   ;;  %v1931_v21 = vld [vmem:[#allocation2 + $0xac] ss:$16 sps:$4 sm:$0xff]   ;;  %v1933_v22 = vld [vmem:[#allocation2 + $0xa0] ss:$16 sps:$4 sm:$0xff]  }
  0x4a   : > { %v1934_v23 = vld [vmem:[#allocation2 + $0xa8] ss:$16 sps:$4 sm:$0xff]   ;;  %v1935_v24 = vld [vmem:[#allocation2 + $0xc4] ss:$16 sps:$4 sm:$0xff]   ;;  %v1937_v25 = vld [vmem:[#allocation2 + $0xcc] ss:$16 sps:$4 sm:$0xff]  }
  0x4b   : > { %v1939_v26 = vld [vmem:[#allocation2 + $0xc0] ss:$16 sps:$4 sm:$0xff]   ;;  %v1940_v27 = vld [vmem:[#allocation2 + $0xc8] ss:$16 sps:$4 sm:$0xff]   ;;  %v1941_v28 = vld [vmem:[#allocation2 + $0xe4] ss:$16 sps:$4 sm:$0xff]  }
  0x4c   : > { %1098 = vmatpush1.bf16.msra.mxu0 %v1915_v10  ;;  %1244 = vmatpush1.bf16.msra.mxu1 %v1916_v11  ;;  %v1943_v29 = vld [vmem:[#allocation2 + $0xec] ss:$16 sps:$4 sm:$0xff]   ;;  %s1618_s16 = sshll.u32 %s1609_s13, 3  ;;  %v1945_v30 = vld [vmem:[#allocation2 + $0xe0] ss:$16 sps:$4 sm:$0xff]  }
  0x4d   : > { %1099 = vmatprep.subr.bf16.mxu0 %v1917_v12  ;;  %1245 = vmatprep.subr.bf16.mxu1 %v1919_v13  ;;  %v1946_v31 = vld [vmem:[#allocation2 + $0xe8] ss:$16 sps:$4 sm:$0xff]   ;;  %v1947_v32 = vld [vmem:[#allocation2 + $0x104] ss:$16 sps:$4 sm:$0xff]   ;;  %v1949_v33 = vld [vmem:[#allocation2 + $0x10c] ss:$16 sps:$4 sm:$0xff]  }
  0x4e   : > { %p194_p5 = scmp.lt.s32.totalorder %s1618_s16, 15  ;;  %v1951_v34 = vld [vmem:[#allocation2 + $0x100] ss:$16 sps:$4 sm:$0xff]   ;;  %v1952_v35 = vld [vmem:[#allocation2 + $0x108] ss:$16 sps:$4 sm:$0xff]  }
  0x4f   : > { %v1953_v36 = vld [vmem:[#allocation2 + $0x124] ss:$16 sps:$4 sm:$0xff]   ;;  %v1955_v37 = vld [vmem:[#allocation2 + $0x12c] ss:$16 sps:$4 sm:$0xff]   ;;  %v1957_v38 = vld [vmem:[#allocation2 + $0x120] ss:$16 sps:$4 sm:$0xff]  }
  0x50   : > { %1100 = vmatpush1.bf16.msra.mxu0 %v1921_v14  ;;  %1246 = vmatpush1.bf16.msra.mxu1 %v1922_v15  ;;  %s2403_s16 = smov (!%p194_p5, %s1618_s16), 15  ;;  %v1958_v39 = vld [vmem:[#allocation2 + $0x128] ss:$16 sps:$4 sm:$0xff]   ;;  %v1959_v40 = vld [vmem:[#allocation2 + $0x144] ss:$16 sps:$4 sm:$0xff]  }
  0x51   : > { %1101 = vmatprep.subr.bf16.mxu0 %v1923_v16  ;;  %1247 = vmatprep.subr.bf16.mxu1 %v1925_v17  ;;  %v1961_v41 = vld [vmem:[#allocation2 + $0x14c] ss:$16 sps:$4 sm:$0xff]   ;;  %s1786_s13 = sshll.u32 %s2403_s16, 4  ;;  %v1963_v42 = vld [vmem:[#allocation2 + $0x140] ss:$16 sps:$4 sm:$0xff]  }
  0x52   : > { %v1964_v43 = vld [vmem:[#allocation2 + $0x148] ss:$16 sps:$4 sm:$0xff]   ;;  %v1965_v44 = vld [vmem:[#allocation2 + $0x164] ss:$16 sps:$4 sm:$0xff]   ;;  %s2306_s20 = scalar_lea.vmem %s2390_s0, %s1786_s13  ;;  %v1967_v45 = vld [vmem:[#allocation2 + $0x16c] ss:$16 sps:$4 sm:$0xff]   ;;  %s2345_s24 = scalar_lea.vmem %s2393_s3, %s1786_s13 }
  0x53   : > { %v1969_v46 = vld [vmem:[#allocation2 + $0x160] ss:$16 sps:$4 sm:$0xff]   ;;  %v1970_v47 = vld [vmem:[#allocation2 + $0x168] ss:$16 sps:$4 sm:$0xff]   ;;  %v1997_v48 = vld [vmem:[%s2306_s20 + $0x4] ss:$16 sps:$4 sm:$0xff]  }
  0x54   : > { %1102 = vmatpush1.bf16.msra.mxu0 %v1927_v18  ;;  %1248 = vmatpush1.bf16.msra.mxu1 %v1928_v19  ;;  %v1971_v49 = vld [vmem:[#allocation2 + $0x184] ss:$16 sps:$4 sm:$0xff]   ;;  %v1973_v50 = vld [vmem:[#allocation2 + $0x18c] ss:$16 sps:$4 sm:$0xff]   ;;  %v1975_v51 = vld [vmem:[#allocation2 + $0x180] ss:$16 sps:$4 sm:$0xff]  }
  0x55   : > { %1103 = vmatprep.subr.bf16.mxu0 %v1929_v20  ;;  %1249 = vmatprep.subr.bf16.mxu1 %v1931_v21  ;;  %v1976_v52 = vld [vmem:[#allocation2 + $0x188] ss:$16 sps:$4 sm:$0xff]   ;;  %v1977_v53 = vld [vmem:[#allocation2 + $0x1a4] ss:$16 sps:$4 sm:$0xff]   ;;  %v1979_v54 = vld [vmem:[#allocation2 + $0x1ac] ss:$16 sps:$4 sm:$0xff]  }
  0x56   : > { %1125 = vmatprep.mubr.bf16.mxu0 %v1997_v48  ;;  %1271 = vmatprep.mubr.bf16.mxu1 %v1997_v48  ;;  %v1981_v55 = vld [vmem:[#allocation2 + $0x1a0] ss:$16 sps:$4 sm:$0xff]   ;;  %v1982_v56 = vld [vmem:[#allocation2 + $0x1a8] ss:$16 sps:$4 sm:$0xff]   ;;  %v1983_v57 = vld [vmem:[#allocation2 + $0x1c4] ss:$16 sps:$4 sm:$0xff]  }
  0x57   : > { %v1985_v58 = vld [vmem:[#allocation2 + $0x1cc] ss:$16 sps:$4 sm:$0xff]   ;;  %v1987_v59 = vld [vmem:[#allocation2 + $0x1c0] ss:$16 sps:$4 sm:$0xff]   ;;  %v1988_v60 = vld [vmem:[#allocation2 + $0x1c8] ss:$16 sps:$4 sm:$0xff]  }
  0x58   : > { %1104 = vmatpush1.bf16.msra.mxu0 %v1933_v22  ;;  %1250 = vmatpush1.bf16.msra.mxu1 %v1934_v23  ;;  %v1989_v61 = vld [vmem:[#allocation2 + $0x1e4] ss:$16 sps:$4 sm:$0xff]   ;;  %v1991_v62 = vld [vmem:[#allocation2 + $0x1ec] ss:$16 sps:$4 sm:$0xff]   ;;  %v1993_v63 = vld [vmem:[#allocation2 + $0x1e0] ss:$16 sps:$4 sm:$0xff]  }
  0x59   : > { %1105 = vmatprep.subr.bf16.mxu0 %v1935_v24  ;;  %1251 = vmatprep.subr.bf16.mxu1 %v1937_v25  ;;  %v1994_v0 = vld [vmem:[#allocation2 + $0x1e8] ss:$16 sps:$4 sm:$0xff]   ;;  %v2000_v1 = vld [vmem:[#allocation2 + $0x204] ss:$16 sps:$4 sm:$0xff]   ;;  %v2003_v2 = vld [vmem:[#allocation2 + $0x20c] ss:$16 sps:$4 sm:$0xff]  }
  0x5a   : > { %v1995_v3 = vld [vmem:[%s2306_s20] ss:$16 sps:$4 sm:$0xff]   ;;  %v2001_v5 = vld [vmem:[#allocation2 + $0x208] ss:$16 sps:$4 sm:$0xff]   ;;  %v2006_v6 = vld [vmem:[#allocation2 + $0x224] ss:$16 sps:$4 sm:$0xff]  }
  0x5b   : > { %v1998_v4 = vld [vmem:[#allocation2 + $0x200] ss:$16 sps:$4 sm:$0xff]   ;;  %v2009_v7 = vld [vmem:[#allocation2 + $0x22c] ss:$16 sps:$4 sm:$0xff]   ;;  %v2007_v9 = vld [vmem:[#allocation2 + $0x228] ss:$16 sps:$4 sm:$0xff]  }
  0x5c   : > { %1106 = vmatpush1.bf16.msra.mxu0 %v1939_v26  ;;  %1252 = vmatpush1.bf16.msra.mxu1 %v1940_v27  ;;  %v2004_v8 = vld [vmem:[#allocation2 + $0x220] ss:$16 sps:$4 sm:$0xff]   ;;  %v2012_v10 = vld [vmem:[#allocation2 + $0x244] ss:$16 sps:$4 sm:$0xff]   ;;  %v2015_v11 = vld [vmem:[#allocation2 + $0x24c] ss:$16 sps:$4 sm:$0xff]  }
  0x5d   : > { %1107 = vmatprep.subr.bf16.mxu0 %v1941_v28  ;;  %1253 = vmatprep.subr.bf16.mxu1 %v1943_v29  ;;  %v2010_v12 = vld [vmem:[#allocation2 + $0x240] ss:$16 sps:$4 sm:$0xff]   ;;  %v2013_v13 = vld [vmem:[#allocation2 + $0x248] ss:$16 sps:$4 sm:$0xff]   ;;  %v2058_v14 = vld [vmem:[%s2306_s20 + $0x24] ss:$16 sps:$4 sm:$0xff]  }
  0x5e   : > { %v2060_v15 = vld [vmem:[%s2306_s20 + $0x20] ss:$16 sps:$4 sm:$0xff]   ;;  %v2018_v16 = vld [vmem:[#allocation2 + $0x264] ss:$16 sps:$4 sm:$0xff]   ;;  %v2021_v17 = vld [vmem:[#allocation2 + $0x26c] ss:$16 sps:$4 sm:$0xff]  }
  0x5f   : > { %v2016_v18 = vld [vmem:[#allocation2 + $0x260] ss:$16 sps:$4 sm:$0xff]   ;;  %v2019_v19 = vld [vmem:[#allocation2 + $0x268] ss:$16 sps:$4 sm:$0xff]   ;;  %v2024_v20 = vld [vmem:[#allocation2 + $0x284] ss:$16 sps:$4 sm:$0xff]  }
  0x60   : > { %1108 = vmatpush1.bf16.msra.mxu0 %v1945_v30  ;;  %1254 = vmatpush1.bf16.msra.mxu1 %v1946_v31  ;;  %v2027_v21 = vld [vmem:[#allocation2 + $0x28c] ss:$16 sps:$4 sm:$0xff]   ;;  %v2022_v22 = vld [vmem:[#allocation2 + $0x280] ss:$16 sps:$4 sm:$0xff]   ;;  %v2073_v23 = vld [vmem:[%s2306_s20 + $0x44] ss:$16 sps:$4 sm:$0xff]  }
  0x61   : > { %1109 = vmatprep.subr.bf16.mxu0 %v1947_v32  ;;  %1255 = vmatprep.subr.bf16.mxu1 %v1949_v33  ;;  %v2025_v24 = vld [vmem:[#allocation2 + $0x288] ss:$16 sps:$4 sm:$0xff]   ;;  %v2075_v25 = vld [vmem:[%s2306_s20 + $0x40] ss:$16 sps:$4 sm:$0xff]   ;;  %v2030_v26 = vld [vmem:[#allocation2 + $0x2a4] ss:$16 sps:$4 sm:$0xff]  }
  0x62   : > { %v2033_v27 = vld [vmem:[#allocation2 + $0x2ac] ss:$16 sps:$4 sm:$0xff]   ;;  %v2028_v28 = vld [vmem:[#allocation2 + $0x2a0] ss:$16 sps:$4 sm:$0xff]   ;;  %v2031_v29 = vld [vmem:[#allocation2 + $0x2a8] ss:$16 sps:$4 sm:$0xff]  }
  0x63   : > { %v2036_v30 = vld [vmem:[#allocation2 + $0x2c4] ss:$16 sps:$4 sm:$0xff]   ;;  %v2039_v32 = vld [vmem:[#allocation2 + $0x2cc] ss:$16 sps:$4 sm:$0xff]   ;;  %v2034_v33 = vld [vmem:[#allocation2 + $0x2c0] ss:$16 sps:$4 sm:$0xff]  }
  0x64   : > { %1110 = vmatpush1.bf16.msra.mxu0 %v1951_v34  ;;  %1256 = vmatpush1.bf16.msra.mxu1 %v1952_v35  ;;  %v2088_v31 = vld [vmem:[%s2306_s20 + $0x64] ss:$16 sps:$4 sm:$0xff]   ;;  %v2037_v34 = vld [vmem:[#allocation2 + $0x2c8] ss:$16 sps:$4 sm:$0xff]   ;;  %v2090_v35 = vld [vmem:[%s2306_s20 + $0x60] ss:$16 sps:$4 sm:$0xff]  }
  0x65   : > { %1111 = vmatprep.subr.bf16.mxu0 %v1953_v36  ;;  %1257 = vmatprep.subr.bf16.mxu1 %v1955_v37  ;;  %v2042_v36 = vld [vmem:[#allocation2 + $0x2e4] ss:$16 sps:$4 sm:$0xff]   ;;  %v2045_v37 = vld [vmem:[#allocation2 + $0x2ec] ss:$16 sps:$4 sm:$0xff]   ;;  %v2055_v48 = vld [vmem:[#allocation2 + $0x328] ss:$16 sps:$4 sm:$0xff]  }
  0x68   : > { %1112 = vmatpush1.bf16.msra.mxu0 %v1957_v38  ;;  %1258 = vmatpush1.bf16.msra.mxu1 %v1958_v39  ;;  %v2040_v38 = vld [vmem:[#allocation2 + $0x2e0] ss:$16 sps:$4 sm:$0xff]   ;;  %v2043_v39 = vld [vmem:[#allocation2 + $0x2e8] ss:$16 sps:$4 sm:$0xff]  }
  0x69   : > { %1113 = vmatprep.subr.bf16.mxu0 %v1959_v40  ;;  %1259 = vmatprep.subr.bf16.mxu1 %v1961_v41  ;;  %v2105_v40 = vld [vmem:[%s2306_s20 + $0xc] ss:$16 sps:$4 sm:$0xff]   ;;  %v2048_v41 = vld [vmem:[#allocation2 + $0x304] ss:$16 sps:$4 sm:$0xff]  }
  0x6c   : > { %1114 = vmatpush1.bf16.msra.mxu0 %v1963_v42  ;;  %1260 = vmatpush1.bf16.msra.mxu1 %v1964_v43  ;;  %v2051_v42 = vld [vmem:[#allocation2 + $0x30c] ss:$16 sps:$4 sm:$0xff]   ;;  %v2046_v43 = vld [vmem:[#allocation2 + $0x300] ss:$16 sps:$4 sm:$0xff]  }
  0x6d   : > { %1115 = vmatprep.subr.bf16.mxu0 %v1965_v44  ;;  %1261 = vmatprep.subr.bf16.mxu1 %v1967_v45  ;;  %v2049_v44 = vld [vmem:[#allocation2 + $0x308] ss:$16 sps:$4 sm:$0xff]   ;;  %v2054_v45 = vld [vmem:[#allocation2 + $0x324] ss:$16 sps:$4 sm:$0xff]  }
  0x70   : > { %1116 = vmatpush1.bf16.msra.mxu0 %v1969_v46  ;;  %1262 = vmatpush1.bf16.msra.mxu1 %v1970_v47  ;;  %v2057_v46 = vld [vmem:[#allocation2 + $0x32c] ss:$16 sps:$4 sm:$0xff]   ;;  %v2052_v47 = vld [vmem:[#allocation2 + $0x320] ss:$16 sps:$4 sm:$0xff]  }
  0x71   : > { %1117 = vmatprep.subr.bf16.mxu0 %v1971_v49  ;;  %1263 = vmatprep.subr.bf16.mxu1 %v1973_v50  ;;  %v2063_v49 = vld [vmem:[#allocation2 + $0x344] ss:$16 sps:$4 sm:$0xff]   ;;  %v2066_v50 = vld [vmem:[#allocation2 + $0x34c] ss:$16 sps:$4 sm:$0xff]  }
  0x74   : > { %1118 = vmatpush1.bf16.msra.mxu0 %v1975_v51  ;;  %1264 = vmatpush1.bf16.msra.mxu1 %v1976_v52  ;;  %v2061_v51 = vld [vmem:[#allocation2 + $0x340] ss:$16 sps:$4 sm:$0xff]   ;;  %v2064_v52 = vld [vmem:[#allocation2 + $0x348] ss:$16 sps:$4 sm:$0xff]  }
  0x75   : > { %1119 = vmatprep.subr.bf16.mxu0 %v1977_v53  ;;  %1265 = vmatprep.subr.bf16.mxu1 %v1979_v54  ;;  %v2069_v53 = vld [vmem:[#allocation2 + $0x364] ss:$16 sps:$4 sm:$0xff]   ;;  %v2072_v54 = vld [vmem:[#allocation2 + $0x36c] ss:$16 sps:$4 sm:$0xff]  }
  0x78   : > { %1120 = vmatpush1.bf16.msra.mxu0 %v1981_v55  ;;  %1266 = vmatpush1.bf16.msra.mxu1 %v1982_v56  ;;  %v2067_v55 = vld [vmem:[#allocation2 + $0x360] ss:$16 sps:$4 sm:$0xff]   ;;  %v2070_v56 = vld [vmem:[#allocation2 + $0x368] ss:$16 sps:$4 sm:$0xff]  }
  0x79   : > { %1121 = vmatprep.subr.bf16.mxu0 %v1983_v57  ;;  %1267 = vmatprep.subr.bf16.mxu1 %v1985_v58  ;;  %v2078_v57 = vld [vmem:[#allocation2 + $0x384] ss:$16 sps:$4 sm:$0xff]   ;;  %v2081_v58 = vld [vmem:[#allocation2 + $0x38c] ss:$16 sps:$4 sm:$0xff]  }
  0x7c   : > { %1122 = vmatpush1.bf16.msra.mxu0 %v1987_v59  ;;  %1268 = vmatpush1.bf16.msra.mxu1 %v1988_v60  ;;  %v2076_v59 = vld [vmem:[#allocation2 + $0x380] ss:$16 sps:$4 sm:$0xff]   ;;  %v2079_v60 = vld [vmem:[#allocation2 + $0x388] ss:$16 sps:$4 sm:$0xff]  }
  0x7d   : > { %1123 = vmatprep.subr.bf16.mxu0 %v1989_v61  ;;  %1269 = vmatprep.subr.bf16.mxu1 %v1991_v62  ;;  %v2084_v61 = vld [vmem:[#allocation2 + $0x3a4] ss:$16 sps:$4 sm:$0xff]   ;;  %v2087_v62 = vld [vmem:[#allocation2 + $0x3ac] ss:$16 sps:$4 sm:$0xff]  }
  0x80   : > { %1124 = vmatpush1.bf16.msra.mxu0 %v1993_v63  ;;  %1270 = vmatpush1.bf16.msra.mxu1 %v1994_v0  ;;  %v2082_v63 = vld [vmem:[#allocation2 + $0x3a0] ss:$16 sps:$4 sm:$0xff]   ;;  %v2085_v0 = vld [vmem:[#allocation2 + $0x3a8] ss:$16 sps:$4 sm:$0xff]  }
  0x81   : > { %1166 = vmatprep.subr.bf16.mxu0 %v2000_v1  ;;  %1312 = vmatprep.subr.bf16.mxu1 %v2003_v2  ;;  %v2093_v1 = vld [vmem:[#allocation2 + $0x3c4] ss:$16 sps:$4 sm:$0xff]   ;;  %v2096_v2 = vld [vmem:[#allocation2 + $0x3cc] ss:$16 sps:$4 sm:$0xff]  }
  0x83   : > { %1126 = vmatmul.mubr.bf16.vlgmr.msra.gmra.mrb[0].mxu0 %v1995_v3  ;;  %1272 = vmatmul.mubr.bf16.vlgmr.msra.gmra.mrb[0].mxu1 %v1995_v3  ;;  %v2091_v3 = vld [vmem:[#allocation2 + $0x3c0] ss:$16 sps:$4 sm:$0xff]  }
  0x84   : > { %1167 = vmatpush1.bf16.msra.mxu0 %v1998_v4  ;;  %1313 = vmatpush1.bf16.msra.mxu1 %v2001_v5  ;;  %v2094_v4 = vld [vmem:[#allocation2 + $0x3c8] ss:$16 sps:$4 sm:$0xff]   ;;  %v2099_v5 = vld [vmem:[#allocation2 + $0x3e4] ss:$16 sps:$4 sm:$0xff]  }
  0x85   : > { %1168 = vmatprep.subr.bf16.mxu0 %v2006_v6  ;;  %1314 = vmatprep.subr.bf16.mxu1 %v2009_v7  ;;  %v2102_v6 = vld [vmem:[#allocation2 + $0x3ec] ss:$16 sps:$4 sm:$0xff]   ;;  %v2097_v7 = vld [vmem:[#allocation2 + $0x3e0] ss:$16 sps:$4 sm:$0xff]  }
  0x86   : > { %1135 = vmatprep.mubr.bf16.mxu0 %v2058_v14  ;;  %1281 = vmatprep.mubr.bf16.mxu1 %v2058_v14  ;;  %v2112_v14 = vld [vmem:[%s2306_s20 + $0x6c] ss:$16 sps:$4 sm:$0xff]  }
  0x88   : > { %1169 = vmatpush1.bf16.msra.mxu0 %v2004_v8  ;;  %1315 = vmatpush1.bf16.msra.mxu1 %v2007_v9  ;;  %v2100_v8 = vld [vmem:[#allocation2 + $0x3e8] ss:$16 sps:$4 sm:$0xff]  }
  0x89   : > { %1170 = vmatprep.subr.bf16.mxu0 %v2012_v10  ;;  %1316 = vmatprep.subr.bf16.mxu1 %v2015_v11  ;;  %v2103_v9 = vld [vmem:[%s2306_s20 + $0x8] ss:$16 sps:$4 sm:$0xff]   ;;  %v2106_v10 = vld [vmem:[%s2306_s20 + $0x2c] ss:$16 sps:$4 sm:$0xff]  }
  0x8a   : > { %v2108_v11 = vld [vmem:[%s2306_s20 + $0x28] ss:$16 sps:$4 sm:$0xff]  }
  0x8b   : > { %1136 = vmatmul.mubr.bf16.gmra.mrb[4].mxu0 %v2060_v15  ;;  %1282 = vmatmul.mubr.bf16.gmra.mrb[4].mxu1 %v2060_v15  ;;  %v2114_v15 = vld [vmem:[%s2306_s20 + $0x68] ss:$16 sps:$4 sm:$0xff]  }
  0x8c   : > { %1171 = vmatpush1.bf16.msra.mxu0 %v2010_v12  ;;  %1317 = vmatpush1.bf16.msra.mxu1 %v2013_v13  ;;  %v2109_v12 = vld [vmem:[%s2306_s20 + $0x4c] ss:$16 sps:$4 sm:$0xff]   ;;  %v2111_v13 = vld [vmem:[%s2306_s20 + $0x48] ss:$16 sps:$4 sm:$0xff]  }
  0x8d   : > { %1172 = vmatprep.subr.bf16.mxu0 %v2018_v16  ;;  %1318 = vmatprep.subr.bf16.mxu1 %v2021_v17  ;;  %v353_v16 = vlaneseq }
  0x8e   : > { %1145 = vmatprep.mubr.bf16.mxu0 %v2073_v23  ;;  %1291 = vmatprep.mubr.bf16.mxu1 %v2073_v23 }
  0x8f   : > { %v354_v17 = vshrl.u32 %v353_v16, 7 }
  0x90   : > { %1173 = vmatpush1.bf16.msra.mxu0 %v2016_v18  ;;  %1319 = vmatpush1.bf16.msra.mxu1 %v2019_v19 }
  0x91   : > { %1174 = vmatprep.subr.bf16.mxu0 %v2024_v20  ;;  %1320 = vmatprep.subr.bf16.mxu1 %v2027_v21  ;;  %v355_v18 = vsub.s32 0, %v354_v17  ;;  %v363_v19 = vsub.s32 2, %v354_v17  ;;  %v351_v20 = vld [vmem:[#allocation4] sm:$0xf]  ;;  %v359_v21 = vsub.s32 1, %v354_v17 }
  0x93   : > { %1146 = vmatmul.mubr.bf16.gmra.mrb[8].mxu0 %v2075_v25  ;;  %1292 = vmatmul.mubr.bf16.gmra.mrb[8].mxu1 %v2075_v25  ;;  %v2324_v23 = vrot.slane %v351_v20, %v355_v18  ;;  %v2328_v25 = vrot.slane %v351_v20, %v359_v21 }
  0x94   : > { %1175 = vmatpush1.bf16.msra.mxu0 %v2022_v22  ;;  %1321 = vmatpush1.bf16.msra.mxu1 %v2025_v24  ;;  %v367_v22 = vsub.s32 3, %v354_v17  ;;  %v2326_v24 = vrot.slane %v351_v20, %v363_v19 }
  0x95   : > { %1176 = vmatprep.subr.bf16.mxu0 %v2030_v26  ;;  %1322 = vmatprep.subr.bf16.mxu1 %v2033_v27 }
  0x96   : > { %1155 = vmatprep.mubr.bf16.mxu0 %v2088_v31  ;;  %1301 = vmatprep.mubr.bf16.mxu1 %v2088_v31  ;;  %v2330_v26 = vrot.slane %v351_v20, %v367_v22 }
  0x98   : > { %1177 = vmatpush1.bf16.msra.mxu0 %v2028_v28  ;;  %1323 = vmatpush1.bf16.msra.mxu1 %v2031_v29 }
  0x99   : > { %1178 = vmatprep.subr.bf16.mxu0 %v2036_v30  ;;  %1324 = vmatprep.subr.bf16.mxu1 %v2039_v32 }
  0x9b   : > { %1156 = vmatmul.mubr.bf16.gmra.mrb[12].mxu0 %v2090_v35  ;;  %1302 = vmatmul.mubr.bf16.gmra.mrb[12].mxu1 %v2090_v35 }
  0x9c   : > { %1179 = vmatpush1.bf16.msra.mxu0 %v2034_v33  ;;  %1325 = vmatpush1.bf16.msra.mxu1 %v2037_v34 }
  0x9d   : > { %1180 = vmatprep.subr.bf16.mxu0 %v2042_v36  ;;  %1326 = vmatprep.subr.bf16.mxu1 %v2045_v37 }
  0x9e   : > { %1198 = vmatprep.mubr.bf16.mxu0 %v2105_v40  ;;  %1344 = vmatprep.mubr.bf16.mxu1 %v2105_v40 }
  0xa0   : > { %1181 = vmatpush1.bf16.msra.mxu0 %v2040_v38  ;;  %1327 = vmatpush1.bf16.msra.mxu1 %v2043_v39 }
  0xa1   : > { %1182 = vmatprep.subr.bf16.mxu0 %v2048_v41  ;;  %1328 = vmatprep.subr.bf16.mxu1 %v2051_v42 }
  0xa4   : > { %1183 = vmatpush1.bf16.msra.mxu0 %v2046_v43  ;;  %1329 = vmatpush1.bf16.msra.mxu1 %v2049_v44 }
  0xa5   : > { %1184 = vmatprep.subr.bf16.mxu0 %v2054_v45  ;;  %1330 = vmatprep.subr.bf16.mxu1 %v2057_v46 }
  0xa8   : > { %1185 = vmatpush1.bf16.msra.mxu0 %v2052_v47  ;;  %1331 = vmatpush1.bf16.msra.mxu1 %v2055_v48 }
  0xa9   : > { %1186 = vmatprep.subr.bf16.mxu0 %v2063_v49  ;;  %1332 = vmatprep.subr.bf16.mxu1 %v2066_v50 }
  0xac   : > { %1187 = vmatpush1.bf16.msra.mxu0 %v2061_v51  ;;  %1333 = vmatpush1.bf16.msra.mxu1 %v2064_v52 }
  0xad   : > { %1188 = vmatprep.subr.bf16.mxu0 %v2069_v53  ;;  %1334 = vmatprep.subr.bf16.mxu1 %v2072_v54 }
  0xb0   : > { %1189 = vmatpush1.bf16.msra.mxu0 %v2067_v55  ;;  %1335 = vmatpush1.bf16.msra.mxu1 %v2070_v56 }
  0xb1   : > { %1190 = vmatprep.subr.bf16.mxu0 %v2078_v57  ;;  %1336 = vmatprep.subr.bf16.mxu1 %v2081_v58 }
  0xb4   : > { %1191 = vmatpush1.bf16.msra.mxu0 %v2076_v59  ;;  %1337 = vmatpush1.bf16.msra.mxu1 %v2079_v60 }
  0xb5   : > { %1192 = vmatprep.subr.bf16.mxu0 %v2084_v61  ;;  %1338 = vmatprep.subr.bf16.mxu1 %v2087_v62 }
  0xb8   : > { %1193 = vmatpush1.bf16.msra.mxu0 %v2082_v63  ;;  %1339 = vmatpush1.bf16.msra.mxu1 %v2085_v0 }
  0xb9   : > { %1194 = vmatprep.subr.bf16.mxu0 %v2093_v1  ;;  %1340 = vmatprep.subr.bf16.mxu1 %v2096_v2 }
  0xbc   : > { %1195 = vmatpush1.bf16.msra.mxu0 %v2091_v3  ;;  %1341 = vmatpush1.bf16.msra.mxu1 %v2094_v4 }
  0xbd   : > { %1196 = vmatprep.subr.bf16.mxu0 %v2099_v5  ;;  %1342 = vmatprep.subr.bf16.mxu1 %v2102_v6 }
  0xc0   : > { %1197 = vmatpush1.bf16.msra.mxu0 %v2097_v7  ;;  %1343 = vmatpush1.bf16.msra.mxu1 %v2100_v8 }
  0xc3   : > { %1199 = vmatmul.mubr.bf16.vlgmr.msra.gmra.mrb[0].mxu0 %v2103_v9  ;;  %1345 = vmatmul.mubr.bf16.vlgmr.msra.gmra.mrb[0].mxu1 %v2103_v9 }
  0xc4   : > { %1208 = vmatprep.mubr.bf16.mxu0 %v2106_v10  ;;  %1354 = vmatprep.mubr.bf16.mxu1 %v2106_v10 }
  0xcb   : > { %1209 = vmatmul.mubr.bf16.gmra.mrb[4].mxu0 %v2108_v11  ;;  %1355 = vmatmul.mubr.bf16.gmra.mrb[4].mxu1 %v2108_v11 }
  0xcc   : > { %1218 = vmatprep.mubr.bf16.mxu0 %v2109_v12  ;;  %1364 = vmatprep.mubr.bf16.mxu1 %v2109_v12 }
  0xd3   : > { %1219 = vmatmul.mubr.bf16.gmra.mrb[8].mxu0 %v2111_v13  ;;  %1365 = vmatmul.mubr.bf16.gmra.mrb[8].mxu1 %v2111_v13 }
  0xd4   : > { %1228 = vmatprep.mubr.bf16.mxu0 %v2112_v14  ;;  %1374 = vmatprep.mubr.bf16.mxu1 %v2112_v14 }
  0xdb   : > { %1229 = vmatmul.mubr.bf16.gmra.mrb[12].mxu0 %v2114_v15  ;;  %1375 = vmatmul.mubr.bf16.gmra.mrb[12].mxu1 %v2114_v15 }
 0x196   : > { %v1200_v27 = vpop.f32.mrb[0].mxu0  ;;  %v1346_v28 = vpop.f32.mrb[0].mxu1 }
 0x197   : > { %v1804_v29 = vadd.f32 %v1200_v27, %v2324_v23  ;;  %v1820_v30 = vadd.f32 %v1346_v28, %v2326_v24  ;;  %v1202_v31 = vpop.f32.mrb[1].mxu0  ;;  %v1348_v32 = vpop.f32.mrb[1].mxu1 }
 0x198   : > { %v1805_v33 = vadd.f32 %v1202_v31, %v2328_v25  ;;  %v1821_v34 = vadd.f32 %v1348_v32, %v2330_v26  ;;  %v1204_v35 = vpop.f32.mrb[2].mxu0  ;;  %v1350_v36 = vpop.f32.mrb[2].mxu1 }
 0x199   : > { %v1385_v37 = vmax.f32 %v1804_v29, 0.0  ;;  %v1387_v38 = vmax.f32 %v1820_v30, 0.0  ;;  %v1806_v39 = vadd.f32 %v1204_v35, %v2324_v23  ;;  %v1822_v40 = vadd.f32 %v1350_v36, %v2326_v24  ;;  %v1206_v41 = vpop.f32.mrb[3].mxu0  ;;  %v1352_v42 = vpop.f32.mrb[3].mxu1 }
 0x19a   : > { %v1386_v43 = vmax.f32 %v1805_v33, 0.0  ;;  %v1388_v44 = vmax.f32 %v1821_v34, 0.0  ;;  %v1807_v45 = vadd.f32 %v1206_v41, %v2328_v25  ;;  %v1823_v46 = vadd.f32 %v1352_v42, %v2330_v26 }
 0x19b   : > { %v1389_v47 = vmax.f32 %v1806_v39, 0.0  ;;  %v1391_v48 = vmax.f32 %v1822_v40, 0.0 }
 0x19c   : > { %v1788_v49 = vpack.c.bf16 %v1386_v43, %v1385_v37  ;;  %v1789_v50 = vpack.c.bf16 %v1388_v44, %v1387_v38  ;;  %v1390_v51 = vmax.f32 %v1807_v45, 0.0  ;;  %v1392_v52 = vmax.f32 %v1823_v46, 0.0 }
 0x19e   : > { %1513 = vst [vmem:[%s2345_s24] sm:$0xff] %v1788_v49  ;;  %1514 = vst [vmem:[%s2345_s24 + $0x8] sm:$0xff] %v1789_v50  ;;  %v1790_v53 = vpack.c.bf16 %v1390_v51, %v1389_v47  ;;  %v1791_v54 = vpack.c.bf16 %v1392_v52, %v1391_v48  ;;  %v1210_v55 = vpop.f32.mrb[4].mxu0  ;;  %v1356_v56 = vpop.f32.mrb[4].mxu1 }
 0x19f   : > { %v1808_v57 = vadd.f32 %v1210_v55, %v2324_v23  ;;  %v1824_v58 = vadd.f32 %v1356_v56, %v2326_v24  ;;  %v1212_v59 = vpop.f32.mrb[5].mxu0  ;;  %v1358_v60 = vpop.f32.mrb[5].mxu1 }
 0x1a0   : > { %1515 = vst [vmem:[%s2345_s24 + $0x10] sm:$0xff] %v1790_v53  ;;  %1516 = vst [vmem:[%s2345_s24 + $0x18] sm:$0xff] %v1791_v54  ;;  %v1809_v61 = vadd.f32 %v1212_v59, %v2328_v25  ;;  %v1825_v62 = vadd.f32 %v1358_v60, %v2330_v26  ;;  %v1214_v63 = vpop.f32.mrb[6].mxu0  ;;  %v1360_v0 = vpop.f32.mrb[6].mxu1 }
 0x1a1   : > { %v1393_v1 = vmax.f32 %v1808_v57, 0.0  ;;  %v1395_v2 = vmax.f32 %v1824_v58, 0.0  ;;  %v1810_v3 = vadd.f32 %v1214_v63, %v2324_v23  ;;  %v1826_v4 = vadd.f32 %v1360_v0, %v2326_v24  ;;  %v1216_v5 = vpop.f32.mrb[7].mxu0  ;;  %v1362_v6 = vpop.f32.mrb[7].mxu1 }
 0x1a2   : > { %v1394_v7 = vmax.f32 %v1809_v61, 0.0  ;;  %v1396_v8 = vmax.f32 %v1825_v62, 0.0  ;;  %v1811_v9 = vadd.f32 %v1216_v5, %v2328_v25  ;;  %v1827_v10 = vadd.f32 %v1362_v6, %v2330_v26 }
 0x1a3   : > { %v1397_v11 = vmax.f32 %v1810_v3, 0.0  ;;  %v1399_v12 = vmax.f32 %v1826_v4, 0.0 }
 0x1a4   : > { %v1792_v13 = vpack.c.bf16 %v1394_v7, %v1393_v1  ;;  %v1793_v14 = vpack.c.bf16 %v1396_v8, %v1395_v2  ;;  %v1398_v15 = vmax.f32 %v1811_v9, 0.0  ;;  %v1400_v16 = vmax.f32 %v1827_v10, 0.0 }
 0x1a6   : > { %1517 = vst [vmem:[%s2345_s24 + $0x20] sm:$0xff] %v1792_v13  ;;  %1518 = vst [vmem:[%s2345_s24 + $0x28] sm:$0xff] %v1793_v14  ;;  %v1794_v17 = vpack.c.bf16 %v1398_v15, %v1397_v11  ;;  %v1795_v18 = vpack.c.bf16 %v1400_v16, %v1399_v12  ;;  %v1220_v19 = vpop.f32.mrb[8].mxu0  ;;  %v1366_v20 = vpop.f32.mrb[8].mxu1 }
 0x1a7   : > { %v1812_v21 = vadd.f32 %v1220_v19, %v2324_v23  ;;  %v1828_v22 = vadd.f32 %v1366_v20, %v2326_v24  ;;  %v1222_v27 = vpop.f32.mrb[9].mxu0  ;;  %v1368_v28 = vpop.f32.mrb[9].mxu1 }
 0x1a8   : > { %1519 = vst [vmem:[%s2345_s24 + $0x30] sm:$0xff] %v1794_v17  ;;  %1520 = vst [vmem:[%s2345_s24 + $0x38] sm:$0xff] %v1795_v18  ;;  %v1813_v29 = vadd.f32 %v1222_v27, %v2328_v25  ;;  %v1829_v30 = vadd.f32 %v1368_v28, %v2330_v26  ;;  %v1224_v31 = vpop.f32.mrb[10].mxu0  ;;  %v1370_v32 = vpop.f32.mrb[10].mxu1 }
 0x1a9   : > { %v1401_v33 = vmax.f32 %v1812_v21, 0.0  ;;  %v1403_v34 = vmax.f32 %v1828_v22, 0.0  ;;  %v1814_v35 = vadd.f32 %v1224_v31, %v2324_v23  ;;  %v1830_v36 = vadd.f32 %v1370_v32, %v2326_v24  ;;  %v1226_v37 = vpop.f32.mrb[11].mxu0  ;;  %v1372_v38 = vpop.f32.mrb[11].mxu1 }
 0x1aa   : > { %v1402_v39 = vmax.f32 %v1813_v29, 0.0  ;;  %v1404_v40 = vmax.f32 %v1829_v30, 0.0  ;;  %v1815_v41 = vadd.f32 %v1226_v37, %v2328_v25  ;;  %v1831_v42 = vadd.f32 %v1372_v38, %v2330_v26 }
 0x1ab   : > { %v1405_v43 = vmax.f32 %v1814_v35, 0.0  ;;  %v1407_v44 = vmax.f32 %v1830_v36, 0.0 }
 0x1ac   : > { %v1796_v45 = vpack.c.bf16 %v1402_v39, %v1401_v33  ;;  %v1797_v46 = vpack.c.bf16 %v1404_v40, %v1403_v34  ;;  %v1406_v47 = vmax.f32 %v1815_v41, 0.0  ;;  %v1408_v48 = vmax.f32 %v1831_v42, 0.0 }
 0x1ae   : > { %1521 = vst [vmem:[%s2345_s24 + $0x40] sm:$0xff] %v1796_v45  ;;  %1522 = vst [vmem:[%s2345_s24 + $0x48] sm:$0xff] %v1797_v46  ;;  %v1798_v49 = vpack.c.bf16 %v1406_v47, %v1405_v43  ;;  %v1799_v50 = vpack.c.bf16 %v1408_v48, %v1407_v44  ;;  %v1230_v51 = vpop.f32.mrb[12].mxu0  ;;  %v1376_v52 = vpop.f32.mrb[12].mxu1 }
 0x1af   : > { %v1816_v53 = vadd.f32 %v1230_v51, %v2324_v23  ;;  %v1832_v54 = vadd.f32 %v1376_v52, %v2326_v24  ;;  %v1232_v55 = vpop.f32.mrb[13].mxu0  ;;  %v1378_v56 = vpop.f32.mrb[13].mxu1 }
 0x1b0   : > { %1523 = vst [vmem:[%s2345_s24 + $0x50] sm:$0xff] %v1798_v49  ;;  %1524 = vst [vmem:[%s2345_s24 + $0x58] sm:$0xff] %v1799_v50  ;;  %v1817_v57 = vadd.f32 %v1232_v55, %v2328_v25  ;;  %v1833_v58 = vadd.f32 %v1378_v56, %v2330_v26  ;;  %v1234_v59 = vpop.f32.mrb[14].mxu0  ;;  %v1380_v60 = vpop.f32.mrb[14].mxu1 }
 0x1b1   : > { %v1409_v61 = vmax.f32 %v1816_v53, 0.0  ;;  %v1411_v62 = vmax.f32 %v1832_v54, 0.0  ;;  %v1818_v63 = vadd.f32 %v1234_v59, %v2324_v23  ;;  %v1834_v0 = vadd.f32 %v1380_v60, %v2326_v24  ;;  %v1236_v1 = vpop.f32.mrb[15].mxu0  ;;  %v1382_v2 = vpop.f32.mrb[15].mxu1 }
 0x1b2   : > { %v1410_v3 = vmax.f32 %v1817_v57, 0.0  ;;  %v1412_v4 = vmax.f32 %v1833_v58, 0.0  ;;  %v1819_v5 = vadd.f32 %v1236_v1, %v2328_v25  ;;  %v1835_v6 = vadd.f32 %v1382_v2, %v2330_v26 }
 0x1b3   : > { %v1413_v7 = vmax.f32 %v1818_v63, 0.0  ;;  %v1415_v8 = vmax.f32 %v1834_v0, 0.0 }
 0x1b4   : > { %v1800_v9 = vpack.c.bf16 %v1410_v3, %v1409_v61  ;;  %v1801_v10 = vpack.c.bf16 %v1412_v4, %v1411_v62  ;;  %v1414_v11 = vmax.f32 %v1819_v5, 0.0  ;;  %v1416_v12 = vmax.f32 %v1835_v6, 0.0 }
 0x1b6   : > { %1525 = vst [vmem:[%s2345_s24 + $0x60] sm:$0xff] %v1800_v9  ;;  %1526 = vst [vmem:[%s2345_s24 + $0x68] sm:$0xff] %v1801_v10  ;;  %v1802_v23 = vpack.c.bf16 %v1414_v11, %v1413_v7  ;;  %v1803_v24 = vpack.c.bf16 %v1416_v12, %v1415_v8 }
 0x1b8   : > { %1527 = vst [vmem:[%s2345_s24 + $0x70] sm:$0xff] %v1802_v23  ;;  %1528 = vst [vmem:[%s2345_s24 + $0x78] sm:$0xff] %v1803_v24 }
 0x1b9 PF: > { %s15_s12 = sadd.s32 1, %s2185_s12  }
 0x1ba   : > { %p12_p7 = scmp.ge.s32.totalorder %s15_s12, 4  }
 0x1bc   :  { %14 = sbr.rel (!%p12_p7) target bundleno = 2 (0x2), region = 71 }
 0x1c3   :  { %1553 = vsyncpa [#allocation3], 1 }
 0x1c4   :  { %1555 = vsyncpa [#allocation3 + $0x1], 1 }
 0x1c5   :  { %1556 = vsyncpa [#allocation5], 1 }

// kernel: centernet_forward.6
= control target key start
LH: loop header
LB: loop body
LE: loop exit
PB: predicated region body
PF: predicated region fallthrough
CT: control target
= control target key end

     0   :  { %8 = vsyncpa [#allocation3], 0  ;;  %s4190_s0 = inlined_call_operand.vmem [shape: bf16[512,512], index: 0, kind: input, shape index: {}]   ;;  %s4191_s1 = inlined_call_operand.hbm [shape: bf16[512,512], index: 1, kind: input, shape index: {}]   ;;  %s4192_s2 = inlined_call_operand.hbm [shape: f32[1,512], index: 2, kind: input, shape index: {}]   ;;  %s4193_s3 = inlined_call_operand.vmem [shape: bf16[512,512], index: 3, kind: output, shape index: {}]  }
   0x1   :  { %9 = vsyncpa [#allocation5], 0  ;;  %s3819_s12 = smov 0  }
   0x2 LB: > { %s2809_s13 = sadd.s32 4294967295, %s3793_s12   ;;  %p2811_p0 = scmp.ge.s32.totalorder %s3793_s12, 1  ;;  %s3793_s12 = sphi %s3819_s12, %s15_s12  }
   0x3   : > { %p114_p1 = scmp.lt.s32.totalorder %s3793_s12, 3  ;;  %s3795_s14 = smov [#allocation2]  }
   0x4   : > { %s126_s15 = sshll.u32 %s3795_s14, 4  ;;  %p3833_p3 = scmp.eq.s32.totalorder %s2809_s13, 0  ;;  %s127_s15 = int_to_ptr.vmem [resolvable:$true] %s126_s15 }
   0x5   : > { %p3827_p2 = pnand %p2811_p0, %p114_p1  ;;  %s3796_s18 = smov [#allocation4]  }
   0x6   : > { %s4198_s17 = scalar_select %p3833_p3, 1, 0 }
   0x7   : > { %s4197_s16 = scalar_select %p3827_p2, 1, 0 }
   0x8   : > { %p3412_p4 = pneg %p3827_p2  ;;  %s140_s19 = sshll.u32 %s3796_s18, 4  ;;  %s3845_s19 = int_to_ptr.vmem [resolvable:$true] %s140_s19 }
   0x9   : > { %s3723_s23 = scalar_lea.hbm %s4191_s1, 16384 }
   0xa   : > { %p3841_p5 = pnand %p3833_p3, %p3412_p4  ;;  %p3724_p6 = scmp.ne.s32.totalorder %s4191_s1, %s3723_s23 }
   0xb   : > { %p3730_p10 = scmp.lt.u32.totalorder %s3723_s23, %s4191_s1 }
   0xc   : > { %p3725_p7 = pneg %p3841_p5 }
   0xe   : > { %p3726_p8 = pnand %p3725_p7, %p3724_p6 }
  0x10   : > { %p3727_p9 = pneg %p3726_p8 }
  0x12   : > { %p3732_p11 = pnand %p3730_p10, %p3727_p9 }
  0x14   : > { %3735 = shalt.err (!%p3732_p11)
}
  0x15   : > { %s3736_s28 = scalar_lea.vmem %s127_s15, 16384  ;;  %p3744_p1 = scmp.lt.s32.totalorder %s127_s15, %s127_s15 }
  0x16   : > { %p3737_p12 = scmp.ne.s32.totalorder %s127_s15, %s3736_s28  ;;  %p3745_p4 = scmp.lt.s32.totalorder %s3736_s28, %s3736_s28 }
  0x18   : > { %p3739_p13 = pnand %p3737_p12, %p3725_p7  ;;  %p3746_p3 = por %p3745_p4, %p3744_p1 }
  0x1a   : > { %p3740_p0 = pneg %p3739_p13 }
  0x1c   : > { %p3747_p2 = pnand %p3746_p3, %p3740_p0 }
  0x1e   : > { %3750 = shalt.err (!%p3747_p2)
}
  0x1f   : > { %s3797_s29 = smov 256   ;;  %s3798_s30 = smov 16  }
  0x20   : > { %3415 = dma.hbm_to_vmem [thread:$0]  (!%p3841_p5), %s4191_s1, 16384, %s127_s15, [#allocation3], %s3797_s29, %s3797_s29, %s3798_s30  }
  0x21   : > { %s3751_s8 = scalar_lea.hbm %s4192_s2, 64 }
  0x22   : > { %p3752_p6 = scmp.ne.s32.totalorder %s4192_s2, %s3751_s8  ;;  %p3758_p8 = scmp.lt.u32.totalorder %s3751_s8, %s4192_s2 }
  0x24   : > { %p3754_p2 = pnand %p3752_p6, %p3725_p7 }
  0x26   : > { %p3755_p3 = pneg %p3754_p2 }
  0x28   : > { %p3760_p9 = pnand %p3758_p8, %p3755_p3 }
  0x2a   : > { %3763 = shalt.err (!%p3760_p9)
}
  0x2b   : > { %s3764_s15 = scalar_lea.vmem %s3845_s19, 64  ;;  %p3772_p13 = scmp.lt.s32.totalorder %s3845_s19, %s3845_s19 }
  0x2c   : > { %p3765_p10 = scmp.ne.s32.totalorder %s3845_s19, %s3764_s15  ;;  %p3773_p0 = scmp.lt.s32.totalorder %s3764_s15, %s3764_s15 }
  0x2e   : > { %p3767_p11 = pnand %p3765_p10, %p3725_p7  ;;  %p3774_p1 = por %p3773_p0, %p3772_p13 }
  0x30   : > { %p3768_p12 = pneg %p3767_p11 }
  0x32   : > { %p3775_p4 = pnand %p3774_p1, %p3768_p12 }
  0x34   : > { %3778 = shalt.err (!%p3775_p4)
}
  0x35   : > { %3418 = dma.hbm_to_vmem [thread:$0]  (!%p3841_p5), %s4192_s2, 64, %s3845_s19, [#allocation5]  }
  0x36   : > { %p4200_p6 = scmp.ne.s32.totalorder %s4197_s16, 0 }
  0x37   : > { %p4201_p2 = scmp.ne.s32.totalorder (!%p4200_p6), %s4198_s17, 0 }
  0x38   : > { %163 = sbr.rel (%p4200_p6) target bundleno = 601 (0x259), region = 32 }
  0x3f   : > { %3784 = dma.done.wait (%p4201_p2), [#allocation3], 16384  }
  0x40   : > { %3786 = vsyncadd (%p4201_p2), [#allocation3], 4294950912 }
  0x41   : > { %3788 = dma.done.wait (%p4201_p2), [#allocation5], 64  }
  0x42   : > { %3790 = vsyncadd (%p4201_p2), [#allocation5], 4294967232  ;;  %v3435_v0 = vld [vmem:[#allocation2 + $0x4] ss:$16 sps:$4 sm:$0xff]   ;;  %v3437_v1 = vld [vmem:[#allocation2 + $0xc] ss:$16 sps:$4 sm:$0xff]  }
  0x43   : > { %1381 = vmatprep.subr.bf16.mxu0 %v3435_v0  ;;  %v3439_v2 = vld [vmem:[#allocation2] ss:$16 sps:$4 sm:$0xff]   ;;  %v3440_v3 = vld [vmem:[#allocation2 + $0x8] ss:$16 sps:$4 sm:$0xff]   ;;  %1767 = vmatprep.subr.bf16.mxu1 %v3437_v1  ;;  %v3441_v4 = vld [vmem:[#allocation2 + $0x24] ss:$16 sps:$4 sm:$0xff]  }
  0x44   : > { %1382 = vmatpush1.bf16.msra.mxu0 %v3439_v2  ;;  %1768 = vmatpush1.bf16.msra.mxu1 %v3440_v3  ;;  %v3443_v5 = vld [vmem:[#allocation2 + $0x2c] ss:$16 sps:$4 sm:$0xff]   ;;  %v3445_v6 = vld [vmem:[#allocation2 + $0x20] ss:$16 sps:$4 sm:$0xff]   ;;  %v3446_v7 = vld [vmem:[#allocation2 + $0x28] ss:$16 sps:$4 sm:$0xff]  }
  0x45   : > { %1383 = vmatprep.subr.bf16.mxu0 %v3441_v4  ;;  %1769 = vmatprep.subr.bf16.mxu1 %v3443_v5  ;;  %v3447_v8 = vld [vmem:[#allocation2 + $0x44] ss:$16 sps:$4 sm:$0xff]   ;;  %v3449_v9 = vld [vmem:[#allocation2 + $0x4c] ss:$16 sps:$4 sm:$0xff]   ;;  %v3451_v10 = vld [vmem:[#allocation2 + $0x40] ss:$16 sps:$4 sm:$0xff]  }
  0x46   : > { %v3452_v11 = vld [vmem:[#allocation2 + $0x48] ss:$16 sps:$4 sm:$0xff]   ;;  %v3453_v12 = vld [vmem:[#allocation2 + $0x64] ss:$16 sps:$4 sm:$0xff]   ;;  %v3455_v13 = vld [vmem:[#allocation2 + $0x6c] ss:$16 sps:$4 sm:$0xff]  }
  0x47   : > { %v3457_v14 = vld [vmem:[#allocation2 + $0x60] ss:$16 sps:$4 sm:$0xff]   ;;  %v3458_v15 = vld [vmem:[#allocation2 + $0x68] ss:$16 sps:$4 sm:$0xff]   ;;  %v3459_v16 = vld [vmem:[#allocation2 + $0x84] ss:$16 sps:$4 sm:$0xff]  }
  0x48   : > { %1384 = vmatpush1.bf16.msra.mxu0 %v3445_v6  ;;  %1770 = vmatpush1.bf16.msra.mxu1 %v3446_v7  ;;  %v3461_v17 = vld [vmem:[#allocation2 + $0x8c] ss:$16 sps:$4 sm:$0xff]   ;;  %v3463_v18 = vld [vmem:[#allocation2 + $0x80] ss:$16 sps:$4 sm:$0xff]   ;;  %v3464_v19 = vld [vmem:[#allocation2 + $0x88] ss:$16 sps:$4 sm:$0xff]  }
  0x49   : > { %1385 = vmatprep.subr.bf16.mxu0 %v3447_v8  ;;  %1771 = vmatprep.subr.bf16.mxu1 %v3449_v9  ;;  %v3465_v20 = vld [vmem:[#allocation2 + $0xa4] ss:$16 sps:$4 sm:$0xff]   ;;  %v3467_v21 = vld [vmem:[#allocation2 + $0xac] ss:$16 sps:$4 sm:$0xff]   ;;  %v3469_v22 = vld [vmem:[#allocation2 + $0xa0] ss:$16 sps:$4 sm:$0xff]  }
  0x4a   : > { %v3470_v23 = vld [vmem:[#allocation2 + $0xa8] ss:$16 sps:$4 sm:$0xff]   ;;  %v3471_v24 = vld [vmem:[#allocation2 + $0xc4] ss:$16 sps:$4 sm:$0xff]   ;;  %v3473_v25 = vld [vmem:[#allocation2 + $0xcc] ss:$16 sps:$4 sm:$0xff]  }
  0x4b   : > { %v3475_v26 = vld [vmem:[#allocation2 + $0xc0] ss:$16 sps:$4 sm:$0xff]   ;;  %v3476_v27 = vld [vmem:[#allocation2 + $0xc8] ss:$16 sps:$4 sm:$0xff]   ;;  %v3477_v28 = vld [vmem:[#allocation2 + $0xe4] ss:$16 sps:$4 sm:$0xff]  }
  0x4c   : > { %1386 = vmatpush1.bf16.msra.mxu0 %v3451_v10  ;;  %1772 = vmatpush1.bf16.msra.mxu1 %v3452_v11  ;;  %v3479_v29 = vld [vmem:[#allocation2 + $0xec] ss:$16 sps:$4 sm:$0xff]   ;;  %s2818_s16 = sshll.u32 %s2809_s13, 5  ;;  %v3481_v30 = vld [vmem:[#allocation2 + $0xe0] ss:$16 sps:$4 sm:$0xff]  }
  0x4d   : > { %1387 = vmatprep.subr.bf16.mxu0 %v3453_v12  ;;  %1773 = vmatprep.subr.bf16.mxu1 %v3455_v13  ;;  %v3482_v31 = vld [vmem:[#allocation2 + $0xe8] ss:$16 sps:$4 sm:$0xff]   ;;  %v3483_v32 = vld [vmem:[#allocation2 + $0x104] ss:$16 sps:$4 sm:$0xff]   ;;  %v3485_v33 = vld [vmem:[#allocation2 + $0x10c] ss:$16 sps:$4 sm:$0xff]  }
  0x4e   : > { %p194_p5 = scmp.lt.s32.totalorder %s2818_s16, 63  ;;  %v3487_v34 = vld [vmem:[#allocation2 + $0x100] ss:$16 sps:$4 sm:$0xff]   ;;  %v3488_v35 = vld [vmem:[#allocation2 + $0x108] ss:$16 sps:$4 sm:$0xff]  }
  0x4f   : > { %v3489_v36 = vld [vmem:[#allocation2 + $0x124] ss:$16 sps:$4 sm:$0xff]   ;;  %v3491_v37 = vld [vmem:[#allocation2 + $0x12c] ss:$16 sps:$4 sm:$0xff]   ;;  %v3493_v38 = vld [vmem:[#allocation2 + $0x120] ss:$16 sps:$4 sm:$0xff]  }
  0x50   : > { %1388 = vmatpush1.bf16.msra.mxu0 %v3457_v14  ;;  %1774 = vmatpush1.bf16.msra.mxu1 %v3458_v15  ;;  %s4203_s16 = smov (!%p194_p5, %s2818_s16), 63  ;;  %v3494_v39 = vld [vmem:[#allocation2 + $0x128] ss:$16 sps:$4 sm:$0xff]   ;;  %v3495_v40 = vld [vmem:[#allocation2 + $0x144] ss:$16 sps:$4 sm:$0xff]  }
  0x51   : > { %1389 = vmatprep.subr.bf16.mxu0 %v3459_v16  ;;  %1775 = vmatprep.subr.bf16.mxu1 %v3461_v17  ;;  %v3497_v41 = vld [vmem:[#allocation2 + $0x14c] ss:$16 sps:$4 sm:$0xff]   ;;  %s3082_s13 = sshll.u32 %s4203_s16, 4  ;;  %v3499_v42 = vld [vmem:[#allocation2 + $0x140] ss:$16 sps:$4 sm:$0xff]  }
  0x52   : > { %v3500_v43 = vld [vmem:[#allocation2 + $0x148] ss:$16 sps:$4 sm:$0xff]   ;;  %v3501_v44 = vld [vmem:[#allocation2 + $0x164] ss:$16 sps:$4 sm:$0xff]   ;;  %s3914_s20 = scalar_lea.vmem %s4190_s0, %s3082_s13  ;;  %v3503_v45 = vld [vmem:[#allocation2 + $0x16c] ss:$16 sps:$4 sm:$0xff]   ;;  %s4001_s24 = scalar_lea.vmem %s4193_s3, %s3082_s13 }
  0x53   : > { %v3505_v46 = vld [vmem:[#allocation2 + $0x160] ss:$16 sps:$4 sm:$0xff]   ;;  %v3506_v47 = vld [vmem:[#allocation2 + $0x168] ss:$16 sps:$4 sm:$0xff]   ;;  %v3533_v48 = vld [vmem:[%s3914_s20 + $0x4] ss:$16 sps:$4 sm:$0xff]  }
  0x54   : > { %1390 = vmatpush1.bf16.msra.mxu0 %v3463_v18  ;;  %1776 = vmatpush1.bf16.msra.mxu1 %v3464_v19  ;;  %v3507_v49 = vld [vmem:[#allocation2 + $0x184] ss:$16 sps:$4 sm:$0xff]   ;;  %v3509_v50 = vld [vmem:[#allocation2 + $0x18c] ss:$16 sps:$4 sm:$0xff]   ;;  %v3511_v51 = vld [vmem:[#allocation2 + $0x180] ss:$16 sps:$4 sm:$0xff]  }
  0x55   : > { %1391 = vmatprep.subr.bf16.mxu0 %v3465_v20  ;;  %1777 = vmatprep.subr.bf16.mxu1 %v3467_v21  ;;  %v3512_v52 = vld [vmem:[#allocation2 + $0x188] ss:$16 sps:$4 sm:$0xff]   ;;  %v3513_v53 = vld [vmem:[#allocation2 + $0x1a4] ss:$16 sps:$4 sm:$0xff]   ;;  %v3515_v54 = vld [vmem:[#allocation2 + $0x1ac] ss:$16 sps:$4 sm:$0xff]  }
  0x56   : > { %1413 = vmatprep.mubr.bf16.mxu0 %v3533_v48  ;;  %1799 = vmatprep.mubr.bf16.mxu1 %v3533_v48  ;;  %v3517_v55 = vld [vmem:[#allocation2 + $0x1a0] ss:$16 sps:$4 sm:$0xff]   ;;  %v3518_v56 = vld [vmem:[#allocation2 + $0x1a8] ss:$16 sps:$4 sm:$0xff]   ;;  %v3519_v57 = vld [vmem:[#allocation2 + $0x1c4] ss:$16 sps:$4 sm:$0xff]  }
  0x57   : > { %v3521_v58 = vld [vmem:[#allocation2 + $0x1cc] ss:$16 sps:$4 sm:$0xff]   ;;  %v3523_v59 = vld [vmem:[#allocation2 + $0x1c0] ss:$16 sps:$4 sm:$0xff]   ;;  %v3524_v60 = vld [vmem:[#allocation2 + $0x1c8] ss:$16 sps:$4 sm:$0xff]  }
  0x58   : > { %1392 = vmatpush1.bf16.msra.mxu0 %v3469_v22  ;;  %1778 = vmatpush1.bf16.msra.mxu1 %v3470_v23  ;;  %v3525_v61 = vld [vmem:[#allocation2 + $0x1e4] ss:$16 sps:$4 sm:$0xff]   ;;  %v3527_v62 = vld [vmem:[#allocation2 + $0x1ec] ss:$16 sps:$4 sm:$0xff]   ;;  %v3529_v63 = vld [vmem:[#allocation2 + $0x1e0] ss:$16 sps:$4 sm:$0xff]  }
  0x59   : > { %1393 = vmatprep.subr.bf16.mxu0 %v3471_v24  ;;  %1779 = vmatprep.subr.bf16.mxu1 %v3473_v25  ;;  %v3530_v0 = vld [vmem:[#allocation2 + $0x1e8] ss:$16 sps:$4 sm:$0xff]   ;;  %v3536_v1 = vld [vmem:[#allocation2 + $0x204] ss:$16 sps:$4 sm:$0xff]   ;;  %v3539_v2 = vld [vmem:[#allocation2 + $0x20c] ss:$16 sps:$4 sm:$0xff]  }
  0x5a   : > { %v3531_v3 = vld [vmem:[%s3914_s20] ss:$16 sps:$4 sm:$0xff]   ;;  %v3537_v5 = vld [vmem:[#allocation2 + $0x208] ss:$16 sps:$4 sm:$0xff]   ;;  %v3540_v6 = vld [vmem:[%s3914_s20 + $0x24] ss:$16 sps:$4 sm:$0xff]  }
  0x5b   : > { %v3534_v4 = vld [vmem:[#allocation2 + $0x200] ss:$16 sps:$4 sm:$0xff]   ;;  %v3545_v7 = vld [vmem:[#allocation2 + $0x224] ss:$16 sps:$4 sm:$0xff]   ;;  %v3548_v8 = vld [vmem:[#allocation2 + $0x22c] ss:$16 sps:$4 sm:$0xff]  }
  0x5c   : > { %1394 = vmatpush1.bf16.msra.mxu0 %v3475_v26  ;;  %1780 = vmatpush1.bf16.msra.mxu1 %v3476_v27  ;;  %v3543_v9 = vld [vmem:[#allocation2 + $0x220] ss:$16 sps:$4 sm:$0xff]   ;;  %v3546_v10 = vld [vmem:[#allocation2 + $0x228] ss:$16 sps:$4 sm:$0xff]   ;;  %v3554_v11 = vld [vmem:[#allocation2 + $0x244] ss:$16 sps:$4 sm:$0xff]  }
  0x5d   : > { %1395 = vmatprep.subr.bf16.mxu0 %v3477_v28  ;;  %1781 = vmatprep.subr.bf16.mxu1 %v3479_v29  ;;  %v3557_v12 = vld [vmem:[#allocation2 + $0x24c] ss:$16 sps:$4 sm:$0xff]   ;;  %v3542_v13 = vld [vmem:[%s3914_s20 + $0x20] ss:$16 sps:$4 sm:$0xff]   ;;  %v3549_v14 = vld [vmem:[%s3914_s20 + $0x44] ss:$16 sps:$4 sm:$0xff]  }
  0x5e   : > { %v3552_v15 = vld [vmem:[#allocation2 + $0x240] ss:$16 sps:$4 sm:$0xff]   ;;  %v3555_v16 = vld [vmem:[#allocation2 + $0x248] ss:$16 sps:$4 sm:$0xff]   ;;  %v3563_v17 = vld [vmem:[#allocation2 + $0x264] ss:$16 sps:$4 sm:$0xff]  }
  0x5f   : > { %v3566_v18 = vld [vmem:[#allocation2 + $0x26c] ss:$16 sps:$4 sm:$0xff]   ;;  %v3561_v19 = vld [vmem:[#allocation2 + $0x260] ss:$16 sps:$4 sm:$0xff]   ;;  %v3564_v20 = vld [vmem:[#allocation2 + $0x268] ss:$16 sps:$4 sm:$0xff]  }
  0x60   : > { %1396 = vmatpush1.bf16.msra.mxu0 %v3481_v30  ;;  %1782 = vmatpush1.bf16.msra.mxu1 %v3482_v31  ;;  %v3572_v21 = vld [vmem:[#allocation2 + $0x284] ss:$16 sps:$4 sm:$0xff]   ;;  %v3575_v22 = vld [vmem:[#allocation2 + $0x28c] ss:$16 sps:$4 sm:$0xff]   ;;  %v3551_v23 = vld [vmem:[%s3914_s20 + $0x40] ss:$16 sps:$4 sm:$0xff]  }
  0x61   : > { %1397 = vmatprep.subr.bf16.mxu0 %v3483_v32  ;;  %1783 = vmatprep.subr.bf16.mxu1 %v3485_v33  ;;  %v3558_v24 = vld [vmem:[%s3914_s20 + $0x64] ss:$16 sps:$4 sm:$0xff]   ;;  %v3570_v25 = vld [vmem:[#allocation2 + $0x280] ss:$16 sps:$4 sm:$0xff]   ;;  %v3573_v26 = vld [vmem:[#allocation2 + $0x288] ss:$16 sps:$4 sm:$0xff]  }
  0x62   : > { %v3581_v27 = vld [vmem:[#allocation2 + $0x2a4] ss:$16 sps:$4 sm:$0xff]   ;;  %v3584_v28 = vld [vmem:[#allocation2 + $0x2ac] ss:$16 sps:$4 sm:$0xff]   ;;  %v3579_v29 = vld [vmem:[#allocation2 + $0x2a0] ss:$16 sps:$4 sm:$0xff]  }
  0x63   : > { %v3582_v30 = vld [vmem:[#allocation2 + $0x2a8] ss:$16 sps:$4 sm:$0xff]   ;;  %v3590_v31 = vld [vmem:[#allocation2 + $0x2c4] ss:$16 sps:$4 sm:$0xff]   ;;  %v3593_v32 = vld [vmem:[#allocation2 + $0x2cc] ss:$16 sps:$4 sm:$0xff]  }
  0x64   : > { %1398 = vmatpush1.bf16.msra.mxu0 %v3487_v34  ;;  %1784 = vmatpush1.bf16.msra.mxu1 %v3488_v35  ;;  %v3560_v33 = vld [vmem:[%s3914_s20 + $0x60] ss:$16 sps:$4 sm:$0xff]   ;;  %v3567_v34 = vld [vmem:[%s3914_s20 + $0x84] ss:$16 sps:$4 sm:$0xff]   ;;  %v3620_v48 = vld [vmem:[#allocation2 + $0x32c] ss:$16 sps:$4 sm:$0xff]  }
  0x65   : > { %1399 = vmatprep.subr.bf16.mxu0 %v3489_v36  ;;  %1785 = vmatprep.subr.bf16.mxu1 %v3491_v37  ;;  %v3588_v35 = vld [vmem:[#allocation2 + $0x2c0] ss:$16 sps:$4 sm:$0xff]   ;;  %v3591_v36 = vld [vmem:[#allocation2 + $0x2c8] ss:$16 sps:$4 sm:$0xff]   ;;  %v3599_v37 = vld [vmem:[#allocation2 + $0x2e4] ss:$16 sps:$4 sm:$0xff]  }
  0x68   : > { %1400 = vmatpush1.bf16.msra.mxu0 %v3493_v38  ;;  %1786 = vmatpush1.bf16.msra.mxu1 %v3494_v39  ;;  %v3602_v38 = vld [vmem:[#allocation2 + $0x2ec] ss:$16 sps:$4 sm:$0xff]   ;;  %v3597_v39 = vld [vmem:[#allocation2 + $0x2e0] ss:$16 sps:$4 sm:$0xff]  }
  0x69   : > { %1401 = vmatprep.subr.bf16.mxu0 %v3495_v40  ;;  %1787 = vmatprep.subr.bf16.mxu1 %v3497_v41  ;;  %v3600_v40 = vld [vmem:[#allocation2 + $0x2e8] ss:$16 sps:$4 sm:$0xff]   ;;  %v3608_v41 = vld [vmem:[#allocation2 + $0x304] ss:$16 sps:$4 sm:$0xff]  }
  0x6c   : > { %1402 = vmatpush1.bf16.msra.mxu0 %v3499_v42  ;;  %1788 = vmatpush1.bf16.msra.mxu1 %v3500_v43  ;;  %v3611_v42 = vld [vmem:[#allocation2 + $0x30c] ss:$16 sps:$4 sm:$0xff]   ;;  %v3569_v43 = vld [vmem:[%s3914_s20 + $0x80] ss:$16 sps:$4 sm:$0xff]  }
  0x6d   : > { %1403 = vmatprep.subr.bf16.mxu0 %v3501_v44  ;;  %1789 = vmatprep.subr.bf16.mxu1 %v3503_v45  ;;  %v3576_v44 = vld [vmem:[%s3914_s20 + $0xa4] ss:$16 sps:$4 sm:$0xff]   ;;  %v3606_v45 = vld [vmem:[#allocation2 + $0x300] ss:$16 sps:$4 sm:$0xff]  }
  0x70   : > { %1404 = vmatpush1.bf16.msra.mxu0 %v3505_v46  ;;  %1790 = vmatpush1.bf16.msra.mxu1 %v3506_v47  ;;  %v3609_v46 = vld [vmem:[#allocation2 + $0x308] ss:$16 sps:$4 sm:$0xff]   ;;  %v3617_v47 = vld [vmem:[#allocation2 + $0x324] ss:$16 sps:$4 sm:$0xff]  }
  0x71   : > { %1405 = vmatprep.subr.bf16.mxu0 %v3507_v49  ;;  %1791 = vmatprep.subr.bf16.mxu1 %v3509_v50  ;;  %v3615_v49 = vld [vmem:[#allocation2 + $0x320] ss:$16 sps:$4 sm:$0xff]   ;;  %v3618_v50 = vld [vmem:[#allocation2 + $0x328] ss:$16 sps:$4 sm:$0xff]  }
  0x74   : > { %1406 = vmatpush1.bf16.msra.mxu0 %v3511_v51  ;;  %1792 = vmatpush1.bf16.msra.mxu1 %v3512_v52  ;;  %v3626_v51 = vld [vmem:[#allocation2 + $0x344] ss:$16 sps:$4 sm:$0xff]   ;;  %v3629_v52 = vld [vmem:[#allocation2 + $0x34c] ss:$16 sps:$4 sm:$0xff]  }
  0x75   : > { %1407 = vmatprep.subr.bf16.mxu0 %v3513_v53  ;;  %1793 = vmatprep.subr.bf16.mxu1 %v3515_v54  ;;  %v3578_v53 = vld [vmem:[%s3914_s20 + $0xa0] ss:$16 sps:$4 sm:$0xff]   ;;  %v3585_v54 = vld [vmem:[%s3914_s20 + $0xc4] ss:$16 sps:$4 sm:$0xff]  }
  0x78   : > { %1408 = vmatpush1.bf16.msra.mxu0 %v3517_v55  ;;  %1794 = vmatpush1.bf16.msra.mxu1 %v3518_v56  ;;  %v3624_v55 = vld [vmem:[#allocation2 + $0x340] ss:$16 sps:$4 sm:$0xff]   ;;  %v3627_v56 = vld [vmem:[#allocation2 + $0x348] ss:$16 sps:$4 sm:$0xff]  }
  0x79   : > { %1409 = vmatprep.subr.bf16.mxu0 %v3519_v57  ;;  %1795 = vmatprep.subr.bf16.mxu1 %v3521_v58  ;;  %v3635_v57 = vld [vmem:[#allocation2 + $0x364] ss:$16 sps:$4 sm:$0xff]   ;;  %v3638_v58 = vld [vmem:[#allocation2 + $0x36c] ss:$16 sps:$4 sm:$0xff]  }
  0x7c   : > { %1410 = vmatpush1.bf16.msra.mxu0 %v3523_v59  ;;  %1796 = vmatpush1.bf16.msra.mxu1 %v3524_v60  ;;  %v3633_v59 = vld [vmem:[#allocation2 + $0x360] ss:$16 sps:$4 sm:$0xff]   ;;  %v3636_v60 = vld [vmem:[#allocation2 + $0x368] ss:$16 sps:$4 sm:$0xff]  }
  0x7d   : > { %1411 = vmatprep.subr.bf16.mxu0 %v3525_v61  ;;  %1797 = vmatprep.subr.bf16.mxu1 %v3527_v62  ;;  %v3644_v61 = vld [vmem:[#allocation2 + $0x384] ss:$16 sps:$4 sm:$0xff]   ;;  %v3647_v62 = vld [vmem:[#allocation2 + $0x38c] ss:$16 sps:$4 sm:$0xff]  }
  0x80   : > { %1412 = vmatpush1.bf16.msra.mxu0 %v3529_v63  ;;  %1798 = vmatpush1.bf16.msra.mxu1 %v3530_v0  ;;  %v3587_v63 = vld [vmem:[%s3914_s20 + $0xc0] ss:$16 sps:$4 sm:$0xff]   ;;  %v3594_v0 = vld [vmem:[%s3914_s20 + $0xe4] ss:$16 sps:$4 sm:$0xff]  }
  0x81   : > { %1574 = vmatprep.subr.bf16.mxu0 %v3536_v1  ;;  %1960 = vmatprep.subr.bf16.mxu1 %v3539_v2  ;;  %v3642_v1 = vld [vmem:[#allocation2 + $0x380] ss:$16 sps:$4 sm:$0xff]   ;;  %v3645_v2 = vld [vmem:[#allocation2 + $0x388] ss:$16 sps:$4 sm:$0xff]  }
  0x83   : > { %1414 = vmatmul.mubr.bf16.vlgmr.msra.gmra.mrb[0].mxu0 %v3531_v3  ;;  %1800 = vmatmul.mubr.bf16.vlgmr.msra.gmra.mrb[0].mxu1 %v3531_v3  ;;  %v3653_v3 = vld [vmem:[#allocation2 + $0x3a4] ss:$16 sps:$4 sm:$0xff]  }
  0x84   : > { %1575 = vmatpush1.bf16.msra.mxu0 %v3534_v4  ;;  %1961 = vmatpush1.bf16.msra.mxu1 %v3537_v5  ;;  %v3656_v4 = vld [vmem:[#allocation2 + $0x3ac] ss:$16 sps:$4 sm:$0xff]   ;;  %v3651_v5 = vld [vmem:[#allocation2 + $0x3a0] ss:$16 sps:$4 sm:$0xff]  }
  0x85   : > { %1423 = vmatprep.mubr.bf16.mxu0 %v3540_v6  ;;  %1809 = vmatprep.mubr.bf16.mxu1 %v3540_v6  ;;  %v3654_v6 = vld [vmem:[#allocation2 + $0x3a8] ss:$16 sps:$4 sm:$0xff]  }
  0x86   : > { %1576 = vmatprep.subr.bf16.mxu0 %v3545_v7  ;;  %1962 = vmatprep.subr.bf16.mxu1 %v3548_v8  ;;  %v3662_v7 = vld [vmem:[#allocation2 + $0x3c4] ss:$16 sps:$4 sm:$0xff]   ;;  %v3596_v8 = vld [vmem:[%s3914_s20 + $0xe0] ss:$16 sps:$4 sm:$0xff]  }
  0x88   : > { %1577 = vmatpush1.bf16.msra.mxu0 %v3543_v9  ;;  %1963 = vmatpush1.bf16.msra.mxu1 %v3546_v10  ;;  %v3665_v9 = vld [vmem:[#allocation2 + $0x3cc] ss:$16 sps:$4 sm:$0xff]   ;;  %v3603_v10 = vld [vmem:[%s3914_s20 + $0x104] ss:$16 sps:$4 sm:$0xff]  }
  0x89   : > { %1578 = vmatprep.subr.bf16.mxu0 %v3554_v11  ;;  %1964 = vmatprep.subr.bf16.mxu1 %v3557_v12  ;;  %v3660_v11 = vld [vmem:[#allocation2 + $0x3c0] ss:$16 sps:$4 sm:$0xff]   ;;  %v3663_v12 = vld [vmem:[#allocation2 + $0x3c8] ss:$16 sps:$4 sm:$0xff]  }
  0x8b   : > { %1424 = vmatmul.mubr.bf16.gmra.mrb[4].mxu0 %v3542_v13  ;;  %1810 = vmatmul.mubr.bf16.gmra.mrb[4].mxu1 %v3542_v13  ;;  %v3671_v13 = vld [vmem:[#allocation2 + $0x3e4] ss:$16 sps:$4 sm:$0xff]  }
  0x8c   : > { %1433 = vmatprep.mubr.bf16.mxu0 %v3549_v14  ;;  %1819 = vmatprep.mubr.bf16.mxu1 %v3549_v14  ;;  %v3674_v14 = vld [vmem:[#allocation2 + $0x3ec] ss:$16 sps:$4 sm:$0xff]  }
  0x8d   : > { %1579 = vmatpush1.bf16.msra.mxu0 %v3552_v15  ;;  %1965 = vmatpush1.bf16.msra.mxu1 %v3555_v16  ;;  %v3669_v15 = vld [vmem:[#allocation2 + $0x3e0] ss:$16 sps:$4 sm:$0xff]   ;;  %v3672_v16 = vld [vmem:[#allocation2 + $0x3e8] ss:$16 sps:$4 sm:$0xff]  }
  0x8e   : > { %1580 = vmatprep.subr.bf16.mxu0 %v3563_v17  ;;  %1966 = vmatprep.subr.bf16.mxu1 %v3566_v18  ;;  %v3605_v17 = vld [vmem:[%s3914_s20 + $0x100] ss:$16 sps:$4 sm:$0xff]   ;;  %v3612_v18 = vld [vmem:[%s3914_s20 + $0x124] ss:$16 sps:$4 sm:$0xff]  }
  0x91   : > { %1581 = vmatpush1.bf16.msra.mxu0 %v3561_v19  ;;  %1967 = vmatpush1.bf16.msra.mxu1 %v3564_v20  ;;  %v3614_v19 = vld [vmem:[%s3914_s20 + $0x120] ss:$16 sps:$4 sm:$0xff]   ;;  %v3621_v20 = vld [vmem:[%s3914_s20 + $0x144] ss:$16 sps:$4 sm:$0xff]  }
  0x92   : > { %1582 = vmatprep.subr.bf16.mxu0 %v3572_v21  ;;  %1968 = vmatprep.subr.bf16.mxu1 %v3575_v22  ;;  %v3623_v21 = vld [vmem:[%s3914_s20 + $0x140] ss:$16 sps:$4 sm:$0xff]   ;;  %v3630_v22 = vld [vmem:[%s3914_s20 + $0x164] ss:$16 sps:$4 sm:$0xff]  }
  0x93   : > { %1434 = vmatmul.mubr.bf16.gmra.mrb[8].mxu0 %v3551_v23  ;;  %1820 = vmatmul.mubr.bf16.gmra.mrb[8].mxu1 %v3551_v23  ;;  %v3632_v23 = vld [vmem:[%s3914_s20 + $0x160] ss:$16 sps:$4 sm:$0xff]  }
  0x94   : > { %1443 = vmatprep.mubr.bf16.mxu0 %v3558_v24  ;;  %1829 = vmatprep.mubr.bf16.mxu1 %v3558_v24  ;;  %v3639_v24 = vld [vmem:[%s3914_s20 + $0x184] ss:$16 sps:$4 sm:$0xff]  }
  0x95   : > { %1583 = vmatpush1.bf16.msra.mxu0 %v3570_v25  ;;  %1969 = vmatpush1.bf16.msra.mxu1 %v3573_v26  ;;  %v3641_v25 = vld [vmem:[%s3914_s20 + $0x180] ss:$16 sps:$4 sm:$0xff]   ;;  %v3648_v26 = vld [vmem:[%s3914_s20 + $0x1a4] ss:$16 sps:$4 sm:$0xff]  }
  0x96   : > { %1584 = vmatprep.subr.bf16.mxu0 %v3581_v27  ;;  %1970 = vmatprep.subr.bf16.mxu1 %v3584_v28  ;;  %v3650_v27 = vld [vmem:[%s3914_s20 + $0x1a0] ss:$16 sps:$4 sm:$0xff]   ;;  %v3657_v28 = vld [vmem:[%s3914_s20 + $0x1c4] ss:$16 sps:$4 sm:$0xff]  }
  0x99   : > { %1585 = vmatpush1.bf16.msra.mxu0 %v3579_v29  ;;  %1971 = vmatpush1.bf16.msra.mxu1 %v3582_v30  ;;  %v3659_v29 = vld [vmem:[%s3914_s20 + $0x1c0] ss:$16 sps:$4 sm:$0xff]   ;;  %v3666_v30 = vld [vmem:[%s3914_s20 + $0x1e4] ss:$16 sps:$4 sm:$0xff]  }
  0x9a   : > { %1586 = vmatprep.subr.bf16.mxu0 %v3590_v31  ;;  %1972 = vmatprep.subr.bf16.mxu1 %v3593_v32  ;;  %v3668_v31 = vld [vmem:[%s3914_s20 + $0x1e0] ss:$16 sps:$4 sm:$0xff]   ;;  %v3677_v32 = vld [vmem:[%s3914_s20 + $0xc] ss:$16 sps:$4 sm:$0xff]  }
  0x9b   : > { %1444 = vmatmul.mubr.bf16.gmra.mrb[12].mxu0 %v3560_v33  ;;  %1830 = vmatmul.mubr.bf16.gmra.mrb[12].mxu1 %v3560_v33  ;;  %v3675_v33 = vld [vmem:[%s3914_s20 + $0x8] ss:$16 sps:$4 sm:$0xff]  }
  0x9c   : > { %1453 = vmatprep.mubr.bf16.mxu0 %v3567_v34  ;;  %1839 = vmatprep.mubr.bf16.mxu1 %v3567_v34  ;;  %v3678_v34 = vld [vmem:[%s3914_s20 + $0x2c] ss:$16 sps:$4 sm:$0xff]  }
  0x9d   : > { %1587 = vmatpush1.bf16.msra.mxu0 %v3588_v35  ;;  %1973 = vmatpush1.bf16.msra.mxu1 %v3591_v36  ;;  %v3680_v35 = vld [vmem:[%s3914_s20 + $0x28] ss:$16 sps:$4 sm:$0xff]   ;;  %v3681_v36 = vld [vmem:[%s3914_s20 + $0x4c] ss:$16 sps:$4 sm:$0xff]  }
  0x9e   : > { %1588 = vmatprep.subr.bf16.mxu0 %v3599_v37  ;;  %1974 = vmatprep.subr.bf16.mxu1 %v3602_v38  ;;  %v3683_v37 = vld [vmem:[%s3914_s20 + $0x48] ss:$16 sps:$4 sm:$0xff]   ;;  %v3684_v38 = vld [vmem:[%s3914_s20 + $0x6c] ss:$16 sps:$4 sm:$0xff]  }
  0xa1   : > { %1589 = vmatpush1.bf16.msra.mxu0 %v3597_v39  ;;  %1975 = vmatpush1.bf16.msra.mxu1 %v3600_v40  ;;  %v3686_v39 = vld [vmem:[%s3914_s20 + $0x68] ss:$16 sps:$4 sm:$0xff]   ;;  %v3687_v40 = vld [vmem:[%s3914_s20 + $0x8c] ss:$16 sps:$4 sm:$0xff]  }
  0xa2   : > { %1590 = vmatprep.subr.bf16.mxu0 %v3608_v41  ;;  %1976 = vmatprep.subr.bf16.mxu1 %v3611_v42  ;;  %v3689_v41 = vld [vmem:[%s3914_s20 + $0x88] ss:$16 sps:$4 sm:$0xff]   ;;  %v3690_v42 = vld [vmem:[%s3914_s20 + $0xac] ss:$16 sps:$4 sm:$0xff]  }
  0xa3   : > { %1454 = vmatmul.mubr.bf16.gmra.mrb[16].mxu0 %v3569_v43  ;;  %1840 = vmatmul.mubr.bf16.gmra.mrb[16].mxu1 %v3569_v43  ;;  %v3692_v43 = vld [vmem:[%s3914_s20 + $0xa8] ss:$16 sps:$4 sm:$0xff]  }
  0xa4   : > { %1463 = vmatprep.mubr.bf16.mxu0 %v3576_v44  ;;  %1849 = vmatprep.mubr.bf16.mxu1 %v3576_v44  ;;  %v3693_v44 = vld [vmem:[%s3914_s20 + $0xcc] ss:$16 sps:$4 sm:$0xff]  }
  0xa5   : > { %1591 = vmatpush1.bf16.msra.mxu0 %v3606_v45  ;;  %1977 = vmatpush1.bf16.msra.mxu1 %v3609_v46  ;;  %v3695_v45 = vld [vmem:[%s3914_s20 + $0xc8] ss:$16 sps:$4 sm:$0xff]   ;;  %v3696_v46 = vld [vmem:[%s3914_s20 + $0xec] ss:$16 sps:$4 sm:$0xff]  }
  0xa6   : > { %1592 = vmatprep.subr.bf16.mxu0 %v3617_v47  ;;  %1978 = vmatprep.subr.bf16.mxu1 %v3620_v48  ;;  %v3698_v47 = vld [vmem:[%s3914_s20 + $0xe8] ss:$16 sps:$4 sm:$0xff]   ;;  %v3699_v48 = vld [vmem:[%s3914_s20 + $0x10c] ss:$16 sps:$4 sm:$0xff]  }
  0xa9   : > { %1593 = vmatpush1.bf16.msra.mxu0 %v3615_v49  ;;  %1979 = vmatpush1.bf16.msra.mxu1 %v3618_v50  ;;  %v3701_v49 = vld [vmem:[%s3914_s20 + $0x108] ss:$16 sps:$4 sm:$0xff]   ;;  %v3702_v50 = vld [vmem:[%s3914_s20 + $0x12c] ss:$16 sps:$4 sm:$0xff]  }
  0xaa   : > { %1594 = vmatprep.subr.bf16.mxu0 %v3626_v51  ;;  %1980 = vmatprep.subr.bf16.mxu1 %v3629_v52  ;;  %v3704_v51 = vld [vmem:[%s3914_s20 + $0x128] ss:$16 sps:$4 sm:$0xff]   ;;  %v3705_v52 = vld [vmem:[%s3914_s20 + $0x14c] ss:$16 sps:$4 sm:$0xff]  }
  0xab   : > { %1464 = vmatmul.mubr.bf16.gmra.mrb[20].mxu0 %v3578_v53  ;;  %1850 = vmatmul.mubr.bf16.gmra.mrb[20].mxu1 %v3578_v53  ;;  %v3707_v53 = vld [vmem:[%s3914_s20 + $0x148] ss:$16 sps:$4 sm:$0xff]  }
  0xac   : > { %1473 = vmatprep.mubr.bf16.mxu0 %v3585_v54  ;;  %1859 = vmatprep.mubr.bf16.mxu1 %v3585_v54  ;;  %v3708_v54 = vld [vmem:[%s3914_s20 + $0x16c] ss:$16 sps:$4 sm:$0xff]  }
  0xad   : > { %1595 = vmatpush1.bf16.msra.mxu0 %v3624_v55  ;;  %1981 = vmatpush1.bf16.msra.mxu1 %v3627_v56  ;;  %v3710_v55 = vld [vmem:[%s3914_s20 + $0x168] ss:$16 sps:$4 sm:$0xff]   ;;  %v3711_v56 = vld [vmem:[%s3914_s20 + $0x18c] ss:$16 sps:$4 sm:$0xff]  }
  0xae   : > { %1596 = vmatprep.subr.bf16.mxu0 %v3635_v57  ;;  %1982 = vmatprep.subr.bf16.mxu1 %v3638_v58  ;;  %v3713_v57 = vld [vmem:[%s3914_s20 + $0x188] ss:$16 sps:$4 sm:$0xff]   ;;  %v3714_v58 = vld [vmem:[%s3914_s20 + $0x1ac] ss:$16 sps:$4 sm:$0xff]  }
  0xb1   : > { %1597 = vmatpush1.bf16.msra.mxu0 %v3633_v59  ;;  %1983 = vmatpush1.bf16.msra.mxu1 %v3636_v60  ;;  %v3716_v59 = vld [vmem:[%s3914_s20 + $0x1a8] ss:$16 sps:$4 sm:$0xff]   ;;  %v3717_v60 = vld [vmem:[%s3914_s20 + $0x1cc] ss:$16 sps:$4 sm:$0xff]  }
  0xb2   : > { %1598 = vmatprep.subr.bf16.mxu0 %v3644_v61  ;;  %1984 = vmatprep.subr.bf16.mxu1 %v3647_v62  ;;  %v3719_v61 = vld [vmem:[%s3914_s20 + $0x1c8] ss:$16 sps:$4 sm:$0xff]   ;;  %v3720_v62 = vld [vmem:[%s3914_s20 + $0x1ec] ss:$16 sps:$4 sm:$0xff]  }
  0xb3   : > { %1474 = vmatmul.mubr.bf16.gmra.mrb[24].mxu0 %v3587_v63  ;;  %1860 = vmatmul.mubr.bf16.gmra.mrb[24].mxu1 %v3587_v63  ;;  %v3722_v63 = vld [vmem:[%s3914_s20 + $0x1e8] ss:$16 sps:$4 sm:$0xff]  }
  0xb4   : > { %1483 = vmatprep.mubr.bf16.mxu0 %v3594_v0  ;;  %1869 = vmatprep.mubr.bf16.mxu1 %v3594_v0  ;;  %v401_v0 = vlaneseq }
  0xb5   : > { %1599 = vmatpush1.bf16.msra.mxu0 %v3642_v1  ;;  %1985 = vmatpush1.bf16.msra.mxu1 %v3645_v2 }
  0xb6   : > { %1600 = vmatprep.subr.bf16.mxu0 %v3653_v3  ;;  %1986 = vmatprep.subr.bf16.mxu1 %v3656_v4  ;;  %v402_v1 = vshrl.u32 %v401_v0, 7  ;;  %v399_v4 = vld [vmem:[#allocation4] sm:$0xf] }
  0xb8   : > { %v403_v2 = vsub.s32 0, %v402_v1  ;;  %v411_v3 = vsub.s32 2, %v402_v1 }
  0xb9   : > { %1601 = vmatpush1.bf16.msra.mxu0 %v3651_v5  ;;  %1987 = vmatpush1.bf16.msra.mxu1 %v3654_v6  ;;  %v407_v5 = vsub.s32 1, %v402_v1  ;;  %v415_v6 = vsub.s32 3, %v402_v1 }
  0xba   : > { %1602 = vmatprep.subr.bf16.mxu0 %v3662_v7  ;;  %1988 = vmatprep.subr.bf16.mxu1 %v3665_v9  ;;  %v3980_v7 = vrot.slane %v399_v4, %v403_v2 }
  0xbb   : > { %1484 = vmatmul.mubr.bf16.gmra.mrb[28].mxu0 %v3596_v8  ;;  %1870 = vmatmul.mubr.bf16.gmra.mrb[28].mxu1 %v3596_v8  ;;  %v3982_v8 = vrot.slane %v399_v4, %v411_v3  ;;  %v3984_v9 = vrot.slane %v399_v4, %v407_v5 }
  0xbc   : > { %1493 = vmatprep.mubr.bf16.mxu0 %v3603_v10  ;;  %1879 = vmatprep.mubr.bf16.mxu1 %v3603_v10  ;;  %v3986_v10 = vrot.slane %v399_v4, %v415_v6 }
  0xbd   : > { %1603 = vmatpush1.bf16.msra.mxu0 %v3660_v11  ;;  %1989 = vmatpush1.bf16.msra.mxu1 %v3663_v12 }
  0xbe   : > { %1604 = vmatprep.subr.bf16.mxu0 %v3671_v13  ;;  %1990 = vmatprep.subr.bf16.mxu1 %v3674_v14 }
  0xc1   : > { %1605 = vmatpush1.bf16.msra.mxu0 %v3669_v15  ;;  %1991 = vmatpush1.bf16.msra.mxu1 %v3672_v16 }
  0xc3   : > { %1494 = vmatmul.mubr.bf16.gmra.mrb[32].mxu0 %v3605_v17  ;;  %1880 = vmatmul.mubr.bf16.gmra.mrb[32].mxu1 %v3605_v17 }
  0xc4   : > { %1503 = vmatprep.mubr.bf16.mxu0 %v3612_v18  ;;  %1889 = vmatprep.mubr.bf16.mxu1 %v3612_v18 }
  0xcb   : > { %1504 = vmatmul.mubr.bf16.gmra.mrb[36].mxu0 %v3614_v19  ;;  %1890 = vmatmul.mubr.bf16.gmra.mrb[36].mxu1 %v3614_v19 }
  0xcc   : > { %1513 = vmatprep.mubr.bf16.mxu0 %v3621_v20  ;;  %1899 = vmatprep.mubr.bf16.mxu1 %v3621_v20 }
  0xd3   : > { %1514 = vmatmul.mubr.bf16.gmra.mrb[40].mxu0 %v3623_v21  ;;  %1900 = vmatmul.mubr.bf16.gmra.mrb[40].mxu1 %v3623_v21 }
  0xd4   : > { %1523 = vmatprep.mubr.bf16.mxu0 %v3630_v22  ;;  %1909 = vmatprep.mubr.bf16.mxu1 %v3630_v22 }
  0xdb   : > { %1524 = vmatmul.mubr.bf16.gmra.mrb[44].mxu0 %v3632_v23  ;;  %1910 = vmatmul.mubr.bf16.gmra.mrb[44].mxu1 %v3632_v23 }
  0xdc   : > { %1533 = vmatprep.mubr.bf16.mxu0 %v3639_v24  ;;  %1919 = vmatprep.mubr.bf16.mxu1 %v3639_v24 }
  0xe3   : > { %1534 = vmatmul.mubr.bf16.gmra.mrb[48].mxu0 %v3641_v25  ;;  %1920 = vmatmul.mubr.bf16.gmra.mrb[48].mxu1 %v3641_v25 }
  0xe4   : > { %1543 = vmatprep.mubr.bf16.mxu0 %v3648_v26  ;;  %1929 = vmatprep.mubr.bf16.mxu1 %v3648_v26 }
  0xeb   : > { %1544 = vmatmul.mubr.bf16.gmra.mrb[52].mxu0 %v3650_v27  ;;  %1930 = vmatmul.mubr.bf16.gmra.mrb[52].mxu1 %v3650_v27 }
  0xec   : > { %1553 = vmatprep.mubr.bf16.mxu0 %v3657_v28  ;;  %1939 = vmatprep.mubr.bf16.mxu1 %v3657_v28 }
  0xf3   : > { %1554 = vmatmul.mubr.bf16.gmra.mrb[56].mxu0 %v3659_v29  ;;  %1940 = vmatmul.mubr.bf16.gmra.mrb[56].mxu1 %v3659_v29 }
  0xf4   : > { %1563 = vmatprep.mubr.bf16.mxu0 %v3666_v30  ;;  %1949 = vmatprep.mubr.bf16.mxu1 %v3666_v30 }
  0xfb   : > { %1564 = vmatmul.mubr.bf16.gmra.mrb[60].mxu0 %v3668_v31  ;;  %1950 = vmatmul.mubr.bf16.gmra.mrb[60].mxu1 %v3668_v31 }
  0xfc   : > { %1606 = vmatprep.mubr.bf16.mxu0 %v3677_v32  ;;  %1992 = vmatprep.mubr.bf16.mxu1 %v3677_v32 }
 0x103   : > { %1607 = vmatmul.mubr.bf16.vlgmr.msra.gmra.mrb[0].mxu0 %v3675_v33  ;;  %1993 = vmatmul.mubr.bf16.vlgmr.msra.gmra.mrb[0].mxu1 %v3675_v33 }
 0x104   : > { %1616 = vmatprep.mubr.bf16.mxu0 %v3678_v34  ;;  %2002 = vmatprep.mubr.bf16.mxu1 %v3678_v34 }
 0x10b   : > { %1617 = vmatmul.mubr.bf16.gmra.mrb[4].mxu0 %v3680_v35  ;;  %2003 = vmatmul.mubr.bf16.gmra.mrb[4].mxu1 %v3680_v35 }
 0x10c   : > { %1626 = vmatprep.mubr.bf16.mxu0 %v3681_v36  ;;  %2012 = vmatprep.mubr.bf16.mxu1 %v3681_v36 }
 0x113   : > { %1627 = vmatmul.mubr.bf16.gmra.mrb[8].mxu0 %v3683_v37  ;;  %2013 = vmatmul.mubr.bf16.gmra.mrb[8].mxu1 %v3683_v37 }
 0x114   : > { %1636 = vmatprep.mubr.bf16.mxu0 %v3684_v38  ;;  %2022 = vmatprep.mubr.bf16.mxu1 %v3684_v38 }
 0x11b   : > { %1637 = vmatmul.mubr.bf16.gmra.mrb[12].mxu0 %v3686_v39  ;;  %2023 = vmatmul.mubr.bf16.gmra.mrb[12].mxu1 %v3686_v39 }
 0x11c   : > { %1646 = vmatprep.mubr.bf16.mxu0 %v3687_v40  ;;  %2032 = vmatprep.mubr.bf16.mxu1 %v3687_v40 }
 0x123   : > { %1647 = vmatmul.mubr.bf16.gmra.mrb[16].mxu0 %v3689_v41  ;;  %2033 = vmatmul.mubr.bf16.gmra.mrb[16].mxu1 %v3689_v41 }
 0x124   : > { %1656 = vmatprep.mubr.bf16.mxu0 %v3690_v42  ;;  %2042 = vmatprep.mubr.bf16.mxu1 %v3690_v42 }
 0x12b   : > { %1657 = vmatmul.mubr.bf16.gmra.mrb[20].mxu0 %v3692_v43  ;;  %2043 = vmatmul.mubr.bf16.gmra.mrb[20].mxu1 %v3692_v43 }
 0x12c   : > { %1666 = vmatprep.mubr.bf16.mxu0 %v3693_v44  ;;  %2052 = vmatprep.mubr.bf16.mxu1 %v3693_v44 }
 0x133   : > { %1667 = vmatmul.mubr.bf16.gmra.mrb[24].mxu0 %v3695_v45  ;;  %2053 = vmatmul.mubr.bf16.gmra.mrb[24].mxu1 %v3695_v45 }
 0x134   : > { %1676 = vmatprep.mubr.bf16.mxu0 %v3696_v46  ;;  %2062 = vmatprep.mubr.bf16.mxu1 %v3696_v46 }
 0x13b   : > { %1677 = vmatmul.mubr.bf16.gmra.mrb[28].mxu0 %v3698_v47  ;;  %2063 = vmatmul.mubr.bf16.gmra.mrb[28].mxu1 %v3698_v47 }
 0x13c   : > { %1686 = vmatprep.mubr.bf16.mxu0 %v3699_v48  ;;  %2072 = vmatprep.mubr.bf16.mxu1 %v3699_v48 }
 0x143   : > { %1687 = vmatmul.mubr.bf16.gmra.mrb[32].mxu0 %v3701_v49  ;;  %2073 = vmatmul.mubr.bf16.gmra.mrb[32].mxu1 %v3701_v49 }
 0x144   : > { %1696 = vmatprep.mubr.bf16.mxu0 %v3702_v50  ;;  %2082 = vmatprep.mubr.bf16.mxu1 %v3702_v50 }
 0x14b   : > { %1697 = vmatmul.mubr.bf16.gmra.mrb[36].mxu0 %v3704_v51  ;;  %2083 = vmatmul.mubr.bf16.gmra.mrb[36].mxu1 %v3704_v51 }
 0x14c   : > { %1706 = vmatprep.mubr.bf16.mxu0 %v3705_v52  ;;  %2092 = vmatprep.mubr.bf16.mxu1 %v3705_v52 }
 0x153   : > { %1707 = vmatmul.mubr.bf16.gmra.mrb[40].mxu0 %v3707_v53  ;;  %2093 = vmatmul.mubr.bf16.gmra.mrb[40].mxu1 %v3707_v53 }
 0x154   : > { %1716 = vmatprep.mubr.bf16.mxu0 %v3708_v54  ;;  %2102 = vmatprep.mubr.bf16.mxu1 %v3708_v54 }
 0x15b   : > { %1717 = vmatmul.mubr.bf16.gmra.mrb[44].mxu0 %v3710_v55  ;;  %2103 = vmatmul.mubr.bf16.gmra.mrb[44].mxu1 %v3710_v55 }
 0x15c   : > { %1726 = vmatprep.mubr.bf16.mxu0 %v3711_v56  ;;  %2112 = vmatprep.mubr.bf16.mxu1 %v3711_v56 }
 0x163   : > { %1727 = vmatmul.mubr.bf16.gmra.mrb[48].mxu0 %v3713_v57  ;;  %2113 = vmatmul.mubr.bf16.gmra.mrb[48].mxu1 %v3713_v57 }
 0x164   : > { %1736 = vmatprep.mubr.bf16.mxu0 %v3714_v58  ;;  %2122 = vmatprep.mubr.bf16.mxu1 %v3714_v58 }
 0x16b   : > { %1737 = vmatmul.mubr.bf16.gmra.mrb[52].mxu0 %v3716_v59  ;;  %2123 = vmatmul.mubr.bf16.gmra.mrb[52].mxu1 %v3716_v59 }
 0x16c   : > { %1746 = vmatprep.mubr.bf16.mxu0 %v3717_v60  ;;  %2132 = vmatprep.mubr.bf16.mxu1 %v3717_v60 }
 0x173   : > { %1747 = vmatmul.mubr.bf16.gmra.mrb[56].mxu0 %v3719_v61  ;;  %2133 = vmatmul.mubr.bf16.gmra.mrb[56].mxu1 %v3719_v61 }
 0x174   : > { %1756 = vmatprep.mubr.bf16.mxu0 %v3720_v62  ;;  %2142 = vmatprep.mubr.bf16.mxu1 %v3720_v62 }
 0x17b   : > { %1757 = vmatmul.mubr.bf16.gmra.mrb[60].mxu0 %v3722_v63  ;;  %2143 = vmatmul.mubr.bf16.gmra.mrb[60].mxu1 %v3722_v63 }
 0x1d6   : > { %v1608_v11 = vpop.f32.mrb[0].mxu0  ;;  %v1994_v12 = vpop.f32.mrb[0].mxu1 }
 0x1d7   : > { %v3148_v13 = vadd.f32 %v1608_v11, %v3980_v7  ;;  %v3212_v14 = vadd.f32 %v1994_v12, %v3982_v8  ;;  %v1610_v15 = vpop.f32.mrb[1].mxu0  ;;  %v1996_v16 = vpop.f32.mrb[1].mxu1 }
 0x1d8   : > { %v3149_v17 = vadd.f32 %v1610_v15, %v3984_v9  ;;  %v3213_v18 = vadd.f32 %v1996_v16, %v3986_v10  ;;  %v1612_v19 = vpop.f32.mrb[2].mxu0  ;;  %v1998_v20 = vpop.f32.mrb[2].mxu1 }
 0x1d9   : > { %v2153_v21 = vmax.f32 %v3148_v13, 0.0  ;;  %v2155_v22 = vmax.f32 %v3212_v14, 0.0  ;;  %v3150_v23 = vadd.f32 %v1612_v19, %v3980_v7  ;;  %v3214_v24 = vadd.f32 %v1998_v20, %v3982_v8  ;;  %v1614_v25 = vpop.f32.mrb[3].mxu0  ;;  %v2000_v26 = vpop.f32.mrb[3].mxu1 }
 0x1da   : > { %v2154_v27 = vmax.f32 %v3149_v17, 0.0  ;;  %v2156_v28 = vmax.f32 %v3213_v18, 0.0  ;;  %v3151_v29 = vadd.f32 %v1614_v25, %v3984_v9  ;;  %v3215_v30 = vadd.f32 %v2000_v26, %v3986_v10 }
 0x1db   : > { %v2157_v31 = vmax.f32 %v3150_v23, 0.0  ;;  %v2159_v32 = vmax.f32 %v3214_v24, 0.0 }
 0x1dc   : > { %v3084_v33 = vpack.c.bf16 %v2154_v27, %v2153_v21  ;;  %v3085_v34 = vpack.c.bf16 %v2156_v28, %v2155_v22  ;;  %v2158_v35 = vmax.f32 %v3151_v29, 0.0  ;;  %v2160_v36 = vmax.f32 %v3215_v30, 0.0 }
 0x1de   : > { %2665 = vst [vmem:[%s4001_s24] sm:$0xff] %v3084_v33  ;;  %2666 = vst [vmem:[%s4001_s24 + $0x8] sm:$0xff] %v3085_v34  ;;  %v3086_v37 = vpack.c.bf16 %v2158_v35, %v2157_v31  ;;  %v3087_v38 = vpack.c.bf16 %v2160_v36, %v2159_v32  ;;  %v1618_v39 = vpop.f32.mrb[4].mxu0  ;;  %v2004_v40 = vpop.f32.mrb[4].mxu1 }
 0x1df   : > { %v3152_v41 = vadd.f32 %v1618_v39, %v3980_v7  ;;  %v3216_v42 = vadd.f32 %v2004_v40, %v3982_v8  ;;  %v1620_v43 = vpop.f32.mrb[5].mxu0  ;;  %v2006_v44 = vpop.f32.mrb[5].mxu1 }
 0x1e0   : > { %2667 = vst [vmem:[%s4001_s24 + $0x10] sm:$0xff] %v3086_v37  ;;  %2668 = vst [vmem:[%s4001_s24 + $0x18] sm:$0xff] %v3087_v38  ;;  %v3153_v45 = vadd.f32 %v1620_v43, %v3984_v9  ;;  %v3217_v46 = vadd.f32 %v2006_v44, %v3986_v10  ;;  %v1622_v47 = vpop.f32.mrb[6].mxu0  ;;  %v2008_v48 = vpop.f32.mrb[6].mxu1 }
 0x1e1   : > { %v2161_v49 = vmax.f32 %v3152_v41, 0.0  ;;  %v2163_v50 = vmax.f32 %v3216_v42, 0.0  ;;  %v3154_v51 = vadd.f32 %v1622_v47, %v3980_v7  ;;  %v3218_v52 = vadd.f32 %v2008_v48, %v3982_v8  ;;  %v1624_v53 = vpop.f32.mrb[7].mxu0  ;;  %v2010_v54 = vpop.f32.mrb[7].mxu1 }
 0x1e2   : > { %v2162_v55 = vmax.f32 %v3153_v45, 0.0  ;;  %v2164_v56 = vmax.f32 %v3217_v46, 0.0  ;;  %v3155_v57 = vadd.f32 %v1624_v53, %v3984_v9  ;;  %v3219_v58 = vadd.f32 %v2010_v54, %v3986_v10 }
 0x1e3   : > { %v2165_v59 = vmax.f32 %v3154_v51, 0.0  ;;  %v2167_v60 = vmax.f32 %v3218_v52, 0.0 }
 0x1e4   : > { %v3088_v61 = vpack.c.bf16 %v2162_v55, %v2161_v49  ;;  %v3089_v62 = vpack.c.bf16 %v2164_v56, %v2163_v50  ;;  %v2166_v63 = vmax.f32 %v3155_v57, 0.0  ;;  %v2168_v0 = vmax.f32 %v3219_v58, 0.0 }
 0x1e6   : > { %2669 = vst [vmem:[%s4001_s24 + $0x20] sm:$0xff] %v3088_v61  ;;  %2670 = vst [vmem:[%s4001_s24 + $0x28] sm:$0xff] %v3089_v62  ;;  %v3090_v1 = vpack.c.bf16 %v2166_v63, %v2165_v59  ;;  %v3091_v2 = vpack.c.bf16 %v2168_v0, %v2167_v60  ;;  %v1628_v3 = vpop.f32.mrb[8].mxu0  ;;  %v2014_v4 = vpop.f32.mrb[8].mxu1 }
 0x1e7   : > { %v3156_v5 = vadd.f32 %v1628_v3, %v3980_v7  ;;  %v3220_v6 = vadd.f32 %v2014_v4, %v3982_v8  ;;  %v1630_v11 = vpop.f32.mrb[9].mxu0  ;;  %v2016_v12 = vpop.f32.mrb[9].mxu1 }
 0x1e8   : > { %2671 = vst [vmem:[%s4001_s24 + $0x30] sm:$0xff] %v3090_v1  ;;  %2672 = vst [vmem:[%s4001_s24 + $0x38] sm:$0xff] %v3091_v2  ;;  %v3157_v13 = vadd.f32 %v1630_v11, %v3984_v9  ;;  %v3221_v14 = vadd.f32 %v2016_v12, %v3986_v10  ;;  %v1632_v15 = vpop.f32.mrb[10].mxu0  ;;  %v2018_v16 = vpop.f32.mrb[10].mxu1 }
 0x1e9   : > { %v2169_v17 = vmax.f32 %v3156_v5, 0.0  ;;  %v2171_v18 = vmax.f32 %v3220_v6, 0.0  ;;  %v3158_v19 = vadd.f32 %v1632_v15, %v3980_v7  ;;  %v3222_v20 = vadd.f32 %v2018_v16, %v3982_v8  ;;  %v1634_v21 = vpop.f32.mrb[11].mxu0  ;;  %v2020_v22 = vpop.f32.mrb[11].mxu1 }
 0x1ea   : > { %v2170_v23 = vmax.f32 %v3157_v13, 0.0  ;;  %v2172_v24 = vmax.f32 %v3221_v14, 0.0  ;;  %v3159_v25 = vadd.f32 %v1634_v21, %v3984_v9  ;;  %v3223_v26 = vadd.f32 %v2020_v22, %v3986_v10 }
 0x1eb   : > { %v2173_v27 = vmax.f32 %v3158_v19, 0.0  ;;  %v2175_v28 = vmax.f32 %v3222_v20, 0.0 }
 0x1ec   : > { %v3092_v29 = vpack.c.bf16 %v2170_v23, %v2169_v17  ;;  %v3093_v30 = vpack.c.bf16 %v2172_v24, %v2171_v18  ;;  %v2174_v31 = vmax.f32 %v3159_v25, 0.0  ;;  %v2176_v32 = vmax.f32 %v3223_v26, 0.0 }
 0x1ee   : > { %2673 = vst [vmem:[%s4001_s24 + $0x40] sm:$0xff] %v3092_v29  ;;  %2674 = vst [vmem:[%s4001_s24 + $0x48] sm:$0xff] %v3093_v30  ;;  %v3094_v33 = vpack.c.bf16 %v2174_v31, %v2173_v27  ;;  %v3095_v34 = vpack.c.bf16 %v2176_v32, %v2175_v28  ;;  %v1638_v35 = vpop.f32.mrb[12].mxu0  ;;  %v2024_v36 = vpop.f32.mrb[12].mxu1 }
 0x1ef   : > { %v3160_v37 = vadd.f32 %v1638_v35, %v3980_v7  ;;  %v3224_v38 = vadd.f32 %v2024_v36, %v3982_v8  ;;  %v1640_v39 = vpop.f32.mrb[13].mxu0  ;;  %v2026_v40 = vpop.f32.mrb[13].mxu1 }
 0x1f0   : > { %2675 = vst [vmem:[%s4001_s24 + $0x50] sm:$0xff] %v3094_v33  ;;  %2676 = vst [vmem:[%s4001_s24 + $0x58] sm:$0xff] %v3095_v34  ;;  %v3161_v41 = vadd.f32 %v1640_v39, %v3984_v9  ;;  %v3225_v42 = vadd.f32 %v2026_v40, %v3986_v10  ;;  %v1642_v43 = vpop.f32.mrb[14].mxu0  ;;  %v2028_v44 = vpop.f32.mrb[14].mxu1 }
 0x1f1   : > { %v2177_v45 = vmax.f32 %v3160_v37, 0.0  ;;  %v2179_v46 = vmax.f32 %v3224_v38, 0.0  ;;  %v3162_v47 = vadd.f32 %v1642_v43, %v3980_v7  ;;  %v3226_v48 = vadd.f32 %v2028_v44, %v3982_v8  ;;  %v1644_v49 = vpop.f32.mrb[15].mxu0  ;;  %v2030_v50 = vpop.f32.mrb[15].mxu1 }
 0x1f2   : > { %v2178_v51 = vmax.f32 %v3161_v41, 0.0  ;;  %v2180_v52 = vmax.f32 %v3225_v42, 0.0  ;;  %v3163_v53 = vadd.f32 %v1644_v49, %v3984_v9  ;;  %v3227_v54 = vadd.f32 %v2030_v50, %v3986_v10 }
 0x1f3   : > { %v2181_v55 = vmax.f32 %v3162_v47, 0.0  ;;  %v2183_v56 = vmax.f32 %v3226_v48, 0.0 }
 0x1f4   : > { %v3096_v57 = vpack.c.bf16 %v2178_v51, %v2177_v45  ;;  %v3097_v58 = vpack.c.bf16 %v2180_v52, %v2179_v46  ;;  %v2182_v59 = vmax.f32 %v3163_v53, 0.0  ;;  %v2184_v60 = vmax.f32 %v3227_v54, 0.0 }
 0x1f6   : > { %2677 = vst [vmem:[%s4001_s24 + $0x60] sm:$0xff] %v3096_v57  ;;  %2678 = vst [vmem:[%s4001_s24 + $0x68] sm:$0xff] %v3097_v58  ;;  %v3098_v61 = vpack.c.bf16 %v2182_v59, %v2181_v55  ;;  %v3099_v62 = vpack.c.bf16 %v2184_v60, %v2183_v56  ;;  %v1648_v63 = vpop.f32.mrb[16].mxu0  ;;  %v2034_v0 = vpop.f32.mrb[16].mxu1 }
 0x1f7   : > { %v3164_v1 = vadd.f32 %v1648_v63, %v3980_v7  ;;  %v3228_v2 = vadd.f32 %v2034_v0, %v3982_v8  ;;  %v1650_v3 = vpop.f32.mrb[17].mxu0  ;;  %v2036_v4 = vpop.f32.mrb[17].mxu1 }
 0x1f8   : > { %2679 = vst [vmem:[%s4001_s24 + $0x70] sm:$0xff] %v3098_v61  ;;  %2680 = vst [vmem:[%s4001_s24 + $0x78] sm:$0xff] %v3099_v62  ;;  %v3165_v5 = vadd.f32 %v1650_v3, %v3984_v9  ;;  %v3229_v6 = vadd.f32 %v2036_v4, %v3986_v10  ;;  %v1652_v11 = vpop.f32.mrb[18].mxu0  ;;  %v2038_v12 = vpop.f32.mrb[18].mxu1 }
 0x1f9   : > { %v2185_v13 = vmax.f32 %v3164_v1, 0.0  ;;  %v2187_v14 = vmax.f32 %v3228_v2, 0.0  ;;  %v3166_v15 = vadd.f32 %v1652_v11, %v3980_v7  ;;  %v3230_v16 = vadd.f32 %v2038_v12, %v3982_v8  ;;  %v1654_v17 = vpop.f32.mrb[19].mxu0  ;;  %v2040_v18 = vpop.f32.mrb[19].mxu1 }
 0x1fa   : > { %v2186_v19 = vmax.f32 %v3165_v5, 0.0  ;;  %v2188_v20 = vmax.f32 %v3229_v6, 0.0  ;;  %v3167_v21 = vadd.f32 %v1654_v17, %v3984_v9  ;;  %v3231_v22 = vadd.f32 %v2040_v18, %v3986_v10 }
 0x1fb   : > { %v2189_v23 = vmax.f32 %v3166_v15, 0.0  ;;  %v2191_v24 = vmax.f32 %v3230_v16, 0.0 }
 0x1fc   : > { %v3100_v25 = vpack.c.bf16 %v2186_v19, %v2185_v13  ;;  %v3101_v26 = vpack.c.bf16 %v2188_v20, %v2187_v14  ;;  %v2190_v27 = vmax.f32 %v3167_v21, 0.0  ;;  %v2192_v28 = vmax.f32 %v3231_v22, 0.0 }
 0x1fe   : > { %2681 = vst [vmem:[%s4001_s24 + $0x80] sm:$0xff] %v3100_v25  ;;  %2682 = vst [vmem:[%s4001_s24 + $0x88] sm:$0xff] %v3101_v26  ;;  %v3102_v29 = vpack.c.bf16 %v2190_v27, %v2189_v23  ;;  %v3103_v30 = vpack.c.bf16 %v2192_v28, %v2191_v24  ;;  %v1658_v31 = vpop.f32.mrb[20].mxu0  ;;  %v2044_v32 = vpop.f32.mrb[20].mxu1 }
 0x1ff   : > { %v3168_v33 = vadd.f32 %v1658_v31, %v3980_v7  ;;  %v3232_v34 = vadd.f32 %v2044_v32, %v3982_v8  ;;  %v1660_v35 = vpop.f32.mrb[21].mxu0  ;;  %v2046_v36 = vpop.f32.mrb[21].mxu1 }
 0x200   : > { %2683 = vst [vmem:[%s4001_s24 + $0x90] sm:$0xff] %v3102_v29  ;;  %2684 = vst [vmem:[%s4001_s24 + $0x98] sm:$0xff] %v3103_v30  ;;  %v3169_v37 = vadd.f32 %v1660_v35, %v3984_v9  ;;  %v3233_v38 = vadd.f32 %v2046_v36, %v3986_v10  ;;  %v1662_v39 = vpop.f32.mrb[22].mxu0  ;;  %v2048_v40 = vpop.f32.mrb[22].mxu1 }
 0x201   : > { %v2193_v41 = vmax.f32 %v3168_v33, 0.0  ;;  %v2195_v42 = vmax.f32 %v3232_v34, 0.0  ;;  %v3170_v43 = vadd.f32 %v1662_v39, %v3980_v7  ;;  %v3234_v44 = vadd.f32 %v2048_v40, %v3982_v8  ;;  %v1664_v45 = vpop.f32.mrb[23].mxu0  ;;  %v2050_v46 = vpop.f32.mrb[23].mxu1 }
 0x202   : > { %v2194_v47 = vmax.f32 %v3169_v37, 0.0  ;;  %v2196_v48 = vmax.f32 %v3233_v38, 0.0  ;;  %v3171_v49 = vadd.f32 %v1664_v45, %v3984_v9  ;;  %v3235_v50 = vadd.f32 %v2050_v46, %v3986_v10 }
 0x203   : > { %v2197_v51 = vmax.f32 %v3170_v43, 0.0  ;;  %v2199_v52 = vmax.f32 %v3234_v44, 0.0 }
 0x204   : > { %v3104_v53 = vpack.c.bf16 %v2194_v47, %v2193_v41  ;;  %v3105_v54 = vpack.c.bf16 %v2196_v48, %v2195_v42  ;;  %v2198_v55 = vmax.f32 %v3171_v49, 0.0  ;;  %v2200_v56 = vmax.f32 %v3235_v50, 0.0 }
 0x206   : > { %2685 = vst [vmem:[%s4001_s24 + $0xa0] sm:$0xff] %v3104_v53  ;;  %2686 = vst [vmem:[%s4001_s24 + $0xa8] sm:$0xff] %v3105_v54  ;;  %v3106_v57 = vpack.c.bf16 %v2198_v55, %v2197_v51  ;;  %v3107_v58 = vpack.c.bf16 %v2200_v56, %v2199_v52  ;;  %v1668_v59 = vpop.f32.mrb[24].mxu0  ;;  %v2054_v60 = vpop.f32.mrb[24].mxu1 }
 0x207   : > { %v3172_v61 = vadd.f32 %v1668_v59, %v3980_v7  ;;  %v3236_v62 = vadd.f32 %v2054_v60, %v3982_v8  ;;  %v1670_v63 = vpop.f32.mrb[25].mxu0  ;;  %v2056_v0 = vpop.f32.mrb[25].mxu1 }
 0x208   : > { %2687 = vst [vmem:[%s4001_s24 + $0xb0] sm:$0xff] %v3106_v57  ;;  %2688 = vst [vmem:[%s4001_s24 + $0xb8] sm:$0xff] %v3107_v58  ;;  %v3173_v1 = vadd.f32 %v1670_v63, %v3984_v9  ;;  %v3237_v2 = vadd.f32 %v2056_v0, %v3986_v10  ;;  %v1672_v3 = vpop.f32.mrb[26].mxu0  ;;  %v2058_v4 = vpop.f32.mrb[26].mxu1 }
 0x209   : > { %v2201_v5 = vmax.f32 %v3172_v61, 0.0  ;;  %v2203_v6 = vmax.f32 %v3236_v62, 0.0  ;;  %v3174_v11 = vadd.f32 %v1672_v3, %v3980_v7  ;;  %v3238_v12 = vadd.f32 %v2058_v4, %v3982_v8  ;;  %v1674_v13 = vpop.f32.mrb[27].mxu0  ;;  %v2060_v14 = vpop.f32.mrb[27].mxu1 }
 0x20a   : > { %v2202_v15 = vmax.f32 %v3173_v1, 0.0  ;;  %v2204_v16 = vmax.f32 %v3237_v2, 0.0  ;;  %v3175_v17 = vadd.f32 %v1674_v13, %v3984_v9  ;;  %v3239_v18 = vadd.f32 %v2060_v14, %v3986_v10 }
 0x20b   : > { %v2205_v19 = vmax.f32 %v3174_v11, 0.0  ;;  %v2207_v20 = vmax.f32 %v3238_v12, 0.0 }
 0x20c   : > { %v3108_v21 = vpack.c.bf16 %v2202_v15, %v2201_v5  ;;  %v3109_v22 = vpack.c.bf16 %v2204_v16, %v2203_v6  ;;  %v2206_v23 = vmax.f32 %v3175_v17, 0.0  ;;  %v2208_v24 = vmax.f32 %v3239_v18, 0.0 }
 0x20e   : > { %2689 = vst [vmem:[%s4001_s24 + $0xc0] sm:$0xff] %v3108_v21  ;;  %2690 = vst [vmem:[%s4001_s24 + $0xc8] sm:$0xff] %v3109_v22  ;;  %v3110_v25 = vpack.c.bf16 %v2206_v23, %v2205_v19  ;;  %v3111_v26 = vpack.c.bf16 %v2208_v24, %v2207_v20  ;;  %v1678_v27 = vpop.f32.mrb[28].mxu0  ;;  %v2064_v28 = vpop.f32.mrb[28].mxu1 }
 0x20f   : > { %v3176_v29 = vadd.f32 %v1678_v27, %v3980_v7  ;;  %v3240_v30 = vadd.f32 %v2064_v28, %v3982_v8  ;;  %v1680_v31 = vpop.f32.mrb[29].mxu0  ;;  %v2066_v32 = vpop.f32.mrb[29].mxu1 }
 0x210   : > { %2691 = vst [vmem:[%s4001_s24 + $0xd0] sm:$0xff] %v3110_v25  ;;  %2692 = vst [vmem:[%s4001_s24 + $0xd8] sm:$0xff] %v3111_v26  ;;  %v3177_v33 = vadd.f32 %v1680_v31, %v3984_v9  ;;  %v3241_v34 = vadd.f32 %v2066_v32, %v3986_v10  ;;  %v1682_v35 = vpop.f32.mrb[30].mxu0  ;;  %v2068_v36 = vpop.f32.mrb[30].mxu1 }
 0x211   : > { %v2209_v37 = vmax.f32 %v3176_v29, 0.0  ;;  %v2211_v38 = vmax.f32 %v3240_v30, 0.0  ;;  %v3178_v39 = vadd.f32 %v1682_v35, %v3980_v7  ;;  %v3242_v40 = vadd.f32 %v2068_v36, %v3982_v8  ;;  %v1684_v41 = vpop.f32.mrb[31].mxu0  ;;  %v2070_v42 = vpop.f32.mrb[31].mxu1 }
 0x212   : > { %v2210_v43 = vmax.f32 %v3177_v33, 0.0  ;;  %v2212_v44 = vmax.f32 %v3241_v34, 0.0  ;;  %v3179_v45 = vadd.f32 %v1684_v41, %v3984_v9  ;;  %v3243_v46 = vadd.f32 %v2070_v42, %v3986_v10 }
 0x213   : > { %v2213_v47 = vmax.f32 %v3178_v39, 0.0  ;;  %v2215_v48 = vmax.f32 %v3242_v40, 0.0 }
 0x214   : > { %v3112_v49 = vpack.c.bf16 %v2210_v43, %v2209_v37  ;;  %v3113_v50 = vpack.c.bf16 %v2212_v44, %v2211_v38  ;;  %v2214_v51 = vmax.f32 %v3179_v45, 0.0  ;;  %v2216_v52 = vmax.f32 %v3243_v46, 0.0 }
 0x216   : > { %2693 = vst [vmem:[%s4001_s24 + $0xe0] sm:$0xff] %v3112_v49  ;;  %2694 = vst [vmem:[%s4001_s24 + $0xe8] sm:$0xff] %v3113_v50  ;;  %v3114_v53 = vpack.c.bf16 %v2214_v51, %v2213_v47  ;;  %v3115_v54 = vpack.c.bf16 %v2216_v52, %v2215_v48  ;;  %v1688_v55 = vpop.f32.mrb[32].mxu0  ;;  %v2074_v56 = vpop.f32.mrb[32].mxu1 }
 0x217   : > { %v3180_v57 = vadd.f32 %v1688_v55, %v3980_v7  ;;  %v3244_v58 = vadd.f32 %v2074_v56, %v3982_v8  ;;  %v1690_v59 = vpop.f32.mrb[33].mxu0  ;;  %v2076_v60 = vpop.f32.mrb[33].mxu1 }
 0x218   : > { %2695 = vst [vmem:[%s4001_s24 + $0xf0] sm:$0xff] %v3114_v53  ;;  %2696 = vst [vmem:[%s4001_s24 + $0xf8] sm:$0xff] %v3115_v54  ;;  %v3181_v61 = vadd.f32 %v1690_v59, %v3984_v9  ;;  %v3245_v62 = vadd.f32 %v2076_v60, %v3986_v10  ;;  %v1692_v63 = vpop.f32.mrb[34].mxu0  ;;  %v2078_v0 = vpop.f32.mrb[34].mxu1 }
 0x219   : > { %v2217_v1 = vmax.f32 %v3180_v57, 0.0  ;;  %v2219_v2 = vmax.f32 %v3244_v58, 0.0  ;;  %v3182_v3 = vadd.f32 %v1692_v63, %v3980_v7  ;;  %v3246_v4 = vadd.f32 %v2078_v0, %v3982_v8  ;;  %v1694_v5 = vpop.f32.mrb[35].mxu0  ;;  %v2080_v6 = vpop.f32.mrb[35].mxu1 }
 0x21a   : > { %v2218_v11 = vmax.f32 %v3181_v61, 0.0  ;;  %v2220_v12 = vmax.f32 %v3245_v62, 0.0  ;;  %v3183_v13 = vadd.f32 %v1694_v5, %v3984_v9  ;;  %v3247_v14 = vadd.f32 %v2080_v6, %v3986_v10 }
 0x21b   : > { %v2221_v15 = vmax.f32 %v3182_v3, 0.0  ;;  %v2223_v16 = vmax.f32 %v3246_v4, 0.0 }
 0x21c   : > { %v3116_v17 = vpack.c.bf16 %v2218_v11, %v2217_v1  ;;  %v3117_v18 = vpack.c.bf16 %v2220_v12, %v2219_v2  ;;  %v2222_v19 = vmax.f32 %v3183_v13, 0.0  ;;  %v2224_v20 = vmax.f32 %v3247_v14, 0.0 }
 0x21e   : > { %2697 = vst [vmem:[%s4001_s24 + $0x100] sm:$0xff] %v3116_v17  ;;  %2698 = vst [vmem:[%s4001_s24 + $0x108] sm:$0xff] %v3117_v18  ;;  %v3118_v21 = vpack.c.bf16 %v2222_v19, %v2221_v15  ;;  %v3119_v22 = vpack.c.bf16 %v2224_v20, %v2223_v16  ;;  %v1698_v23 = vpop.f32.mrb[36].mxu0  ;;  %v2084_v24 = vpop.f32.mrb[36].mxu1 }
 0x21f   : > { %v3184_v25 = vadd.f32 %v1698_v23, %v3980_v7  ;;  %v3248_v26 = vadd.f32 %v2084_v24, %v3982_v8  ;;  %v1700_v27 = vpop.f32.mrb[37].mxu0  ;;  %v2086_v28 = vpop.f32.mrb[37].mxu1 }
 0x220   : > { %2699 = vst [vmem:[%s4001_s24 + $0x110] sm:$0xff] %v3118_v21  ;;  %2700 = vst [vmem:[%s4001_s24 + $0x118] sm:$0xff] %v3119_v22  ;;  %v3185_v29 = vadd.f32 %v1700_v27, %v3984_v9  ;;  %v3249_v30 = vadd.f32 %v2086_v28, %v3986_v10  ;;  %v1702_v31 = vpop.f32.mrb[38].mxu0  ;;  %v2088_v32 = vpop.f32.mrb[38].mxu1 }
 0x221   : > { %v2225_v33 = vmax.f32 %v3184_v25, 0.0  ;;  %v2227_v34 = vmax.f32 %v3248_v26, 0.0  ;;  %v3186_v35 = vadd.f32 %v1702_v31, %v3980_v7  ;;  %v3250_v36 = vadd.f32 %v2088_v32, %v3982_v8  ;;  %v1704_v37 = vpop.f32.mrb[39].mxu0  ;;  %v2090_v38 = vpop.f32.mrb[39].mxu1 }
 0x222   : > { %v2226_v39 = vmax.f32 %v3185_v29, 0.0  ;;  %v2228_v40 = vmax.f32 %v3249_v30, 0.0  ;;  %v3187_v41 = vadd.f32 %v1704_v37, %v3984_v9  ;;  %v3251_v42 = vadd.f32 %v2090_v38, %v3986_v10 }
 0x223   : > { %v2229_v43 = vmax.f32 %v3186_v35, 0.0  ;;  %v2231_v44 = vmax.f32 %v3250_v36, 0.0 }
 0x224   : > { %v3120_v45 = vpack.c.bf16 %v2226_v39, %v2225_v33  ;;  %v3121_v46 = vpack.c.bf16 %v2228_v40, %v2227_v34  ;;  %v2230_v47 = vmax.f32 %v3187_v41, 0.0  ;;  %v2232_v48 = vmax.f32 %v3251_v42, 0.0 }
 0x226   : > { %2701 = vst [vmem:[%s4001_s24 + $0x120] sm:$0xff] %v3120_v45  ;;  %2702 = vst [vmem:[%s4001_s24 + $0x128] sm:$0xff] %v3121_v46  ;;  %v3122_v49 = vpack.c.bf16 %v2230_v47, %v2229_v43  ;;  %v3123_v50 = vpack.c.bf16 %v2232_v48, %v2231_v44  ;;  %v1708_v51 = vpop.f32.mrb[40].mxu0  ;;  %v2094_v52 = vpop.f32.mrb[40].mxu1 }
 0x227   : > { %v3188_v53 = vadd.f32 %v1708_v51, %v3980_v7  ;;  %v3252_v54 = vadd.f32 %v2094_v52, %v3982_v8  ;;  %v1710_v55 = vpop.f32.mrb[41].mxu0  ;;  %v2096_v56 = vpop.f32.mrb[41].mxu1 }
 0x228   : > { %2703 = vst [vmem:[%s4001_s24 + $0x130] sm:$0xff] %v3122_v49  ;;  %2704 = vst [vmem:[%s4001_s24 + $0x138] sm:$0xff] %v3123_v50  ;;  %v3189_v57 = vadd.f32 %v1710_v55, %v3984_v9  ;;  %v3253_v58 = vadd.f32 %v2096_v56, %v3986_v10  ;;  %v1712_v59 = vpop.f32.mrb[42].mxu0  ;;  %v2098_v60 = vpop.f32.mrb[42].mxu1 }
 0x229   : > { %v2233_v61 = vmax.f32 %v3188_v53, 0.0  ;;  %v2235_v62 = vmax.f32 %v3252_v54, 0.0  ;;  %v3190_v63 = vadd.f32 %v1712_v59, %v3980_v7  ;;  %v3254_v0 = vadd.f32 %v2098_v60, %v3982_v8  ;;  %v1714_v1 = vpop.f32.mrb[43].mxu0  ;;  %v2100_v2 = vpop.f32.mrb[43].mxu1 }
 0x22a   : > { %v2234_v3 = vmax.f32 %v3189_v57, 0.0  ;;  %v2236_v4 = vmax.f32 %v3253_v58, 0.0  ;;  %v3191_v5 = vadd.f32 %v1714_v1, %v3984_v9  ;;  %v3255_v6 = vadd.f32 %v2100_v2, %v3986_v10 }
 0x22b   : > { %v2237_v11 = vmax.f32 %v3190_v63, 0.0  ;;  %v2239_v12 = vmax.f32 %v3254_v0, 0.0 }
 0x22c   : > { %v3124_v13 = vpack.c.bf16 %v2234_v3, %v2233_v61  ;;  %v3125_v14 = vpack.c.bf16 %v2236_v4, %v2235_v62  ;;  %v2238_v15 = vmax.f32 %v3191_v5, 0.0  ;;  %v2240_v16 = vmax.f32 %v3255_v6, 0.0 }
 0x22e   : > { %2705 = vst [vmem:[%s4001_s24 + $0x140] sm:$0xff] %v3124_v13  ;;  %2706 = vst [vmem:[%s4001_s24 + $0x148] sm:$0xff] %v3125_v14  ;;  %v3126_v17 = vpack.c.bf16 %v2238_v15, %v2237_v11  ;;  %v3127_v18 = vpack.c.bf16 %v2240_v16, %v2239_v12  ;;  %v1718_v19 = vpop.f32.mrb[44].mxu0  ;;  %v2104_v20 = vpop.f32.mrb[44].mxu1 }
 0x22f   : > { %v3192_v21 = vadd.f32 %v1718_v19, %v3980_v7  ;;  %v3256_v22 = vadd.f32 %v2104_v20, %v3982_v8  ;;  %v1720_v23 = vpop.f32.mrb[45].mxu0  ;;  %v2106_v24 = vpop.f32.mrb[45].mxu1 }
 0x230   : > { %2707 = vst [vmem:[%s4001_s24 + $0x150] sm:$0xff] %v3126_v17  ;;  %2708 = vst [vmem:[%s4001_s24 + $0x158] sm:$0xff] %v3127_v18  ;;  %v3193_v25 = vadd.f32 %v1720_v23, %v3984_v9  ;;  %v3257_v26 = vadd.f32 %v2106_v24, %v3986_v10  ;;  %v1722_v27 = vpop.f32.mrb[46].mxu0  ;;  %v2108_v28 = vpop.f32.mrb[46].mxu1 }
 0x231   : > { %v2241_v29 = vmax.f32 %v3192_v21, 0.0  ;;  %v2243_v30 = vmax.f32 %v3256_v22, 0.0  ;;  %v3194_v31 = vadd.f32 %v1722_v27, %v3980_v7  ;;  %v3258_v32 = vadd.f32 %v2108_v28, %v3982_v8  ;;  %v1724_v33 = vpop.f32.mrb[47].mxu0  ;;  %v2110_v34 = vpop.f32.mrb[47].mxu1 }
 0x232   : > { %v2242_v35 = vmax.f32 %v3193_v25, 0.0  ;;  %v2244_v36 = vmax.f32 %v3257_v26, 0.0  ;;  %v3195_v37 = vadd.f32 %v1724_v33, %v3984_v9  ;;  %v3259_v38 = vadd.f32 %v2110_v34, %v3986_v10 }
 0x233   : > { %v2245_v39 = vmax.f32 %v3194_v31, 0.0  ;;  %v2247_v40 = vmax.f32 %v3258_v32, 0.0 }
 0x234   : > { %v3128_v41 = vpack.c.bf16 %v2242_v35, %v2241_v29  ;;  %v3129_v42 = vpack.c.bf16 %v2244_v36, %v2243_v30  ;;  %v2246_v43 = vmax.f32 %v3195_v37, 0.0  ;;  %v2248_v44 = vmax.f32 %v3259_v38, 0.0 }
 0x236   : > { %2709 = vst [vmem:[%s4001_s24 + $0x160] sm:$0xff] %v3128_v41  ;;  %2710 = vst [vmem:[%s4001_s24 + $0x168] sm:$0xff] %v3129_v42  ;;  %v3130_v45 = vpack.c.bf16 %v2246_v43, %v2245_v39  ;;  %v3131_v46 = vpack.c.bf16 %v2248_v44, %v2247_v40  ;;  %v1728_v47 = vpop.f32.mrb[48].mxu0  ;;  %v2114_v48 = vpop.f32.mrb[48].mxu1 }
 0x237   : > { %v3196_v49 = vadd.f32 %v1728_v47, %v3980_v7  ;;  %v3260_v50 = vadd.f32 %v2114_v48, %v3982_v8  ;;  %v1730_v51 = vpop.f32.mrb[49].mxu0  ;;  %v2116_v52 = vpop.f32.mrb[49].mxu1 }
 0x238   : > { %2711 = vst [vmem:[%s4001_s24 + $0x170] sm:$0xff] %v3130_v45  ;;  %2712 = vst [vmem:[%s4001_s24 + $0x178] sm:$0xff] %v3131_v46  ;;  %v3197_v53 = vadd.f32 %v1730_v51, %v3984_v9  ;;  %v3261_v54 = vadd.f32 %v2116_v52, %v3986_v10  ;;  %v1732_v55 = vpop.f32.mrb[50].mxu0  ;;  %v2118_v56 = vpop.f32.mrb[50].mxu1 }
 0x239   : > { %v2249_v57 = vmax.f32 %v3196_v49, 0.0  ;;  %v2251_v58 = vmax.f32 %v3260_v50, 0.0  ;;  %v3198_v59 = vadd.f32 %v1732_v55, %v3980_v7  ;;  %v3262_v60 = vadd.f32 %v2118_v56, %v3982_v8  ;;  %v1734_v61 = vpop.f32.mrb[51].mxu0  ;;  %v2120_v62 = vpop.f32.mrb[51].mxu1 }
 0x23a   : > { %v2250_v63 = vmax.f32 %v3197_v53, 0.0  ;;  %v2252_v0 = vmax.f32 %v3261_v54, 0.0  ;;  %v3199_v1 = vadd.f32 %v1734_v61, %v3984_v9  ;;  %v3263_v2 = vadd.f32 %v2120_v62, %v3986_v10 }
 0x23b   : > { %v2253_v3 = vmax.f32 %v3198_v59, 0.0  ;;  %v2255_v4 = vmax.f32 %v3262_v60, 0.0 }
 0x23c   : > { %v3132_v5 = vpack.c.bf16 %v2250_v63, %v2249_v57  ;;  %v3133_v6 = vpack.c.bf16 %v2252_v0, %v2251_v58  ;;  %v2254_v11 = vmax.f32 %v3199_v1, 0.0  ;;  %v2256_v12 = vmax.f32 %v3263_v2, 0.0 }
 0x23e   : > { %2713 = vst [vmem:[%s4001_s24 + $0x180] sm:$0xff] %v3132_v5  ;;  %2714 = vst [vmem:[%s4001_s24 + $0x188] sm:$0xff] %v3133_v6  ;;  %v3134_v13 = vpack.c.bf16 %v2254_v11, %v2253_v3  ;;  %v3135_v14 = vpack.c.bf16 %v2256_v12, %v2255_v4  ;;  %v1738_v15 = vpop.f32.mrb[52].mxu0  ;;  %v2124_v16 = vpop.f32.mrb[52].mxu1 }
 0x23f   : > { %v3200_v17 = vadd.f32 %v1738_v15, %v3980_v7  ;;  %v3264_v18 = vadd.f32 %v2124_v16, %v3982_v8  ;;  %v1740_v19 = vpop.f32.mrb[53].mxu0  ;;  %v2126_v20 = vpop.f32.mrb[53].mxu1 }
 0x240   : > { %2715 = vst [vmem:[%s4001_s24 + $0x190] sm:$0xff] %v3134_v13  ;;  %2716 = vst [vmem:[%s4001_s24 + $0x198] sm:$0xff] %v3135_v14  ;;  %v3201_v21 = vadd.f32 %v1740_v19, %v3984_v9  ;;  %v3265_v22 = vadd.f32 %v2126_v20, %v3986_v10  ;;  %v1742_v23 = vpop.f32.mrb[54].mxu0  ;;  %v2128_v24 = vpop.f32.mrb[54].mxu1 }
 0x241   : > { %v2257_v25 = vmax.f32 %v3200_v17, 0.0  ;;  %v2259_v26 = vmax.f32 %v3264_v18, 0.0  ;;  %v3202_v27 = vadd.f32 %v1742_v23, %v3980_v7  ;;  %v3266_v28 = vadd.f32 %v2128_v24, %v3982_v8  ;;  %v1744_v29 = vpop.f32.mrb[55].mxu0  ;;  %v2130_v30 = vpop.f32.mrb[55].mxu1 }
 0x242   : > { %v2258_v31 = vmax.f32 %v3201_v21, 0.0  ;;  %v2260_v32 = vmax.f32 %v3265_v22, 0.0  ;;  %v3203_v33 = vadd.f32 %v1744_v29, %v3984_v9  ;;  %v3267_v34 = vadd.f32 %v2130_v30, %v3986_v10 }
 0x243   : > { %v2261_v35 = vmax.f32 %v3202_v27, 0.0  ;;  %v2263_v36 = vmax.f32 %v3266_v28, 0.0 }
 0x244   : > { %v3136_v37 = vpack.c.bf16 %v2258_v31, %v2257_v25  ;;  %v3137_v38 = vpack.c.bf16 %v2260_v32, %v2259_v26  ;;  %v2262_v39 = vmax.f32 %v3203_v33, 0.0  ;;  %v2264_v40 = vmax.f32 %v3267_v34, 0.0 }
 0x246   : > { %2717 = vst [vmem:[%s4001_s24 + $0x1a0] sm:$0xff] %v3136_v37  ;;  %2718 = vst [vmem:[%s4001_s24 + $0x1a8] sm:$0xff] %v3137_v38  ;;  %v3138_v41 = vpack.c.bf16 %v2262_v39, %v2261_v35  ;;  %v3139_v42 = vpack.c.bf16 %v2264_v40, %v2263_v36  ;;  %v1748_v43 = vpop.f32.mrb[56].mxu0  ;;  %v2134_v44 = vpop.f32.mrb[56].mxu1 }
 0x247   : > { %v3204_v45 = vadd.f32 %v1748_v43, %v3980_v7  ;;  %v3268_v46 = vadd.f32 %v2134_v44, %v3982_v8  ;;  %v1750_v47 = vpop.f32.mrb[57].mxu0  ;;  %v2136_v48 = vpop.f32.mrb[57].mxu1 }
 0x248   : > { %2719 = vst [vmem:[%s4001_s24 + $0x1b0] sm:$0xff] %v3138_v41  ;;  %2720 = vst [vmem:[%s4001_s24 + $0x1b8] sm:$0xff] %v3139_v42  ;;  %v3205_v49 = vadd.f32 %v1750_v47, %v3984_v9  ;;  %v3269_v50 = vadd.f32 %v2136_v48, %v3986_v10  ;;  %v1752_v51 = vpop.f32.mrb[58].mxu0  ;;  %v2138_v52 = vpop.f32.mrb[58].mxu1 }
 0x249   : > { %v2265_v53 = vmax.f32 %v3204_v45, 0.0  ;;  %v2267_v54 = vmax.f32 %v3268_v46, 0.0  ;;  %v3206_v55 = vadd.f32 %v1752_v51, %v3980_v7  ;;  %v3270_v56 = vadd.f32 %v2138_v52, %v3982_v8  ;;  %v1754_v57 = vpop.f32.mrb[59].mxu0  ;;  %v2140_v58 = vpop.f32.mrb[59].mxu1 }
 0x24a   : > { %v2266_v59 = vmax.f32 %v3205_v49, 0.0  ;;  %v2268_v60 = vmax.f32 %v3269_v50, 0.0  ;;  %v3207_v61 = vadd.f32 %v1754_v57, %v3984_v9  ;;  %v3271_v62 = vadd.f32 %v2140_v58, %v3986_v10 }
 0x24b   : > { %v2269_v63 = vmax.f32 %v3206_v55, 0.0  ;;  %v2271_v0 = vmax.f32 %v3270_v56, 0.0 }
 0x24c   : > { %v3140_v1 = vpack.c.bf16 %v2266_v59, %v2265_v53  ;;  %v3141_v2 = vpack.c.bf16 %v2268_v60, %v2267_v54  ;;  %v2270_v3 = vmax.f32 %v3207_v61, 0.0  ;;  %v2272_v4 = vmax.f32 %v3271_v62, 0.0 }
 0x24e   : > { %2721 = vst [vmem:[%s4001_s24 + $0x1c0] sm:$0xff] %v3140_v1  ;;  %2722 = vst [vmem:[%s4001_s24 + $0x1c8] sm:$0xff] %v3141_v2  ;;  %v3142_v5 = vpack.c.bf16 %v2270_v3, %v2269_v63  ;;  %v3143_v6 = vpack.c.bf16 %v2272_v4, %v2271_v0  ;;  %v1758_v11 = vpop.f32.mrb[60].mxu0  ;;  %v2144_v12 = vpop.f32.mrb[60].mxu1 }
 0x24f   : > { %v3208_v13 = vadd.f32 %v1758_v11, %v3980_v7  ;;  %v3272_v14 = vadd.f32 %v2144_v12, %v3982_v8  ;;  %v1760_v15 = vpop.f32.mrb[61].mxu0  ;;  %v2146_v16 = vpop.f32.mrb[61].mxu1 }
 0x250   : > { %2723 = vst [vmem:[%s4001_s24 + $0x1d0] sm:$0xff] %v3142_v5  ;;  %2724 = vst [vmem:[%s4001_s24 + $0x1d8] sm:$0xff] %v3143_v6  ;;  %v3209_v17 = vadd.f32 %v1760_v15, %v3984_v9  ;;  %v3273_v18 = vadd.f32 %v2146_v16, %v3986_v10  ;;  %v1762_v19 = vpop.f32.mrb[62].mxu0  ;;  %v2148_v20 = vpop.f32.mrb[62].mxu1 }
 0x251   : > { %v2273_v21 = vmax.f32 %v3208_v13, 0.0  ;;  %v2275_v22 = vmax.f32 %v3272_v14, 0.0  ;;  %v3210_v23 = vadd.f32 %v1762_v19, %v3980_v7  ;;  %v3274_v24 = vadd.f32 %v2148_v20, %v3982_v8  ;;  %v1764_v25 = vpop.f32.mrb[63].mxu0  ;;  %v2150_v26 = vpop.f32.mrb[63].mxu1 }
 0x252   : > { %v2274_v27 = vmax.f32 %v3209_v17, 0.0  ;;  %v2276_v28 = vmax.f32 %v3273_v18, 0.0  ;;  %v3211_v29 = vadd.f32 %v1764_v25, %v3984_v9  ;;  %v3275_v30 = vadd.f32 %v2150_v26, %v3986_v10 }
 0x253   : > { %v2277_v31 = vmax.f32 %v3210_v23, 0.0  ;;  %v2279_v32 = vmax.f32 %v3274_v24, 0.0 }
 0x254   : > { %v3144_v33 = vpack.c.bf16 %v2274_v27, %v2273_v21  ;;  %v3145_v34 = vpack.c.bf16 %v2276_v28, %v2275_v22  ;;  %v2278_v35 = vmax.f32 %v3211_v29, 0.0  ;;  %v2280_v36 = vmax.f32 %v3275_v30, 0.0 }
 0x256   : > { %2725 = vst [vmem:[%s4001_s24 + $0x1e0] sm:$0xff] %v3144_v33  ;;  %2726 = vst [vmem:[%s4001_s24 + $0x1e8] sm:$0xff] %v3145_v34  ;;  %v3146_v7 = vpack.c.bf16 %v2278_v35, %v2277_v31  ;;  %v3147_v8 = vpack.c.bf16 %v2280_v36, %v2279_v32 }
 0x258   : > { %2727 = vst [vmem:[%s4001_s24 + $0x1f0] sm:$0xff] %v3146_v7  ;;  %2728 = vst [vmem:[%s4001_s24 + $0x1f8] sm:$0xff] %v3147_v8 }
 0x259 PF: > { %s15_s12 = sadd.s32 1, %s3793_s12  }
 0x25a   : > { %p12_p7 = scmp.ge.s32.totalorder %s15_s12, 4  }
 0x25c   :  { %14 = sbr.rel (!%p12_p7) target bundleno = 2 (0x2), region = 71 }
 0x263   :  { %2753 = vsyncpa [#allocation3], 1 }
 0x264   :  { %2755 = vsyncpa [#allocation3 + $0x1], 1 }
 0x265   :  { %2756 = vsyncpa [#allocation5], 1 }

// kernel: centernet_forward.7
= control target key start
LH: loop header
LB: loop body
LE: loop exit
PB: predicated region body
PF: predicated region fallthrough
CT: control target
= control target key end

     0   :  { %s12665_s18 = smov 0   ;;  %s15178_s0 = inlined_call_operand.vmem [shape: bf16[2048,1152], index: 0, kind: input, shape index: {}]   ;;  %s15179_s1 = inlined_call_operand.vmem [shape: bf16[1152,192], index: 1, kind: input, shape index: {}]   ;;  %s15180_s2 = inlined_call_operand.vmem [shape: f32[1,192], index: 2, kind: input, shape index: {}]   ;;  %s15181_s3 = inlined_call_operand.vmem [shape: bf16[192,128], index: 3, kind: input, shape index: {}]   ;;  %s15182_s4 = inlined_call_operand.vmem [shape: f32[1,128], index: 4, kind: input, shape index: {}]   ;;  %s15183_s5 = inlined_call_operand.vmem [shape: f32[2048,128], index: 5, kind: output, shape index: {}]  }
   0x1 LB: > { %s9466_s19 = sadd.s32 4294967295, %s12632_s18   ;;  %p9470_p0 = scmp.ge.s32.totalorder %s12632_s18, 1  ;;  %s12632_s18 = sphi %s12665_s18, %s15_s18  }
   0x2   : > { %p189_p1 = scmp.lt.s32.totalorder %s12632_s18, 3 }
   0x4   : > { %p190_p2 = pnand %p9470_p0, %p189_p1 }
   0x6   : > { %193 = sbr.rel (%p190_p2) target bundleno = 2046 (0x7fe), region = 40 }
   0xd   : > { %v11564_v0 = vld [vmem:[%s15179_s1 + $0x4] ss:$8 sps:$4 sm:$0xff]   ;;  %v11568_v2 = vld [vmem:[%s15179_s1] ss:$8 sps:$4 sm:$0xff]   ;;  %v11570_v4 = vld [vmem:[%s15179_s1 + $0x14] ss:$8 sps:$4 sm:$0xff]  }
   0xe   : > { %v11566_v1 = vld [vmem:[%s15179_s1 + $0x204] ss:$8 sps:$4 sm:$0xff]   ;;  %4692 = vmatprep.subr.bf16.mxu1 %v11564_v0  ;;  %v11569_v3 = vld [vmem:[%s15179_s1 + $0x200] ss:$8 sps:$4 sm:$0xff]   ;;  %v11572_v5 = vld [vmem:[%s15179_s1 + $0x214] ss:$8 sps:$4 sm:$0xff]  }
   0xf   : > { %6038 = vmatprep.subr.bf16.mxu0 %v11566_v1  ;;  %4693 = vmatpush1.bf16.msra.mxu1 %v11568_v2  ;;  %v11574_v6 = vld [vmem:[%s15179_s1 + $0x10] ss:$8 sps:$4 sm:$0xff]   ;;  %v11576_v8 = vld [vmem:[%s15179_s1 + $0x24] ss:$8 sps:$4 sm:$0xff]   ;;  %v11580_v10 = vld [vmem:[%s15179_s1 + $0x20] ss:$8 sps:$4 sm:$0xff]  }
  0x10   : > { %6039 = vmatpush1.bf16.msra.mxu0 %v11569_v3  ;;  %4694 = vmatprep.subr.bf16.mxu1 %v11570_v4  ;;  %v11575_v7 = vld [vmem:[%s15179_s1 + $0x210] ss:$8 sps:$4 sm:$0xff]   ;;  %v11578_v9 = vld [vmem:[%s15179_s1 + $0x224] ss:$8 sps:$4 sm:$0xff]   ;;  %v11581_v11 = vld [vmem:[%s15179_s1 + $0x220] ss:$8 sps:$4 sm:$0xff]  }
  0x11   : > { %6040 = vmatprep.subr.bf16.mxu0 %v11572_v5  ;;  %v11582_v12 = vld [vmem:[%s15179_s1 + $0x34] ss:$8 sps:$4 sm:$0xff]   ;;  %v11586_v14 = vld [vmem:[%s15179_s1 + $0x30] ss:$8 sps:$4 sm:$0xff]   ;;  %v11588_v16 = vld [vmem:[%s15179_s1 + $0x44] ss:$8 sps:$4 sm:$0xff]  }
  0x12   : > { %v11584_v13 = vld [vmem:[%s15179_s1 + $0x234] ss:$8 sps:$4 sm:$0xff]   ;;  %v11587_v15 = vld [vmem:[%s15179_s1 + $0x230] ss:$8 sps:$4 sm:$0xff]   ;;  %v11590_v17 = vld [vmem:[%s15179_s1 + $0x244] ss:$8 sps:$4 sm:$0xff]  }
  0x13   : > { %4695 = vmatpush1.bf16.msra.mxu1 %v11574_v6  ;;  %v11592_v18 = vld [vmem:[%s15179_s1 + $0x40] ss:$8 sps:$4 sm:$0xff]   ;;  %v11594_v20 = vld [vmem:[%s15179_s1 + $0x54] ss:$8 sps:$4 sm:$0xff]   ;;  %v11598_v22 = vld [vmem:[%s15179_s1 + $0x50] ss:$8 sps:$4 sm:$0xff]  }
  0x14   : > { %6041 = vmatpush1.bf16.msra.mxu0 %v11575_v7  ;;  %4696 = vmatprep.subr.bf16.mxu1 %v11576_v8  ;;  %v11593_v19 = vld [vmem:[%s15179_s1 + $0x240] ss:$8 sps:$4 sm:$0xff]   ;;  %v11596_v21 = vld [vmem:[%s15179_s1 + $0x254] ss:$8 sps:$4 sm:$0xff]   ;;  %v11599_v23 = vld [vmem:[%s15179_s1 + $0x250] ss:$8 sps:$4 sm:$0xff]  }
  0x15   : > { %6042 = vmatprep.subr.bf16.mxu0 %v11578_v9  ;;  %v11600_v24 = vld [vmem:[%s15179_s1 + $0x64] ss:$8 sps:$4 sm:$0xff]   ;;  %v11604_v26 = vld [vmem:[%s15179_s1 + $0x60] ss:$8 sps:$4 sm:$0xff]   ;;  %v11606_v28 = vld [vmem:[%s15179_s1 + $0x74] ss:$8 sps:$4 sm:$0xff]  }
  0x16   : > { %v11602_v25 = vld [vmem:[%s15179_s1 + $0x264] ss:$8 sps:$4 sm:$0xff]   ;;  %v11605_v27 = vld [vmem:[%s15179_s1 + $0x260] ss:$8 sps:$4 sm:$0xff]   ;;  %v11608_v29 = vld [vmem:[%s15179_s1 + $0x274] ss:$8 sps:$4 sm:$0xff]  }
  0x17   : > { %4697 = vmatpush1.bf16.msra.mxu1 %v11580_v10  ;;  %s9471_s9 = sshll.u32 %s9466_s19, 7  ;;  %v11610_v30 = vld [vmem:[%s15179_s1 + $0x70] ss:$8 sps:$4 sm:$0xff]   ;;  %v11612_v32 = vld [vmem:[%s15179_s1 + $0x84] ss:$8 sps:$4 sm:$0xff]   ;;  %vm8544_vm0 = vcmask 523264  }
  0x18   : > { %6043 = vmatpush1.bf16.msra.mxu0 %v11581_v11  ;;  %4698 = vmatprep.subr.bf16.mxu1 %v11582_v12  ;;  %v11611_v31 = vld [vmem:[%s15179_s1 + $0x270] ss:$8 sps:$4 sm:$0xff]   ;;  %p219_p3 = scmp.lt.s32.totalorder %s9471_s9, 255  ;;  %v11614_v33 = vld [vmem:[%s15179_s1 + $0x284] ss:$8 sps:$4 sm:$0xff]  }
  0x19   : > { %6044 = vmatprep.subr.bf16.mxu0 %v11584_v13  ;;  %v11616_v34 = vld [vmem:[%s15179_s1 + $0x80] ss:$8 sps:$4 sm:$0xff]   ;;  %v11618_v36 = vld [vmem:[%s15179_s1 + $0x94] ss:$8 sps:$4 sm:$0xff]   ;;  %v11622_v38 = vld [vmem:[%s15179_s1 + $0x90] ss:$8 sps:$4 sm:$0xff]  }
  0x1a   : > { %v11617_v35 = vld [vmem:[%s15179_s1 + $0x280] ss:$8 sps:$4 sm:$0xff]   ;;  %s15608_s9 = smov (!%p219_p3, %s9471_s9), 255  ;;  %v11620_v37 = vld [vmem:[%s15179_s1 + $0x294] ss:$8 sps:$4 sm:$0xff]  }
  0x1b   : > { %4699 = vmatpush1.bf16.msra.mxu1 %v11586_v14  ;;  %v11623_v39 = vld [vmem:[%s15179_s1 + $0x290] ss:$8 sps:$4 sm:$0xff]   ;;  %v11624_v40 = vld [vmem:[%s15179_s1 + $0xa4] ss:$8 sps:$4 sm:$0xff]   ;;  %s11554_s8 = smul.u32 36, %s15608_s9  ;;  %s9474_s26 = sshll.u32 %s15608_s9, 3 }
  0x1c   : > { %6045 = vmatpush1.bf16.msra.mxu0 %v11587_v15  ;;  %4700 = vmatprep.subr.bf16.mxu1 %v11588_v16  ;;  %v11626_v41 = vld [vmem:[%s15179_s1 + $0x2a4] ss:$8 sps:$4 sm:$0xff]   ;;  %v11628_v42 = vld [vmem:[%s15179_s1 + $0xa0] ss:$8 sps:$4 sm:$0xff]   ;;  %v11630_v44 = vld [vmem:[%s15179_s1 + $0xb4] ss:$8 sps:$4 sm:$0xff]   ;;  %s14564_s6 = scalar_lea.vmem %s15183_s5, %s9474_s26 }
  0x1d   : > { %6046 = vmatprep.subr.bf16.mxu0 %v11590_v17  ;;  %v11629_v43 = vld [vmem:[%s15179_s1 + $0x2a0] ss:$8 sps:$4 sm:$0xff]   ;;  %s12816_s21 = scalar_lea.vmem %s15178_s0, %s11554_s8  ;;  %v11632_v45 = vld [vmem:[%s15179_s1 + $0x2b4] ss:$8 sps:$4 sm:$0xff]   ;;  %v11634_v46 = vld [vmem:[%s15179_s1 + $0xb0] ss:$8 sps:$4 sm:$0xff]  }
  0x1e   : > { %v11635_v47 = vld [vmem:[%s15179_s1 + $0x2b0] ss:$8 sps:$4 sm:$0xff]   ;;  %v11636_v48 = vld [vmem:[%s15179_s1 + $0xc4] ss:$8 sps:$4 sm:$0xff]   ;;  %v11640_v52 = vld [vmem:[%s15179_s1 + $0xc0] ss:$8 sps:$4 sm:$0xff]  }
  0x1f   : > { %4701 = vmatpush1.bf16.msra.mxu1 %v11592_v18  ;;  %v11662_v49 = vld [vmem:[%s12816_s21 + $0x4] ss:$36 sps:$4 sm:$0xff]   ;;  %v11665_v51 = vld [vmem:[%s12816_s21 + $0x14] ss:$36 sps:$4 sm:$0xff]   ;;  %v11669_v6 = vld [vmem:[%s12816_s21 + $0x4c] ss:$36 sps:$4 sm:$0xff]  }
  0x20   : > { %6047 = vmatpush1.bf16.msra.mxu0 %v11593_v19  ;;  %4702 = vmatprep.subr.bf16.mxu1 %v11594_v20  ;;  %v11638_v50 = vld [vmem:[%s15179_s1 + $0x2c4] ss:$8 sps:$4 sm:$0xff]   ;;  %v11641_v53 = vld [vmem:[%s15179_s1 + $0x2c0] ss:$8 sps:$4 sm:$0xff]   ;;  %v11642_v54 = vld [vmem:[%s15179_s1 + $0xd4] ss:$8 sps:$4 sm:$0xff]  }
  0x21   : > { %6048 = vmatprep.subr.bf16.mxu0 %v11596_v21  ;;  %4724 = vmatprep.mubr.bf16.mxu1 %v11662_v49  ;;  %v11644_v55 = vld [vmem:[%s15179_s1 + $0x2d4] ss:$8 sps:$4 sm:$0xff]   ;;  %v11646_v56 = vld [vmem:[%s15179_s1 + $0xd0] ss:$8 sps:$4 sm:$0xff]   ;;  %v11648_v58 = vld [vmem:[%s15179_s1 + $0xe4] ss:$8 sps:$4 sm:$0xff]  }
  0x22   : > { %6070 = vmatprep.mubr.bf16.mxu0 %v11665_v51  ;;  %v11647_v57 = vld [vmem:[%s15179_s1 + $0x2d0] ss:$8 sps:$4 sm:$0xff]   ;;  %v11650_v59 = vld [vmem:[%s15179_s1 + $0x2e4] ss:$8 sps:$4 sm:$0xff]   ;;  %v11652_v60 = vld [vmem:[%s15179_s1 + $0xe0] ss:$8 sps:$4 sm:$0xff]  }
  0x23   : > { %4703 = vmatpush1.bf16.msra.mxu1 %v11598_v22  ;;  %v11653_v61 = vld [vmem:[%s15179_s1 + $0x2e0] ss:$8 sps:$4 sm:$0xff]   ;;  %v11654_v62 = vld [vmem:[%s15179_s1 + $0xf4] ss:$8 sps:$4 sm:$0xff]   ;;  %v11658_v0 = vld [vmem:[%s15179_s1 + $0xf0] ss:$8 sps:$4 sm:$0xff]  }
  0x24   : > { %6049 = vmatpush1.bf16.msra.mxu0 %v11599_v23  ;;  %4704 = vmatprep.subr.bf16.mxu1 %v11600_v24  ;;  %v11656_v63 = vld [vmem:[%s15179_s1 + $0x2f4] ss:$8 sps:$4 sm:$0xff]   ;;  %v11659_v1 = vld [vmem:[%s15179_s1 + $0x2f0] ss:$8 sps:$4 sm:$0xff]   ;;  %v11668_v2 = vld [vmem:[%s15179_s1 + $0x304] ss:$8 sps:$4 sm:$0xff]  }
  0x25   : > { %6050 = vmatprep.subr.bf16.mxu0 %v11602_v25  ;;  %v11660_v3 = vld [vmem:[%s12816_s21] ss:$36 sps:$4 sm:$0xff]   ;;  %v11663_v4 = vld [vmem:[%s12816_s21 + $0x10] ss:$36 sps:$4 sm:$0xff]   ;;  %v11673_v10 = vld [vmem:[%s12816_s21 + $0x48] ss:$36 sps:$4 sm:$0xff]  }
  0x26   : > { %v11666_v5 = vld [vmem:[%s15179_s1 + $0x300] ss:$8 sps:$4 sm:$0xff]   ;;  %v11695_v8 = vld [vmem:[%s15179_s1 + $0x314] ss:$8 sps:$4 sm:$0xff]   ;;  %v11693_v9 = vld [vmem:[%s15179_s1 + $0x310] ss:$8 sps:$4 sm:$0xff]  }
  0x27   : > { %4705 = vmatpush1.bf16.msra.mxu1 %v11604_v26  ;;  %v11671_v7 = vld [vmem:[%s12816_s21 + $0x5c] ss:$36 sps:$4 sm:$0xff]   ;;  %v11722_v11 = vld [vmem:[%s15179_s1 + $0x324] ss:$8 sps:$4 sm:$0xff]   ;;  %v11675_v13 = vld [vmem:[%s12816_s21 + $0x94] ss:$36 sps:$4 sm:$0xff]  }
  0x28   : > { %6051 = vmatpush1.bf16.msra.mxu0 %v11605_v27  ;;  %4706 = vmatprep.subr.bf16.mxu1 %v11606_v28  ;;  %v11674_v12 = vld [vmem:[%s12816_s21 + $0x58] ss:$36 sps:$4 sm:$0xff]   ;;  %v11677_v14 = vld [vmem:[%s12816_s21 + $0xa4] ss:$36 sps:$4 sm:$0xff]   ;;  %v11679_v16 = vld [vmem:[%s12816_s21 + $0x90] ss:$36 sps:$4 sm:$0xff]  }
  0x29   : > { %6052 = vmatprep.subr.bf16.mxu0 %v11608_v29  ;;  %v11720_v15 = vld [vmem:[%s15179_s1 + $0x320] ss:$8 sps:$4 sm:$0xff]   ;;  %v11683_v19 = vld [vmem:[%s12816_s21 + $0xec] ss:$36 sps:$4 sm:$0xff]   ;;  %v11749_v21 = vld [vmem:[%s15179_s1 + $0x334] ss:$8 sps:$4 sm:$0xff]  }
  0x2a   : > { %v11680_v17 = vld [vmem:[%s12816_s21 + $0xa0] ss:$36 sps:$4 sm:$0xff]   ;;  %v11747_v20 = vld [vmem:[%s15179_s1 + $0x330] ss:$8 sps:$4 sm:$0xff]   ;;  %v11686_v23 = vld [vmem:[%s12816_s21 + $0xe8] ss:$36 sps:$4 sm:$0xff]  }
  0x2b   : > { %4707 = vmatpush1.bf16.msra.mxu1 %v11610_v30  ;;  %v11681_v18 = vld [vmem:[%s12816_s21 + $0xdc] ss:$36 sps:$4 sm:$0xff]   ;;  %v11687_v24 = vld [vmem:[%s12816_s21 + $0x124] ss:$36 sps:$4 sm:$0xff]   ;;  %v11689_v25 = vld [vmem:[%s12816_s21 + $0x134] ss:$36 sps:$4 sm:$0xff]  }
  0x2c   : > { %6053 = vmatpush1.bf16.msra.mxu0 %v11611_v31  ;;  %4708 = vmatprep.subr.bf16.mxu1 %v11612_v32  ;;  %v11685_v22 = vld [vmem:[%s12816_s21 + $0xd8] ss:$36 sps:$4 sm:$0xff]   ;;  %v11691_v26 = vld [vmem:[%s12816_s21 + $0x120] ss:$36 sps:$4 sm:$0xff]   ;;  %v11692_v29 = vld [vmem:[%s12816_s21 + $0x130] ss:$36 sps:$4 sm:$0xff]  }
  0x2d   : > { %6054 = vmatprep.subr.bf16.mxu0 %v11614_v33  ;;  %v11774_v27 = vld [vmem:[%s15179_s1 + $0x340] ss:$8 sps:$4 sm:$0xff]   ;;  %v11776_v28 = vld [vmem:[%s15179_s1 + $0x344] ss:$8 sps:$4 sm:$0xff]   ;;  %v11701_v33 = vld [vmem:[%s12816_s21 + $0x178] ss:$36 sps:$4 sm:$0xff]  }
  0x2e   : > { %v11696_v30 = vld [vmem:[%s12816_s21 + $0x16c] ss:$36 sps:$4 sm:$0xff]   ;;  %v11698_v31 = vld [vmem:[%s12816_s21 + $0x17c] ss:$36 sps:$4 sm:$0xff]  }
  0x2f   : > { %4709 = vmatpush1.bf16.msra.mxu1 %v11616_v34  ;;  %v11700_v32 = vld [vmem:[%s12816_s21 + $0x168] ss:$36 sps:$4 sm:$0xff]   ;;  %v11702_v34 = vld [vmem:[%s12816_s21 + $0x1b4] ss:$36 sps:$4 sm:$0xff]   ;;  %v11725_v49 = vld [vmem:[%s12816_s21 + $0x29c] ss:$36 sps:$4 sm:$0xff]  }
  0x30   : > { %6055 = vmatpush1.bf16.msra.mxu0 %v11617_v35  ;;  %4710 = vmatprep.subr.bf16.mxu1 %v11618_v36  ;;  %v11704_v35 = vld [vmem:[%s12816_s21 + $0x1c4] ss:$36 sps:$4 sm:$0xff]   ;;  %v11801_v36 = vld [vmem:[%s15179_s1 + $0x350] ss:$8 sps:$4 sm:$0xff]  }
  0x31   : > { %6056 = vmatprep.subr.bf16.mxu0 %v11620_v37  ;;  %v11803_v37 = vld [vmem:[%s15179_s1 + $0x354] ss:$8 sps:$4 sm:$0xff]   ;;  %v11830_v51 = vld [vmem:[%s15179_s1 + $0x364] ss:$8 sps:$4 sm:$0xff]  }
  0x33   : > { %4711 = vmatpush1.bf16.msra.mxu1 %v11622_v38  ;;  %v11706_v38 = vld [vmem:[%s12816_s21 + $0x1b0] ss:$36 sps:$4 sm:$0xff]  }
  0x34   : > { %6057 = vmatpush1.bf16.msra.mxu0 %v11623_v39  ;;  %4712 = vmatprep.subr.bf16.mxu1 %v11624_v40  ;;  %v11707_v39 = vld [vmem:[%s12816_s21 + $0x1c0] ss:$36 sps:$4 sm:$0xff]  }
  0x35   : > { %6058 = vmatprep.subr.bf16.mxu0 %v11626_v41  ;;  %v11708_v40 = vld [vmem:[%s12816_s21 + $0x1fc] ss:$36 sps:$4 sm:$0xff]   ;;  %v11710_v41 = vld [vmem:[%s12816_s21 + $0x20c] ss:$36 sps:$4 sm:$0xff]  }
  0x37   : > { %4713 = vmatpush1.bf16.msra.mxu1 %v11628_v42  ;;  %v11712_v42 = vld [vmem:[%s12816_s21 + $0x1f8] ss:$36 sps:$4 sm:$0xff]  }
  0x38   : > { %6059 = vmatpush1.bf16.msra.mxu0 %v11629_v43  ;;  %4714 = vmatprep.subr.bf16.mxu1 %v11630_v44  ;;  %v11713_v43 = vld [vmem:[%s12816_s21 + $0x208] ss:$36 sps:$4 sm:$0xff]  }
  0x39   : > { %6060 = vmatprep.subr.bf16.mxu0 %v11632_v45  ;;  %v11714_v44 = vld [vmem:[%s12816_s21 + $0x244] ss:$36 sps:$4 sm:$0xff]   ;;  %v11716_v45 = vld [vmem:[%s12816_s21 + $0x254] ss:$36 sps:$4 sm:$0xff]  }
  0x3b   : > { %4715 = vmatpush1.bf16.msra.mxu1 %v11634_v46  ;;  %v11718_v46 = vld [vmem:[%s12816_s21 + $0x240] ss:$36 sps:$4 sm:$0xff]  }
  0x3c   : > { %6061 = vmatpush1.bf16.msra.mxu0 %v11635_v47  ;;  %4716 = vmatprep.subr.bf16.mxu1 %v11636_v48  ;;  %v11719_v47 = vld [vmem:[%s12816_s21 + $0x250] ss:$36 sps:$4 sm:$0xff]  }
  0x3d   : > { %6062 = vmatprep.subr.bf16.mxu0 %v11638_v50  ;;  %v11723_v48 = vld [vmem:[%s12816_s21 + $0x28c] ss:$36 sps:$4 sm:$0xff]   ;;  %v11828_v50 = vld [vmem:[%s15179_s1 + $0x360] ss:$8 sps:$4 sm:$0xff]  }
  0x3f   : > { %4717 = vmatpush1.bf16.msra.mxu1 %v11640_v52  ;;  %v11727_v52 = vld [vmem:[%s12816_s21 + $0x288] ss:$36 sps:$4 sm:$0xff]  }
  0x40   : > { %6063 = vmatpush1.bf16.msra.mxu0 %v11641_v53  ;;  %4718 = vmatprep.subr.bf16.mxu1 %v11642_v54  ;;  %v11728_v53 = vld [vmem:[%s12816_s21 + $0x298] ss:$36 sps:$4 sm:$0xff]  }
  0x41   : > { %6064 = vmatprep.subr.bf16.mxu0 %v11644_v55  ;;  %v11729_v54 = vld [vmem:[%s12816_s21 + $0x2d4] ss:$36 sps:$4 sm:$0xff]   ;;  %v11731_v55 = vld [vmem:[%s12816_s21 + $0x2e4] ss:$36 sps:$4 sm:$0xff]  }
  0x43   : > { %4719 = vmatpush1.bf16.msra.mxu1 %v11646_v56  ;;  %v11733_v56 = vld [vmem:[%s12816_s21 + $0x2d0] ss:$36 sps:$4 sm:$0xff]  }
  0x44   : > { %6065 = vmatpush1.bf16.msra.mxu0 %v11647_v57  ;;  %4720 = vmatprep.subr.bf16.mxu1 %v11648_v58  ;;  %v11734_v57 = vld [vmem:[%s12816_s21 + $0x2e0] ss:$36 sps:$4 sm:$0xff]  }
  0x45   : > { %6066 = vmatprep.subr.bf16.mxu0 %v11650_v59  ;;  %v11735_v58 = vld [vmem:[%s12816_s21 + $0x31c] ss:$36 sps:$4 sm:$0xff]   ;;  %v11737_v59 = vld [vmem:[%s12816_s21 + $0x32c] ss:$36 sps:$4 sm:$0xff]  }
  0x47   : > { %4721 = vmatpush1.bf16.msra.mxu1 %v11652_v60  ;;  %v11739_v60 = vld [vmem:[%s12816_s21 + $0x318] ss:$36 sps:$4 sm:$0xff]  }
  0x48   : > { %6067 = vmatpush1.bf16.msra.mxu0 %v11653_v61  ;;  %4722 = vmatprep.subr.bf16.mxu1 %v11654_v62  ;;  %v11740_v61 = vld [vmem:[%s12816_s21 + $0x328] ss:$36 sps:$4 sm:$0xff]  }
  0x49   : > { %6068 = vmatprep.subr.bf16.mxu0 %v11656_v63  ;;  %v11741_v62 = vld [vmem:[%s12816_s21 + $0x364] ss:$36 sps:$4 sm:$0xff]   ;;  %v11743_v63 = vld [vmem:[%s12816_s21 + $0x374] ss:$36 sps:$4 sm:$0xff]  }
  0x4b   : > { %4723 = vmatpush1.bf16.msra.mxu1 %v11658_v0  ;;  %v11849_v0 = vld [vmem:[%s15179_s1 + $0x100] ss:$8 sps:$4 sm:$0xff]  }
  0x4c   : > { %6069 = vmatpush1.bf16.msra.mxu0 %v11659_v1  ;;  %v11851_v1 = vld [vmem:[%s15179_s1 + $0x104] ss:$8 sps:$4 sm:$0xff]  }
  0x4d   : > { %6711 = vmatprep.subr.bf16.mxu0 %v11668_v2  ;;  %v11745_v2 = vld [vmem:[%s12816_s21 + $0x360] ss:$36 sps:$4 sm:$0xff]   ;;  %5365 = vmatprep.subr.bf16.mxu1 %v11851_v1 }
  0x4e   : > { %4725 = vmatmul.mubr.bf16.vlgmr.msra.gmra.mrb[0].mxu1 %v11660_v3  ;;  %v11746_v3 = vld [vmem:[%s12816_s21 + $0x370] ss:$36 sps:$4 sm:$0xff]   ;;  %v11833_v1 = vld [vmem:[%s12816_s21 + $0x71c] ss:$36 sps:$4 sm:$0xff]  }
  0x4f   : > { %6071 = vmatmul.mubr.bf16.vlgmr.msra.gmra.mrb[0].mxu0 %v11663_v4  ;;  %4734 = vmatprep.mubr.bf16.mxu1 %v11669_v6  ;;  %v11750_v4 = vld [vmem:[%s12816_s21 + $0x3ac] ss:$36 sps:$4 sm:$0xff]  }
  0x50   : > { %6712 = vmatpush1.bf16.msra.mxu0 %v11666_v5  ;;  %6080 = vmatprep.mubr.bf16.mxu0 %v11671_v7  ;;  %v11752_v5 = vld [vmem:[%s12816_s21 + $0x3bc] ss:$36 sps:$4 sm:$0xff]   ;;  %v11858_v6 = vld [vmem:[%s15179_s1 + $0x370] ss:$8 sps:$4 sm:$0xff]  }
  0x51   : > { %6713 = vmatprep.subr.bf16.mxu0 %v11695_v8  ;;  %5366 = vmatpush1.bf16.msra.mxu1 %v11849_v0  ;;  %v11860_v7 = vld [vmem:[%s15179_s1 + $0x374] ss:$8 sps:$4 sm:$0xff]   ;;  %v11754_v8 = vld [vmem:[%s12816_s21 + $0x3a8] ss:$36 sps:$4 sm:$0xff]  }
  0x52   : > { %v11831_v0 = vld [vmem:[%s12816_s21 + $0x70c] ss:$36 sps:$4 sm:$0xff]  }
  0x54   : > { %6714 = vmatpush1.bf16.msra.mxu0 %v11693_v9  ;;  %v11755_v9 = vld [vmem:[%s12816_s21 + $0x3b8] ss:$36 sps:$4 sm:$0xff]  }
  0x55   : > { %6715 = vmatprep.subr.bf16.mxu0 %v11722_v11  ;;  %v11758_v11 = vld [vmem:[%s12816_s21 + $0x404] ss:$36 sps:$4 sm:$0xff]  }
  0x56   : > { %4735 = vmatmul.mubr.bf16.gmra.mrb[4].mxu1 %v11673_v10  ;;  %v11756_v10 = vld [vmem:[%s12816_s21 + $0x3f4] ss:$36 sps:$4 sm:$0xff]  }
  0x57   : > { %6081 = vmatmul.mubr.bf16.gmra.mrb[4].mxu0 %v11674_v12  ;;  %4744 = vmatprep.mubr.bf16.mxu1 %v11675_v13  ;;  %v11760_v12 = vld [vmem:[%s12816_s21 + $0x3f0] ss:$36 sps:$4 sm:$0xff]   ;;  %v11761_v13 = vld [vmem:[%s12816_s21 + $0x400] ss:$36 sps:$4 sm:$0xff]  }
  0x58   : > { %6090 = vmatprep.mubr.bf16.mxu0 %v11677_v14  ;;  %6716 = vmatpush1.bf16.msra.mxu0 %v11720_v15  ;;  %v11762_v14 = vld [vmem:[%s12816_s21 + $0x43c] ss:$36 sps:$4 sm:$0xff]   ;;  %v11764_v15 = vld [vmem:[%s12816_s21 + $0x44c] ss:$36 sps:$4 sm:$0xff]  }
  0x59   : > { %6717 = vmatprep.subr.bf16.mxu0 %v11749_v21  ;;  %v11881_v21 = vld [vmem:[%s15179_s1 + $0x114] ss:$8 sps:$4 sm:$0xff]  }
  0x5a   : > { %5367 = vmatprep.subr.bf16.mxu1 %v11881_v21  ;;  %v11863_v21 = vld [vmem:[%s12816_s21 + $0x83c] ss:$36 sps:$4 sm:$0xff]  }
  0x5c   : > { %6718 = vmatpush1.bf16.msra.mxu0 %v11747_v20  ;;  %v11879_v20 = vld [vmem:[%s15179_s1 + $0x110] ss:$8 sps:$4 sm:$0xff]  }
  0x5d   : > { %6719 = vmatprep.subr.bf16.mxu0 %v11776_v28  ;;  %5368 = vmatpush1.bf16.msra.mxu1 %v11879_v20  ;;  %v11781_v28 = vld [vmem:[%s12816_s21 + $0x4c8] ss:$36 sps:$4 sm:$0xff]  }
  0x5e   : > { %4745 = vmatmul.mubr.bf16.gmra.mrb[8].mxu1 %v11679_v16  ;;  %v11766_v16 = vld [vmem:[%s12816_s21 + $0x438] ss:$36 sps:$4 sm:$0xff]   ;;  %v11861_v20 = vld [vmem:[%s12816_s21 + $0x82c] ss:$36 sps:$4 sm:$0xff]  }
  0x5f   : > { %6091 = vmatmul.mubr.bf16.gmra.mrb[8].mxu0 %v11680_v17  ;;  %4754 = vmatprep.mubr.bf16.mxu1 %v11681_v18  ;;  %v11767_v17 = vld [vmem:[%s12816_s21 + $0x448] ss:$36 sps:$4 sm:$0xff]  }
  0x60   : > { %6100 = vmatprep.mubr.bf16.mxu0 %v11683_v19  ;;  %6720 = vmatpush1.bf16.msra.mxu0 %v11774_v27  ;;  %v11768_v18 = vld [vmem:[%s12816_s21 + $0x484] ss:$36 sps:$4 sm:$0xff]   ;;  %v11770_v19 = vld [vmem:[%s12816_s21 + $0x494] ss:$36 sps:$4 sm:$0xff]  }
  0x61   : > { %6721 = vmatprep.subr.bf16.mxu0 %v11803_v37  ;;  %v11890_v27 = vld [vmem:[%s15179_s1 + $0x384] ss:$8 sps:$4 sm:$0xff]  }
  0x62   : > { %v11794_v37 = vld [vmem:[%s12816_s21 + $0x568] ss:$36 sps:$4 sm:$0xff]  }
  0x64   : > { %6722 = vmatpush1.bf16.msra.mxu0 %v11801_v36  ;;  %v11793_v36 = vld [vmem:[%s12816_s21 + $0x558] ss:$36 sps:$4 sm:$0xff]  }
  0x65   : > { %6723 = vmatprep.subr.bf16.mxu0 %v11830_v51  ;;  %v11812_v51 = vld [vmem:[%s12816_s21 + $0x644] ss:$36 sps:$4 sm:$0xff]  }
  0x66   : > { %4755 = vmatmul.mubr.bf16.gmra.mrb[12].mxu1 %v11685_v22  ;;  %v11772_v22 = vld [vmem:[%s12816_s21 + $0x480] ss:$36 sps:$4 sm:$0xff]  }
  0x67   : > { %6101 = vmatmul.mubr.bf16.gmra.mrb[12].mxu0 %v11686_v23  ;;  %4764 = vmatprep.mubr.bf16.mxu1 %v11687_v24  ;;  %v11773_v23 = vld [vmem:[%s12816_s21 + $0x490] ss:$36 sps:$4 sm:$0xff]  }
  0x68   : > { %6110 = vmatprep.mubr.bf16.mxu0 %v11689_v25  ;;  %6724 = vmatpush1.bf16.msra.mxu0 %v11828_v50  ;;  %v11777_v24 = vld [vmem:[%s12816_s21 + $0x4cc] ss:$36 sps:$4 sm:$0xff]   ;;  %v11779_v25 = vld [vmem:[%s12816_s21 + $0x4dc] ss:$36 sps:$4 sm:$0xff]   ;;  %v11810_v50 = vld [vmem:[%s12816_s21 + $0x634] ss:$36 sps:$4 sm:$0xff]  }
  0x69   : > { %6725 = vmatprep.subr.bf16.mxu0 %v11860_v7  ;;  %v11839_v7 = vld [vmem:[%s12816_s21 + $0x764] ss:$36 sps:$4 sm:$0xff]  }
  0x6c   : > { %6726 = vmatpush1.bf16.msra.mxu0 %v11858_v6  ;;  %v11837_v6 = vld [vmem:[%s12816_s21 + $0x754] ss:$36 sps:$4 sm:$0xff]  }
  0x6d   : > { %6727 = vmatprep.subr.bf16.mxu0 %v11890_v27  ;;  %v11869_v27 = vld [vmem:[%s12816_s21 + $0x884] ss:$36 sps:$4 sm:$0xff]  }
  0x6e   : > { %4765 = vmatmul.mubr.bf16.gmra.mrb[16].mxu1 %v11691_v26  ;;  %v11888_v26 = vld [vmem:[%s15179_s1 + $0x380] ss:$8 sps:$4 sm:$0xff]  }
  0x6f   : > { %6111 = vmatmul.mubr.bf16.gmra.mrb[16].mxu0 %v11692_v29  ;;  %4774 = vmatprep.mubr.bf16.mxu1 %v11696_v30  ;;  %v11782_v29 = vld [vmem:[%s12816_s21 + $0x4d8] ss:$36 sps:$4 sm:$0xff]  }
  0x70   : > { %6120 = vmatprep.mubr.bf16.mxu0 %v11698_v31  ;;  %v11783_v30 = vld [vmem:[%s12816_s21 + $0x514] ss:$36 sps:$4 sm:$0xff]   ;;  %v11785_v31 = vld [vmem:[%s12816_s21 + $0x524] ss:$36 sps:$4 sm:$0xff]   ;;  %6728 = vmatpush1.bf16.msra.mxu0 %v11888_v26 }
  0x71   : > { %v11867_v26 = vld [vmem:[%s12816_s21 + $0x874] ss:$36 sps:$4 sm:$0xff]  }
  0x76   : > { %4775 = vmatmul.mubr.bf16.gmra.mrb[20].mxu1 %v11700_v32  ;;  %v11787_v32 = vld [vmem:[%s12816_s21 + $0x510] ss:$36 sps:$4 sm:$0xff]  }
  0x77   : > { %6121 = vmatmul.mubr.bf16.gmra.mrb[20].mxu0 %v11701_v33  ;;  %4784 = vmatprep.mubr.bf16.mxu1 %v11702_v34  ;;  %v11788_v33 = vld [vmem:[%s12816_s21 + $0x520] ss:$36 sps:$4 sm:$0xff]  }
  0x78   : > { %6130 = vmatprep.mubr.bf16.mxu0 %v11704_v35  ;;  %v11789_v34 = vld [vmem:[%s12816_s21 + $0x55c] ss:$36 sps:$4 sm:$0xff]   ;;  %v11791_v35 = vld [vmem:[%s12816_s21 + $0x56c] ss:$36 sps:$4 sm:$0xff]  }
  0x7e   : > { %4785 = vmatmul.mubr.bf16.gmra.mrb[24].mxu1 %v11706_v38  ;;  %v11795_v38 = vld [vmem:[%s12816_s21 + $0x5a4] ss:$36 sps:$4 sm:$0xff]  }
  0x7f   : > { %6131 = vmatmul.mubr.bf16.gmra.mrb[24].mxu0 %v11707_v39  ;;  %4794 = vmatprep.mubr.bf16.mxu1 %v11708_v40  ;;  %v11797_v39 = vld [vmem:[%s12816_s21 + $0x5b4] ss:$36 sps:$4 sm:$0xff]   ;;  %v11909_v40 = vld [vmem:[%s15179_s1 + $0x120] ss:$8 sps:$4 sm:$0xff]  }
  0x80   : > { %6140 = vmatprep.mubr.bf16.mxu0 %v11710_v41  ;;  %v11911_v41 = vld [vmem:[%s15179_s1 + $0x124] ss:$8 sps:$4 sm:$0xff]  }
  0x81   : > { %5369 = vmatprep.subr.bf16.mxu1 %v11911_v41  ;;  %v11893_v41 = vld [vmem:[%s12816_s21 + $0x95c] ss:$36 sps:$4 sm:$0xff]  }
  0x82   : > { %5370 = vmatpush1.bf16.msra.mxu1 %v11909_v40  ;;  %v11891_v40 = vld [vmem:[%s12816_s21 + $0x94c] ss:$36 sps:$4 sm:$0xff]  }
  0x86   : > { %4795 = vmatmul.mubr.bf16.gmra.mrb[28].mxu1 %v11712_v42  ;;  %v11799_v42 = vld [vmem:[%s12816_s21 + $0x5a0] ss:$36 sps:$4 sm:$0xff]  }
  0x87   : > { %6141 = vmatmul.mubr.bf16.gmra.mrb[28].mxu0 %v11713_v43  ;;  %4804 = vmatprep.mubr.bf16.mxu1 %v11714_v44  ;;  %v11800_v43 = vld [vmem:[%s12816_s21 + $0x5b0] ss:$36 sps:$4 sm:$0xff]  }
  0x88   : > { %6150 = vmatprep.mubr.bf16.mxu0 %v11716_v45  ;;  %v11804_v44 = vld [vmem:[%s12816_s21 + $0x5ec] ss:$36 sps:$4 sm:$0xff]   ;;  %v11806_v45 = vld [vmem:[%s12816_s21 + $0x5fc] ss:$36 sps:$4 sm:$0xff]  }
  0x8e   : > { %4805 = vmatmul.mubr.bf16.gmra.mrb[32].mxu1 %v11718_v46  ;;  %v11918_v46 = vld [vmem:[%s15179_s1 + $0x390] ss:$8 sps:$4 sm:$0xff]  }
  0x8f   : > { %6151 = vmatmul.mubr.bf16.gmra.mrb[32].mxu0 %v11719_v47  ;;  %4814 = vmatprep.mubr.bf16.mxu1 %v11723_v48  ;;  %v11920_v47 = vld [vmem:[%s15179_s1 + $0x394] ss:$8 sps:$4 sm:$0xff]   ;;  %v11808_v48 = vld [vmem:[%s12816_s21 + $0x5e8] ss:$36 sps:$4 sm:$0xff]  }
  0x90   : > { %6160 = vmatprep.mubr.bf16.mxu0 %v11725_v49  ;;  %v11809_v49 = vld [vmem:[%s12816_s21 + $0x5f8] ss:$36 sps:$4 sm:$0xff]   ;;  %6729 = vmatprep.subr.bf16.mxu0 %v11920_v47  ;;  %v11899_v47 = vld [vmem:[%s12816_s21 + $0x9a4] ss:$36 sps:$4 sm:$0xff]  }
  0x91   : > { %6730 = vmatpush1.bf16.msra.mxu0 %v11918_v46  ;;  %v11897_v46 = vld [vmem:[%s12816_s21 + $0x994] ss:$36 sps:$4 sm:$0xff]  }
  0x96   : > { %4815 = vmatmul.mubr.bf16.gmra.mrb[36].mxu1 %v11727_v52  ;;  %v11814_v52 = vld [vmem:[%s12816_s21 + $0x630] ss:$36 sps:$4 sm:$0xff]  }
  0x97   : > { %6161 = vmatmul.mubr.bf16.gmra.mrb[36].mxu0 %v11728_v53  ;;  %4824 = vmatprep.mubr.bf16.mxu1 %v11729_v54  ;;  %v11815_v53 = vld [vmem:[%s12816_s21 + $0x640] ss:$36 sps:$4 sm:$0xff]  }
  0x98   : > { %6170 = vmatprep.mubr.bf16.mxu0 %v11731_v55  ;;  %v11816_v54 = vld [vmem:[%s12816_s21 + $0x67c] ss:$36 sps:$4 sm:$0xff]   ;;  %v11818_v55 = vld [vmem:[%s12816_s21 + $0x68c] ss:$36 sps:$4 sm:$0xff]  }
  0x9e   : > { %4825 = vmatmul.mubr.bf16.gmra.mrb[40].mxu1 %v11733_v56  ;;  %v11820_v56 = vld [vmem:[%s12816_s21 + $0x678] ss:$36 sps:$4 sm:$0xff]  }
  0x9f   : > { %6171 = vmatmul.mubr.bf16.gmra.mrb[40].mxu0 %v11734_v57  ;;  %4834 = vmatprep.mubr.bf16.mxu1 %v11735_v58  ;;  %v11821_v57 = vld [vmem:[%s12816_s21 + $0x688] ss:$36 sps:$4 sm:$0xff]  }
  0xa0   : > { %6180 = vmatprep.mubr.bf16.mxu0 %v11737_v59  ;;  %v11822_v58 = vld [vmem:[%s12816_s21 + $0x6c4] ss:$36 sps:$4 sm:$0xff]   ;;  %v11824_v59 = vld [vmem:[%s12816_s21 + $0x6d4] ss:$36 sps:$4 sm:$0xff]  }
  0xa6   : > { %4835 = vmatmul.mubr.bf16.gmra.mrb[44].mxu1 %v11739_v60  ;;  %v11939_v60 = vld [vmem:[%s15179_s1 + $0x130] ss:$8 sps:$4 sm:$0xff]  }
  0xa7   : > { %6181 = vmatmul.mubr.bf16.gmra.mrb[44].mxu0 %v11740_v61  ;;  %4844 = vmatprep.mubr.bf16.mxu1 %v11741_v62  ;;  %v11941_v61 = vld [vmem:[%s15179_s1 + $0x134] ss:$8 sps:$4 sm:$0xff]   ;;  %v11826_v62 = vld [vmem:[%s12816_s21 + $0x6c0] ss:$36 sps:$4 sm:$0xff]  }
  0xa8   : > { %6190 = vmatprep.mubr.bf16.mxu0 %v11743_v63  ;;  %v11827_v63 = vld [vmem:[%s12816_s21 + $0x6d0] ss:$36 sps:$4 sm:$0xff]   ;;  %5371 = vmatprep.subr.bf16.mxu1 %v11941_v61  ;;  %v11923_v61 = vld [vmem:[%s12816_s21 + $0xa7c] ss:$36 sps:$4 sm:$0xff]  }
  0xa9   : > { %5372 = vmatpush1.bf16.msra.mxu1 %v11939_v60  ;;  %v11921_v60 = vld [vmem:[%s12816_s21 + $0xa6c] ss:$36 sps:$4 sm:$0xff]  }
  0xae   : > { %4845 = vmatmul.mubr.bf16.gmra.mrb[48].mxu1 %v11745_v2  ;;  %v11948_v2 = vld [vmem:[%s15179_s1 + $0x3a0] ss:$8 sps:$4 sm:$0xff]  }
  0xaf   : > { %6191 = vmatmul.mubr.bf16.gmra.mrb[48].mxu0 %v11746_v3  ;;  %4854 = vmatprep.mubr.bf16.mxu1 %v11750_v4  ;;  %v11950_v3 = vld [vmem:[%s15179_s1 + $0x3a4] ss:$8 sps:$4 sm:$0xff]  }
  0xb0   : > { %6200 = vmatprep.mubr.bf16.mxu0 %v11752_v5  ;;  %v11835_v4 = vld [vmem:[%s12816_s21 + $0x708] ss:$36 sps:$4 sm:$0xff]   ;;  %v11836_v5 = vld [vmem:[%s12816_s21 + $0x718] ss:$36 sps:$4 sm:$0xff]   ;;  %6731 = vmatprep.subr.bf16.mxu0 %v11950_v3 }
  0xb1   : > { %6732 = vmatpush1.bf16.msra.mxu0 %v11948_v2  ;;  %v11927_v2 = vld [vmem:[%s12816_s21 + $0xab4] ss:$36 sps:$4 sm:$0xff]   ;;  %v11929_v3 = vld [vmem:[%s12816_s21 + $0xac4] ss:$36 sps:$4 sm:$0xff]  }
  0xb6   : > { %4855 = vmatmul.mubr.bf16.gmra.mrb[52].mxu1 %v11754_v8  ;;  %v11841_v8 = vld [vmem:[%s12816_s21 + $0x750] ss:$36 sps:$4 sm:$0xff]  }
  0xb7   : > { %6201 = vmatmul.mubr.bf16.gmra.mrb[52].mxu0 %v11755_v9  ;;  %4864 = vmatprep.mubr.bf16.mxu1 %v11756_v10  ;;  %v11842_v9 = vld [vmem:[%s12816_s21 + $0x760] ss:$36 sps:$4 sm:$0xff]  }
  0xb8   : > { %6210 = vmatprep.mubr.bf16.mxu0 %v11758_v11  ;;  %v11843_v10 = vld [vmem:[%s12816_s21 + $0x79c] ss:$36 sps:$4 sm:$0xff]   ;;  %v11845_v11 = vld [vmem:[%s12816_s21 + $0x7ac] ss:$36 sps:$4 sm:$0xff]  }
  0xbe   : > { %4865 = vmatmul.mubr.bf16.gmra.mrb[56].mxu1 %v11760_v12  ;;  %v11847_v12 = vld [vmem:[%s12816_s21 + $0x798] ss:$36 sps:$4 sm:$0xff]  }
  0xbf   : > { %6211 = vmatmul.mubr.bf16.gmra.mrb[56].mxu0 %v11761_v13  ;;  %4874 = vmatprep.mubr.bf16.mxu1 %v11762_v14  ;;  %v11848_v13 = vld [vmem:[%s12816_s21 + $0x7a8] ss:$36 sps:$4 sm:$0xff]  }
  0xc0   : > { %6220 = vmatprep.mubr.bf16.mxu0 %v11764_v15  ;;  %v11852_v14 = vld [vmem:[%s12816_s21 + $0x7e4] ss:$36 sps:$4 sm:$0xff]   ;;  %v11854_v15 = vld [vmem:[%s12816_s21 + $0x7f4] ss:$36 sps:$4 sm:$0xff]  }
  0xc6   : > { %4875 = vmatmul.mubr.bf16.gmra.mrb[60].mxu1 %v11766_v16  ;;  %v11969_v16 = vld [vmem:[%s15179_s1 + $0x140] ss:$8 sps:$4 sm:$0xff]  }
  0xc7   : > { %6221 = vmatmul.mubr.bf16.gmra.mrb[60].mxu0 %v11767_v17  ;;  %4884 = vmatprep.mubr.bf16.mxu1 %v11768_v18  ;;  %v11971_v17 = vld [vmem:[%s15179_s1 + $0x144] ss:$8 sps:$4 sm:$0xff]  }
  0xc8   : > { %6230 = vmatprep.mubr.bf16.mxu0 %v11770_v19  ;;  %v11856_v18 = vld [vmem:[%s12816_s21 + $0x7e0] ss:$36 sps:$4 sm:$0xff]   ;;  %v11857_v19 = vld [vmem:[%s12816_s21 + $0x7f0] ss:$36 sps:$4 sm:$0xff]   ;;  %5373 = vmatprep.subr.bf16.mxu1 %v11971_v17 }
  0xc9   : > { %5374 = vmatpush1.bf16.msra.mxu1 %v11969_v16  ;;  %v11951_v16 = vld [vmem:[%s12816_s21 + $0xb8c] ss:$36 sps:$4 sm:$0xff]   ;;  %v11953_v17 = vld [vmem:[%s12816_s21 + $0xb9c] ss:$36 sps:$4 sm:$0xff]  }
  0xce   : > { %4885 = vmatmul.mubr.bf16.gmra.mrb[64].mxu1 %v11772_v22  ;;  %v11978_v22 = vld [vmem:[%s15179_s1 + $0x3b0] ss:$8 sps:$4 sm:$0xff]  }
  0xcf   : > { %6231 = vmatmul.mubr.bf16.gmra.mrb[64].mxu0 %v11773_v23  ;;  %4894 = vmatprep.mubr.bf16.mxu1 %v11777_v24  ;;  %v11980_v23 = vld [vmem:[%s15179_s1 + $0x3b4] ss:$8 sps:$4 sm:$0xff]   ;;  %v11865_v24 = vld [vmem:[%s12816_s21 + $0x828] ss:$36 sps:$4 sm:$0xff]  }
  0xd0   : > { %6240 = vmatprep.mubr.bf16.mxu0 %v11779_v25  ;;  %v11866_v25 = vld [vmem:[%s12816_s21 + $0x838] ss:$36 sps:$4 sm:$0xff]   ;;  %6733 = vmatprep.subr.bf16.mxu0 %v11980_v23  ;;  %v11959_v23 = vld [vmem:[%s12816_s21 + $0xbe4] ss:$36 sps:$4 sm:$0xff]  }
  0xd1   : > { %6734 = vmatpush1.bf16.msra.mxu0 %v11978_v22  ;;  %v11957_v22 = vld [vmem:[%s12816_s21 + $0xbd4] ss:$36 sps:$4 sm:$0xff]  }
  0xd6   : > { %4895 = vmatmul.mubr.bf16.gmra.mrb[68].mxu1 %v11781_v28  ;;  %v11871_v28 = vld [vmem:[%s12816_s21 + $0x870] ss:$36 sps:$4 sm:$0xff]  }
  0xd7   : > { %6241 = vmatmul.mubr.bf16.gmra.mrb[68].mxu0 %v11782_v29  ;;  %4904 = vmatprep.mubr.bf16.mxu1 %v11783_v30  ;;  %v11872_v29 = vld [vmem:[%s12816_s21 + $0x880] ss:$36 sps:$4 sm:$0xff]  }
  0xd8   : > { %6250 = vmatprep.mubr.bf16.mxu0 %v11785_v31  ;;  %v11873_v30 = vld [vmem:[%s12816_s21 + $0x8bc] ss:$36 sps:$4 sm:$0xff]   ;;  %v11875_v31 = vld [vmem:[%s12816_s21 + $0x8cc] ss:$36 sps:$4 sm:$0xff]  }
  0xde   : > { %4905 = vmatmul.mubr.bf16.gmra.mrb[72].mxu1 %v11787_v32  ;;  %v11877_v32 = vld [vmem:[%s12816_s21 + $0x8b8] ss:$36 sps:$4 sm:$0xff]  }
  0xdf   : > { %6251 = vmatmul.mubr.bf16.gmra.mrb[72].mxu0 %v11788_v33  ;;  %4914 = vmatprep.mubr.bf16.mxu1 %v11789_v34  ;;  %v11878_v33 = vld [vmem:[%s12816_s21 + $0x8c8] ss:$36 sps:$4 sm:$0xff]  }
  0xe0   : > { %6260 = vmatprep.mubr.bf16.mxu0 %v11791_v35  ;;  %v11882_v34 = vld [vmem:[%s12816_s21 + $0x904] ss:$36 sps:$4 sm:$0xff]   ;;  %v11884_v35 = vld [vmem:[%s12816_s21 + $0x914] ss:$36 sps:$4 sm:$0xff]  }
  0xe6   : > { %4915 = vmatmul.mubr.bf16.gmra.mrb[76].mxu1 %v11793_v36  ;;  %v11999_v36 = vld [vmem:[%s15179_s1 + $0x150] ss:$8 sps:$4 sm:$0xff]  }
  0xe7   : > { %6261 = vmatmul.mubr.bf16.gmra.mrb[76].mxu0 %v11794_v37  ;;  %4924 = vmatprep.mubr.bf16.mxu1 %v11795_v38  ;;  %v12001_v37 = vld [vmem:[%s15179_s1 + $0x154] ss:$8 sps:$4 sm:$0xff]   ;;  %v11886_v38 = vld [vmem:[%s12816_s21 + $0x900] ss:$36 sps:$4 sm:$0xff]  }
  0xe8   : > { %6270 = vmatprep.mubr.bf16.mxu0 %v11797_v39  ;;  %v11887_v39 = vld [vmem:[%s12816_s21 + $0x910] ss:$36 sps:$4 sm:$0xff]   ;;  %5375 = vmatprep.subr.bf16.mxu1 %v12001_v37  ;;  %v11983_v37 = vld [vmem:[%s12816_s21 + $0xcbc] ss:$36 sps:$4 sm:$0xff]  }
  0xe9   : > { %5376 = vmatpush1.bf16.msra.mxu1 %v11999_v36  ;;  %v11981_v36 = vld [vmem:[%s12816_s21 + $0xcac] ss:$36 sps:$4 sm:$0xff]  }
  0xee   : > { %4925 = vmatmul.mubr.bf16.gmra.mrb[80].mxu1 %v11799_v42  ;;  %v12008_v42 = vld [vmem:[%s15179_s1 + $0x3c0] ss:$8 sps:$4 sm:$0xff]  }
  0xef   : > { %6271 = vmatmul.mubr.bf16.gmra.mrb[80].mxu0 %v11800_v43  ;;  %4934 = vmatprep.mubr.bf16.mxu1 %v11804_v44  ;;  %v12010_v43 = vld [vmem:[%s15179_s1 + $0x3c4] ss:$8 sps:$4 sm:$0xff]  }
  0xf0   : > { %6280 = vmatprep.mubr.bf16.mxu0 %v11806_v45  ;;  %v11895_v44 = vld [vmem:[%s12816_s21 + $0x948] ss:$36 sps:$4 sm:$0xff]   ;;  %v11896_v45 = vld [vmem:[%s12816_s21 + $0x958] ss:$36 sps:$4 sm:$0xff]   ;;  %6735 = vmatprep.subr.bf16.mxu0 %v12010_v43 }
  0xf1   : > { %6736 = vmatpush1.bf16.msra.mxu0 %v12008_v42  ;;  %v11985_v42 = vld [vmem:[%s12816_s21 + $0xca8] ss:$36 sps:$4 sm:$0xff]   ;;  %v11986_v43 = vld [vmem:[%s12816_s21 + $0xcb8] ss:$36 sps:$4 sm:$0xff]  }
  0xf6   : > { %4935 = vmatmul.mubr.bf16.gmra.mrb[84].mxu1 %v11808_v48  ;;  %v11901_v48 = vld [vmem:[%s12816_s21 + $0x990] ss:$36 sps:$4 sm:$0xff]  }
  0xf7   : > { %6281 = vmatmul.mubr.bf16.gmra.mrb[84].mxu0 %v11809_v49  ;;  %4944 = vmatprep.mubr.bf16.mxu1 %v11810_v50  ;;  %v11902_v49 = vld [vmem:[%s12816_s21 + $0x9a0] ss:$36 sps:$4 sm:$0xff]  }
  0xf8   : > { %6290 = vmatprep.mubr.bf16.mxu0 %v11812_v51  ;;  %v11903_v50 = vld [vmem:[%s12816_s21 + $0x9dc] ss:$36 sps:$4 sm:$0xff]   ;;  %v11905_v51 = vld [vmem:[%s12816_s21 + $0x9ec] ss:$36 sps:$4 sm:$0xff]  }
  0xfe   : > { %4945 = vmatmul.mubr.bf16.gmra.mrb[88].mxu1 %v11814_v52  ;;  %v11907_v52 = vld [vmem:[%s12816_s21 + $0x9d8] ss:$36 sps:$4 sm:$0xff]  }
  0xff   : > { %6291 = vmatmul.mubr.bf16.gmra.mrb[88].mxu0 %v11815_v53  ;;  %4954 = vmatprep.mubr.bf16.mxu1 %v11816_v54  ;;  %v11908_v53 = vld [vmem:[%s12816_s21 + $0x9e8] ss:$36 sps:$4 sm:$0xff]  }
 0x100   : > { %6300 = vmatprep.mubr.bf16.mxu0 %v11818_v55  ;;  %v11912_v54 = vld [vmem:[%s12816_s21 + $0xa24] ss:$36 sps:$4 sm:$0xff]   ;;  %v11914_v55 = vld [vmem:[%s12816_s21 + $0xa34] ss:$36 sps:$4 sm:$0xff]  }
 0x106   : > { %4955 = vmatmul.mubr.bf16.gmra.mrb[92].mxu1 %v11820_v56  ;;  %v12029_v56 = vld [vmem:[%s15179_s1 + $0x160] ss:$8 sps:$4 sm:$0xff]  }
 0x107   : > { %6301 = vmatmul.mubr.bf16.gmra.mrb[92].mxu0 %v11821_v57  ;;  %4964 = vmatprep.mubr.bf16.mxu1 %v11822_v58  ;;  %v12031_v57 = vld [vmem:[%s15179_s1 + $0x164] ss:$8 sps:$4 sm:$0xff]  }
 0x108   : > { %6310 = vmatprep.mubr.bf16.mxu0 %v11824_v59  ;;  %v11916_v58 = vld [vmem:[%s12816_s21 + $0xa20] ss:$36 sps:$4 sm:$0xff]   ;;  %v11917_v59 = vld [vmem:[%s12816_s21 + $0xa30] ss:$36 sps:$4 sm:$0xff]   ;;  %5377 = vmatprep.subr.bf16.mxu1 %v12031_v57 }
 0x109   : > { %5378 = vmatpush1.bf16.msra.mxu1 %v12029_v56  ;;  %v12127_v56 = vld [vmem:[%s15179_s1 + $0x1d4] ss:$8 sps:$4 sm:$0xff]   ;;  %v12125_v57 = vld [vmem:[%s15179_s1 + $0x1d0] ss:$8 sps:$4 sm:$0xff]  }
 0x10e   : > { %4965 = vmatmul.mubr.bf16.gmra.mrb[96].mxu1 %v11826_v62  ;;  %v12038_v62 = vld [vmem:[%s15179_s1 + $0x3d0] ss:$8 sps:$4 sm:$0xff]  }
 0x10f   : > { %6311 = vmatmul.mubr.bf16.gmra.mrb[96].mxu0 %v11827_v63  ;;  %4974 = vmatprep.mubr.bf16.mxu1 %v11831_v0  ;;  %v12040_v63 = vld [vmem:[%s15179_s1 + $0x3d4] ss:$8 sps:$4 sm:$0xff]   ;;  %v11925_v0 = vld [vmem:[%s12816_s21 + $0xa68] ss:$36 sps:$4 sm:$0xff]  }
 0x110   : > { %6320 = vmatprep.mubr.bf16.mxu0 %v11833_v1  ;;  %v11926_v1 = vld [vmem:[%s12816_s21 + $0xa78] ss:$36 sps:$4 sm:$0xff]   ;;  %6737 = vmatprep.subr.bf16.mxu0 %v12040_v63  ;;  %v12133_v63 = vld [vmem:[%s15179_s1 + $0x1e0] ss:$8 sps:$4 sm:$0xff]  }
 0x111   : > { %6738 = vmatpush1.bf16.msra.mxu0 %v12038_v62  ;;  %v12135_v62 = vld [vmem:[%s15179_s1 + $0x1e4] ss:$8 sps:$4 sm:$0xff]  }
 0x116   : > { %4975 = vmatmul.mubr.bf16.gmra.mrb[100].mxu1 %v11835_v4  ;;  %v11931_v4 = vld [vmem:[%s12816_s21 + $0xab0] ss:$36 sps:$4 sm:$0xff]  }
 0x117   : > { %6321 = vmatmul.mubr.bf16.gmra.mrb[100].mxu0 %v11836_v5  ;;  %4984 = vmatprep.mubr.bf16.mxu1 %v11837_v6  ;;  %v11932_v5 = vld [vmem:[%s12816_s21 + $0xac0] ss:$36 sps:$4 sm:$0xff]  }
 0x118   : > { %6330 = vmatprep.mubr.bf16.mxu0 %v11839_v7  ;;  %v11933_v6 = vld [vmem:[%s12816_s21 + $0xafc] ss:$36 sps:$4 sm:$0xff]   ;;  %v11935_v7 = vld [vmem:[%s12816_s21 + $0xb0c] ss:$36 sps:$4 sm:$0xff]  }
 0x11e   : > { %4985 = vmatmul.mubr.bf16.gmra.mrb[104].mxu1 %v11841_v8  ;;  %v11937_v8 = vld [vmem:[%s12816_s21 + $0xaf8] ss:$36 sps:$4 sm:$0xff]  }
 0x11f   : > { %6331 = vmatmul.mubr.bf16.gmra.mrb[104].mxu0 %v11842_v9  ;;  %4994 = vmatprep.mubr.bf16.mxu1 %v11843_v10  ;;  %v11938_v9 = vld [vmem:[%s12816_s21 + $0xb08] ss:$36 sps:$4 sm:$0xff]  }
 0x120   : > { %6340 = vmatprep.mubr.bf16.mxu0 %v11845_v11  ;;  %v11942_v10 = vld [vmem:[%s12816_s21 + $0xb44] ss:$36 sps:$4 sm:$0xff]   ;;  %v11944_v11 = vld [vmem:[%s12816_s21 + $0xb54] ss:$36 sps:$4 sm:$0xff]  }
 0x126   : > { %4995 = vmatmul.mubr.bf16.gmra.mrb[108].mxu1 %v11847_v12  ;;  %v12059_v12 = vld [vmem:[%s15179_s1 + $0x170] ss:$8 sps:$4 sm:$0xff]  }
 0x127   : > { %6341 = vmatmul.mubr.bf16.gmra.mrb[108].mxu0 %v11848_v13  ;;  %5004 = vmatprep.mubr.bf16.mxu1 %v11852_v14  ;;  %v12061_v13 = vld [vmem:[%s15179_s1 + $0x174] ss:$8 sps:$4 sm:$0xff]   ;;  %v11946_v14 = vld [vmem:[%s12816_s21 + $0xb40] ss:$36 sps:$4 sm:$0xff]  }
 0x128   : > { %6350 = vmatprep.mubr.bf16.mxu0 %v11854_v15  ;;  %5379 = vmatprep.subr.bf16.mxu1 %v12061_v13  ;;  %v11947_v15 = vld [vmem:[%s12816_s21 + $0xb50] ss:$36 sps:$4 sm:$0xff]   ;;  %v12023_v13 = vld [vmem:[%s12816_s21 + $0xe5c] ss:$36 sps:$4 sm:$0xff]  }
 0x129   : > { %5380 = vmatpush1.bf16.msra.mxu1 %v12059_v12  ;;  %v12022_v12 = vld [vmem:[%s12816_s21 + $0xe20] ss:$36 sps:$4 sm:$0xff]  }
 0x12e   : > { %5005 = vmatmul.mubr.bf16.gmra.mrb[112].mxu1 %v11856_v18  ;;  %v12068_v18 = vld [vmem:[%s15179_s1 + $0x3e0] ss:$8 sps:$4 sm:$0xff]  }
 0x12f   : > { %6351 = vmatmul.mubr.bf16.gmra.mrb[112].mxu0 %v11857_v19  ;;  %5014 = vmatprep.mubr.bf16.mxu1 %v11861_v20  ;;  %v12070_v19 = vld [vmem:[%s15179_s1 + $0x3e4] ss:$8 sps:$4 sm:$0xff]  }
 0x130   : > { %6360 = vmatprep.mubr.bf16.mxu0 %v11863_v21  ;;  %6739 = vmatprep.subr.bf16.mxu0 %v12070_v19  ;;  %v11955_v20 = vld [vmem:[%s12816_s21 + $0xb88] ss:$36 sps:$4 sm:$0xff]   ;;  %v11956_v21 = vld [vmem:[%s12816_s21 + $0xb98] ss:$36 sps:$4 sm:$0xff]   ;;  %v12036_v19 = vld [vmem:[%s12816_s21 + $0xea0] ss:$36 sps:$4 sm:$0xff]  }
 0x131   : > { %6740 = vmatpush1.bf16.msra.mxu0 %v12068_v18  ;;  %v12034_v18 = vld [vmem:[%s12816_s21 + $0xeb4] ss:$36 sps:$4 sm:$0xff]  }
 0x136   : > { %5015 = vmatmul.mubr.bf16.gmra.mrb[116].mxu1 %v11865_v24  ;;  %v11961_v24 = vld [vmem:[%s12816_s21 + $0xbd0] ss:$36 sps:$4 sm:$0xff]  }
 0x137   : > { %6361 = vmatmul.mubr.bf16.gmra.mrb[116].mxu0 %v11866_v25  ;;  %5024 = vmatprep.mubr.bf16.mxu1 %v11867_v26  ;;  %v11962_v25 = vld [vmem:[%s12816_s21 + $0xbe0] ss:$36 sps:$4 sm:$0xff]  }
 0x138   : > { %6370 = vmatprep.mubr.bf16.mxu0 %v11869_v27  ;;  %v11963_v26 = vld [vmem:[%s12816_s21 + $0xc1c] ss:$36 sps:$4 sm:$0xff]   ;;  %v11965_v27 = vld [vmem:[%s12816_s21 + $0xc2c] ss:$36 sps:$4 sm:$0xff]  }
 0x13e   : > { %5025 = vmatmul.mubr.bf16.gmra.mrb[120].mxu1 %v11871_v28  ;;  %v11967_v28 = vld [vmem:[%s12816_s21 + $0xc18] ss:$36 sps:$4 sm:$0xff]  }
 0x13f   : > { %6371 = vmatmul.mubr.bf16.gmra.mrb[120].mxu0 %v11872_v29  ;;  %5034 = vmatprep.mubr.bf16.mxu1 %v11873_v30  ;;  %v11968_v29 = vld [vmem:[%s12816_s21 + $0xc28] ss:$36 sps:$4 sm:$0xff]  }
 0x140   : > { %6380 = vmatprep.mubr.bf16.mxu0 %v11875_v31  ;;  %v11972_v30 = vld [vmem:[%s12816_s21 + $0xc64] ss:$36 sps:$4 sm:$0xff]   ;;  %v11974_v31 = vld [vmem:[%s12816_s21 + $0xc74] ss:$36 sps:$4 sm:$0xff]  }
 0x146   : > { %5035 = vmatmul.mubr.bf16.gmra.mrb[124].mxu1 %v11877_v32  ;;  %v12089_v32 = vld [vmem:[%s15179_s1 + $0x180] ss:$8 sps:$4 sm:$0xff]  }
 0x147   : > { %6381 = vmatmul.mubr.bf16.gmra.mrb[124].mxu0 %v11878_v33  ;;  %5044 = vmatprep.mubr.bf16.mxu1 %v11882_v34  ;;  %v12091_v33 = vld [vmem:[%s15179_s1 + $0x184] ss:$8 sps:$4 sm:$0xff]  }
 0x148   : > { %6390 = vmatprep.mubr.bf16.mxu0 %v11884_v35  ;;  %5381 = vmatprep.subr.bf16.mxu1 %v12091_v33  ;;  %v11976_v34 = vld [vmem:[%s12816_s21 + $0xc60] ss:$36 sps:$4 sm:$0xff]   ;;  %v11977_v35 = vld [vmem:[%s12816_s21 + $0xc70] ss:$36 sps:$4 sm:$0xff]  }
 0x149   : > { %5382 = vmatpush1.bf16.msra.mxu1 %v12089_v32  ;;  %v12058_v32 = vld [vmem:[%s12816_s21 + $0xf88] ss:$36 sps:$4 sm:$0xff]  }
 0x14a   : > { %v12062_v33 = vld [vmem:[%s12816_s21 + $0xfc4] ss:$36 sps:$4 sm:$0xff]  }
 0x14e   : > { %5045 = vmatmul.mubr.bf16.gmra.mrb[128].mxu1 %v11886_v38  ;;  %v12098_v38 = vld [vmem:[%s15179_s1 + $0x3f0] ss:$8 sps:$4 sm:$0xff]  }
 0x14f   : > { %6391 = vmatmul.mubr.bf16.gmra.mrb[128].mxu0 %v11887_v39  ;;  %5054 = vmatprep.mubr.bf16.mxu1 %v11891_v40  ;;  %v12100_v39 = vld [vmem:[%s15179_s1 + $0x3f4] ss:$8 sps:$4 sm:$0xff]   ;;  %v12101_v40 = vld [vmem:[%s15179_s1 + $0x190] ss:$8 sps:$4 sm:$0xff]  }
 0x150   : > { %6400 = vmatprep.mubr.bf16.mxu0 %v11893_v41  ;;  %v12103_v41 = vld [vmem:[%s15179_s1 + $0x194] ss:$8 sps:$4 sm:$0xff]   ;;  %6741 = vmatprep.subr.bf16.mxu0 %v12100_v39  ;;  %v12075_v39 = vld [vmem:[%s12816_s21 + $0x1008] ss:$36 sps:$4 sm:$0xff]  }
 0x151   : > { %6742 = vmatpush1.bf16.msra.mxu0 %v12098_v38  ;;  %5383 = vmatprep.subr.bf16.mxu1 %v12103_v41  ;;  %v12073_v38 = vld [vmem:[%s12816_s21 + $0x101c] ss:$36 sps:$4 sm:$0xff]   ;;  %v12077_v41 = vld [vmem:[%s12816_s21 + $0x1054] ss:$36 sps:$4 sm:$0xff]  }
 0x152   : > { %5384 = vmatpush1.bf16.msra.mxu1 %v12101_v40  ;;  %v12076_v40 = vld [vmem:[%s12816_s21 + $0x1018] ss:$36 sps:$4 sm:$0xff]  }
 0x156   : > { %5055 = vmatmul.mubr.bf16.gmra.mrb[132].mxu1 %v11895_v44  ;;  %v11987_v44 = vld [vmem:[%s12816_s21 + $0xcf4] ss:$36 sps:$4 sm:$0xff]  }
 0x157   : > { %6401 = vmatmul.mubr.bf16.gmra.mrb[132].mxu0 %v11896_v45  ;;  %5064 = vmatprep.mubr.bf16.mxu1 %v11897_v46  ;;  %v11989_v45 = vld [vmem:[%s12816_s21 + $0xd04] ss:$36 sps:$4 sm:$0xff]  }
 0x158   : > { %6410 = vmatprep.mubr.bf16.mxu0 %v11899_v47  ;;  %v12111_v46 = vld [vmem:[%s15179_s1 + $0x1a4] ss:$8 sps:$4 sm:$0xff]   ;;  %v12109_v47 = vld [vmem:[%s15179_s1 + $0x1a0] ss:$8 sps:$4 sm:$0xff]  }
 0x159   : > { %5385 = vmatprep.subr.bf16.mxu1 %v12111_v46  ;;  %v12085_v46 = vld [vmem:[%s12816_s21 + $0x10ac] ss:$36 sps:$4 sm:$0xff]  }
 0x15a   : > { %5386 = vmatpush1.bf16.msra.mxu1 %v12109_v47  ;;  %v12087_v47 = vld [vmem:[%s12816_s21 + $0x1098] ss:$36 sps:$4 sm:$0xff]  }
 0x15e   : > { %5065 = vmatmul.mubr.bf16.gmra.mrb[136].mxu1 %v11901_v48  ;;  %v12115_v48 = vld [vmem:[%s15179_s1 + $0x1b4] ss:$8 sps:$4 sm:$0xff]  }
 0x15f   : > { %6411 = vmatmul.mubr.bf16.gmra.mrb[136].mxu0 %v11902_v49  ;;  %5074 = vmatprep.mubr.bf16.mxu1 %v11903_v50  ;;  %v12113_v49 = vld [vmem:[%s15179_s1 + $0x1b0] ss:$8 sps:$4 sm:$0xff]  }
 0x160   : > { %6420 = vmatprep.mubr.bf16.mxu0 %v11905_v51  ;;  %v11991_v50 = vld [vmem:[%s12816_s21 + $0xcf0] ss:$36 sps:$4 sm:$0xff]   ;;  %v11992_v51 = vld [vmem:[%s12816_s21 + $0xd00] ss:$36 sps:$4 sm:$0xff]   ;;  %5387 = vmatprep.subr.bf16.mxu1 %v12115_v48  ;;  %v12088_v48 = vld [vmem:[%s12816_s21 + $0x10a8] ss:$36 sps:$4 sm:$0xff]  }
 0x161   : > { %5388 = vmatpush1.bf16.msra.mxu1 %v12113_v49  ;;  %v12092_v49 = vld [vmem:[%s12816_s21 + $0x10e4] ss:$36 sps:$4 sm:$0xff]  }
 0x166   : > { %5075 = vmatmul.mubr.bf16.gmra.mrb[140].mxu1 %v11907_v52  ;;  %v11993_v52 = vld [vmem:[%s12816_s21 + $0xd3c] ss:$36 sps:$4 sm:$0xff]  }
 0x167   : > { %6421 = vmatmul.mubr.bf16.gmra.mrb[140].mxu0 %v11908_v53  ;;  %5084 = vmatprep.mubr.bf16.mxu1 %v11912_v54  ;;  %v11995_v53 = vld [vmem:[%s12816_s21 + $0xd4c] ss:$36 sps:$4 sm:$0xff]  }
 0x168   : > { %6430 = vmatprep.mubr.bf16.mxu0 %v11914_v55  ;;  %v12123_v54 = vld [vmem:[%s15179_s1 + $0x1c4] ss:$8 sps:$4 sm:$0xff]   ;;  %v12121_v55 = vld [vmem:[%s15179_s1 + $0x1c0] ss:$8 sps:$4 sm:$0xff]  }
 0x169   : > { %5389 = vmatprep.subr.bf16.mxu1 %v12123_v54  ;;  %v12106_v54 = vld [vmem:[%s12816_s21 + $0x113c] ss:$36 sps:$4 sm:$0xff]  }
 0x16a   : > { %5390 = vmatpush1.bf16.msra.mxu1 %v12121_v55  ;;  %v12108_v55 = vld [vmem:[%s12816_s21 + $0x1128] ss:$36 sps:$4 sm:$0xff]  }
 0x16b   : > { %5391 = vmatprep.subr.bf16.mxu1 %v12127_v56  ;;  %v12112_v56 = vld [vmem:[%s12816_s21 + $0x1138] ss:$36 sps:$4 sm:$0xff]  }
 0x16e   : > { %5085 = vmatmul.mubr.bf16.gmra.mrb[144].mxu1 %v11916_v58  ;;  %v11997_v58 = vld [vmem:[%s12816_s21 + $0xd38] ss:$36 sps:$4 sm:$0xff]  }
 0x16f   : > { %6431 = vmatmul.mubr.bf16.gmra.mrb[144].mxu0 %v11917_v59  ;;  %5094 = vmatprep.mubr.bf16.mxu1 %v11921_v60  ;;  %v11998_v59 = vld [vmem:[%s12816_s21 + $0xd48] ss:$36 sps:$4 sm:$0xff]  }
 0x170   : > { %6440 = vmatprep.mubr.bf16.mxu0 %v11923_v61  ;;  %v12002_v60 = vld [vmem:[%s12816_s21 + $0xd84] ss:$36 sps:$4 sm:$0xff]   ;;  %v12004_v61 = vld [vmem:[%s12816_s21 + $0xd94] ss:$36 sps:$4 sm:$0xff]   ;;  %5392 = vmatpush1.bf16.msra.mxu1 %v12125_v57 }
 0x171   : > { %5393 = vmatprep.subr.bf16.mxu1 %v12135_v62  ;;  %v12116_v57 = vld [vmem:[%s12816_s21 + $0x1174] ss:$36 sps:$4 sm:$0xff]   ;;  %v12130_v62 = vld [vmem:[%s12816_s21 + $0x11cc] ss:$36 sps:$4 sm:$0xff]  }
 0x174   : > { %5394 = vmatpush1.bf16.msra.mxu1 %v12133_v63  ;;  %v12132_v63 = vld [vmem:[%s12816_s21 + $0x11b8] ss:$36 sps:$4 sm:$0xff]  }
 0x176   : > { %5095 = vmatmul.mubr.bf16.gmra.mrb[148].mxu1 %v11925_v0  ;;  %v12139_v0 = vld [vmem:[%s15179_s1 + $0x1f4] ss:$8 sps:$4 sm:$0xff]  }
 0x177   : > { %6441 = vmatmul.mubr.bf16.gmra.mrb[148].mxu0 %v11926_v1  ;;  %5104 = vmatprep.mubr.bf16.mxu1 %v11927_v2  ;;  %v12137_v1 = vld [vmem:[%s15179_s1 + $0x1f0] ss:$8 sps:$4 sm:$0xff]   ;;  %v12006_v2 = vld [vmem:[%s12816_s21 + $0xd80] ss:$36 sps:$4 sm:$0xff]  }
 0x178   : > { %6450 = vmatprep.mubr.bf16.mxu0 %v11929_v3  ;;  %v12007_v3 = vld [vmem:[%s12816_s21 + $0xd90] ss:$36 sps:$4 sm:$0xff]   ;;  %5395 = vmatprep.subr.bf16.mxu1 %v12139_v0  ;;  %v12136_v0 = vld [vmem:[%s12816_s21 + $0x11c8] ss:$36 sps:$4 sm:$0xff]  }
 0x179   : > { %5396 = vmatpush1.bf16.msra.mxu1 %v12137_v1  ;;  %v12142_v1 = vld [vmem:[%s12816_s21 + $0xc] ss:$36 sps:$4 sm:$0xff]  }
 0x17e   : > { %5105 = vmatmul.mubr.bf16.gmra.mrb[152].mxu1 %v11931_v4  ;;  %v12011_v4 = vld [vmem:[%s12816_s21 + $0xdcc] ss:$36 sps:$4 sm:$0xff]  }
 0x17f   : > { %6451 = vmatmul.mubr.bf16.gmra.mrb[152].mxu0 %v11932_v5  ;;  %5114 = vmatprep.mubr.bf16.mxu1 %v11933_v6  ;;  %v12013_v5 = vld [vmem:[%s12816_s21 + $0xddc] ss:$36 sps:$4 sm:$0xff]   ;;  %v12148_v6 = vld [vmem:[%s15179_s1 + $0x404] ss:$8 sps:$4 sm:$0xff]  }
 0x180   : > { %6460 = vmatprep.mubr.bf16.mxu0 %v11935_v7  ;;  %7384 = vmatprep.subr.bf16.mxu0 %v12148_v6  ;;  %v12015_v7 = vld [vmem:[%s12816_s21 + $0xdc8] ss:$36 sps:$4 sm:$0xff]   ;;  %v12149_v6 = vld [vmem:[%s12816_s21 + $0x54] ss:$36 sps:$4 sm:$0xff]  }
 0x186   : > { %5115 = vmatmul.mubr.bf16.gmra.mrb[156].mxu1 %v11937_v8  ;;  %v12016_v8 = vld [vmem:[%s12816_s21 + $0xdd8] ss:$36 sps:$4 sm:$0xff]  }
 0x187   : > { %6461 = vmatmul.mubr.bf16.gmra.mrb[156].mxu0 %v11938_v9  ;;  %5124 = vmatprep.mubr.bf16.mxu1 %v11942_v10  ;;  %v12017_v9 = vld [vmem:[%s12816_s21 + $0xe14] ss:$36 sps:$4 sm:$0xff]   ;;  %v12019_v10 = vld [vmem:[%s12816_s21 + $0xe24] ss:$36 sps:$4 sm:$0xff]  }
 0x188   : > { %6470 = vmatprep.mubr.bf16.mxu0 %v11944_v11  ;;  %v12021_v11 = vld [vmem:[%s12816_s21 + $0xe10] ss:$36 sps:$4 sm:$0xff]  }
 0x18e   : > { %5125 = vmatmul.mubr.bf16.gmra.mrb[160].mxu1 %v11946_v14  ;;  %v12025_v14 = vld [vmem:[%s12816_s21 + $0xe6c] ss:$36 sps:$4 sm:$0xff]  }
 0x18f   : > { %6471 = vmatmul.mubr.bf16.gmra.mrb[160].mxu0 %v11947_v15  ;;  %5134 = vmatprep.mubr.bf16.mxu1 %v11951_v16  ;;  %v12027_v15 = vld [vmem:[%s12816_s21 + $0xe58] ss:$36 sps:$4 sm:$0xff]   ;;  %v12028_v16 = vld [vmem:[%s12816_s21 + $0xe68] ss:$36 sps:$4 sm:$0xff]  }
 0x190   : > { %6480 = vmatprep.mubr.bf16.mxu0 %v11953_v17  ;;  %v12032_v17 = vld [vmem:[%s12816_s21 + $0xea4] ss:$36 sps:$4 sm:$0xff]  }
 0x196   : > { %5135 = vmatmul.mubr.bf16.gmra.mrb[164].mxu1 %v11955_v20  ;;  %v12037_v20 = vld [vmem:[%s12816_s21 + $0xeb0] ss:$36 sps:$4 sm:$0xff]  }
 0x197   : > { %6481 = vmatmul.mubr.bf16.gmra.mrb[164].mxu0 %v11956_v21  ;;  %5144 = vmatprep.mubr.bf16.mxu1 %v11957_v22  ;;  %v12041_v21 = vld [vmem:[%s12816_s21 + $0xeec] ss:$36 sps:$4 sm:$0xff]   ;;  %v12043_v22 = vld [vmem:[%s12816_s21 + $0xefc] ss:$36 sps:$4 sm:$0xff]  }
 0x198   : > { %6490 = vmatprep.mubr.bf16.mxu0 %v11959_v23  ;;  %v12045_v23 = vld [vmem:[%s12816_s21 + $0xee8] ss:$36 sps:$4 sm:$0xff]  }
 0x19e   : > { %5145 = vmatmul.mubr.bf16.gmra.mrb[168].mxu1 %v11961_v24  ;;  %v12046_v24 = vld [vmem:[%s12816_s21 + $0xef8] ss:$36 sps:$4 sm:$0xff]  }
 0x19f   : > { %6491 = vmatmul.mubr.bf16.gmra.mrb[168].mxu0 %v11962_v25  ;;  %5154 = vmatprep.mubr.bf16.mxu1 %v11963_v26  ;;  %v12047_v25 = vld [vmem:[%s12816_s21 + $0xf34] ss:$36 sps:$4 sm:$0xff]   ;;  %v12049_v26 = vld [vmem:[%s12816_s21 + $0xf44] ss:$36 sps:$4 sm:$0xff]  }
 0x1a0   : > { %6500 = vmatprep.mubr.bf16.mxu0 %v11965_v27  ;;  %v12051_v27 = vld [vmem:[%s12816_s21 + $0xf30] ss:$36 sps:$4 sm:$0xff]  }
 0x1a6   : > { %5155 = vmatmul.mubr.bf16.gmra.mrb[172].mxu1 %v11967_v28  ;;  %v12052_v28 = vld [vmem:[%s12816_s21 + $0xf40] ss:$36 sps:$4 sm:$0xff]  }
 0x1a7   : > { %6501 = vmatmul.mubr.bf16.gmra.mrb[172].mxu0 %v11968_v29  ;;  %5164 = vmatprep.mubr.bf16.mxu1 %v11972_v30  ;;  %v12053_v29 = vld [vmem:[%s12816_s21 + $0xf7c] ss:$36 sps:$4 sm:$0xff]   ;;  %v12055_v30 = vld [vmem:[%s12816_s21 + $0xf8c] ss:$36 sps:$4 sm:$0xff]  }
 0x1a8   : > { %6510 = vmatprep.mubr.bf16.mxu0 %v11974_v31  ;;  %v12057_v31 = vld [vmem:[%s12816_s21 + $0xf78] ss:$36 sps:$4 sm:$0xff]  }
 0x1ae   : > { %5165 = vmatmul.mubr.bf16.gmra.mrb[176].mxu1 %v11976_v34  ;;  %v12064_v34 = vld [vmem:[%s12816_s21 + $0xfd4] ss:$36 sps:$4 sm:$0xff]  }
 0x1af   : > { %6511 = vmatmul.mubr.bf16.gmra.mrb[176].mxu0 %v11977_v35  ;;  %5174 = vmatprep.mubr.bf16.mxu1 %v11981_v36  ;;  %v12066_v35 = vld [vmem:[%s12816_s21 + $0xfc0] ss:$36 sps:$4 sm:$0xff]   ;;  %v12067_v36 = vld [vmem:[%s12816_s21 + $0xfd0] ss:$36 sps:$4 sm:$0xff]  }
 0x1b0   : > { %6520 = vmatprep.mubr.bf16.mxu0 %v11983_v37  ;;  %v12071_v37 = vld [vmem:[%s12816_s21 + $0x100c] ss:$36 sps:$4 sm:$0xff]  }
 0x1b6   : > { %5175 = vmatmul.mubr.bf16.gmra.mrb[180].mxu1 %v11985_v42  ;;  %v12079_v42 = vld [vmem:[%s12816_s21 + $0x1064] ss:$36 sps:$4 sm:$0xff]  }
 0x1b7   : > { %6521 = vmatmul.mubr.bf16.gmra.mrb[180].mxu0 %v11986_v43  ;;  %5184 = vmatprep.mubr.bf16.mxu1 %v11987_v44  ;;  %v12081_v43 = vld [vmem:[%s12816_s21 + $0x1050] ss:$36 sps:$4 sm:$0xff]   ;;  %v12082_v44 = vld [vmem:[%s12816_s21 + $0x1060] ss:$36 sps:$4 sm:$0xff]  }
 0x1b8   : > { %6530 = vmatprep.mubr.bf16.mxu0 %v11989_v45  ;;  %v12083_v45 = vld [vmem:[%s12816_s21 + $0x109c] ss:$36 sps:$4 sm:$0xff]  }
 0x1be   : > { %5185 = vmatmul.mubr.bf16.gmra.mrb[184].mxu1 %v11991_v50  ;;  %v12094_v50 = vld [vmem:[%s12816_s21 + $0x10f4] ss:$36 sps:$4 sm:$0xff]  }
 0x1bf   : > { %6531 = vmatmul.mubr.bf16.gmra.mrb[184].mxu0 %v11992_v51  ;;  %5194 = vmatprep.mubr.bf16.mxu1 %v11993_v52  ;;  %v12096_v51 = vld [vmem:[%s12816_s21 + $0x10e0] ss:$36 sps:$4 sm:$0xff]   ;;  %v12097_v52 = vld [vmem:[%s12816_s21 + $0x10f0] ss:$36 sps:$4 sm:$0xff]  }
 0x1c0   : > { %6540 = vmatprep.mubr.bf16.mxu0 %v11995_v53  ;;  %v12104_v53 = vld [vmem:[%s12816_s21 + $0x112c] ss:$36 sps:$4 sm:$0xff]  }
 0x1c6   : > { %5195 = vmatmul.mubr.bf16.gmra.mrb[188].mxu1 %v11997_v58  ;;  %v12118_v58 = vld [vmem:[%s12816_s21 + $0x1184] ss:$36 sps:$4 sm:$0xff]  }
 0x1c7   : > { %6541 = vmatmul.mubr.bf16.gmra.mrb[188].mxu0 %v11998_v59  ;;  %5204 = vmatprep.mubr.bf16.mxu1 %v12002_v60  ;;  %v12120_v59 = vld [vmem:[%s12816_s21 + $0x1170] ss:$36 sps:$4 sm:$0xff]   ;;  %v12124_v60 = vld [vmem:[%s12816_s21 + $0x1180] ss:$36 sps:$4 sm:$0xff]  }
 0x1c8   : > { %6550 = vmatprep.mubr.bf16.mxu0 %v12004_v61  ;;  %v12128_v61 = vld [vmem:[%s12816_s21 + $0x11bc] ss:$36 sps:$4 sm:$0xff]  }
 0x1ce   : > { %5205 = vmatmul.mubr.bf16.gmra.mrb[192].mxu1 %v12006_v2  ;;  %v12145_v2 = vld [vmem:[%s12816_s21 + $0x1c] ss:$36 sps:$4 sm:$0xff]  }
 0x1cf   : > { %6551 = vmatmul.mubr.bf16.gmra.mrb[192].mxu0 %v12007_v3  ;;  %5214 = vmatprep.mubr.bf16.mxu1 %v12011_v4  ;;  %v12140_v3 = vld [vmem:[%s12816_s21 + $0x8] ss:$36 sps:$4 sm:$0xff]   ;;  %v12143_v4 = vld [vmem:[%s12816_s21 + $0x18] ss:$36 sps:$4 sm:$0xff]  }
 0x1d0   : > { %6560 = vmatprep.mubr.bf16.mxu0 %v12013_v5  ;;  %v12146_v5 = vld [vmem:[%s15179_s1 + $0x400] ss:$8 sps:$4 sm:$0xff]  }
 0x1d6   : > { %5215 = vmatmul.mubr.bf16.gmra.mrb[196].mxu1 %v12015_v7  ;;  %v12151_v7 = vld [vmem:[%s12816_s21 + $0x64] ss:$36 sps:$4 sm:$0xff]  }
 0x1d7   : > { %6561 = vmatmul.mubr.bf16.gmra.mrb[196].mxu0 %v12016_v8  ;;  %5224 = vmatprep.mubr.bf16.mxu1 %v12017_v9  ;;  %v12199_v8 = vld [vmem:[%s15179_s1 + $0x414] ss:$8 sps:$4 sm:$0xff]   ;;  %v12197_v9 = vld [vmem:[%s15179_s1 + $0x410] ss:$8 sps:$4 sm:$0xff]  }
 0x1d8   : > { %6570 = vmatprep.mubr.bf16.mxu0 %v12019_v10  ;;  %v12250_v10 = vld [vmem:[%s15179_s1 + $0x424] ss:$8 sps:$4 sm:$0xff]  }
 0x1de   : > { %5225 = vmatmul.mubr.bf16.gmra.mrb[200].mxu1 %v12021_v11  ;;  %v12153_v11 = vld [vmem:[%s12816_s21 + $0x50] ss:$36 sps:$4 sm:$0xff]  }
 0x1df   : > { %6571 = vmatmul.mubr.bf16.gmra.mrb[200].mxu0 %v12022_v12  ;;  %5234 = vmatprep.mubr.bf16.mxu1 %v12023_v13  ;;  %v12154_v12 = vld [vmem:[%s12816_s21 + $0x60] ss:$36 sps:$4 sm:$0xff]  }
 0x1e0   : > { %6580 = vmatprep.mubr.bf16.mxu0 %v12025_v14  ;;  %v12155_v13 = vld [vmem:[%s12816_s21 + $0x9c] ss:$36 sps:$4 sm:$0xff]   ;;  %v12157_v14 = vld [vmem:[%s12816_s21 + $0xac] ss:$36 sps:$4 sm:$0xff]  }
 0x1e6   : > { %5235 = vmatmul.mubr.bf16.gmra.mrb[204].mxu1 %v12027_v15  ;;  %v12248_v15 = vld [vmem:[%s15179_s1 + $0x420] ss:$8 sps:$4 sm:$0xff]  }
 0x1e7   : > { %6581 = vmatmul.mubr.bf16.gmra.mrb[204].mxu0 %v12028_v16  ;;  %5244 = vmatprep.mubr.bf16.mxu1 %v12032_v17  ;;  %v12159_v16 = vld [vmem:[%s12816_s21 + $0x98] ss:$36 sps:$4 sm:$0xff]   ;;  %v12160_v17 = vld [vmem:[%s12816_s21 + $0xa8] ss:$36 sps:$4 sm:$0xff]  }
 0x1e8   : > { %6590 = vmatprep.mubr.bf16.mxu0 %v12034_v18  ;;  %v12161_v18 = vld [vmem:[%s12816_s21 + $0xe4] ss:$36 sps:$4 sm:$0xff]  }
 0x1ee   : > { %5245 = vmatmul.mubr.bf16.gmra.mrb[208].mxu1 %v12036_v19  ;;  %v12163_v19 = vld [vmem:[%s12816_s21 + $0xf4] ss:$36 sps:$4 sm:$0xff]  }
 0x1ef   : > { %6591 = vmatmul.mubr.bf16.gmra.mrb[208].mxu0 %v12037_v20  ;;  %5254 = vmatprep.mubr.bf16.mxu1 %v12041_v21  ;;  %v12165_v20 = vld [vmem:[%s12816_s21 + $0xe0] ss:$36 sps:$4 sm:$0xff]   ;;  %v12166_v21 = vld [vmem:[%s12816_s21 + $0xf0] ss:$36 sps:$4 sm:$0xff]  }
 0x1f0   : > { %6600 = vmatprep.mubr.bf16.mxu0 %v12043_v22  ;;  %v12167_v22 = vld [vmem:[%s12816_s21 + $0x12c] ss:$36 sps:$4 sm:$0xff]  }
 0x1f6   : > { %5255 = vmatmul.mubr.bf16.gmra.mrb[212].mxu1 %v12045_v23  ;;  %v12169_v23 = vld [vmem:[%s12816_s21 + $0x13c] ss:$36 sps:$4 sm:$0xff]  }
 0x1f7   : > { %6601 = vmatmul.mubr.bf16.gmra.mrb[212].mxu0 %v12046_v24  ;;  %5264 = vmatprep.mubr.bf16.mxu1 %v12047_v25  ;;  %v12171_v24 = vld [vmem:[%s12816_s21 + $0x128] ss:$36 sps:$4 sm:$0xff]   ;;  %v12172_v25 = vld [vmem:[%s12816_s21 + $0x138] ss:$36 sps:$4 sm:$0xff]  }
 0x1f8   : > { %6610 = vmatprep.mubr.bf16.mxu0 %v12049_v26  ;;  %v12173_v26 = vld [vmem:[%s12816_s21 + $0x174] ss:$36 sps:$4 sm:$0xff]  }
 0x1fe   : > { %5265 = vmatmul.mubr.bf16.gmra.mrb[216].mxu1 %v12051_v27  ;;  %v12175_v27 = vld [vmem:[%s12816_s21 + $0x184] ss:$36 sps:$4 sm:$0xff]  }
 0x1ff   : > { %6611 = vmatmul.mubr.bf16.gmra.mrb[216].mxu0 %v12052_v28  ;;  %5274 = vmatprep.mubr.bf16.mxu1 %v12053_v29  ;;  %v12177_v28 = vld [vmem:[%s12816_s21 + $0x170] ss:$36 sps:$4 sm:$0xff]   ;;  %v12178_v29 = vld [vmem:[%s12816_s21 + $0x180] ss:$36 sps:$4 sm:$0xff]  }
 0x200   : > { %6620 = vmatprep.mubr.bf16.mxu0 %v12055_v30  ;;  %v12179_v30 = vld [vmem:[%s12816_s21 + $0x1bc] ss:$36 sps:$4 sm:$0xff]  }
 0x206   : > { %5275 = vmatmul.mubr.bf16.gmra.mrb[220].mxu1 %v12057_v31  ;;  %v12181_v31 = vld [vmem:[%s12816_s21 + $0x1cc] ss:$36 sps:$4 sm:$0xff]  }
 0x207   : > { %6621 = vmatmul.mubr.bf16.gmra.mrb[220].mxu0 %v12058_v32  ;;  %5284 = vmatprep.mubr.bf16.mxu1 %v12062_v33  ;;  %v12183_v32 = vld [vmem:[%s12816_s21 + $0x1b8] ss:$36 sps:$4 sm:$0xff]   ;;  %v12184_v33 = vld [vmem:[%s12816_s21 + $0x1c8] ss:$36 sps:$4 sm:$0xff]  }
 0x208   : > { %6630 = vmatprep.mubr.bf16.mxu0 %v12064_v34  ;;  %v12185_v34 = vld [vmem:[%s12816_s21 + $0x204] ss:$36 sps:$4 sm:$0xff]  }
 0x20e   : > { %5285 = vmatmul.mubr.bf16.gmra.mrb[224].mxu1 %v12066_v35  ;;  %v12187_v35 = vld [vmem:[%s12816_s21 + $0x214] ss:$36 sps:$4 sm:$0xff]  }
 0x20f   : > { %6631 = vmatmul.mubr.bf16.gmra.mrb[224].mxu0 %v12067_v36  ;;  %5294 = vmatprep.mubr.bf16.mxu1 %v12071_v37  ;;  %v12189_v36 = vld [vmem:[%s12816_s21 + $0x200] ss:$36 sps:$4 sm:$0xff]   ;;  %v12190_v37 = vld [vmem:[%s12816_s21 + $0x210] ss:$36 sps:$4 sm:$0xff]  }
 0x210   : > { %6640 = vmatprep.mubr.bf16.mxu0 %v12073_v38  ;;  %v12191_v38 = vld [vmem:[%s12816_s21 + $0x24c] ss:$36 sps:$4 sm:$0xff]  }
 0x216   : > { %5295 = vmatmul.mubr.bf16.gmra.mrb[228].mxu1 %v12075_v39  ;;  %v12193_v39 = vld [vmem:[%s12816_s21 + $0x25c] ss:$36 sps:$4 sm:$0xff]  }
 0x217   : > { %6641 = vmatmul.mubr.bf16.gmra.mrb[228].mxu0 %v12076_v40  ;;  %5304 = vmatprep.mubr.bf16.mxu1 %v12077_v41  ;;  %v12195_v40 = vld [vmem:[%s12816_s21 + $0x248] ss:$36 sps:$4 sm:$0xff]   ;;  %v12196_v41 = vld [vmem:[%s12816_s21 + $0x258] ss:$36 sps:$4 sm:$0xff]  }
 0x218   : > { %6650 = vmatprep.mubr.bf16.mxu0 %v12079_v42  ;;  %v12200_v42 = vld [vmem:[%s12816_s21 + $0x294] ss:$36 sps:$4 sm:$0xff]  }
 0x21e   : > { %5305 = vmatmul.mubr.bf16.gmra.mrb[232].mxu1 %v12081_v43  ;;  %v12202_v43 = vld [vmem:[%s12816_s21 + $0x2a4] ss:$36 sps:$4 sm:$0xff]  }
 0x21f   : > { %6651 = vmatmul.mubr.bf16.gmra.mrb[232].mxu0 %v12082_v44  ;;  %5314 = vmatprep.mubr.bf16.mxu1 %v12083_v45  ;;  %v12299_v44 = vld [vmem:[%s15179_s1 + $0x430] ss:$8 sps:$4 sm:$0xff]   ;;  %v12301_v45 = vld [vmem:[%s15179_s1 + $0x434] ss:$8 sps:$4 sm:$0xff]  }
 0x220   : > { %6660 = vmatprep.mubr.bf16.mxu0 %v12085_v46  ;;  %v12204_v46 = vld [vmem:[%s12816_s21 + $0x290] ss:$36 sps:$4 sm:$0xff]  }
 0x226   : > { %5315 = vmatmul.mubr.bf16.gmra.mrb[236].mxu1 %v12087_v47  ;;  %v12205_v47 = vld [vmem:[%s12816_s21 + $0x2a0] ss:$36 sps:$4 sm:$0xff]  }
 0x227   : > { %6661 = vmatmul.mubr.bf16.gmra.mrb[236].mxu0 %v12088_v48  ;;  %5324 = vmatprep.mubr.bf16.mxu1 %v12092_v49  ;;  %v12206_v48 = vld [vmem:[%s12816_s21 + $0x2dc] ss:$36 sps:$4 sm:$0xff]   ;;  %v12208_v49 = vld [vmem:[%s12816_s21 + $0x2ec] ss:$36 sps:$4 sm:$0xff]  }
 0x228   : > { %6670 = vmatprep.mubr.bf16.mxu0 %v12094_v50  ;;  %v12210_v50 = vld [vmem:[%s12816_s21 + $0x2d8] ss:$36 sps:$4 sm:$0xff]  }
 0x22e   : > { %5325 = vmatmul.mubr.bf16.gmra.mrb[240].mxu1 %v12096_v51  ;;  %v12211_v51 = vld [vmem:[%s12816_s21 + $0x2e8] ss:$36 sps:$4 sm:$0xff]  }
 0x22f   : > { %6671 = vmatmul.mubr.bf16.gmra.mrb[240].mxu0 %v12097_v52  ;;  %5334 = vmatprep.mubr.bf16.mxu1 %v12104_v53  ;;  %v12212_v52 = vld [vmem:[%s12816_s21 + $0x324] ss:$36 sps:$4 sm:$0xff]   ;;  %v12214_v53 = vld [vmem:[%s12816_s21 + $0x334] ss:$36 sps:$4 sm:$0xff]  }
 0x230   : > { %6680 = vmatprep.mubr.bf16.mxu0 %v12106_v54  ;;  %v12216_v54 = vld [vmem:[%s12816_s21 + $0x320] ss:$36 sps:$4 sm:$0xff]  }
 0x236   : > { %5335 = vmatmul.mubr.bf16.gmra.mrb[244].mxu1 %v12108_v55  ;;  %v12217_v55 = vld [vmem:[%s12816_s21 + $0x330] ss:$36 sps:$4 sm:$0xff]  }
 0x237   : > { %6681 = vmatmul.mubr.bf16.gmra.mrb[244].mxu0 %v12112_v56  ;;  %5344 = vmatprep.mubr.bf16.mxu1 %v12116_v57  ;;  %v12218_v56 = vld [vmem:[%s12816_s21 + $0x36c] ss:$36 sps:$4 sm:$0xff]   ;;  %v12220_v57 = vld [vmem:[%s12816_s21 + $0x37c] ss:$36 sps:$4 sm:$0xff]  }
 0x238   : > { %6690 = vmatprep.mubr.bf16.mxu0 %v12118_v58  ;;  %v12222_v58 = vld [vmem:[%s12816_s21 + $0x368] ss:$36 sps:$4 sm:$0xff]  }
 0x23e   : > { %5345 = vmatmul.mubr.bf16.gmra.mrb[248].mxu1 %v12120_v59  ;;  %v12223_v59 = vld [vmem:[%s12816_s21 + $0x378] ss:$36 sps:$4 sm:$0xff]  }
 0x23f   : > { %6691 = vmatmul.mubr.bf16.gmra.mrb[248].mxu0 %v12124_v60  ;;  %5354 = vmatprep.mubr.bf16.mxu1 %v12128_v61  ;;  %v12224_v60 = vld [vmem:[%s12816_s21 + $0x3b4] ss:$36 sps:$4 sm:$0xff]   ;;  %v12226_v61 = vld [vmem:[%s12816_s21 + $0x3c4] ss:$36 sps:$4 sm:$0xff]  }
 0x240   : > { %6700 = vmatprep.mubr.bf16.mxu0 %v12130_v62  ;;  %v12324_v62 = vld [vmem:[%s15181_s3] sm:$0xff]  }
 0x246   : > { %5355 = vmatmul.mubr.bf16.gmra.mrb[252].mxu1 %v12132_v63  ;;  %v15184_v63 = vmov 0  }
 0x247   : > { %6701 = vmatmul.mubr.bf16.gmra.mrb[252].mxu0 %v12136_v0  ;;  %5397 = vmatprep.mubr.bf16.mxu1 %v12142_v1  ;;  %v12228_v0 = vld [vmem:[%s12816_s21 + $0x3b0] ss:$36 sps:$4 sm:$0xff]   ;;  %v12229_v1 = vld [vmem:[%s12816_s21 + $0x3c0] ss:$36 sps:$4 sm:$0xff]  }
 0x248   : > { %6743 = vmatprep.mubr.bf16.mxu0 %v12145_v2  ;;  %8737 = vmatprep.subr.bf16.mxu1 %v15184_v63  ;;  %v12230_v2 = vld [vmem:[%s12816_s21 + $0x3fc] ss:$36 sps:$4 sm:$0xff]  }
 0x24e   : > { %5398 = vmatmul.mubr.bf16.vlgmr.msra.gmra.mrb[0].mxu1 %v12140_v3  ;;  %v12232_v3 = vld [vmem:[%s12816_s21 + $0x40c] ss:$36 sps:$4 sm:$0xff]  }
 0x24f   : > { %6744 = vmatmul.mubr.bf16.vlgmr.msra.gmra.mrb[0].mxu0 %v12143_v4  ;;  %5407 = vmatprep.mubr.bf16.mxu1 %v12149_v6  ;;  %v12234_v4 = vld [vmem:[%s12816_s21 + $0x3f8] ss:$36 sps:$4 sm:$0xff]   ;;  %v12236_v6 = vld [vmem:[%s12816_s21 + $0x444] ss:$36 sps:$4 sm:$0xff]  }
 0x250   : > { %7385 = vmatpush1.bf16.msra.mxu0 %v12146_v5  ;;  %6753 = vmatprep.mubr.bf16.mxu0 %v12151_v7  ;;  %v12235_v5 = vld [vmem:[%s12816_s21 + $0x408] ss:$36 sps:$4 sm:$0xff]   ;;  %v12238_v7 = vld [vmem:[%s12816_s21 + $0x454] ss:$36 sps:$4 sm:$0xff]  }
 0x251   : > { %7386 = vmatprep.subr.bf16.mxu0 %v12199_v8  ;;  %8738 = vmatpush1.bf16.msra.mxu1 %v12324_v62  ;;  %v12240_v8 = vld [vmem:[%s12816_s21 + $0x440] ss:$36 sps:$4 sm:$0xff]  }
 0x252   : > { %8739 = vmatprep.subr.bf16.mxu1 %v15184_v63 }
 0x254   : > { %7387 = vmatpush1.bf16.msra.mxu0 %v12197_v9  ;;  %v12241_v9 = vld [vmem:[%s12816_s21 + $0x450] ss:$36 sps:$4 sm:$0xff]  }
 0x255   : > { %7388 = vmatprep.subr.bf16.mxu0 %v12250_v10  ;;  %v12242_v10 = vld [vmem:[%s12816_s21 + $0x48c] ss:$36 sps:$4 sm:$0xff]  }
 0x256   : > { %5408 = vmatmul.mubr.bf16.gmra.mrb[4].mxu1 %v12153_v11  ;;  %v12244_v11 = vld [vmem:[%s12816_s21 + $0x49c] ss:$36 sps:$4 sm:$0xff]  }
 0x257   : > { %6754 = vmatmul.mubr.bf16.gmra.mrb[4].mxu0 %v12154_v12  ;;  %5417 = vmatprep.mubr.bf16.mxu1 %v12155_v13  ;;  %v12246_v12 = vld [vmem:[%s12816_s21 + $0x488] ss:$36 sps:$4 sm:$0xff]   ;;  %v12247_v13 = vld [vmem:[%s12816_s21 + $0x498] ss:$36 sps:$4 sm:$0xff]  }
 0x258   : > { %6763 = vmatprep.mubr.bf16.mxu0 %v12157_v14  ;;  %7389 = vmatpush1.bf16.msra.mxu0 %v12248_v15  ;;  %v12251_v14 = vld [vmem:[%s12816_s21 + $0x4d4] ss:$36 sps:$4 sm:$0xff]   ;;  %v12253_v15 = vld [vmem:[%s12816_s21 + $0x4e4] ss:$36 sps:$4 sm:$0xff]  }
 0x259   : > { %7390 = vmatprep.subr.bf16.mxu0 %v12301_v45  ;;  %v12293_v45 = vld [vmem:[%s12816_s21 + $0x6cc] ss:$36 sps:$4 sm:$0xff]  }
 0x25c   : > { %7391 = vmatpush1.bf16.msra.mxu0 %v12299_v44  ;;  %v12292_v44 = vld [vmem:[%s12816_s21 + $0x690] ss:$36 sps:$4 sm:$0xff]  }
 0x25e   : > { %5418 = vmatmul.mubr.bf16.gmra.mrb[8].mxu1 %v12159_v16  ;;  %v12351_v16 = vld [vmem:[%s15179_s1 + $0x440] ss:$8 sps:$4 sm:$0xff]  }
 0x25f   : > { %6764 = vmatmul.mubr.bf16.gmra.mrb[8].mxu0 %v12160_v17  ;;  %5427 = vmatprep.mubr.bf16.mxu1 %v12161_v18  ;;  %v12353_v17 = vld [vmem:[%s15179_s1 + $0x444] ss:$8 sps:$4 sm:$0xff]   ;;  %v12255_v18 = vld [vmem:[%s12816_s21 + $0x4d0] ss:$36 sps:$4 sm:$0xff]  }
 0x260   : > { %6773 = vmatprep.mubr.bf16.mxu0 %v12163_v19  ;;  %7392 = vmatprep.subr.bf16.mxu0 %v12353_v17  ;;  %v12256_v19 = vld [vmem:[%s12816_s21 + $0x4e0] ss:$36 sps:$4 sm:$0xff]  }
 0x261   : > { %7393 = vmatpush1.bf16.msra.mxu0 %v12351_v16 }
 0x266   : > { %5428 = vmatmul.mubr.bf16.gmra.mrb[12].mxu1 %v12165_v20  ;;  %v12257_v20 = vld [vmem:[%s12816_s21 + $0x51c] ss:$36 sps:$4 sm:$0xff]  }
 0x267   : > { %6774 = vmatmul.mubr.bf16.gmra.mrb[12].mxu0 %v12166_v21  ;;  %5437 = vmatprep.mubr.bf16.mxu1 %v12167_v22  ;;  %v12259_v21 = vld [vmem:[%s12816_s21 + $0x52c] ss:$36 sps:$4 sm:$0xff]  }
 0x268   : > { %6783 = vmatprep.mubr.bf16.mxu0 %v12169_v23  ;;  %v12360_v22 = vld [vmem:[%s15181_s3 + $0x8] sm:$0xff]   ;;  %v12261_v23 = vld [vmem:[%s12816_s21 + $0x518] ss:$36 sps:$4 sm:$0xff]  }
 0x269   : > { %8740 = vmatpush1.bf16.msra.mxu1 %v12360_v22  ;;  %v12335_v22 = vld [vmem:[%s12816_s21 + $0x88c] ss:$36 sps:$4 sm:$0xff]  }
 0x26a   : > { %8741 = vmatprep.subr.bf16.mxu1 %v15184_v63 }
 0x26e   : > { %5438 = vmatmul.mubr.bf16.gmra.mrb[16].mxu1 %v12171_v24  ;;  %v12262_v24 = vld [vmem:[%s12816_s21 + $0x528] ss:$36 sps:$4 sm:$0xff]  }
 0x26f   : > { %6784 = vmatmul.mubr.bf16.gmra.mrb[16].mxu0 %v12172_v25  ;;  %5447 = vmatprep.mubr.bf16.mxu1 %v12173_v26  ;;  %v12263_v25 = vld [vmem:[%s12816_s21 + $0x564] ss:$36 sps:$4 sm:$0xff]   ;;  %v12265_v26 = vld [vmem:[%s12816_s21 + $0x574] ss:$36 sps:$4 sm:$0xff]  }
 0x270   : > { %6793 = vmatprep.mubr.bf16.mxu0 %v12175_v27  ;;  %v12267_v27 = vld [vmem:[%s12816_s21 + $0x560] ss:$36 sps:$4 sm:$0xff]  }
 0x276   : > { %5448 = vmatmul.mubr.bf16.gmra.mrb[20].mxu1 %v12177_v28  ;;  %v12268_v28 = vld [vmem:[%s12816_s21 + $0x570] ss:$36 sps:$4 sm:$0xff]  }
 0x277   : > { %6794 = vmatmul.mubr.bf16.gmra.mrb[20].mxu0 %v12178_v29  ;;  %5457 = vmatprep.mubr.bf16.mxu1 %v12179_v30  ;;  %v12269_v29 = vld [vmem:[%s12816_s21 + $0x5ac] ss:$36 sps:$4 sm:$0xff]   ;;  %v12271_v30 = vld [vmem:[%s12816_s21 + $0x5bc] ss:$36 sps:$4 sm:$0xff]  }
 0x278   : > { %6803 = vmatprep.mubr.bf16.mxu0 %v12181_v31  ;;  %v12273_v31 = vld [vmem:[%s12816_s21 + $0x5a8] ss:$36 sps:$4 sm:$0xff]  }
 0x27e   : > { %5458 = vmatmul.mubr.bf16.gmra.mrb[24].mxu1 %v12183_v32  ;;  %v12274_v32 = vld [vmem:[%s12816_s21 + $0x5b8] ss:$36 sps:$4 sm:$0xff]  }
 0x27f   : > { %6804 = vmatmul.mubr.bf16.gmra.mrb[24].mxu0 %v12184_v33  ;;  %5467 = vmatprep.mubr.bf16.mxu1 %v12185_v34  ;;  %v12275_v33 = vld [vmem:[%s12816_s21 + $0x5f4] ss:$36 sps:$4 sm:$0xff]   ;;  %v12277_v34 = vld [vmem:[%s12816_s21 + $0x604] ss:$36 sps:$4 sm:$0xff]  }
 0x280   : > { %6813 = vmatprep.mubr.bf16.mxu0 %v12187_v35  ;;  %v12279_v35 = vld [vmem:[%s12816_s21 + $0x5f0] ss:$36 sps:$4 sm:$0xff]  }
 0x286   : > { %5468 = vmatmul.mubr.bf16.gmra.mrb[28].mxu1 %v12189_v36  ;;  %v12280_v36 = vld [vmem:[%s12816_s21 + $0x600] ss:$36 sps:$4 sm:$0xff]  }
 0x287   : > { %6814 = vmatmul.mubr.bf16.gmra.mrb[28].mxu0 %v12190_v37  ;;  %5477 = vmatprep.mubr.bf16.mxu1 %v12191_v38  ;;  %v12281_v37 = vld [vmem:[%s12816_s21 + $0x63c] ss:$36 sps:$4 sm:$0xff]   ;;  %v12283_v38 = vld [vmem:[%s12816_s21 + $0x64c] ss:$36 sps:$4 sm:$0xff]  }
 0x288   : > { %6823 = vmatprep.mubr.bf16.mxu0 %v12193_v39  ;;  %v12285_v39 = vld [vmem:[%s12816_s21 + $0x638] ss:$36 sps:$4 sm:$0xff]  }
 0x28e   : > { %5478 = vmatmul.mubr.bf16.gmra.mrb[32].mxu1 %v12195_v40  ;;  %v12286_v40 = vld [vmem:[%s12816_s21 + $0x648] ss:$36 sps:$4 sm:$0xff]  }
 0x28f   : > { %6824 = vmatmul.mubr.bf16.gmra.mrb[32].mxu0 %v12196_v41  ;;  %5487 = vmatprep.mubr.bf16.mxu1 %v12200_v42  ;;  %v12287_v41 = vld [vmem:[%s12816_s21 + $0x684] ss:$36 sps:$4 sm:$0xff]   ;;  %v12289_v42 = vld [vmem:[%s12816_s21 + $0x694] ss:$36 sps:$4 sm:$0xff]  }
 0x290   : > { %6833 = vmatprep.mubr.bf16.mxu0 %v12202_v43  ;;  %v12291_v43 = vld [vmem:[%s12816_s21 + $0x680] ss:$36 sps:$4 sm:$0xff]  }
 0x296   : > { %5488 = vmatmul.mubr.bf16.gmra.mrb[36].mxu1 %v12204_v46  ;;  %v12295_v46 = vld [vmem:[%s12816_s21 + $0x6dc] ss:$36 sps:$4 sm:$0xff]  }
 0x297   : > { %6834 = vmatmul.mubr.bf16.gmra.mrb[36].mxu0 %v12205_v47  ;;  %5497 = vmatprep.mubr.bf16.mxu1 %v12206_v48  ;;  %v12391_v47 = vld [vmem:[%s15181_s3 + $0x10] sm:$0xff]   ;;  %v12297_v48 = vld [vmem:[%s12816_s21 + $0x6c8] ss:$36 sps:$4 sm:$0xff]  }
 0x298   : > { %6843 = vmatprep.mubr.bf16.mxu0 %v12208_v49  ;;  %8742 = vmatpush1.bf16.msra.mxu1 %v12391_v47  ;;  %v12298_v49 = vld [vmem:[%s12816_s21 + $0x6d8] ss:$36 sps:$4 sm:$0xff]  }
 0x299   : > { %8743 = vmatprep.subr.bf16.mxu1 %v15184_v63 }
 0x29e   : > { %5498 = vmatmul.mubr.bf16.gmra.mrb[40].mxu1 %v12210_v50  ;;  %v12302_v50 = vld [vmem:[%s12816_s21 + $0x714] ss:$36 sps:$4 sm:$0xff]  }
 0x29f   : > { %6844 = vmatmul.mubr.bf16.gmra.mrb[40].mxu0 %v12211_v51  ;;  %5507 = vmatprep.mubr.bf16.mxu1 %v12212_v52  ;;  %v12304_v51 = vld [vmem:[%s12816_s21 + $0x724] ss:$36 sps:$4 sm:$0xff]   ;;  %v12404_v52 = vld [vmem:[%s15179_s1 + $0x450] ss:$8 sps:$4 sm:$0xff]  }
 0x2a0   : > { %6853 = vmatprep.mubr.bf16.mxu0 %v12214_v53  ;;  %v12406_v53 = vld [vmem:[%s15179_s1 + $0x454] ss:$8 sps:$4 sm:$0xff]  }
 0x2a1   : > { %7394 = vmatprep.subr.bf16.mxu0 %v12406_v53  ;;  %v12359_v53 = vld [vmem:[%s12816_s21 + $0x960] ss:$36 sps:$4 sm:$0xff]  }
 0x2a2   : > { %7395 = vmatpush1.bf16.msra.mxu0 %v12404_v52  ;;  %v12358_v52 = vld [vmem:[%s12816_s21 + $0x950] ss:$36 sps:$4 sm:$0xff]  }
 0x2a6   : > { %5508 = vmatmul.mubr.bf16.gmra.mrb[44].mxu1 %v12216_v54  ;;  %v12306_v54 = vld [vmem:[%s12816_s21 + $0x710] ss:$36 sps:$4 sm:$0xff]  }
 0x2a7   : > { %6854 = vmatmul.mubr.bf16.gmra.mrb[44].mxu0 %v12217_v55  ;;  %5517 = vmatprep.mubr.bf16.mxu1 %v12218_v56  ;;  %v12307_v55 = vld [vmem:[%s12816_s21 + $0x720] ss:$36 sps:$4 sm:$0xff]  }
 0x2a8   : > { %6863 = vmatprep.mubr.bf16.mxu0 %v12220_v57  ;;  %v12308_v56 = vld [vmem:[%s12816_s21 + $0x75c] ss:$36 sps:$4 sm:$0xff]   ;;  %v12310_v57 = vld [vmem:[%s12816_s21 + $0x76c] ss:$36 sps:$4 sm:$0xff]  }
 0x2ae   : > { %5518 = vmatmul.mubr.bf16.gmra.mrb[48].mxu1 %v12222_v58  ;;  %v12312_v58 = vld [vmem:[%s12816_s21 + $0x758] ss:$36 sps:$4 sm:$0xff]  }
 0x2af   : > { %6864 = vmatmul.mubr.bf16.gmra.mrb[48].mxu0 %v12223_v59  ;;  %5527 = vmatprep.mubr.bf16.mxu1 %v12224_v60  ;;  %v12313_v59 = vld [vmem:[%s12816_s21 + $0x768] ss:$36 sps:$4 sm:$0xff]  }
 0x2b0   : > { %6873 = vmatprep.mubr.bf16.mxu0 %v12226_v61  ;;  %v12314_v60 = vld [vmem:[%s12816_s21 + $0x7a4] ss:$36 sps:$4 sm:$0xff]   ;;  %v12316_v61 = vld [vmem:[%s12816_s21 + $0x7b4] ss:$36 sps:$4 sm:$0xff]  }
 0x2b6   : > { %5528 = vmatmul.mubr.bf16.gmra.mrb[52].mxu1 %v12228_v0 }
 0x2b7   : > { %6874 = vmatmul.mubr.bf16.gmra.mrb[52].mxu0 %v12229_v1  ;;  %5537 = vmatprep.mubr.bf16.mxu1 %v12230_v2  ;;  %v12318_v1 = vld [vmem:[%s12816_s21 + $0x7a0] ss:$36 sps:$4 sm:$0xff]   ;;  %v12319_v2 = vld [vmem:[%s12816_s21 + $0x7b0] ss:$36 sps:$4 sm:$0xff]  }
 0x2b8   : > { %6883 = vmatprep.mubr.bf16.mxu0 %v12232_v3 }
 0x2be   : > { %5538 = vmatmul.mubr.bf16.gmra.mrb[56].mxu1 %v12234_v4  ;;  %v12320_v4 = vld [vmem:[%s12816_s21 + $0x7ec] ss:$36 sps:$4 sm:$0xff]  }
 0x2bf   : > { %6884 = vmatmul.mubr.bf16.gmra.mrb[56].mxu0 %v12235_v5  ;;  %5547 = vmatprep.mubr.bf16.mxu1 %v12236_v6  ;;  %v12322_v5 = vld [vmem:[%s12816_s21 + $0x7fc] ss:$36 sps:$4 sm:$0xff]  }
 0x2c0   : > { %6893 = vmatprep.mubr.bf16.mxu0 %v12238_v7 }
 0x2c6   : > { %5548 = vmatmul.mubr.bf16.gmra.mrb[60].mxu1 %v12240_v8 }
 0x2c7   : > { %6894 = vmatmul.mubr.bf16.gmra.mrb[60].mxu0 %v12241_v9  ;;  %5557 = vmatprep.mubr.bf16.mxu1 %v12242_v10  ;;  %v12325_v9 = vld [vmem:[%s12816_s21 + $0x7e8] ss:$36 sps:$4 sm:$0xff]   ;;  %v12326_v10 = vld [vmem:[%s12816_s21 + $0x7f8] ss:$36 sps:$4 sm:$0xff]  }
 0x2c8   : > { %6903 = vmatprep.mubr.bf16.mxu0 %v12244_v11 }
 0x2ce   : > { %5558 = vmatmul.mubr.bf16.gmra.mrb[64].mxu1 %v12246_v12  ;;  %v12327_v12 = vld [vmem:[%s12816_s21 + $0x834] ss:$36 sps:$4 sm:$0xff]  }
 0x2cf   : > { %6904 = vmatmul.mubr.bf16.gmra.mrb[64].mxu0 %v12247_v13  ;;  %5567 = vmatprep.mubr.bf16.mxu1 %v12251_v14  ;;  %v12329_v13 = vld [vmem:[%s12816_s21 + $0x844] ss:$36 sps:$4 sm:$0xff]  }
 0x2d0   : > { %6913 = vmatprep.mubr.bf16.mxu0 %v12253_v15  ;;  %v12429_v15 = vld [vmem:[%s15181_s3 + $0x18] sm:$0xff]  }
 0x2d1   : > { %8744 = vmatpush1.bf16.msra.mxu1 %v12429_v15  ;;  %v12372_v15 = vld [vmem:[%s12816_s21 + $0x9f0] ss:$36 sps:$4 sm:$0xff]  }
 0x2d2   : > { %8745 = vmatprep.subr.bf16.mxu1 %v15184_v63 }
 0x2d6   : > { %5568 = vmatmul.mubr.bf16.gmra.mrb[68].mxu1 %v12255_v18  ;;  %v12331_v18 = vld [vmem:[%s12816_s21 + $0x830] ss:$36 sps:$4 sm:$0xff]  }
 0x2d7   : > { %6914 = vmatmul.mubr.bf16.gmra.mrb[68].mxu0 %v12256_v19  ;;  %5577 = vmatprep.mubr.bf16.mxu1 %v12257_v20  ;;  %v12332_v19 = vld [vmem:[%s12816_s21 + $0x840] ss:$36 sps:$4 sm:$0xff]  }
 0x2d8   : > { %6923 = vmatprep.mubr.bf16.mxu0 %v12259_v21  ;;  %v12333_v21 = vld [vmem:[%s12816_s21 + $0x87c] ss:$36 sps:$4 sm:$0xff]  }
 0x2de   : > { %5578 = vmatmul.mubr.bf16.gmra.mrb[72].mxu1 %v12261_v23 }
 0x2df   : > { %6924 = vmatmul.mubr.bf16.gmra.mrb[72].mxu0 %v12262_v24  ;;  %5587 = vmatprep.mubr.bf16.mxu1 %v12263_v25 }
 0x2e0   : > { %6933 = vmatprep.mubr.bf16.mxu0 %v12265_v26  ;;  %v12337_v26 = vld [vmem:[%s12816_s21 + $0x878] ss:$36 sps:$4 sm:$0xff]  }
 0x2e6   : > { %5588 = vmatmul.mubr.bf16.gmra.mrb[76].mxu1 %v12267_v27  ;;  %v12338_v27 = vld [vmem:[%s12816_s21 + $0x888] ss:$36 sps:$4 sm:$0xff]  }
 0x2e7   : > { %6934 = vmatmul.mubr.bf16.gmra.mrb[76].mxu0 %v12268_v28  ;;  %5597 = vmatprep.mubr.bf16.mxu1 %v12269_v29  ;;  %v12339_v29 = vld [vmem:[%s12816_s21 + $0x8c4] ss:$36 sps:$4 sm:$0xff]  }
 0x2e8   : > { %6943 = vmatprep.mubr.bf16.mxu0 %v12271_v30  ;;  %v12341_v30 = vld [vmem:[%s12816_s21 + $0x8d4] ss:$36 sps:$4 sm:$0xff]  }
 0x2ee   : > { %5598 = vmatmul.mubr.bf16.gmra.mrb[80].mxu1 %v12273_v31 }
 0x2ef   : > { %6944 = vmatmul.mubr.bf16.gmra.mrb[80].mxu0 %v12274_v32  ;;  %5607 = vmatprep.mubr.bf16.mxu1 %v12275_v33 }
 0x2f0   : > { %6953 = vmatprep.mubr.bf16.mxu0 %v12277_v34  ;;  %v12343_v34 = vld [vmem:[%s12816_s21 + $0x8c0] ss:$36 sps:$4 sm:$0xff]  }
 0x2f6   : > { %5608 = vmatmul.mubr.bf16.gmra.mrb[84].mxu1 %v12279_v35  ;;  %v12344_v35 = vld [vmem:[%s12816_s21 + $0x8d0] ss:$36 sps:$4 sm:$0xff]  }
 0x2f7   : > { %6954 = vmatmul.mubr.bf16.gmra.mrb[84].mxu0 %v12280_v36  ;;  %5617 = vmatprep.mubr.bf16.mxu1 %v12281_v37  ;;  %v12345_v37 = vld [vmem:[%s12816_s21 + $0x90c] ss:$36 sps:$4 sm:$0xff]  }
 0x2f8   : > { %6963 = vmatprep.mubr.bf16.mxu0 %v12283_v38  ;;  %v12347_v38 = vld [vmem:[%s12816_s21 + $0x91c] ss:$36 sps:$4 sm:$0xff]  }
 0x2fe   : > { %5618 = vmatmul.mubr.bf16.gmra.mrb[88].mxu1 %v12285_v39 }
 0x2ff   : > { %6964 = vmatmul.mubr.bf16.gmra.mrb[88].mxu0 %v12286_v40  ;;  %5627 = vmatprep.mubr.bf16.mxu1 %v12287_v41 }
 0x300   : > { %6973 = vmatprep.mubr.bf16.mxu0 %v12289_v42  ;;  %v12349_v42 = vld [vmem:[%s12816_s21 + $0x908] ss:$36 sps:$4 sm:$0xff]  }
 0x306   : > { %5628 = vmatmul.mubr.bf16.gmra.mrb[92].mxu1 %v12291_v43  ;;  %v12350_v43 = vld [vmem:[%s12816_s21 + $0x918] ss:$36 sps:$4 sm:$0xff]  }
 0x307   : > { %6974 = vmatmul.mubr.bf16.gmra.mrb[92].mxu0 %v12292_v44  ;;  %5637 = vmatprep.mubr.bf16.mxu1 %v12293_v45  ;;  %v12354_v45 = vld [vmem:[%s12816_s21 + $0x954] ss:$36 sps:$4 sm:$0xff]  }
 0x308   : > { %6983 = vmatprep.mubr.bf16.mxu0 %v12295_v46  ;;  %v12356_v46 = vld [vmem:[%s12816_s21 + $0x964] ss:$36 sps:$4 sm:$0xff]  }
 0x30e   : > { %5638 = vmatmul.mubr.bf16.gmra.mrb[96].mxu1 %v12297_v48  ;;  %v12456_v48 = vld [vmem:[%s15179_s1 + $0x460] ss:$8 sps:$4 sm:$0xff]  }
 0x30f   : > { %6984 = vmatmul.mubr.bf16.gmra.mrb[96].mxu0 %v12298_v49  ;;  %5647 = vmatprep.mubr.bf16.mxu1 %v12302_v50  ;;  %v12458_v49 = vld [vmem:[%s15179_s1 + $0x464] ss:$8 sps:$4 sm:$0xff]  }
 0x310   : > { %6993 = vmatprep.mubr.bf16.mxu0 %v12304_v51  ;;  %7396 = vmatprep.subr.bf16.mxu0 %v12458_v49  ;;  %v12385_v49 = vld [vmem:[%s12816_s21 + $0xabc] ss:$36 sps:$4 sm:$0xff]  }
 0x311   : > { %7397 = vmatpush1.bf16.msra.mxu0 %v12456_v48 }
 0x316   : > { %5648 = vmatmul.mubr.bf16.gmra.mrb[100].mxu1 %v12306_v54 }
 0x317   : > { %6994 = vmatmul.mubr.bf16.gmra.mrb[100].mxu0 %v12307_v55  ;;  %5657 = vmatprep.mubr.bf16.mxu1 %v12308_v56  ;;  %v12361_v55 = vld [vmem:[%s12816_s21 + $0x99c] ss:$36 sps:$4 sm:$0xff]   ;;  %v12363_v56 = vld [vmem:[%s12816_s21 + $0x9ac] ss:$36 sps:$4 sm:$0xff]  }
 0x318   : > { %7003 = vmatprep.mubr.bf16.mxu0 %v12310_v57 }
 0x31e   : > { %5658 = vmatmul.mubr.bf16.gmra.mrb[104].mxu1 %v12312_v58  ;;  %v12465_v58 = vld [vmem:[%s15181_s3 + $0x20] sm:$0xff]  }
 0x31f   : > { %7004 = vmatmul.mubr.bf16.gmra.mrb[104].mxu0 %v12313_v59  ;;  %5667 = vmatprep.mubr.bf16.mxu1 %v12314_v60 }
 0x320   : > { %7013 = vmatprep.mubr.bf16.mxu0 %v12316_v61  ;;  %8746 = vmatpush1.bf16.msra.mxu1 %v12465_v58  ;;  %v12365_v61 = vld [vmem:[%s12816_s21 + $0x998] ss:$36 sps:$4 sm:$0xff]  }
 0x321   : > { %v13482_v62 = vpop.f32.mrb[0].mxu1  ;;  %8747 = vmatprep.subr.bf16.mxu1 %v15184_v63  ;;  %v12389_v58 = vld [vmem:[%s12816_s21 + $0xab8] ss:$36 sps:$4 sm:$0xff]  }
 0x322   : > { %v13484_v0 = vpop.f32.mrb[1].mxu1 }
 0x323   : > { %v13488_v3 = vpop.f32.mrb[2].mxu1 }
 0x324   : > { %v13492_v6 = vpop.f32.mrb[3].mxu1 }
 0x326   : > { %5668 = vmatmul.mubr.bf16.gmra.mrb[108].mxu1 %v12318_v1  ;;  %v12366_v1 = vld [vmem:[%s12816_s21 + $0x9a8] ss:$36 sps:$4 sm:$0xff]  }
 0x327   : > { %7014 = vmatmul.mubr.bf16.gmra.mrb[108].mxu0 %v12319_v2  ;;  %5677 = vmatprep.mubr.bf16.mxu1 %v12320_v4  ;;  %v12367_v4 = vld [vmem:[%s12816_s21 + $0x9e4] ss:$36 sps:$4 sm:$0xff]  }
 0x328   : > { %7023 = vmatprep.mubr.bf16.mxu0 %v12322_v5  ;;  %v12369_v5 = vld [vmem:[%s12816_s21 + $0x9f4] ss:$36 sps:$4 sm:$0xff]  }
 0x329   : > { %v13494_v7 = vpop.f32.mrb[4].mxu1 }
 0x32a   : > { %v13496_v8 = vpop.f32.mrb[5].mxu1 }
 0x32b   : > { %v13500_v11 = vpop.f32.mrb[6].mxu1 }
 0x32c   : > { %v13504_v14 = vpop.f32.mrb[7].mxu1 }
 0x32e   : > { %5678 = vmatmul.mubr.bf16.gmra.mrb[112].mxu1 %v12325_v9 }
 0x32f   : > { %7024 = vmatmul.mubr.bf16.gmra.mrb[112].mxu0 %v12326_v10  ;;  %5687 = vmatprep.mubr.bf16.mxu1 %v12327_v12 }
 0x330   : > { %7033 = vmatprep.mubr.bf16.mxu0 %v12329_v13  ;;  %v12371_v13 = vld [vmem:[%s12816_s21 + $0x9e0] ss:$36 sps:$4 sm:$0xff]  }
 0x331   : > { %v13509_v16 = vpop.f32.mrb[8].mxu1 }
 0x332   : > { %v13512_v17 = vpop.f32.mrb[9].mxu1 }
 0x333   : > { %v13516_v20 = vpop.f32.mrb[10].mxu1 }
 0x334   : > { %v13520_v23 = vpop.f32.mrb[11].mxu1 }
 0x336   : > { %5688 = vmatmul.mubr.bf16.gmra.mrb[116].mxu1 %v12331_v18 }
 0x337   : > { %7034 = vmatmul.mubr.bf16.gmra.mrb[116].mxu0 %v12332_v19  ;;  %5697 = vmatprep.mubr.bf16.mxu1 %v12333_v21  ;;  %v12373_v19 = vld [vmem:[%s12816_s21 + $0xa2c] ss:$36 sps:$4 sm:$0xff]   ;;  %v12375_v21 = vld [vmem:[%s12816_s21 + $0xa3c] ss:$36 sps:$4 sm:$0xff]  }
 0x338   : > { %7043 = vmatprep.mubr.bf16.mxu0 %v12335_v22 }
 0x339   : > { %v13522_v24 = vpop.f32.mrb[12].mxu1 }
 0x33a   : > { %v13524_v25 = vpop.f32.mrb[13].mxu1 }
 0x33b   : > { %v13528_v28 = vpop.f32.mrb[14].mxu1 }
 0x33c   : > { %v13532_v31 = vpop.f32.mrb[15].mxu1 }
 0x33e   : > { %5698 = vmatmul.mubr.bf16.gmra.mrb[120].mxu1 %v12337_v26 }
 0x33f   : > { %7044 = vmatmul.mubr.bf16.gmra.mrb[120].mxu0 %v12338_v27  ;;  %5707 = vmatprep.mubr.bf16.mxu1 %v12339_v29  ;;  %v12377_v29 = vld [vmem:[%s12816_s21 + $0xa28] ss:$36 sps:$4 sm:$0xff]  }
 0x340   : > { %7053 = vmatprep.mubr.bf16.mxu0 %v12341_v30  ;;  %v12378_v30 = vld [vmem:[%s12816_s21 + $0xa38] ss:$36 sps:$4 sm:$0xff]  }
 0x341   : > { %v13534_v32 = vpop.f32.mrb[16].mxu1 }
 0x342   : > { %v13536_v33 = vpop.f32.mrb[17].mxu1 }
 0x343   : > { %v13540_v36 = vpop.f32.mrb[18].mxu1 }
 0x344   : > { %v13544_v39 = vpop.f32.mrb[19].mxu1 }
 0x346   : > { %5708 = vmatmul.mubr.bf16.gmra.mrb[124].mxu1 %v12343_v34 }
 0x347   : > { %7054 = vmatmul.mubr.bf16.gmra.mrb[124].mxu0 %v12344_v35  ;;  %5717 = vmatprep.mubr.bf16.mxu1 %v12345_v37  ;;  %v12379_v35 = vld [vmem:[%s12816_s21 + $0xa74] ss:$36 sps:$4 sm:$0xff]   ;;  %v12381_v37 = vld [vmem:[%s12816_s21 + $0xa84] ss:$36 sps:$4 sm:$0xff]  }
 0x348   : > { %7063 = vmatprep.mubr.bf16.mxu0 %v12347_v38 }
 0x349   : > { %v13546_v40 = vpop.f32.mrb[20].mxu1 }
 0x34a   : > { %v13548_v41 = vpop.f32.mrb[21].mxu1 }
 0x34b   : > { %v13552_v44 = vpop.f32.mrb[22].mxu1 }
 0x34c   : > { %v13556_v47 = vpop.f32.mrb[23].mxu1 }
 0x34e   : > { %5718 = vmatmul.mubr.bf16.gmra.mrb[128].mxu1 %v12349_v42 }
 0x34f   : > { %7064 = vmatmul.mubr.bf16.gmra.mrb[128].mxu0 %v12350_v43  ;;  %5727 = vmatprep.mubr.bf16.mxu1 %v12354_v45  ;;  %v12383_v45 = vld [vmem:[%s12816_s21 + $0xa70] ss:$36 sps:$4 sm:$0xff]  }
 0x350   : > { %7073 = vmatprep.mubr.bf16.mxu0 %v12356_v46  ;;  %v12384_v46 = vld [vmem:[%s12816_s21 + $0xa80] ss:$36 sps:$4 sm:$0xff]  }
 0x351   : > { %v13564_v50 = vpop.f32.mrb[24].mxu1 }
 0x352   : > { %v13566_v51 = vpop.f32.mrb[25].mxu1 }
 0x353   : > { %v13570_v54 = vpop.f32.mrb[26].mxu1 }
 0x354   : > { %v13574_v57 = vpop.f32.mrb[27].mxu1 }
 0x356   : > { %5728 = vmatmul.mubr.bf16.gmra.mrb[132].mxu1 %v12358_v52  ;;  %v12387_v52 = vld [vmem:[%s12816_s21 + $0xacc] ss:$36 sps:$4 sm:$0xff]  }
 0x357   : > { %7074 = vmatmul.mubr.bf16.gmra.mrb[132].mxu0 %v12359_v53  ;;  %5737 = vmatprep.mubr.bf16.mxu1 %v12361_v55 }
 0x358   : > { %7083 = vmatprep.mubr.bf16.mxu0 %v12363_v56 }
 0x359   : > { %v13579_v59 = vpop.f32.mrb[28].mxu1 }
 0x35a   : > { %v13582_v60 = vpop.f32.mrb[29].mxu1 }
 0x35b   : > { %v13586_v2 = vpop.f32.mrb[30].mxu1 }
 0x35c   : > { %v13590_v9 = vpop.f32.mrb[31].mxu1 }
 0x35e   : > { %5738 = vmatmul.mubr.bf16.gmra.mrb[136].mxu1 %v12365_v61  ;;  %v12390_v61 = vld [vmem:[%s12816_s21 + $0xac8] ss:$36 sps:$4 sm:$0xff]  }
 0x35f   : > { %7084 = vmatmul.mubr.bf16.gmra.mrb[136].mxu0 %v12366_v1  ;;  %5747 = vmatprep.mubr.bf16.mxu1 %v12367_v4  ;;  %v12392_v4 = vld [vmem:[%s12816_s21 + $0xb04] ss:$36 sps:$4 sm:$0xff]  }
 0x360   : > { %7093 = vmatprep.mubr.bf16.mxu0 %v12369_v5  ;;  %v12394_v5 = vld [vmem:[%s12816_s21 + $0xb14] ss:$36 sps:$4 sm:$0xff]  }
 0x361   : > { %v13592_v10 = vpop.f32.mrb[32].mxu1 }
 0x362   : > { %v13594_v12 = vpop.f32.mrb[33].mxu1 }
 0x363   : > { %v13598_v18 = vpop.f32.mrb[34].mxu1 }
 0x364   : > { %v13602_v22 = vpop.f32.mrb[35].mxu1 }
 0x366   : > { %5748 = vmatmul.mubr.bf16.gmra.mrb[140].mxu1 %v12371_v13 }
 0x367   : > { %7094 = vmatmul.mubr.bf16.gmra.mrb[140].mxu0 %v12372_v15  ;;  %5757 = vmatprep.mubr.bf16.mxu1 %v12373_v19 }
 0x368   : > { %7103 = vmatprep.mubr.bf16.mxu0 %v12375_v21  ;;  %v12396_v21 = vld [vmem:[%s12816_s21 + $0xb00] ss:$36 sps:$4 sm:$0xff]  }
 0x369   : > { %v13604_v26 = vpop.f32.mrb[36].mxu1 }
 0x36a   : > { %v13606_v27 = vpop.f32.mrb[37].mxu1 }
 0x36b   : > { %v13610_v34 = vpop.f32.mrb[38].mxu1 }
 0x36c   : > { %v13614_v38 = vpop.f32.mrb[39].mxu1 }
 0x36e   : > { %5758 = vmatmul.mubr.bf16.gmra.mrb[144].mxu1 %v12377_v29  ;;  %v12397_v29 = vld [vmem:[%s12816_s21 + $0xb10] ss:$36 sps:$4 sm:$0xff]  }
 0x36f   : > { %7104 = vmatmul.mubr.bf16.gmra.mrb[144].mxu0 %v12378_v30  ;;  %5767 = vmatprep.mubr.bf16.mxu1 %v12379_v35  ;;  %v12398_v35 = vld [vmem:[%s12816_s21 + $0xb4c] ss:$36 sps:$4 sm:$0xff]  }
 0x370   : > { %7113 = vmatprep.mubr.bf16.mxu0 %v12381_v37  ;;  %v12400_v37 = vld [vmem:[%s12816_s21 + $0xb5c] ss:$36 sps:$4 sm:$0xff]  }
 0x371   : > { %v13616_v42 = vpop.f32.mrb[40].mxu1 }
 0x372   : > { %v13618_v43 = vpop.f32.mrb[41].mxu1 }
 0x373   : > { %v13622_v48 = vpop.f32.mrb[42].mxu1 }
 0x374   : > { %v13626_v53 = vpop.f32.mrb[43].mxu1 }
 0x376   : > { %5768 = vmatmul.mubr.bf16.gmra.mrb[148].mxu1 %v12383_v45  ;;  %v12496_v45 = vld [vmem:[%s15181_s3 + $0x28] sm:$0xff]  }
 0x377   : > { %7114 = vmatmul.mubr.bf16.gmra.mrb[148].mxu0 %v12384_v46  ;;  %5777 = vmatprep.mubr.bf16.mxu1 %v12385_v49 }
 0x378   : > { %7123 = vmatprep.mubr.bf16.mxu0 %v12387_v52  ;;  %8748 = vmatpush1.bf16.msra.mxu1 %v12496_v45 }
 0x379   : > { %v13628_v55 = vpop.f32.mrb[44].mxu1  ;;  %8749 = vmatprep.subr.bf16.mxu1 %v15184_v63 }
 0x37a   : > { %v13630_v56 = vpop.f32.mrb[45].mxu1 }
 0x37b   : > { %v13634_v1 = vpop.f32.mrb[46].mxu1 }
 0x37c   : > { %15186 = vst [vmem:[#allocation2_spill] sm:$0xff] %v13634_v1  ;;  %v13638_v13 = vpop.f32.mrb[47].mxu1 }
 0x37d   : > { %15187 = vst [vmem:[#allocation3_spill] sm:$0xff] %v13638_v13 }
 0x37e   : > { %5778 = vmatmul.mubr.bf16.gmra.mrb[152].mxu1 %v12389_v58  ;;  %v12402_v58 = vld [vmem:[%s12816_s21 + $0xb48] ss:$36 sps:$4 sm:$0xff]  }
 0x37f   : > { %7124 = vmatmul.mubr.bf16.gmra.mrb[152].mxu0 %v12390_v61  ;;  %5787 = vmatprep.mubr.bf16.mxu1 %v12392_v4  ;;  %v12403_v61 = vld [vmem:[%s12816_s21 + $0xb58] ss:$36 sps:$4 sm:$0xff]  }
 0x380   : > { %7133 = vmatprep.mubr.bf16.mxu0 %v12394_v5  ;;  %v12407_v5 = vld [vmem:[%s12816_s21 + $0xb94] ss:$36 sps:$4 sm:$0xff]  }
 0x381   : > { %v13640_v15 = vpop.f32.mrb[48].mxu1 }
 0x382   : > { %15188 = vst [vmem:[#allocation4_spill] sm:$0xff] %v13640_v15  ;;  %v13642_v19 = vpop.f32.mrb[49].mxu1 }
 0x383   : > { %15189 = vst [vmem:[#allocation5_spill] sm:$0xff] %v13642_v19  ;;  %v13646_v30 = vpop.f32.mrb[50].mxu1 }
 0x384   : > { %15190 = vst [vmem:[#allocation6_spill] sm:$0xff] %v13646_v30  ;;  %v13653_v46 = vpop.f32.mrb[51].mxu1 }
 0x385   : > { %15191 = vst [vmem:[#allocation7_spill] sm:$0xff] %v13653_v46  ;;  %v12409_v46 = vld [vmem:[%s12816_s21 + $0xba4] ss:$36 sps:$4 sm:$0xff]  }
 0x386   : > { %5788 = vmatmul.mubr.bf16.gmra.mrb[156].mxu1 %v12396_v21 }
 0x387   : > { %7134 = vmatmul.mubr.bf16.gmra.mrb[156].mxu0 %v12397_v29  ;;  %5797 = vmatprep.mubr.bf16.mxu1 %v12398_v35  ;;  %v12509_v29 = vld [vmem:[%s15179_s1 + $0x470] ss:$8 sps:$4 sm:$0xff]   ;;  %v12511_v35 = vld [vmem:[%s15179_s1 + $0x474] ss:$8 sps:$4 sm:$0xff]  }
 0x388   : > { %7143 = vmatprep.mubr.bf16.mxu0 %v12400_v37  ;;  %7398 = vmatprep.subr.bf16.mxu0 %v12511_v35  ;;  %v12418_v35 = vld [vmem:[%s12816_s21 + $0xbe8] ss:$36 sps:$4 sm:$0xff]  }
 0x389   : > { %v13656_v49 = vpop.f32.mrb[52].mxu1  ;;  %7399 = vmatpush1.bf16.msra.mxu0 %v12509_v29  ;;  %v12417_v29 = vld [vmem:[%s12816_s21 + $0xbd8] ss:$36 sps:$4 sm:$0xff]  }
 0x38a   : > { %15192 = vst [vmem:[#allocation8_spill] sm:$0xff] %v13656_v49  ;;  %v13658_v52 = vpop.f32.mrb[53].mxu1 }
 0x38b   : > { %15193 = vst [vmem:[#allocation9_spill] sm:$0xff] %v13658_v52  ;;  %v13662_v4 = vpop.f32.mrb[54].mxu1 }
 0x38c   : > { %15194 = vst [vmem:[#allocation10_spill] sm:$0xff] %v13662_v4  ;;  %v13666_v21 = vpop.f32.mrb[55].mxu1  ;;  %v12415_v4 = vld [vmem:[%s12816_s21 + $0xbec] ss:$36 sps:$4 sm:$0xff]  }
 0x38d   : > { %15195 = vst [vmem:[#allocation11_spill] sm:$0xff] %v13666_v21  ;;  %v12413_v21 = vld [vmem:[%s12816_s21 + $0xbdc] ss:$36 sps:$4 sm:$0xff]  }
 0x38e   : > { %5798 = vmatmul.mubr.bf16.gmra.mrb[160].mxu1 %v12402_v58  ;;  %v12411_v58 = vld [vmem:[%s12816_s21 + $0xb90] ss:$36 sps:$4 sm:$0xff]  }
 0x38f   : > { %7144 = vmatmul.mubr.bf16.gmra.mrb[160].mxu0 %v12403_v61  ;;  %5807 = vmatprep.mubr.bf16.mxu1 %v12407_v5  ;;  %v12412_v61 = vld [vmem:[%s12816_s21 + $0xba0] ss:$36 sps:$4 sm:$0xff]  }
 0x390   : > { %7153 = vmatprep.mubr.bf16.mxu0 %v12409_v46 }
 0x391   : > { %v13674_v37 = vpop.f32.mrb[56].mxu1 }
 0x392   : > { %15196 = vst [vmem:[#allocation12_spill] sm:$0xff] %v13674_v37  ;;  %v13676_v45 = vpop.f32.mrb[57].mxu1  ;;  %v12421_v37 = vld [vmem:[%s12816_s21 + $0xc34] ss:$36 sps:$4 sm:$0xff]  }
 0x393   : > { %15197 = vst [vmem:[#allocation13_spill] sm:$0xff] %v13676_v45  ;;  %v13680_v63 = vpop.f32.mrb[58].mxu1 }
 0x394   : > { %15198 = vst [vmem:[#allocation14_spill] sm:$0xff] %v13680_v63  ;;  %v13684_v52 = vpop.f32.mrb[59].mxu1  ;;  %v12419_v63 = vld [vmem:[%s12816_s21 + $0xc24] ss:$36 sps:$4 sm:$0xff]  }
 0x395   : > { %15199 = vst [vmem:[#allocation15_spill] sm:$0xff] %v13684_v52 }
 0x396   : > { %5808 = vmatmul.mubr.bf16.gmra.mrb[164].mxu1 %v12411_v58  ;;  %v12423_v58 = vld [vmem:[%s12816_s21 + $0xc20] ss:$36 sps:$4 sm:$0xff]  }
 0x397   : > { %7154 = vmatmul.mubr.bf16.gmra.mrb[164].mxu0 %v12412_v61  ;;  %5817 = vmatprep.mubr.bf16.mxu1 %v12413_v21  ;;  %v12424_v61 = vld [vmem:[%s12816_s21 + $0xc30] ss:$36 sps:$4 sm:$0xff]  }
 0x398   : > { %7163 = vmatprep.mubr.bf16.mxu0 %v12415_v4 }
 0x399   : > { %v13686_v46 = vpop.f32.mrb[60].mxu1 }
 0x39a   : > { %15200 = vst [vmem:[#allocation16_spill] sm:$0xff] %v13686_v46  ;;  %v13688_v5 = vpop.f32.mrb[61].mxu1  ;;  %v12427_v46 = vld [vmem:[%s12816_s21 + $0xc7c] ss:$36 sps:$4 sm:$0xff]  }
 0x39b   : > { %15201 = vst [vmem:[#allocation17_spill] sm:$0xff] %v13688_v5  ;;  %v13692_v45 = vpop.f32.mrb[62].mxu1 }
 0x39c   : > { %15202 = vst [vmem:[#allocation18_spill] sm:$0xff] %v13692_v45  ;;  %v13696_v49 = vpop.f32.mrb[63].mxu1  ;;  %v12425_v45 = vld [vmem:[%s12816_s21 + $0xc6c] ss:$36 sps:$4 sm:$0xff]  }
 0x39d   : > { %15203 = vst [vmem:[#allocation19_spill] sm:$0xff] %v13696_v49 }
 0x39e   : > { %5818 = vmatmul.mubr.bf16.gmra.mrb[168].mxu1 %v12417_v29  ;;  %v12430_v29 = vld [vmem:[%s12816_s21 + $0xc68] ss:$36 sps:$4 sm:$0xff]  }
 0x39f   : > { %7164 = vmatmul.mubr.bf16.gmra.mrb[168].mxu0 %v12418_v35  ;;  %5827 = vmatprep.mubr.bf16.mxu1 %v12419_v63  ;;  %v12431_v35 = vld [vmem:[%s12816_s21 + $0xc78] ss:$36 sps:$4 sm:$0xff]  }
 0x3a0   : > { %7173 = vmatprep.mubr.bf16.mxu0 %v12421_v37 }
 0x3a1   : > { %v13698_v4 = vpop.f32.mrb[64].mxu1 }
 0x3a2   : > { %15204 = vst [vmem:[#allocation20_spill] sm:$0xff] %v13698_v4  ;;  %v13700_v21 = vpop.f32.mrb[65].mxu1  ;;  %v12434_v4 = vld [vmem:[%s12816_s21 + $0xcc4] ss:$36 sps:$4 sm:$0xff]  }
 0x3a3   : > { %15205 = vst [vmem:[#allocation21_spill] sm:$0xff] %v13700_v21  ;;  %v13704_v5 = vpop.f32.mrb[66].mxu1 }
 0x3a4   : > { %15206 = vst [vmem:[#allocation22_spill] sm:$0xff] %v13704_v5  ;;  %v13708_v52 = vpop.f32.mrb[67].mxu1  ;;  %v12432_v5 = vld [vmem:[%s12816_s21 + $0xcb4] ss:$36 sps:$4 sm:$0xff]  }
 0x3a5   : > { %15207 = vst [vmem:[#allocation23_spill] sm:$0xff] %v13708_v52  ;;  %v12446_v52 = vld [vmem:[%s12816_s21 + $0xd54] ss:$36 sps:$4 sm:$0xff]  }
 0x3a6   : > { %5828 = vmatmul.mubr.bf16.gmra.mrb[172].mxu1 %v12423_v58  ;;  %v15213_v58 = vmov 0  }
 0x3a7   : > { %7174 = vmatmul.mubr.bf16.gmra.mrb[172].mxu0 %v12424_v61  ;;  %5837 = vmatprep.mubr.bf16.mxu1 %v12425_v45  ;;  %v12534_v45 = vld [vmem:[%s15181_s3 + $0x30] sm:$0xff]  }
 0x3a8   : > { %7183 = vmatprep.mubr.bf16.mxu0 %v12427_v46  ;;  %8750 = vmatpush1.bf16.msra.mxu1 %v12534_v45  ;;  %v12442_v45 = vld [vmem:[%s12816_s21 + $0xcf8] ss:$36 sps:$4 sm:$0xff]  }
 0x3a9   : > { %v13710_v63 = vpop.f32.mrb[68].mxu1  ;;  %8751 = vmatprep.subr.bf16.mxu1 %v15213_v58 }
 0x3aa   : > { %15208 = vst [vmem:[#allocation24_spill] sm:$0xff] %v13710_v63  ;;  %v13712_v37 = vpop.f32.mrb[69].mxu1  ;;  %v12438_v63 = vld [vmem:[%s12816_s21 + $0xcfc] ss:$36 sps:$4 sm:$0xff]  }
 0x3ab   : > { %15209 = vst [vmem:[#allocation25_spill] sm:$0xff] %v13712_v37  ;;  %v13716_v21 = vpop.f32.mrb[70].mxu1 }
 0x3ac   : > { %15210 = vst [vmem:[#allocation26_spill] sm:$0xff] %v13716_v21  ;;  %v13720_v49 = vpop.f32.mrb[71].mxu1  ;;  %v12436_v21 = vld [vmem:[%s12816_s21 + $0xcb0] ss:$36 sps:$4 sm:$0xff]  }
 0x3ad   : > { %15211 = vst [vmem:[#allocation27_spill] sm:$0xff] %v13720_v49  ;;  %v12437_v49 = vld [vmem:[%s12816_s21 + $0xcc0] ss:$36 sps:$4 sm:$0xff]  }
 0x3ae   : > { %5838 = vmatmul.mubr.bf16.gmra.mrb[176].mxu1 %v12430_v29  ;;  %v12440_v29 = vld [vmem:[%s12816_s21 + $0xd0c] ss:$36 sps:$4 sm:$0xff]  }
 0x3af   : > { %7184 = vmatmul.mubr.bf16.gmra.mrb[176].mxu0 %v12431_v35  ;;  %5847 = vmatprep.mubr.bf16.mxu1 %v12432_v5 }
 0x3b0   : > { %7193 = vmatprep.mubr.bf16.mxu0 %v12434_v4 }
 0x3b1   : > { %v13725_v46 = vpop.f32.mrb[72].mxu1 }
 0x3b2   : > { %15212 = vst [vmem:[#allocation28_spill] sm:$0xff] %v13725_v46  ;;  %v13728_v61 = vpop.f32.mrb[73].mxu1 }
 0x3b3   : > { %15214 = vst [vmem:[#allocation29_spill] sm:$0xff] %v13728_v61  ;;  %v13732_v37 = vpop.f32.mrb[74].mxu1  ;;  %v12443_v61 = vld [vmem:[%s12816_s21 + $0xd08] ss:$36 sps:$4 sm:$0xff]  }
 0x3b4   : > { %15215 = vst [vmem:[#allocation30_spill] sm:$0xff] %v13732_v37  ;;  %v13736_v35 = vpop.f32.mrb[75].mxu1  ;;  %v12444_v37 = vld [vmem:[%s12816_s21 + $0xd44] ss:$36 sps:$4 sm:$0xff]  }
 0x3b5   : > { %15216 = vst [vmem:[#allocation31_spill] sm:$0xff] %v13736_v35 }
 0x3b6   : > { %5848 = vmatmul.mubr.bf16.gmra.mrb[180].mxu1 %v12436_v21 }
 0x3b7   : > { %7194 = vmatmul.mubr.bf16.gmra.mrb[180].mxu0 %v12437_v49  ;;  %5857 = vmatprep.mubr.bf16.mxu1 %v12438_v63  ;;  %v12448_v63 = vld [vmem:[%s12816_s21 + $0xd40] ss:$36 sps:$4 sm:$0xff]  }
 0x3b8   : > { %7203 = vmatprep.mubr.bf16.mxu0 %v12440_v29  ;;  %v12449_v29 = vld [vmem:[%s12816_s21 + $0xd50] ss:$36 sps:$4 sm:$0xff]  }
 0x3b9   : > { %v13738_v5 = vpop.f32.mrb[76].mxu1 }
 0x3ba   : > { %15217 = vst [vmem:[#allocation32_spill] sm:$0xff] %v13738_v5  ;;  %v13740_v4 = vpop.f32.mrb[77].mxu1  ;;  %v12452_v5 = vld [vmem:[%s12816_s21 + $0xd9c] ss:$36 sps:$4 sm:$0xff]  }
 0x3bb   : > { %15218 = vst [vmem:[#allocation33_spill] sm:$0xff] %v13740_v4  ;;  %v13744_v46 = vpop.f32.mrb[78].mxu1 }
 0x3bc   : > { %15219 = vst [vmem:[#allocation34_spill] sm:$0xff] %v13744_v46  ;;  %v13748_v30 = vpop.f32.mrb[79].mxu1  ;;  %v12450_v46 = vld [vmem:[%s12816_s21 + $0xd8c] ss:$36 sps:$4 sm:$0xff]  }
 0x3bd   : > { %15220 = vst [vmem:[#allocation35_spill] sm:$0xff] %v13748_v30 }
 0x3be   : > { %5858 = vmatmul.mubr.bf16.gmra.mrb[184].mxu1 %v12442_v45  ;;  %v12455_v45 = vld [vmem:[%s12816_s21 + $0xd98] ss:$36 sps:$4 sm:$0xff]  }
 0x3bf   : > { %7204 = vmatmul.mubr.bf16.gmra.mrb[184].mxu0 %v12443_v61  ;;  %5867 = vmatprep.mubr.bf16.mxu1 %v12444_v37  ;;  %v12454_v61 = vld [vmem:[%s12816_s21 + $0xd88] ss:$36 sps:$4 sm:$0xff]  }
 0x3c0   : > { %7213 = vmatprep.mubr.bf16.mxu0 %v12446_v52 }
 0x3c1   : > { %v13750_v49 = vpop.f32.mrb[80].mxu1 }
 0x3c2   : > { %15221 = vst [vmem:[#allocation36_spill] sm:$0xff] %v13750_v49  ;;  %v13752_v21 = vpop.f32.mrb[81].mxu1  ;;  %v12461_v49 = vld [vmem:[%s12816_s21 + $0xde4] ss:$36 sps:$4 sm:$0xff]  }
 0x3c3   : > { %15222 = vst [vmem:[#allocation37_spill] sm:$0xff] %v13752_v21  ;;  %v13756_v4 = vpop.f32.mrb[82].mxu1 }
 0x3c4   : > { %15223 = vst [vmem:[#allocation38_spill] sm:$0xff] %v13756_v4  ;;  %v13760_v35 = vpop.f32.mrb[83].mxu1  ;;  %v12459_v4 = vld [vmem:[%s12816_s21 + $0xdd4] ss:$36 sps:$4 sm:$0xff]  }
 0x3c5   : > { %15224 = vst [vmem:[#allocation39_spill] sm:$0xff] %v13760_v35 }
 0x3c6   : > { %5868 = vmatmul.mubr.bf16.gmra.mrb[188].mxu1 %v12448_v63  ;;  %v12463_v63 = vld [vmem:[%s12816_s21 + $0xdd0] ss:$36 sps:$4 sm:$0xff]  }
 0x3c7   : > { %7214 = vmatmul.mubr.bf16.gmra.mrb[188].mxu0 %v12449_v29  ;;  %5877 = vmatprep.mubr.bf16.mxu1 %v12450_v46  ;;  %v12464_v29 = vld [vmem:[%s12816_s21 + $0xde0] ss:$36 sps:$4 sm:$0xff]  }
 0x3c8   : > { %7223 = vmatprep.mubr.bf16.mxu0 %v12452_v5 }
 0x3c9   : > { %v13762_v52 = vpop.f32.mrb[84].mxu1 }
 0x3ca   : > { %15225 = vst [vmem:[#allocation40_spill] sm:$0xff] %v13762_v52  ;;  %v13764_v37 = vpop.f32.mrb[85].mxu1  ;;  %v12468_v52 = vld [vmem:[%s12816_s21 + $0xe2c] ss:$36 sps:$4 sm:$0xff]  }
 0x3cb   : > { %15226 = vst [vmem:[#allocation41_spill] sm:$0xff] %v13764_v37  ;;  %v13768_v21 = vpop.f32.mrb[86].mxu1 }
 0x3cc   : > { %15227 = vst [vmem:[#allocation42_spill] sm:$0xff] %v13768_v21  ;;  %v13772_v30 = vpop.f32.mrb[87].mxu1  ;;  %v12466_v21 = vld [vmem:[%s12816_s21 + $0xe1c] ss:$36 sps:$4 sm:$0xff]  }
 0x3cd   : > { %15228 = vst [vmem:[#allocation43_spill] sm:$0xff] %v13772_v30 }
 0x3ce   : > { %5878 = vmatmul.mubr.bf16.gmra.mrb[192].mxu1 %v12454_v61 }
 0x3cf   : > { %7224 = vmatmul.mubr.bf16.gmra.mrb[192].mxu0 %v12455_v45  ;;  %5887 = vmatprep.mubr.bf16.mxu1 %v12459_v4  ;;  %v12557_v4 = vld [vmem:[%s15181_s3 + $0x38] sm:$0xff]  }
 0x3d0   : > { %7233 = vmatprep.mubr.bf16.mxu0 %v12461_v49  ;;  %8752 = vmatpush1.bf16.msra.mxu1 %v12557_v4  ;;  %v12470_v45 = vld [vmem:[%s12816_s21 + $0xe18] ss:$36 sps:$4 sm:$0xff]   ;;  %v12476_v4 = vld [vmem:[%s12816_s21 + $0xe60] ss:$36 sps:$4 sm:$0xff]  }
 0x3d1   : > { %v13774_v46 = vpop.f32.mrb[88].mxu1  ;;  %8753 = vmatprep.subr.bf16.mxu1 %v15213_v58 }
 0x3d2   : > { %15229 = vst [vmem:[#allocation44_spill] sm:$0xff] %v13774_v46  ;;  %v13776_v5 = vpop.f32.mrb[89].mxu1  ;;  %v12480_v46 = vld [vmem:[%s12816_s21 + $0xebc] ss:$36 sps:$4 sm:$0xff]  }
 0x3d3   : > { %15230 = vst [vmem:[#allocation45_spill] sm:$0xff] %v13776_v5  ;;  %v13780_v37 = vpop.f32.mrb[90].mxu1 }
 0x3d4   : > { %15231 = vst [vmem:[#allocation46_spill] sm:$0xff] %v13780_v37  ;;  %v13784_v35 = vpop.f32.mrb[91].mxu1  ;;  %v12474_v37 = vld [vmem:[%s12816_s21 + $0xe74] ss:$36 sps:$4 sm:$0xff]  }
 0x3d5   : > { %15232 = vst [vmem:[#allocation47_spill] sm:$0xff] %v13784_v35  ;;  %v12472_v35 = vld [vmem:[%s12816_s21 + $0xe64] ss:$36 sps:$4 sm:$0xff]  }
 0x3d6   : > { %5888 = vmatmul.mubr.bf16.gmra.mrb[196].mxu1 %v12463_v63  ;;  %v12471_v63 = vld [vmem:[%s12816_s21 + $0xe28] ss:$36 sps:$4 sm:$0xff]  }
 0x3d7   : > { %7234 = vmatmul.mubr.bf16.gmra.mrb[196].mxu0 %v12464_v29  ;;  %5897 = vmatprep.mubr.bf16.mxu1 %v12466_v21 }
 0x3d8   : > { %7243 = vmatprep.mubr.bf16.mxu0 %v12468_v52 }
 0x3d9   : > { %v13789_v49 = vpop.f32.mrb[92].mxu1 }
 0x3da   : > { %15233 = vst [vmem:[#allocation48_spill] sm:$0xff] %v13789_v49  ;;  %v13792_v61 = vpop.f32.mrb[93].mxu1 }
 0x3db   : > { %15234 = vst [vmem:[#allocation49_spill] sm:$0xff] %v13792_v61  ;;  %v13796_v29 = vpop.f32.mrb[94].mxu1  ;;  %v12477_v61 = vld [vmem:[%s12816_s21 + $0xe70] ss:$36 sps:$4 sm:$0xff]  }
 0x3dc   : > { %15235 = vst [vmem:[#allocation50_spill] sm:$0xff] %v13796_v29  ;;  %v13800_v5 = vpop.f32.mrb[95].mxu1  ;;  %v12478_v29 = vld [vmem:[%s12816_s21 + $0xeac] ss:$36 sps:$4 sm:$0xff]  }
 0x3dd   : > { %15236 = vst [vmem:[#allocation51_spill] sm:$0xff] %v13800_v5 }
 0x3de   : > { %5898 = vmatmul.mubr.bf16.gmra.mrb[200].mxu1 %v12470_v45  ;;  %v12482_v45 = vld [vmem:[%s12816_s21 + $0xea8] ss:$36 sps:$4 sm:$0xff]  }
 0x3df   : > { %7244 = vmatmul.mubr.bf16.gmra.mrb[200].mxu0 %v12471_v63  ;;  %5907 = vmatprep.mubr.bf16.mxu1 %v12472_v35  ;;  %v12483_v63 = vld [vmem:[%s12816_s21 + $0xeb8] ss:$36 sps:$4 sm:$0xff]  }
 0x3e0   : > { %7253 = vmatprep.mubr.bf16.mxu0 %v12474_v37 }
 0x3e1   : > { %v13802_v21 = vpop.f32.mrb[96].mxu1 }
 0x3e2   : > { %15237 = vst [vmem:[#allocation52_spill] sm:$0xff] %v13802_v21  ;;  %v13804_v52 = vpop.f32.mrb[97].mxu1  ;;  %v12486_v21 = vld [vmem:[%s12816_s21 + $0xf04] ss:$36 sps:$4 sm:$0xff]  }
 0x3e3   : > { %15238 = vst [vmem:[#allocation53_spill] sm:$0xff] %v13804_v52  ;;  %v13808_v49 = vpop.f32.mrb[98].mxu1 }
 0x3e4   : > { %15239 = vst [vmem:[#allocation54_spill] sm:$0xff] %v13808_v49  ;;  %v13812_v30 = vpop.f32.mrb[99].mxu1  ;;  %v12484_v49 = vld [vmem:[%s12816_s21 + $0xef4] ss:$36 sps:$4 sm:$0xff]  }
 0x3e5   : > { %15240 = vst [vmem:[#allocation55_spill] sm:$0xff] %v13812_v30 }
 0x3e6   : > { %5908 = vmatmul.mubr.bf16.gmra.mrb[204].mxu1 %v12476_v4  ;;  %v12489_v4 = vld [vmem:[%s12816_s21 + $0xf00] ss:$36 sps:$4 sm:$0xff]  }
 0x3e7   : > { %7254 = vmatmul.mubr.bf16.gmra.mrb[204].mxu0 %v12477_v61  ;;  %5917 = vmatprep.mubr.bf16.mxu1 %v12478_v29  ;;  %v12488_v29 = vld [vmem:[%s12816_s21 + $0xef0] ss:$36 sps:$4 sm:$0xff]  }
 0x3e8   : > { %7263 = vmatprep.mubr.bf16.mxu0 %v12480_v46 }
 0x3e9   : > { %v13814_v35 = vpop.f32.mrb[100].mxu1 }
 0x3ea   : > { %15241 = vst [vmem:[#allocation56_spill] sm:$0xff] %v13814_v35  ;;  %v13816_v37 = vpop.f32.mrb[101].mxu1  ;;  %v12492_v35 = vld [vmem:[%s12816_s21 + $0xf4c] ss:$36 sps:$4 sm:$0xff]  }
 0x3eb   : > { %15242 = vst [vmem:[#allocation57_spill] sm:$0xff] %v13816_v37  ;;  %v13820_v52 = vpop.f32.mrb[102].mxu1 }
 0x3ec   : > { %15243 = vst [vmem:[#allocation58_spill] sm:$0xff] %v13820_v52  ;;  %v13824_v5 = vpop.f32.mrb[103].mxu1  ;;  %v12490_v52 = vld [vmem:[%s12816_s21 + $0xf3c] ss:$36 sps:$4 sm:$0xff]  }
 0x3ed   : > { %15244 = vst [vmem:[#allocation59_spill] sm:$0xff] %v13824_v5 }
 0x3ee   : > { %5918 = vmatmul.mubr.bf16.gmra.mrb[208].mxu1 %v12482_v45  ;;  %v12494_v45 = vld [vmem:[%s12816_s21 + $0xf38] ss:$36 sps:$4 sm:$0xff]  }
 0x3ef   : > { %7264 = vmatmul.mubr.bf16.gmra.mrb[208].mxu0 %v12483_v63  ;;  %5927 = vmatprep.mubr.bf16.mxu1 %v12484_v49  ;;  %v12495_v63 = vld [vmem:[%s12816_s21 + $0xf48] ss:$36 sps:$4 sm:$0xff]  }
 0x3f0   : > { %7273 = vmatprep.mubr.bf16.mxu0 %v12486_v21 }
 0x3f1   : > { %v13826_v46 = vpop.f32.mrb[104].mxu1 }
 0x3f2   : > { %15245 = vst [vmem:[#allocation60_spill] sm:$0xff] %v13826_v46  ;;  %v13828_v61 = vpop.f32.mrb[105].mxu1  ;;  %v12499_v46 = vld [vmem:[%s12816_s21 + $0xf94] ss:$36 sps:$4 sm:$0xff]  }
 0x3f3   : > { %15246 = vst [vmem:[#allocation61_spill] sm:$0xff] %v13828_v61  ;;  %v13832_v37 = vpop.f32.mrb[106].mxu1 }
 0x3f4   : > { %15247 = vst [vmem:[#allocation62_spill] sm:$0xff] %v13832_v37  ;;  %v13836_v30 = vpop.f32.mrb[107].mxu1  ;;  %v12497_v37 = vld [vmem:[%s12816_s21 + $0xf84] ss:$36 sps:$4 sm:$0xff]  }
 0x3f5   : > { %15248 = vst [vmem:[#allocation63_spill] sm:$0xff] %v13836_v30 }
 0x3f6   : > { %5928 = vmatmul.mubr.bf16.gmra.mrb[212].mxu1 %v12488_v29  ;;  %v12501_v29 = vld [vmem:[%s12816_s21 + $0xf80] ss:$36 sps:$4 sm:$0xff]  }
 0x3f7   : > { %7274 = vmatmul.mubr.bf16.gmra.mrb[212].mxu0 %v12489_v4  ;;  %5937 = vmatprep.mubr.bf16.mxu1 %v12490_v52  ;;  %v12502_v4 = vld [vmem:[%s12816_s21 + $0xf90] ss:$36 sps:$4 sm:$0xff]  }
 0x3f8   : > { %7283 = vmatprep.mubr.bf16.mxu0 %v12492_v35 }
 0x3f9   : > { %v13838_v49 = vpop.f32.mrb[108].mxu1 }
 0x3fa   : > { %15249 = vst [vmem:[#allocation64_spill] sm:$0xff] %v13838_v49  ;;  %v13840_v21 = vpop.f32.mrb[109].mxu1  ;;  %v12505_v49 = vld [vmem:[%s12816_s21 + $0xfdc] ss:$36 sps:$4 sm:$0xff]  }
 0x3fb   : > { %15250 = vst [vmem:[#allocation65_spill] sm:$0xff] %v13840_v21  ;;  %v13844_v61 = vpop.f32.mrb[110].mxu1 }
 0x3fc   : > { %15251 = vst [vmem:[#allocation66_spill] sm:$0xff] %v13844_v61  ;;  %v13848_v5 = vpop.f32.mrb[111].mxu1  ;;  %v12503_v61 = vld [vmem:[%s12816_s21 + $0xfcc] ss:$36 sps:$4 sm:$0xff]  }
 0x3fd   : > { %15252 = vst [vmem:[#allocation67_spill] sm:$0xff] %v13848_v5  ;;  %v12520_v5 = vld [vmem:[%s12816_s21 + $0x106c] ss:$36 sps:$4 sm:$0xff]  }
 0x3fe   : > { %5938 = vmatmul.mubr.bf16.gmra.mrb[216].mxu1 %v12494_v45  ;;  %v12563_v45 = vld [vmem:[%s15181_s3 + $0x40] sm:$0xff]  }
 0x3ff   : > { %7284 = vmatmul.mubr.bf16.gmra.mrb[216].mxu0 %v12495_v63  ;;  %5947 = vmatprep.mubr.bf16.mxu1 %v12497_v37 }
 0x400   : > { %7293 = vmatprep.mubr.bf16.mxu0 %v12499_v46  ;;  %8754 = vmatpush1.bf16.msra.mxu1 %v12563_v45  ;;  %v12514_v45 = vld [vmem:[%s12816_s21 + $0x1024] ss:$36 sps:$4 sm:$0xff]  }
 0x401   : > { %v13850_v52 = vpop.f32.mrb[112].mxu1  ;;  %8755 = vmatprep.subr.bf16.mxu1 %v15213_v58 }
 0x402   : > { %15253 = vst [vmem:[#allocation68_spill] sm:$0xff] %v13850_v52  ;;  %v13852_v35 = vpop.f32.mrb[113].mxu1 }
 0x403   : > { %15254 = vst [vmem:[#allocation69_spill] sm:$0xff] %v13852_v35  ;;  %v13856_v21 = vpop.f32.mrb[114].mxu1  ;;  %v12508_v35 = vld [vmem:[%s12816_s21 + $0xfd8] ss:$36 sps:$4 sm:$0xff]  }
 0x404   : > { %15255 = vst [vmem:[#allocation70_spill] sm:$0xff] %v13856_v21  ;;  %v13863_v37 = vpop.f32.mrb[115].mxu1  ;;  %v12507_v21 = vld [vmem:[%s12816_s21 + $0xfc8] ss:$36 sps:$4 sm:$0xff]  }
 0x405   : > { %15256 = vst [vmem:[#allocation71_spill] sm:$0xff] %v13863_v37  ;;  %v12512_v37 = vld [vmem:[%s12816_s21 + $0x1014] ss:$36 sps:$4 sm:$0xff]  }
 0x406   : > { %5948 = vmatmul.mubr.bf16.gmra.mrb[220].mxu1 %v12501_v29 }
 0x407   : > { %7294 = vmatmul.mubr.bf16.gmra.mrb[220].mxu0 %v12502_v4  ;;  %5957 = vmatprep.mubr.bf16.mxu1 %v12503_v61  ;;  %v12516_v4 = vld [vmem:[%s12816_s21 + $0x1010] ss:$36 sps:$4 sm:$0xff]  }
 0x408   : > { %7303 = vmatprep.mubr.bf16.mxu0 %v12505_v49 }
 0x409   : > { %v13866_v46 = vpop.f32.mrb[116].mxu1 }
 0x40a   : > { %15257 = vst [vmem:[#allocation72_spill] sm:$0xff] %v13866_v46  ;;  %v13868_v63 = vpop.f32.mrb[117].mxu1 }
 0x40b   : > { %15258 = vst [vmem:[#allocation73_spill] sm:$0xff] %v13868_v63  ;;  %v13872_v52 = vpop.f32.mrb[118].mxu1  ;;  %v12517_v63 = vld [vmem:[%s12816_s21 + $0x1020] ss:$36 sps:$4 sm:$0xff]  }
 0x40c   : > { %15259 = vst [vmem:[#allocation74_spill] sm:$0xff] %v13872_v52  ;;  %v13876_v29 = vpop.f32.mrb[119].mxu1  ;;  %v12518_v52 = vld [vmem:[%s12816_s21 + $0x105c] ss:$36 sps:$4 sm:$0xff]  }
 0x40d   : > { %15260 = vst [vmem:[#allocation75_spill] sm:$0xff] %v13876_v29 }
 0x40e   : > { %5958 = vmatmul.mubr.bf16.gmra.mrb[224].mxu1 %v12507_v21 }
 0x40f   : > { %7304 = vmatmul.mubr.bf16.gmra.mrb[224].mxu0 %v12508_v35  ;;  %5967 = vmatprep.mubr.bf16.mxu1 %v12512_v37  ;;  %v12522_v37 = vld [vmem:[%s12816_s21 + $0x1058] ss:$36 sps:$4 sm:$0xff]  }
 0x410   : > { %7313 = vmatprep.mubr.bf16.mxu0 %v12514_v45  ;;  %v12523_v45 = vld [vmem:[%s12816_s21 + $0x1068] ss:$36 sps:$4 sm:$0xff]  }
 0x411   : > { %v13878_v61 = vpop.f32.mrb[120].mxu1 }
 0x412   : > { %15261 = vst [vmem:[#allocation76_spill] sm:$0xff] %v13878_v61  ;;  %v13880_v49 = vpop.f32.mrb[121].mxu1  ;;  %v12526_v61 = vld [vmem:[%s12816_s21 + $0x10b4] ss:$36 sps:$4 sm:$0xff]  }
 0x413   : > { %15262 = vst [vmem:[#allocation77_spill] sm:$0xff] %v13880_v49  ;;  %v13884_v46 = vpop.f32.mrb[122].mxu1 }
 0x414   : > { %15263 = vst [vmem:[#allocation78_spill] sm:$0xff] %v13884_v46  ;;  %v13888_v30 = vpop.f32.mrb[123].mxu1  ;;  %v12524_v46 = vld [vmem:[%s12816_s21 + $0x10a4] ss:$36 sps:$4 sm:$0xff]  }
 0x415   : > { %15264 = vst [vmem:[#allocation79_spill] sm:$0xff] %v13888_v30 }
 0x416   : > { %5968 = vmatmul.mubr.bf16.gmra.mrb[228].mxu1 %v12516_v4  ;;  %v12529_v4 = vld [vmem:[%s12816_s21 + $0x10b0] ss:$36 sps:$4 sm:$0xff]  }
 0x417   : > { %7314 = vmatmul.mubr.bf16.gmra.mrb[228].mxu0 %v12517_v63  ;;  %5977 = vmatprep.mubr.bf16.mxu1 %v12518_v52  ;;  %v12528_v63 = vld [vmem:[%s12816_s21 + $0x10a0] ss:$36 sps:$4 sm:$0xff]  }
 0x418   : > { %7323 = vmatprep.mubr.bf16.mxu0 %v12520_v5 }
 0x419   : > { %v13890_v21 = vpop.f32.mrb[124].mxu1 }
 0x41a   : > { %15265 = vst [vmem:[#allocation80_spill] sm:$0xff] %v13890_v21  ;;  %v13892_v35 = vpop.f32.mrb[125].mxu1  ;;  %v12532_v21 = vld [vmem:[%s12816_s21 + $0x10fc] ss:$36 sps:$4 sm:$0xff]  }
 0x41b   : > { %15266 = vst [vmem:[#allocation81_spill] sm:$0xff] %v13892_v35  ;;  %v13896_v49 = vpop.f32.mrb[126].mxu1 }
 0x41c   : > { %15267 = vst [vmem:[#allocation82_spill] sm:$0xff] %v13896_v49  ;;  %v13900_v29 = vpop.f32.mrb[127].mxu1  ;;  %v12530_v49 = vld [vmem:[%s12816_s21 + $0x10ec] ss:$36 sps:$4 sm:$0xff]  }
 0x41d   : > { %15268 = vst [vmem:[#allocation83_spill] sm:$0xff] %v13900_v29 }
 0x41e   : > { %5978 = vmatmul.mubr.bf16.gmra.mrb[232].mxu1 %v12522_v37  ;;  %v12535_v37 = vld [vmem:[%s12816_s21 + $0x10e8] ss:$36 sps:$4 sm:$0xff]  }
 0x41f   : > { %7324 = vmatmul.mubr.bf16.gmra.mrb[232].mxu0 %v12523_v45  ;;  %5987 = vmatprep.mubr.bf16.mxu1 %v12524_v46  ;;  %v12536_v45 = vld [vmem:[%s12816_s21 + $0x10f8] ss:$36 sps:$4 sm:$0xff]  }
 0x420   : > { %7333 = vmatprep.mubr.bf16.mxu0 %v12526_v61 }
 0x421   : > { %v13902_v5 = vpop.f32.mrb[128].mxu1 }
 0x422   : > { %15269 = vst [vmem:[#allocation84_spill] sm:$0xff] %v13902_v5  ;;  %v13904_v52 = vpop.f32.mrb[129].mxu1  ;;  %v12539_v5 = vld [vmem:[%s12816_s21 + $0x1144] ss:$36 sps:$4 sm:$0xff]  }
 0x423   : > { %15270 = vst [vmem:[#allocation85_spill] sm:$0xff] %v13904_v52  ;;  %v13908_v35 = vpop.f32.mrb[130].mxu1 }
 0x424   : > { %15271 = vst [vmem:[#allocation86_spill] sm:$0xff] %v13908_v35  ;;  %v13912_v30 = vpop.f32.mrb[131].mxu1  ;;  %v12537_v35 = vld [vmem:[%s12816_s21 + $0x1134] ss:$36 sps:$4 sm:$0xff]  }
 0x425   : > { %15272 = vst [vmem:[#allocation87_spill] sm:$0xff] %v13912_v30 }
 0x426   : > { %5988 = vmatmul.mubr.bf16.gmra.mrb[236].mxu1 %v12528_v63 }
 0x427   : > { %7334 = vmatmul.mubr.bf16.gmra.mrb[236].mxu0 %v12529_v4  ;;  %5997 = vmatprep.mubr.bf16.mxu1 %v12530_v49  ;;  %v12569_v49 = vld [vmem:[%s15181_s3 + $0x48] sm:$0xff]   ;;  %v12541_v4 = vld [vmem:[%s12816_s21 + $0x1130] ss:$36 sps:$4 sm:$0xff]  }
 0x428   : > { %7343 = vmatprep.mubr.bf16.mxu0 %v12532_v21  ;;  %8756 = vmatpush1.bf16.msra.mxu1 %v12569_v49  ;;  %v12547_v49 = vld [vmem:[%s12816_s21 + $0x1178] ss:$36 sps:$4 sm:$0xff]  }
 0x429   : > { %v13914_v46 = vpop.f32.mrb[132].mxu1  ;;  %8757 = vmatprep.subr.bf16.mxu1 %v15213_v58 }
 0x42a   : > { %15273 = vst [vmem:[#allocation88_spill] sm:$0xff] %v13914_v46  ;;  %v13916_v61 = vpop.f32.mrb[133].mxu1  ;;  %v12549_v46 = vld [vmem:[%s12816_s21 + $0x11c4] ss:$36 sps:$4 sm:$0xff]  }
 0x42b   : > { %15274 = vst [vmem:[#allocation89_spill] sm:$0xff] %v13916_v61  ;;  %v13920_v52 = vpop.f32.mrb[134].mxu1  ;;  %v12543_v61 = vld [vmem:[%s12816_s21 + $0x117c] ss:$36 sps:$4 sm:$0xff]  }
 0x42c   : > { %15275 = vst [vmem:[#allocation90_spill] sm:$0xff] %v13920_v52  ;;  %v13924_v29 = vpop.f32.mrb[135].mxu1 }
 0x42d   : > { %15276 = vst [vmem:[#allocation91_spill] sm:$0xff] %v13924_v29  ;;  %v12542_v29 = vld [vmem:[%s12816_s21 + $0x1140] ss:$36 sps:$4 sm:$0xff]  }
 0x42e   : > { %5998 = vmatmul.mubr.bf16.gmra.mrb[240].mxu1 %v12535_v37  ;;  %v12545_v37 = vld [vmem:[%s12816_s21 + $0x118c] ss:$36 sps:$4 sm:$0xff]  }
 0x42f   : > { %7344 = vmatmul.mubr.bf16.gmra.mrb[240].mxu0 %v12536_v45  ;;  %6007 = vmatprep.mubr.bf16.mxu1 %v12537_v35 }
 0x430   : > { %7353 = vmatprep.mubr.bf16.mxu0 %v12539_v5 }
 0x431   : > { %v13929_v21 = vpop.f32.mrb[136].mxu1 }
 0x432   : > { %15277 = vst [vmem:[#allocation92_spill] sm:$0xff] %v13929_v21  ;;  %v13932_v63 = vpop.f32.mrb[137].mxu1 }
 0x433   : > { %15278 = vst [vmem:[#allocation93_spill] sm:$0xff] %v13932_v63  ;;  %v13936_v52 = vpop.f32.mrb[138].mxu1  ;;  %v12548_v63 = vld [vmem:[%s12816_s21 + $0x1188] ss:$36 sps:$4 sm:$0xff]  }
 0x434   : > { %15279 = vst [vmem:[#allocation94_spill] sm:$0xff] %v13936_v52  ;;  %v13940_v45 = vpop.f32.mrb[139].mxu1  ;;  %v12551_v52 = vld [vmem:[%s12816_s21 + $0x11d4] ss:$36 sps:$4 sm:$0xff]  }
 0x435   : > { %15280 = vst [vmem:[#allocation95_spill] sm:$0xff] %v13940_v45 }
 0x436   : > { %6008 = vmatmul.mubr.bf16.gmra.mrb[244].mxu1 %v12541_v4  ;;  %v12553_v4 = vld [vmem:[%s12816_s21 + $0x11c0] ss:$36 sps:$4 sm:$0xff]  }
 0x437   : > { %7354 = vmatmul.mubr.bf16.gmra.mrb[244].mxu0 %v12542_v29  ;;  %6017 = vmatprep.mubr.bf16.mxu1 %v12543_v61 }
 0x438   : > { %7363 = vmatprep.mubr.bf16.mxu0 %v12545_v37  ;;  %v12554_v37 = vld [vmem:[%s12816_s21 + $0x11d0] ss:$36 sps:$4 sm:$0xff]  }
 0x439   : > { %v13942_v35 = vpop.f32.mrb[140].mxu1 }
 0x43a   : > { %15281 = vst [vmem:[#allocation96_spill] sm:$0xff] %v13942_v35  ;;  %v13944_v5 = vpop.f32.mrb[141].mxu1 }
 0x43b   : > { %15282 = vst [vmem:[#allocation97_spill] sm:$0xff] %v13944_v5  ;;  %v13948_v21 = vpop.f32.mrb[142].mxu1 }
 0x43c   : > { %15283 = vst [vmem:[#allocation98_spill] sm:$0xff] %v13948_v21  ;;  %v13952_v30 = vpop.f32.mrb[143].mxu1 }
 0x43d   : > { %15284 = vst [vmem:[#allocation99_spill] sm:$0xff] %v13952_v30 }
 0x43e   : > { %6018 = vmatmul.mubr.bf16.gmra.mrb[248].mxu1 %v12547_v49 }
 0x43f   : > { %7364 = vmatmul.mubr.bf16.gmra.mrb[248].mxu0 %v12548_v63  ;;  %6027 = vmatprep.mubr.bf16.mxu1 %v12549_v46 }
 0x440   : > { %7373 = vmatprep.mubr.bf16.mxu0 %v12551_v52  ;;  %v12555_v52 = vld [vmem:[%s12816_s21 + $0x20] ss:$36 sps:$4 sm:$0xff]  }
 0x441   : > { %v13954_v29 = vpop.f32.mrb[144].mxu1 }
 0x442   : > { %15285 = vst [vmem:[#allocation100_spill] sm:$0xff] %v13954_v29  ;;  %v13956_v61 = vpop.f32.mrb[145].mxu1 }
 0x443   : > { %15286 = vst [vmem:[#allocation101_spill] sm:$0xff] %v13956_v61  ;;  %v13960_v5 = vpop.f32.mrb[146].mxu1 }
 0x444   : > { %15287 = vst [vmem:[#allocation102_spill] sm:$0xff] %v13960_v5  ;;  %v13962_v35 = vpop.f32.mrb[147].mxu1 }
 0x445   : > { %15288 = vst [vmem:[#allocation103_spill] sm:$0xff] %v13962_v35 }
 0x446   : > { %6028 = vmatmul.mubr.bf16.gmra.mrb[252].mxu1 %v12553_v4  ;;  %v12556_v4 = vld [vmem:[%s12816_s21 + $0x68] ss:$36 sps:$4 sm:$0xff]  }
 0x447   : > { %7374 = vmatmul.mubr.bf16.gmra.mrb[252].mxu0 %v12554_v37 }
 0x448   : > { %7416 = vmatprep.mubr.bf16.mxu0 %v15213_v58 }
 0x449   : > { %v13965_v30 = vpop.f32.mrb[148].mxu1 }
 0x44a   : > { %15289 = vst [vmem:[#allocation104_spill] sm:$0xff] %v13965_v30  ;;  %v13967_v63 = vpop.f32.mrb[149].mxu1 }
 0x44b   : > { %15290 = vst [vmem:[#allocation105_spill] sm:$0xff] %v13967_v63  ;;  %v13970_v46 = vpop.f32.mrb[150].mxu1 }
 0x44c   : > { %15291 = vst [vmem:[#allocation106_spill] sm:$0xff] %v13970_v46  ;;  %v13972_v49 = vpop.f32.mrb[151].mxu1  ;;  %v12576_v46 = vld [vmem:[%s15181_s3 + $0x50] sm:$0xff]  }
 0x44d   : > { %15292 = vst [vmem:[#allocation107_spill] sm:$0xff] %v13972_v49  ;;  %8758 = vmatpush1.bf16.msra.mxu1 %v12576_v46  ;;  %v12559_v46 = vld [vmem:[%s12816_s21 + $0xf8] ss:$36 sps:$4 sm:$0xff]  }
 0x44e   : > { %8759 = vmatprep.subr.bf16.mxu1 %v15213_v58 }
 0x44f   : > { %7417 = vmatmul.mubr.bf16.vlgmr.msra.gmra.mrb[0].mxu0 %v12555_v52 }
 0x450   : > { %7426 = vmatprep.mubr.bf16.mxu0 %v15213_v58 }
 0x451   : > { %v13975_v5 = vpop.f32.mrb[152].mxu1 }
 0x452   : > { %15293 = vst [vmem:[#allocation108_spill] sm:$0xff] %v13975_v5  ;;  %v13977_v35 = vpop.f32.mrb[153].mxu1  ;;  %v12558_v5 = vld [vmem:[%s12816_s21 + $0xb0] ss:$36 sps:$4 sm:$0xff]  }
 0x453   : > { %15294 = vst [vmem:[#allocation109_spill] sm:$0xff] %v13977_v35  ;;  %v13980_v37 = vpop.f32.mrb[154].mxu1 }
 0x454   : > { %15295 = vst [vmem:[#allocation110_spill] sm:$0xff] %v13980_v37  ;;  %v13982_v30 = vpop.f32.mrb[155].mxu1 }
 0x455   : > { %15296 = vst [vmem:[#allocation111_spill] sm:$0xff] %v13982_v30 }
 0x457   : > { %7427 = vmatmul.mubr.bf16.gmra.mrb[4].mxu0 %v12556_v4 }
 0x458   : > { %7436 = vmatprep.mubr.bf16.mxu0 %v15213_v58 }
 0x459   : > { %v13988_v52 = vpop.f32.mrb[156].mxu1 }
 0x45a   : > { %15297 = vst [vmem:[#allocation112_spill] sm:$0xff] %v13988_v52  ;;  %v13991_v35 = vpop.f32.mrb[157].mxu1 }
 0x45b   : > { %15298 = vst [vmem:[#allocation113_spill] sm:$0xff] %v13991_v35  ;;  %v13994_v37 = vpop.f32.mrb[158].mxu1 }
 0x45c   : > { %15299 = vst [vmem:[#allocation114_spill] sm:$0xff] %v13994_v37  ;;  %v13996_v49 = vpop.f32.mrb[159].mxu1 }
 0x45d   : > { %15300 = vst [vmem:[#allocation115_spill] sm:$0xff] %v13996_v49 }
 0x45f   : > { %7437 = vmatmul.mubr.bf16.gmra.mrb[8].mxu0 %v12558_v5  ;;  %v12560_v5 = vld [vmem:[%s12816_s21 + $0x140] ss:$36 sps:$4 sm:$0xff]  }
 0x460   : > { %7446 = vmatprep.mubr.bf16.mxu0 %v15213_v58 }
 0x461   : > { %v13999_v4 = vpop.f32.mrb[160].mxu1 }
 0x462   : > { %15301 = vst [vmem:[#allocation116_spill] sm:$0xff] %v13999_v4  ;;  %v14001_v30 = vpop.f32.mrb[161].mxu1 }
 0x463   : > { %15302 = vst [vmem:[#allocation117_spill] sm:$0xff] %v14001_v30  ;;  %v14004_v52 = vpop.f32.mrb[162].mxu1 }
 0x464   : > { %15303 = vst [vmem:[#allocation118_spill] sm:$0xff] %v14004_v52  ;;  %v14006_v63 = vpop.f32.mrb[163].mxu1 }
 0x465   : > { %15304 = vst [vmem:[#allocation119_spill] sm:$0xff] %v14006_v63 }
 0x467   : > { %7447 = vmatmul.mubr.bf16.gmra.mrb[12].mxu0 %v12559_v46  ;;  %v12561_v46 = vld [vmem:[%s12816_s21 + $0x188] ss:$36 sps:$4 sm:$0xff]  }
 0x468   : > { %7456 = vmatprep.mubr.bf16.mxu0 %v15213_v58 }
 0x469   : > { %v14009_v35 = vpop.f32.mrb[164].mxu1 }
 0x46a   : > { %15305 = vst [vmem:[#allocation120_spill] sm:$0xff] %v14009_v35  ;;  %v14011_v49 = vpop.f32.mrb[165].mxu1 }
 0x46b   : > { %15306 = vst [vmem:[#allocation121_spill] sm:$0xff] %v14011_v49  ;;  %v14014_v37 = vpop.f32.mrb[166].mxu1 }
 0x46c   : > { %15307 = vst [vmem:[#allocation122_spill] sm:$0xff] %v14014_v37  ;;  %v14016_v4 = vpop.f32.mrb[167].mxu1 }
 0x46d   : > { %15308 = vst [vmem:[#allocation123_spill] sm:$0xff] %v14016_v4 }
 0x46f   : > { %7457 = vmatmul.mubr.bf16.gmra.mrb[16].mxu0 %v12560_v5  ;;  %v12562_v5 = vld [vmem:[%s12816_s21 + $0x1d0] ss:$36 sps:$4 sm:$0xff]  }
 0x470   : > { %7466 = vmatprep.mubr.bf16.mxu0 %v15213_v58 }
 0x471   : > { %v14019_v30 = vpop.f32.mrb[168].mxu1 }
 0x472   : > { %15309 = vst [vmem:[#allocation124_spill] sm:$0xff] %v14019_v30  ;;  %v14021_v63 = vpop.f32.mrb[169].mxu1 }
 0x473   : > { %15310 = vst [vmem:[#allocation125_spill] sm:$0xff] %v14021_v63  ;;  %v14024_v52 = vpop.f32.mrb[170].mxu1 }
 0x474   : > { %15311 = vst [vmem:[#allocation126_spill] sm:$0xff] %v14024_v52  ;;  %v14026_v35 = vpop.f32.mrb[171].mxu1 }
 0x475   : > { %15312 = vst [vmem:[#allocation127_spill] sm:$0xff] %v14026_v35 }
 0x477   : > { %7467 = vmatmul.mubr.bf16.gmra.mrb[20].mxu0 %v12561_v46  ;;  %v12564_v46 = vld [vmem:[%s12816_s21 + $0x218] ss:$36 sps:$4 sm:$0xff]  }
 0x478   : > { %7476 = vmatprep.mubr.bf16.mxu0 %v15213_v58 }
 0x479   : > { %v14029_v49 = vpop.f32.mrb[172].mxu1 }
 0x47a   : > { %15313 = vst [vmem:[#allocation128_spill] sm:$0xff] %v14029_v49  ;;  %v14031_v37 = vpop.f32.mrb[173].mxu1 }
 0x47b   : > { %15314 = vst [vmem:[#allocation129_spill] sm:$0xff] %v14031_v37  ;;  %v14034_v4 = vpop.f32.mrb[174].mxu1  ;;  %v12582_v37 = vld [vmem:[%s15181_s3 + $0x58] sm:$0xff]  }
 0x47c   : > { %15315 = vst [vmem:[#allocation130_spill] sm:$0xff] %v14034_v4  ;;  %v14036_v30 = vpop.f32.mrb[175].mxu1  ;;  %8760 = vmatpush1.bf16.msra.mxu1 %v12582_v37 }
 0x47d   : > { %15316 = vst [vmem:[#allocation131_spill] sm:$0xff] %v14036_v30 }
 0x47f   : > { %7477 = vmatmul.mubr.bf16.gmra.mrb[24].mxu0 %v12562_v5 }
 0x480   : > { %7486 = vmatprep.mubr.bf16.mxu0 %v15213_v58 }
 0x481   : > { %v14039_v63 = vpop.f32.mrb[176].mxu1 }
 0x482   : > { %15317 = vst [vmem:[#allocation132_spill] sm:$0xff] %v14039_v63  ;;  %v14041_v52 = vpop.f32.mrb[177].mxu1 }
 0x483   : > { %15318 = vst [vmem:[#allocation133_spill] sm:$0xff] %v14041_v52  ;;  %v14044_v35 = vpop.f32.mrb[178].mxu1  ;;  %v12565_v52 = vld [vmem:[%s12816_s21 + $0x260] ss:$36 sps:$4 sm:$0xff]  }
 0x484   : > { %15319 = vst [vmem:[#allocation134_spill] sm:$0xff] %v14044_v35  ;;  %v14049_v49 = vpop.f32.mrb[179].mxu1 }
 0x485   : > { %15320 = vst [vmem:[#allocation135_spill] sm:$0xff] %v14049_v49 }
 0x487   : > { %7487 = vmatmul.mubr.bf16.gmra.mrb[28].mxu0 %v12564_v46  ;;  %v12566_v46 = vld [vmem:[%s12816_s21 + $0x2a8] ss:$36 sps:$4 sm:$0xff]  }
 0x488   : > { %7496 = vmatprep.mubr.bf16.mxu0 %v15213_v58 }
 0x489   : > { %v14052_v5 = vpop.f32.mrb[180].mxu1 }
 0x48a   : > { %15321 = vst [vmem:[#allocation136_spill] sm:$0xff] %v14052_v5  ;;  %v14054_v63 = vpop.f32.mrb[181].mxu1 }
 0x48b   : > { %15322 = vst [vmem:[#allocation137_spill] sm:$0xff] %v14054_v63  ;;  %v14057_v30 = vpop.f32.mrb[182].mxu1 }
 0x48c   : > { %15323 = vst [vmem:[#allocation138_spill] sm:$0xff] %v14057_v30  ;;  %v14059_v4 = vpop.f32.mrb[183].mxu1 }
 0x48d   : > { %15324 = vst [vmem:[#allocation139_spill] sm:$0xff] %v14059_v4 }
 0x48f   : > { %7497 = vmatmul.mubr.bf16.gmra.mrb[32].mxu0 %v12565_v52  ;;  %v12567_v52 = vld [vmem:[%s12816_s21 + $0x2f0] ss:$36 sps:$4 sm:$0xff]  }
 0x490   : > { %7506 = vmatprep.mubr.bf16.mxu0 %v15213_v58 }
 0x491   : > { %v14062_v35 = vpop.f32.mrb[184].mxu1 }
 0x492   : > { %15325 = vst [vmem:[#allocation140_spill] sm:$0xff] %v14062_v35  ;;  %v14064_v37 = vpop.f32.mrb[185].mxu1 }
 0x493   : > { %15326 = vst [vmem:[#allocation141_spill] sm:$0xff] %v14064_v37  ;;  %v14067_v49 = vpop.f32.mrb[186].mxu1 }
 0x494   : > { %15327 = vst [vmem:[#allocation142_spill] sm:$0xff] %v14067_v49  ;;  %v14069_v5 = vpop.f32.mrb[187].mxu1 }
 0x495   : > { %15328 = vst [vmem:[#allocation143_spill] sm:$0xff] %v14069_v5 }
 0x497   : > { %7507 = vmatmul.mubr.bf16.gmra.mrb[36].mxu0 %v12566_v46  ;;  %v12568_v46 = vld [vmem:[%s12816_s21 + $0x338] ss:$36 sps:$4 sm:$0xff]  }
 0x498   : > { %7516 = vmatprep.mubr.bf16.mxu0 %v15213_v58 }
 0x499   : > { %v14072_v63 = vpop.f32.mrb[188].mxu1 }
 0x49a   : > { %15329 = vst [vmem:[#allocation144_spill] sm:$0xff] %v14072_v63  ;;  %v14074_v4 = vpop.f32.mrb[189].mxu1 }
 0x49b   : > { %15330 = vst [vmem:[#allocation145_spill] sm:$0xff] %v14074_v4  ;;  %v14077_v30 = vpop.f32.mrb[190].mxu1 }
 0x49c   : > { %15331 = vst [vmem:[#allocation146_spill] sm:$0xff] %v14077_v30  ;;  %v14079_v35 = vpop.f32.mrb[191].mxu1 }
 0x49d   : > { %15332 = vst [vmem:[#allocation147_spill] sm:$0xff] %v14079_v35 }
 0x49f   : > { %7517 = vmatmul.mubr.bf16.gmra.mrb[40].mxu0 %v12567_v52  ;;  %v12570_v52 = vld [vmem:[%s12816_s21 + $0x380] ss:$36 sps:$4 sm:$0xff]  }
 0x4a0   : > { %7526 = vmatprep.mubr.bf16.mxu0 %v15213_v58 }
 0x4a1   : > { %v14082_v37 = vpop.f32.mrb[192].mxu1 }
 0x4a2   : > { %15333 = vst [vmem:[#allocation148_spill] sm:$0xff] %v14082_v37  ;;  %v14084_v5 = vpop.f32.mrb[193].mxu1 }
 0x4a3   : > { %15334 = vst [vmem:[#allocation149_spill] sm:$0xff] %v14084_v5  ;;  %v14087_v49 = vpop.f32.mrb[194].mxu1 }
 0x4a4   : > { %15335 = vst [vmem:[#allocation150_spill] sm:$0xff] %v14087_v49  ;;  %v14089_v63 = vpop.f32.mrb[195].mxu1 }
 0x4a5   : > { %15336 = vst [vmem:[#allocation151_spill] sm:$0xff] %v14089_v63 }
 0x4a7   : > { %7527 = vmatmul.mubr.bf16.gmra.mrb[44].mxu0 %v12568_v46  ;;  %v12571_v46 = vld [vmem:[%s12816_s21 + $0x3c8] ss:$36 sps:$4 sm:$0xff]  }
 0x4a8   : > { %7536 = vmatprep.mubr.bf16.mxu0 %v15213_v58 }
 0x4a9   : > { %v14092_v4 = vpop.f32.mrb[196].mxu1 }
 0x4aa   : > { %15337 = vst [vmem:[#allocation152_spill] sm:$0xff] %v14092_v4  ;;  %v14094_v35 = vpop.f32.mrb[197].mxu1 }
 0x4ab   : > { %15338 = vst [vmem:[#allocation153_spill] sm:$0xff] %v14094_v35  ;;  %v14097_v30 = vpop.f32.mrb[198].mxu1 }
 0x4ac   : > { %15339 = vst [vmem:[#allocation154_spill] sm:$0xff] %v14097_v30  ;;  %v14099_v37 = vpop.f32.mrb[199].mxu1 }
 0x4ad   : > { %15340 = vst [vmem:[#allocation155_spill] sm:$0xff] %v14099_v37 }
 0x4af   : > { %7537 = vmatmul.mubr.bf16.gmra.mrb[48].mxu0 %v12570_v52  ;;  %v12572_v52 = vld [vmem:[%s12816_s21 + $0x410] ss:$36 sps:$4 sm:$0xff]  }
 0x4b0   : > { %7546 = vmatprep.mubr.bf16.mxu0 %v15213_v58 }
 0x4b1   : > { %v14102_v5 = vpop.f32.mrb[200].mxu1 }
 0x4b2   : > { %15341 = vst [vmem:[#allocation156_spill] sm:$0xff] %v14102_v5  ;;  %v14104_v63 = vpop.f32.mrb[201].mxu1 }
 0x4b3   : > { %15342 = vst [vmem:[#allocation157_spill] sm:$0xff] %v14104_v63  ;;  %v14107_v49 = vpop.f32.mrb[202].mxu1 }
 0x4b4   : > { %15343 = vst [vmem:[#allocation158_spill] sm:$0xff] %v14107_v49  ;;  %v14109_v4 = vpop.f32.mrb[203].mxu1 }
 0x4b5   : > { %15344 = vst [vmem:[#allocation159_spill] sm:$0xff] %v14109_v4 }
 0x4b7   : > { %7547 = vmatmul.mubr.bf16.gmra.mrb[52].mxu0 %v12571_v46  ;;  %v12573_v46 = vld [vmem:[%s12816_s21 + $0x458] ss:$36 sps:$4 sm:$0xff]  }
 0x4b8   : > { %7556 = vmatprep.mubr.bf16.mxu0 %v15213_v58 }
 0x4b9   : > { %v14112_v35 = vpop.f32.mrb[204].mxu1 }
 0x4ba   : > { %15345 = vst [vmem:[#allocation160_spill] sm:$0xff] %v14112_v35  ;;  %v14114_v37 = vpop.f32.mrb[205].mxu1 }
 0x4bb   : > { %15346 = vst [vmem:[#allocation161_spill] sm:$0xff] %v14114_v37  ;;  %v14117_v30 = vpop.f32.mrb[206].mxu1 }
 0x4bc   : > { %15347 = vst [vmem:[#allocation162_spill] sm:$0xff] %v14117_v30  ;;  %v14119_v5 = vpop.f32.mrb[207].mxu1 }
 0x4bd   : > { %15348 = vst [vmem:[#allocation163_spill] sm:$0xff] %v14119_v5 }
 0x4bf   : > { %7557 = vmatmul.mubr.bf16.gmra.mrb[56].mxu0 %v12572_v52  ;;  %v12574_v52 = vld [vmem:[%s12816_s21 + $0x4a0] ss:$36 sps:$4 sm:$0xff]  }
 0x4c0   : > { %7566 = vmatprep.mubr.bf16.mxu0 %v15213_v58 }
 0x4c1   : > { %v14122_v63 = vpop.f32.mrb[208].mxu1 }
 0x4c2   : > { %15349 = vst [vmem:[#allocation164_spill] sm:$0xff] %v14122_v63  ;;  %v14124_v4 = vpop.f32.mrb[209].mxu1 }
 0x4c3   : > { %15350 = vst [vmem:[#allocation165_spill] sm:$0xff] %v14124_v4  ;;  %v14127_v49 = vpop.f32.mrb[210].mxu1 }
 0x4c4   : > { %15351 = vst [vmem:[#allocation166_spill] sm:$0xff] %v14127_v49  ;;  %v14129_v35 = vpop.f32.mrb[211].mxu1 }
 0x4c5   : > { %15352 = vst [vmem:[#allocation167_spill] sm:$0xff] %v14129_v35 }
 0x4c7   : > { %7567 = vmatmul.mubr.bf16.gmra.mrb[60].mxu0 %v12573_v46  ;;  %v12575_v46 = vld [vmem:[%s12816_s21 + $0x4e8] ss:$36 sps:$4 sm:$0xff]  }
 0x4c8   : > { %7576 = vmatprep.mubr.bf16.mxu0 %v15213_v58 }
 0x4c9   : > { %v14132_v37 = vpop.f32.mrb[212].mxu1 }
 0x4ca   : > { %15353 = vst [vmem:[#allocation168_spill] sm:$0xff] %v14132_v37  ;;  %v14134_v5 = vpop.f32.mrb[213].mxu1 }
 0x4cb   : > { %15354 = vst [vmem:[#allocation169_spill] sm:$0xff] %v14134_v5  ;;  %v14137_v30 = vpop.f32.mrb[214].mxu1 }
 0x4cc   : > { %15355 = vst [vmem:[#allocation170_spill] sm:$0xff] %v14137_v30  ;;  %v14139_v63 = vpop.f32.mrb[215].mxu1 }
 0x4cd   : > { %15356 = vst [vmem:[#allocation171_spill] sm:$0xff] %v14139_v63 }
 0x4cf   : > { %7577 = vmatmul.mubr.bf16.gmra.mrb[64].mxu0 %v12574_v52  ;;  %v12577_v52 = vld [vmem:[%s12816_s21 + $0x530] ss:$36 sps:$4 sm:$0xff]  }
 0x4d0   : > { %7586 = vmatprep.mubr.bf16.mxu0 %v15213_v58 }
 0x4d1   : > { %v14142_v4 = vpop.f32.mrb[216].mxu1 }
 0x4d2   : > { %15357 = vst [vmem:[#allocation172_spill] sm:$0xff] %v14142_v4  ;;  %v14144_v35 = vpop.f32.mrb[217].mxu1 }
 0x4d3   : > { %15358 = vst [vmem:[#allocation173_spill] sm:$0xff] %v14144_v35  ;;  %v14147_v49 = vpop.f32.mrb[218].mxu1 }
 0x4d4   : > { %15359 = vst [vmem:[#allocation174_spill] sm:$0xff] %v14147_v49  ;;  %v14149_v37 = vpop.f32.mrb[219].mxu1 }
 0x4d5   : > { %15360 = vst [vmem:[#allocation175_spill] sm:$0xff] %v14149_v37 }
 0x4d7   : > { %7587 = vmatmul.mubr.bf16.gmra.mrb[68].mxu0 %v12575_v46  ;;  %v12578_v46 = vld [vmem:[%s12816_s21 + $0x578] ss:$36 sps:$4 sm:$0xff]  }
 0x4d8   : > { %7596 = vmatprep.mubr.bf16.mxu0 %v15213_v58 }
 0x4d9   : > { %v14152_v5 = vpop.f32.mrb[220].mxu1 }
 0x4da   : > { %15361 = vst [vmem:[#allocation176_spill] sm:$0xff] %v14152_v5  ;;  %v14154_v63 = vpop.f32.mrb[221].mxu1 }
 0x4db   : > { %15362 = vst [vmem:[#allocation177_spill] sm:$0xff] %v14154_v63  ;;  %v14157_v30 = vpop.f32.mrb[222].mxu1 }
 0x4dc   : > { %15363 = vst [vmem:[#allocation178_spill] sm:$0xff] %v14157_v30  ;;  %v14159_v4 = vpop.f32.mrb[223].mxu1 }
 0x4dd   : > { %15364 = vst [vmem:[#allocation179_spill] sm:$0xff] %v14159_v4 }
 0x4df   : > { %7597 = vmatmul.mubr.bf16.gmra.mrb[72].mxu0 %v12577_v52  ;;  %v12579_v52 = vld [vmem:[%s12816_s21 + $0x5c0] ss:$36 sps:$4 sm:$0xff]  }
 0x4e0   : > { %7606 = vmatprep.mubr.bf16.mxu0 %v15213_v58 }
 0x4e1   : > { %v14162_v35 = vpop.f32.mrb[224].mxu1 }
 0x4e2   : > { %15365 = vst [vmem:[#allocation180_spill] sm:$0xff] %v14162_v35  ;;  %v14164_v37 = vpop.f32.mrb[225].mxu1 }
 0x4e3   : > { %15366 = vst [vmem:[#allocation181_spill] sm:$0xff] %v14164_v37  ;;  %v14167_v49 = vpop.f32.mrb[226].mxu1 }
 0x4e4   : > { %15367 = vst [vmem:[#allocation182_spill] sm:$0xff] %v14167_v49  ;;  %v14169_v5 = vpop.f32.mrb[227].mxu1 }
 0x4e5   : > { %15368 = vst [vmem:[#allocation183_spill] sm:$0xff] %v14169_v5 }
 0x4e7   : > { %7607 = vmatmul.mubr.bf16.gmra.mrb[76].mxu0 %v12578_v46  ;;  %v12580_v46 = vld [vmem:[%s12816_s21 + $0x608] ss:$36 sps:$4 sm:$0xff]  }
 0x4e8   : > { %7616 = vmatprep.mubr.bf16.mxu0 %v15213_v58 }
 0x4e9   : > { %v14172_v63 = vpop.f32.mrb[228].mxu1 }
 0x4ea   : > { %15369 = vst [vmem:[#allocation184_spill] sm:$0xff] %v14172_v63  ;;  %v14174_v4 = vpop.f32.mrb[229].mxu1 }
 0x4eb   : > { %15370 = vst [vmem:[#allocation185_spill] sm:$0xff] %v14174_v4  ;;  %v14177_v30 = vpop.f32.mrb[230].mxu1 }
 0x4ec   : > { %15371 = vst [vmem:[#allocation186_spill] sm:$0xff] %v14177_v30  ;;  %v14179_v35 = vpop.f32.mrb[231].mxu1 }
 0x4ed   : > { %15372 = vst [vmem:[#allocation187_spill] sm:$0xff] %v14179_v35 }
 0x4ef   : > { %7617 = vmatmul.mubr.bf16.gmra.mrb[80].mxu0 %v12579_v52  ;;  %v12581_v52 = vld [vmem:[%s12816_s21 + $0x650] ss:$36 sps:$4 sm:$0xff]  }
 0x4f0   : > { %7626 = vmatprep.mubr.bf16.mxu0 %v15213_v58 }
 0x4f1   : > { %v14182_v37 = vpop.f32.mrb[232].mxu1 }
 0x4f2   : > { %15373 = vst [vmem:[#allocation188_spill] sm:$0xff] %v14182_v37  ;;  %v14184_v5 = vpop.f32.mrb[233].mxu1 }
 0x4f3   : > { %15374 = vst [vmem:[#allocation189_spill] sm:$0xff] %v14184_v5  ;;  %v14187_v49 = vpop.f32.mrb[234].mxu1 }
 0x4f4   : > { %15375 = vst [vmem:[#allocation190_spill] sm:$0xff] %v14187_v49  ;;  %v14189_v63 = vpop.f32.mrb[235].mxu1 }
 0x4f5   : > { %15376 = vst [vmem:[#allocation191_spill] sm:$0xff] %v14189_v63 }
 0x4f7   : > { %7627 = vmatmul.mubr.bf16.gmra.mrb[84].mxu0 %v12580_v46  ;;  %v12583_v46 = vld [vmem:[%s12816_s21 + $0x698] ss:$36 sps:$4 sm:$0xff]  }
 0x4f8   : > { %7636 = vmatprep.mubr.bf16.mxu0 %v15213_v58 }
 0x4f9   : > { %v14192_v4 = vpop.f32.mrb[236].mxu1 }
 0x4fa   : > { %15377 = vst [vmem:[#allocation192_spill] sm:$0xff] %v14192_v4  ;;  %v14194_v35 = vpop.f32.mrb[237].mxu1 }
 0x4fb   : > { %15378 = vst [vmem:[#allocation193_spill] sm:$0xff] %v14194_v35  ;;  %v14197_v30 = vpop.f32.mrb[238].mxu1 }
 0x4fc   : > { %15379 = vst [vmem:[#allocation194_spill] sm:$0xff] %v14197_v30  ;;  %v14199_v37 = vpop.f32.mrb[239].mxu1 }
 0x4fd   : > { %15380 = vst [vmem:[#allocation195_spill] sm:$0xff] %v14199_v37 }
 0x4ff   : > { %7637 = vmatmul.mubr.bf16.gmra.mrb[88].mxu0 %v12581_v52  ;;  %v12584_v52 = vld [vmem:[%s12816_s21 + $0x6e0] ss:$36 sps:$4 sm:$0xff]  }
 0x500   : > { %7646 = vmatprep.mubr.bf16.mxu0 %v15213_v58 }
 0x501   : > { %v14202_v5 = vpop.f32.mrb[240].mxu1 }
 0x502   : > { %15381 = vst [vmem:[#allocation196_spill] sm:$0xff] %v14202_v5  ;;  %v14204_v49 = vpop.f32.mrb[241].mxu1 }
 0x503   : > { %15382 = vst [vmem:[#allocation197_spill] sm:$0xff] %v14204_v49  ;;  %v14207_v63 = vpop.f32.mrb[242].mxu1  ;;  %v1018_v49 = vlaneseq }
 0x504   : > { %15383 = vst [vmem:[#allocation198_spill] sm:$0xff] %v14207_v63  ;;  %v14209_v4 = vpop.f32.mrb[243].mxu1 }
 0x505   : > { %15384 = vst [vmem:[#allocation199_spill] sm:$0xff] %v14209_v4 }
 0x507   : > { %7647 = vmatmul.mubr.bf16.gmra.mrb[92].mxu0 %v12583_v46  ;;  %v12585_v46 = vld [vmem:[%s12816_s21 + $0x728] ss:$36 sps:$4 sm:$0xff]  }
 0x508   : > { %7656 = vmatprep.mubr.bf16.mxu0 %v15213_v58 }
 0x509   : > { %v14212_v35 = vpop.f32.mrb[244].mxu1 }
 0x50a   : > { %15385 = vst [vmem:[#allocation200_spill] sm:$0xff] %v14212_v35  ;;  %v14214_v30 = vpop.f32.mrb[245].mxu1 }
 0x50b   : > { %15386 = vst [vmem:[#allocation201_spill] sm:$0xff] %v14214_v30  ;;  %v14217_v37 = vpop.f32.mrb[246].mxu1  ;;  %v1019_v30 = vshrl.u32 %v1018_v49, 7 }
 0x50c   : > { %15387 = vst [vmem:[#allocation202_spill] sm:$0xff] %v14217_v37  ;;  %v14219_v61 = vpop.f32.mrb[247].mxu1 }
 0x50d   : > { %15388 = vst [vmem:[#allocation203_spill] sm:$0xff] %v14219_v61  ;;  %v1020_v37 = vsub.s32 0, %v1019_v30 }
 0x50f   : > { %7657 = vmatmul.mubr.bf16.gmra.mrb[96].mxu0 %v12584_v52  ;;  %v1016_v52 = vld [vmem:[%s15180_s2] sm:$0x3] }
 0x510   : > { %7666 = vmatprep.mubr.bf16.mxu0 %v15213_v58  ;;  %v14244_v49 = vrot.slane %v1016_v52, %v1020_v37 }
 0x511   : > { %v14222_v63 = vpop.f32.mrb[248].mxu1 }
 0x512   : > { %15389 = vst [vmem:[#allocation204_spill] sm:$0xff] %v14222_v63  ;;  %v14224_v4 = vpop.f32.mrb[249].mxu1  ;;  %v1024_v63 = vsub.s32 1, %v1019_v30 }
 0x513   : > { %15390 = vst [vmem:[#allocation205_spill] sm:$0xff] %v14224_v4  ;;  %v14227_v5 = vpop.f32.mrb[250].mxu1  ;;  %v12586_v4 = vld [vmem:[%s12816_s21 + $0x770] ss:$36 sps:$4 sm:$0xff]  }
 0x514   : > { %15391 = vst [vmem:[#allocation206_spill] sm:$0xff] %v14227_v5  ;;  %v14229_v35 = vpop.f32.mrb[251].mxu1 }
 0x515   : > { %15392 = vst [vmem:[#allocation207_spill] sm:$0xff] %v14229_v35 }
 0x517   : > { %7667 = vmatmul.mubr.bf16.gmra.mrb[100].mxu0 %v12585_v46  ;;  %v14246_v46 = vrot.slane %v1016_v52, %v1024_v63 }
 0x518   : > { %7676 = vmatprep.mubr.bf16.mxu0 %v15213_v58 }
 0x519   : > { %v14232_v61 = vpop.f32.mrb[252].mxu1  ;;  %v10276_v30 = vadd.f32 %v13484_v0, %v14246_v46  ;;  %v10280_v63 = vadd.f32 %v13492_v6, %v14246_v46  ;;  %v10284_v6 = vadd.f32 %v13496_v8, %v14246_v46 }
 0x51a   : > { %15393 = vst [vmem:[#allocation208_spill] sm:$0xff] %v14232_v61  ;;  %v14237_v29 = vpop.f32.mrb[253].mxu1  ;;  %v10274_v61 = vadd.f32 %v13482_v62, %v14244_v49 }
 0x51b   : > { %15394 = vst [vmem:[#allocation209_spill] sm:$0xff] %v14237_v29  ;;  %v14240_v21 = vpop.f32.mrb[254].mxu1 }
 0x51c   : > { %15395 = vst [vmem:[#allocation210_spill] sm:$0xff] %v14240_v21  ;;  %v14242_v5 = vpop.f32.mrb[255].mxu1  ;;  %v10278_v21 = vadd.f32 %v13488_v3, %v14244_v49  ;;  %v10282_v3 = vadd.f32 %v13494_v7, %v14244_v49 }
 0x51d   : > { %15396 = vst [vmem:[#allocation211_spill] sm:$0xff] %v14242_v5  ;;  %v12587_v5 = vld [vmem:[%s12816_s21 + $0x7b8] ss:$36 sps:$4 sm:$0xff]  }
 0x51f   : > { %7677 = vmatmul.mubr.bf16.gmra.mrb[104].mxu0 %v12586_v4 }
 0x520   : > { %7686 = vmatprep.mubr.bf16.mxu0 %v15213_v58 }
 0x522   : > { %v7418_v35 = vpop.f32.mrb[0].mxu0 }
 0x523   : > { %v10275_v29 = vadd.f32 %v10274_v61, %v7418_v35  ;;  %v7420_v45 = vpop.f32.mrb[1].mxu0 }
 0x524   : > { %v10277_v37 = vadd.f32 %v10276_v30, %v7420_v45  ;;  %v7422_v19 = vpop.f32.mrb[2].mxu0 }
 0x525   : > { %v10279_v4 = vadd.f32 %v10278_v21, %v7422_v19  ;;  %v7424_v52 = vpop.f32.mrb[3].mxu0  ;;  %v8057_v62 = vmax.f32 %v10275_v29, 0.0  ;;  %v10286_v29 = vadd.f32 %v13500_v11, %v14244_v49 }
 0x526   : > { %v10281_v15 = vadd.f32 %v10280_v63, %v7424_v52  ;;  %v8058_v1 = vmax.f32 %v10277_v37, 0.0 }
 0x527   : > { %v8059_v13 = vmax.f32 %v10279_v4, 0.0  ;;  %7687 = vmatmul.mubr.bf16.gmra.mrb[108].mxu0 %v12587_v5  ;;  %v12588_v5 = vld [vmem:[%s12816_s21 + $0x800] ss:$36 sps:$4 sm:$0xff]  }
 0x528   : > { %v8060_v0 = vmax.f32 %v10281_v15, 0.0  ;;  %7696 = vmatprep.mubr.bf16.mxu0 %v15213_v58 }
 0x529   : > { %v8313_v35 = vpack.c.bf16 %v8059_v13, %v8057_v62  ;;  %v10288_v13 = vadd.f32 %v13504_v14, %v14246_v46  ;;  %v10290_v62 = vadd.f32 %v13509_v16, %v14244_v49  ;;  %v10292_v14 = vadd.f32 %v13512_v17, %v14246_v46 }
 0x52a   : > { %v8314_v45 = vpack.c.bf16 %v8060_v0, %v8058_v1  ;;  %v7428_v61 = vpop.f32.mrb[4].mxu0 }
 0x52b   : > { %v10283_v19 = vadd.f32 %v10282_v3, %v7428_v61  ;;  %v7430_v21 = vpop.f32.mrb[5].mxu0  ;;  %v10294_v61 = vadd.f32 %v13516_v20, %v14244_v49 }
 0x52c   : > { %v10285_v30 = vadd.f32 %v10284_v6, %v7430_v21  ;;  %v7432_v15 = vpop.f32.mrb[6].mxu0  ;;  %10208 = vmatprep.mubr.msk.bf16.mxu1 %vm8544_vm0, %v8314_v45  ;;  %v12589_v6 = vld [vmem:[%s12816_s21 + $0x848] ss:$36 sps:$4 sm:$0xff]  }
 0x52d   : > { %v10287_v7 = vadd.f32 %v10286_v29, %v7432_v15  ;;  %v7434_v37 = vpop.f32.mrb[7].mxu0  ;;  %8770 = vmatmul.mubr.bf16.vlgmr.msra.gmra.mrb[0].mxu1 %v8313_v35  ;;  %v8061_v63 = vmax.f32 %v10283_v19, 0.0  ;;  %v10296_v29 = vadd.f32 %v13520_v23, %v14246_v46  ;;  %v10300_v23 = vadd.f32 %v13524_v25, %v14246_v46 }
 0x52e   : > { %v10289_v1 = vadd.f32 %v10288_v13, %v7434_v37  ;;  %v8062_v4 = vmax.f32 %v10285_v30, 0.0  ;;  %v10298_v37 = vadd.f32 %v13522_v24, %v14244_v49 }
 0x52f   : > { %v8063_v8 = vmax.f32 %v10287_v7, 0.0  ;;  %7697 = vmatmul.mubr.bf16.gmra.mrb[112].mxu0 %v12588_v5 }
 0x530   : > { %v8064_v52 = vmax.f32 %v10289_v1, 0.0  ;;  %7706 = vmatprep.mubr.bf16.mxu0 %v15213_v58 }
 0x531   : > { %v8315_v11 = vpack.c.bf16 %v8063_v8, %v8061_v63 }
 0x532   : > { %v8316_v0 = vpack.c.bf16 %v8064_v52, %v8062_v4  ;;  %v7438_v3 = vpop.f32.mrb[8].mxu0  ;;  %v10302_v52 = vadd.f32 %v13528_v28, %v14244_v49 }
 0x533   : > { %v10291_v45 = vadd.f32 %v10290_v62, %v7438_v3  ;;  %v7440_v35 = vpop.f32.mrb[9].mxu0  ;;  %v10304_v3 = vadd.f32 %v13532_v31, %v14246_v46  ;;  %v10308_v31 = vadd.f32 %v13536_v33, %v14246_v46 }
 0x534   : > { %v10293_v19 = vadd.f32 %v10292_v14, %v7440_v35  ;;  %v7442_v21 = vpop.f32.mrb[10].mxu0  ;;  %10209 = vmatprep.mubr.msk.bf16.mxu1 %vm8544_vm0, %v8316_v0 }
 0x535   : > { %v10295_v5 = vadd.f32 %v10294_v61, %v7442_v21  ;;  %v7444_v16 = vpop.f32.mrb[11].mxu0  ;;  %8778 = vmatmul.mubr.bf16.gmra.mrb[4].mxu1 %v8315_v11  ;;  %v8065_v15 = vmax.f32 %v10291_v45, 0.0  ;;  %v12590_v11 = vld [vmem:[%s12816_s21 + $0x890] ss:$36 sps:$4 sm:$0xff]  }
 0x536   : > { %v10297_v30 = vadd.f32 %v10296_v29, %v7444_v16  ;;  %v8066_v13 = vmax.f32 %v10293_v19, 0.0  ;;  %v10306_v19 = vadd.f32 %v13534_v32, %v14244_v49 }
 0x537   : > { %v8067_v17 = vmax.f32 %v10295_v5, 0.0  ;;  %7707 = vmatmul.mubr.bf16.gmra.mrb[116].mxu0 %v12589_v6 }
 0x538   : > { %v8068_v7 = vmax.f32 %v10297_v30, 0.0  ;;  %7716 = vmatprep.mubr.bf16.mxu0 %v15213_v58  ;;  %v10310_v30 = vadd.f32 %v13540_v36, %v14244_v49 }
 0x539   : > { %v8317_v20 = vpack.c.bf16 %v8067_v17, %v8065_v15  ;;  %v12591_v15 = vld [vmem:[%s12816_s21 + $0x8d8] ss:$36 sps:$4 sm:$0xff]  }
 0x53a   : > { %v8318_v1 = vpack.c.bf16 %v8068_v7, %v8066_v13  ;;  %v7448_v63 = vpop.f32.mrb[12].mxu0  ;;  %v10312_v7 = vadd.f32 %v13544_v39, %v14246_v46  ;;  %v10316_v39 = vadd.f32 %v13548_v41, %v14246_v46 }
 0x53b   : > { %v10299_v8 = vadd.f32 %v10298_v37, %v7448_v63  ;;  %v7450_v4 = vpop.f32.mrb[13].mxu0 }
 0x53c   : > { %v10301_v62 = vadd.f32 %v10300_v23, %v7450_v4  ;;  %v7452_v0 = vpop.f32.mrb[14].mxu0  ;;  %10210 = vmatprep.mubr.msk.bf16.mxu1 %vm8544_vm0, %v8318_v1 }
 0x53d   : > { %v10303_v14 = vadd.f32 %v10302_v52, %v7452_v0  ;;  %v7454_v24 = vpop.f32.mrb[15].mxu0  ;;  %8786 = vmatmul.mubr.bf16.gmra.mrb[8].mxu1 %v8317_v20  ;;  %v8069_v35 = vmax.f32 %v10299_v8, 0.0  ;;  %v10314_v8 = vadd.f32 %v13546_v40, %v14244_v49  ;;  %v10318_v0 = vadd.f32 %v13552_v44, %v14244_v49 }
 0x53e   : > { %v10305_v45 = vadd.f32 %v10304_v3, %v7454_v24  ;;  %v8070_v61 = vmax.f32 %v10301_v62, 0.0  ;;  %v12592_v3 = vld [vmem:[%s12816_s21 + $0x920] ss:$36 sps:$4 sm:$0xff]  }
 0x53f   : > { %v8071_v25 = vmax.f32 %v10303_v14, 0.0  ;;  %7717 = vmatmul.mubr.bf16.gmra.mrb[120].mxu0 %v12590_v11 }
 0x540   : > { %v8072_v6 = vmax.f32 %v10305_v45, 0.0  ;;  %7726 = vmatprep.mubr.bf16.mxu0 %v15213_v58  ;;  %v10320_v45 = vadd.f32 %v13556_v47, %v14246_v46  ;;  %v10324_v47 = vadd.f32 %v13566_v51, %v14246_v46 }
 0x541   : > { %v8319_v28 = vpack.c.bf16 %v8071_v25, %v8069_v35 }
 0x542   : > { %v8320_v21 = vpack.c.bf16 %v8072_v6, %v8070_v61  ;;  %v7458_v29 = vpop.f32.mrb[16].mxu0 }
 0x543   : > { %v10307_v5 = vadd.f32 %v10306_v19, %v7458_v29  ;;  %v7460_v16 = vpop.f32.mrb[17].mxu0  ;;  %v10322_v19 = vadd.f32 %v13564_v50, %v14244_v49 }
 0x544   : > { %v10309_v17 = vadd.f32 %v10308_v31, %v7460_v16  ;;  %v7462_v13 = vpop.f32.mrb[18].mxu0  ;;  %10211 = vmatprep.mubr.msk.bf16.mxu1 %vm8544_vm0, %v8320_v21  ;;  %v10326_v16 = vadd.f32 %v13570_v54, %v14244_v49 }
 0x545   : > { %v10311_v20 = vadd.f32 %v10310_v30, %v7462_v13  ;;  %v7464_v32 = vpop.f32.mrb[19].mxu0  ;;  %8794 = vmatmul.mubr.bf16.gmra.mrb[12].mxu1 %v8319_v28  ;;  %v8073_v1 = vmax.f32 %v10307_v5, 0.0  ;;  %v12593_v30 = vld [vmem:[%s12816_s21 + $0x968] ss:$36 sps:$4 sm:$0xff]   ;;  %v10328_v13 = vadd.f32 %v13574_v57, %v14246_v46  ;;  %v10332_v57 = vadd.f32 %v13582_v60, %v14246_v46 }
 0x546   : > { %v10313_v37 = vadd.f32 %v10312_v7, %v7464_v32  ;;  %v8074_v63 = vmax.f32 %v10309_v17, 0.0 }
 0x547   : > { %v8075_v33 = vmax.f32 %v10311_v20, 0.0  ;;  %7727 = vmatmul.mubr.bf16.gmra.mrb[124].mxu0 %v12591_v15 }
 0x548   : > { %v8076_v23 = vmax.f32 %v10313_v37, 0.0  ;;  %7736 = vmatprep.mubr.bf16.mxu0 %v15213_v58 }
 0x549   : > { %v8321_v36 = vpack.c.bf16 %v8075_v33, %v8073_v1  ;;  %v10330_v33 = vadd.f32 %v13579_v59, %v14244_v49 }
 0x54a   : > { %v8322_v4 = vpack.c.bf16 %v8076_v23, %v8074_v63  ;;  %v7468_v52 = vpop.f32.mrb[20].mxu0 }
 0x54b   : > { %v10315_v11 = vadd.f32 %v10314_v8, %v7468_v52  ;;  %v7470_v62 = vpop.f32.mrb[21].mxu0  ;;  %v12594_v52 = vld [vmem:[%s12816_s21 + $0x9b0] ss:$36 sps:$4 sm:$0xff]  }
 0x54c   : > { %v10317_v14 = vadd.f32 %v10316_v39, %v7470_v62  ;;  %v7472_v24 = vpop.f32.mrb[22].mxu0  ;;  %10212 = vmatprep.mubr.msk.bf16.mxu1 %vm8544_vm0, %v8322_v4  ;;  %v10334_v4 = vadd.f32 %v13586_v2, %v14244_v49  ;;  %v10336_v62 = vadd.f32 %v13590_v9, %v14246_v46  ;;  %v10340_v9 = vadd.f32 %v13594_v12, %v14246_v46 }
 0x54d   : > { %v10319_v35 = vadd.f32 %v10318_v0, %v7472_v24  ;;  %v7474_v40 = vpop.f32.mrb[23].mxu0  ;;  %8802 = vmatmul.mubr.bf16.gmra.mrb[16].mxu1 %v8321_v36  ;;  %v8077_v61 = vmax.f32 %v10315_v11, 0.0 }
 0x54e   : > { %v10321_v25 = vadd.f32 %v10320_v45, %v7474_v40  ;;  %v8078_v6 = vmax.f32 %v10317_v14, 0.0 }
 0x54f   : > { %v8079_v41 = vmax.f32 %v10319_v35, 0.0  ;;  %7737 = vmatmul.mubr.bf16.gmra.mrb[128].mxu0 %v12592_v3  ;;  %v10338_v35 = vadd.f32 %v13592_v10, %v14244_v49 }
 0x550   : > { %v8080_v28 = vmax.f32 %v10321_v25, 0.0  ;;  %7746 = vmatprep.mubr.bf16.mxu0 %v15213_v58 }
 0x551   : > { %v8323_v44 = vpack.c.bf16 %v8079_v41, %v8077_v61 }
 0x552   : > { %v8324_v21 = vpack.c.bf16 %v8080_v28, %v8078_v6  ;;  %v7478_v29 = vpop.f32.mrb[24].mxu0  ;;  %v10342_v6 = vadd.f32 %v13598_v18, %v14244_v49  ;;  %v12595_v28 = vld [vmem:[%s12816_s21 + $0x9f8] ss:$36 sps:$4 sm:$0xff]  }
 0x553   : > { %v10323_v31 = vadd.f32 %v10322_v19, %v7478_v29  ;;  %v7480_v5 = vpop.f32.mrb[25].mxu0 }
 0x554   : > { %v10325_v15 = vadd.f32 %v10324_v47, %v7480_v5  ;;  %v7482_v17 = vpop.f32.mrb[26].mxu0  ;;  %10213 = vmatprep.mubr.msk.bf16.mxu1 %vm8544_vm0, %v8324_v21  ;;  %v10344_v21 = vadd.f32 %v13602_v22, %v14246_v46  ;;  %v10348_v22 = vadd.f32 %v13606_v27, %v14246_v46 }
 0x555   : > { %v10327_v7 = vadd.f32 %v10326_v16, %v7482_v17  ;;  %v7484_v50 = vpop.f32.mrb[27].mxu0  ;;  %8810 = vmatmul.mubr.bf16.gmra.mrb[20].mxu1 %v8323_v44  ;;  %v8081_v32 = vmax.f32 %v10323_v31, 0.0 }
 0x556   : > { %v10329_v20 = vadd.f32 %v10328_v13, %v7484_v50  ;;  %v8082_v37 = vmax.f32 %v10325_v15, 0.0  ;;  %v10350_v50 = vadd.f32 %v13610_v34, %v14244_v49 }
 0x557   : > { %v8083_v51 = vmax.f32 %v10327_v7, 0.0  ;;  %7747 = vmatmul.mubr.bf16.gmra.mrb[132].mxu0 %v12593_v30  ;;  %v10346_v30 = vadd.f32 %v13604_v26, %v14244_v49 }
 0x558   : > { %v8084_v1 = vmax.f32 %v10329_v20, 0.0  ;;  %7756 = vmatprep.mubr.bf16.mxu0 %v15213_v58  ;;  %v12596_v20 = vld [vmem:[%s12816_s21 + $0xa40] ss:$36 sps:$4 sm:$0xff]  }
 0x559   : > { %v8325_v54 = vpack.c.bf16 %v8083_v51, %v8081_v32 }
 0x55a   : > { %v8326_v63 = vpack.c.bf16 %v8084_v1, %v8082_v37  ;;  %v7488_v23 = vpop.f32.mrb[28].mxu0  ;;  %v10352_v37 = vadd.f32 %v13614_v38, %v14246_v46  ;;  %v10356_v38 = vadd.f32 %v13618_v43, %v14246_v46 }
 0x55b   : > { %v10331_v36 = vadd.f32 %v10330_v33, %v7488_v23  ;;  %v7490_v8 = vpop.f32.mrb[29].mxu0 }
 0x55c   : > { %v10333_v39 = vadd.f32 %v10332_v57, %v7490_v8  ;;  %v7492_v11 = vpop.f32.mrb[30].mxu0  ;;  %10214 = vmatprep.mubr.msk.bf16.mxu1 %vm8544_vm0, %v8326_v63  ;;  %v10354_v57 = vadd.f32 %v13616_v42, %v14244_v49 }
 0x55d   : > { %v10335_v0 = vadd.f32 %v10334_v4, %v7492_v11  ;;  %v7494_v59 = vpop.f32.mrb[31].mxu0  ;;  %8818 = vmatmul.mubr.bf16.gmra.mrb[24].mxu1 %v8325_v54  ;;  %v8085_v14 = vmax.f32 %v10331_v36, 0.0  ;;  %v12597_v11 = vld [vmem:[%s12816_s21 + $0xa88] ss:$36 sps:$4 sm:$0xff]  }
 0x55e   : > { %v10337_v3 = vadd.f32 %v10336_v62, %v7494_v59  ;;  %v8086_v24 = vmax.f32 %v10333_v39, 0.0  ;;  %v10358_v39 = vadd.f32 %v13622_v48, %v14244_v49  ;;  %v10360_v59 = vadd.f32 %v13626_v53, %v14246_v46 }
 0x55f   : > { %v8087_v60 = vmax.f32 %v10335_v0, 0.0  ;;  %7757 = vmatmul.mubr.bf16.gmra.mrb[136].mxu0 %v12594_v52  ;;  %v10364_v53 = vadd.f32 %v13630_v56, %v14246_v46 }
 0x560   : > { %v8088_v45 = vmax.f32 %v10337_v3, 0.0  ;;  %7766 = vmatprep.mubr.bf16.mxu0 %v15213_v58 }
 0x561   : > { %v8327_v2 = vpack.c.bf16 %v8087_v60, %v8085_v14 }
 0x562   : > { %v8328_v40 = vpack.c.bf16 %v8088_v45, %v8086_v24  ;;  %v7498_v25 = vpop.f32.mrb[32].mxu0 }
 0x563   : > { %v10339_v61 = vadd.f32 %v10338_v35, %v7498_v25  ;;  %v7500_v41 = vpop.f32.mrb[33].mxu0 }
 0x564   : > { %v10341_v44 = vadd.f32 %v10340_v9, %v7500_v41  ;;  %v7502_v19 = vpop.f32.mrb[34].mxu0  ;;  %10215 = vmatprep.mubr.msk.bf16.mxu1 %vm8544_vm0, %v8328_v40 }
 0x565   : > { %v10343_v29 = vadd.f32 %v10342_v6, %v7502_v19  ;;  %v7504_v10 = vpop.f32.mrb[35].mxu0  ;;  %8826 = vmatmul.mubr.bf16.gmra.mrb[28].mxu1 %v8327_v2  ;;  %v8089_v31 = vmax.f32 %v10339_v61, 0.0  ;;  %v10362_v2 = vadd.f32 %v13628_v55, %v14244_v49  ;;  %v15397_v61 = vld [vmem:[#allocation2_spill] sm:$0xff]  ;;  %v12598_v6 = vld [vmem:[%s12816_s21 + $0xad0] ss:$36 sps:$4 sm:$0xff]   ;;  %v15398_v19 = vld [vmem:[#allocation3_spill] sm:$0xff] }
 0x566   : > { %v10345_v47 = vadd.f32 %v10344_v21, %v7504_v10  ;;  %v8090_v5 = vmax.f32 %v10341_v44, 0.0  ;;  %v10366_v41 = vadd.f32 %v15397_v61, %v14244_v49  ;;  %v10368_v21 = vadd.f32 %v15398_v19, %v14246_v46  ;;  %v15407_v61 = vld [vmem:[#allocation12_spill] sm:$0xff] }
 0x567   : > { %v8091_v12 = vmax.f32 %v10343_v29, 0.0  ;;  %7767 = vmatmul.mubr.bf16.gmra.mrb[140].mxu0 %v12595_v28 }
 0x568   : > { %v8092_v16 = vmax.f32 %v10345_v47, 0.0  ;;  %7776 = vmatprep.mubr.bf16.mxu0 %v15213_v58 }
 0x569   : > { %v8329_v18 = vpack.c.bf16 %v8091_v12, %v8089_v31 }
 0x56a   : > { %v8330_v15 = vpack.c.bf16 %v8092_v16, %v8090_v5  ;;  %v7508_v17 = vpop.f32.mrb[36].mxu0  ;;  %v15399_v16 = vld [vmem:[#allocation4_spill] sm:$0xff] }
 0x56b   : > { %v10347_v13 = vadd.f32 %v10346_v30, %v7508_v17  ;;  %v7510_v7 = vpop.f32.mrb[37].mxu0  ;;  %v15400_v17 = vld [vmem:[#allocation5_spill] sm:$0xff] }
 0x56c   : > { %v10349_v32 = vadd.f32 %v10348_v22, %v7510_v7  ;;  %v7512_v51 = vpop.f32.mrb[38].mxu0  ;;  %10216 = vmatprep.mubr.msk.bf16.mxu1 %vm8544_vm0, %v8330_v15  ;;  %v10372_v22 = vadd.f32 %v15400_v17, %v14246_v46 }
 0x56d   : > { %v10351_v1 = vadd.f32 %v10350_v50, %v7512_v51  ;;  %v7514_v26 = vpop.f32.mrb[39].mxu0  ;;  %8834 = vmatmul.mubr.bf16.gmra.mrb[32].mxu1 %v8329_v18  ;;  %v8093_v33 = vmax.f32 %v10347_v13, 0.0  ;;  %v10370_v18 = vadd.f32 %v15399_v16, %v14244_v49  ;;  %v15401_v50 = vld [vmem:[#allocation6_spill] sm:$0xff] }
 0x56e   : > { %v10353_v54 = vadd.f32 %v10352_v37, %v7514_v26  ;;  %v8094_v63 = vmax.f32 %v10349_v32, 0.0  ;;  %v12599_v32 = vld [vmem:[%s12816_s21 + $0xb18] ss:$36 sps:$4 sm:$0xff]  }
 0x56f   : > { %v8095_v27 = vmax.f32 %v10351_v1, 0.0  ;;  %7777 = vmatmul.mubr.bf16.gmra.mrb[144].mxu0 %v12596_v20  ;;  %v10374_v20 = vadd.f32 %v15401_v50, %v14244_v49  ;;  %v15402_v1 = vld [vmem:[#allocation7_spill] sm:$0xff]  ;;  %v15411_v50 = vld [vmem:[#allocation16_spill] sm:$0xff] }
 0x570   : > { %v8096_v23 = vmax.f32 %v10353_v54, 0.0  ;;  %7786 = vmatprep.mubr.bf16.mxu0 %v15213_v58  ;;  %v10376_v26 = vadd.f32 %v15402_v1, %v14246_v46 }
 0x571   : > { %v8331_v34 = vpack.c.bf16 %v8095_v27, %v8093_v33 }
 0x572   : > { %v8332_v36 = vpack.c.bf16 %v8096_v23, %v8094_v63  ;;  %v7518_v8 = vpop.f32.mrb[40].mxu0 }
 0x573   : > { %v10355_v4 = vadd.f32 %v10354_v57, %v7518_v8  ;;  %v7520_v52 = vpop.f32.mrb[41].mxu0  ;;  %v15403_v8 = vld [vmem:[#allocation8_spill] sm:$0xff] }
 0x574   : > { %v10357_v62 = vadd.f32 %v10356_v38, %v7520_v52  ;;  %v7522_v0 = vpop.f32.mrb[42].mxu0  ;;  %10217 = vmatprep.mubr.msk.bf16.mxu1 %vm8544_vm0, %v8332_v36  ;;  %v10378_v38 = vadd.f32 %v15403_v8, %v14244_v49 }
 0x575   : > { %v10359_v3 = vadd.f32 %v10358_v39, %v7522_v0  ;;  %v7524_v42 = vpop.f32.mrb[43].mxu0  ;;  %8842 = vmatmul.mubr.bf16.gmra.mrb[36].mxu1 %v8331_v34  ;;  %v8097_v60 = vmax.f32 %v10355_v4, 0.0  ;;  %v15404_v39 = vld [vmem:[#allocation9_spill] sm:$0xff] }
 0x576   : > { %v10361_v14 = vadd.f32 %v10360_v59, %v7524_v42  ;;  %v8098_v24 = vmax.f32 %v10357_v62, 0.0  ;;  %v15405_v59 = vld [vmem:[#allocation10_spill] sm:$0xff] }
 0x577   : > { %v8099_v43 = vmax.f32 %v10359_v3, 0.0  ;;  %7787 = vmatmul.mubr.bf16.gmra.mrb[148].mxu0 %v12597_v11  ;;  %v10380_v11 = vadd.f32 %v15404_v39, %v14246_v46  ;;  %v10382_v3 = vadd.f32 %v15405_v59, %v14244_v49  ;;  %v12600_v42 = vld [vmem:[%s12816_s21 + $0xb60] ss:$36 sps:$4 sm:$0xff]   ;;  %v15415_v59 = vld [vmem:[#allocation20_spill] sm:$0xff] }
 0x578   : > { %v8100_v45 = vmax.f32 %v10361_v14, 0.0  ;;  %7796 = vmatprep.mubr.bf16.mxu0 %v15213_v58 }
 0x579   : > { %v8333_v48 = vpack.c.bf16 %v8099_v43, %v8097_v60  ;;  %v15406_v43 = vld [vmem:[#allocation11_spill] sm:$0xff] }
 0x57a   : > { %v8334_v35 = vpack.c.bf16 %v8100_v45, %v8098_v24  ;;  %v7528_v40 = vpop.f32.mrb[44].mxu0  ;;  %v10384_v24 = vadd.f32 %v15406_v43, %v14246_v46 }
 0x57b   : > { %v10363_v25 = vadd.f32 %v10362_v2, %v7528_v40  ;;  %v7530_v9 = vpop.f32.mrb[45].mxu0 }
 0x57c   : > { %v10365_v28 = vadd.f32 %v10364_v53, %v7530_v9  ;;  %v7532_v44 = vpop.f32.mrb[46].mxu0  ;;  %10218 = vmatprep.mubr.msk.bf16.mxu1 %vm8544_vm0, %v8334_v35 }
 0x57d   : > { %v10367_v29 = vadd.f32 %v10366_v41, %v7532_v44  ;;  %v7534_v55 = vpop.f32.mrb[47].mxu0  ;;  %8850 = vmatmul.mubr.bf16.gmra.mrb[40].mxu1 %v8333_v48  ;;  %v8101_v47 = vmax.f32 %v10363_v25, 0.0  ;;  %v10386_v41 = vadd.f32 %v15407_v61, %v14244_v49  ;;  %v15408_v44 = vld [vmem:[#allocation13_spill] sm:$0xff] }
 0x57e   : > { %v10369_v10 = vadd.f32 %v10368_v21, %v7534_v55  ;;  %v8102_v31 = vmax.f32 %v10365_v28, 0.0  ;;  %v10388_v19 = vadd.f32 %v15408_v44, %v14246_v46  ;;  %v15409_v55 = vld [vmem:[#allocation14_spill] sm:$0xff] }
 0x57f   : > { %v8103_v56 = vmax.f32 %v10367_v29, 0.0  ;;  %7797 = vmatmul.mubr.bf16.gmra.mrb[152].mxu0 %v12598_v6 }
 0x580   : > { %v8104_v12 = vmax.f32 %v10369_v10, 0.0  ;;  %7806 = vmatprep.mubr.bf16.mxu0 %v15213_v58  ;;  %v10390_v10 = vadd.f32 %v15409_v55, %v14244_v49  ;;  %v15419_v55 = vld [vmem:[#allocation24_spill] sm:$0xff] }
 0x581   : > { %v8335_v5 = vpack.c.bf16 %v8103_v56, %v8101_v47  ;;  %v12601_v47 = vld [vmem:[%s12816_s21 + $0xba8] ss:$36 sps:$4 sm:$0xff]  }
 0x582   : > { %v8336_v30 = vpack.c.bf16 %v8104_v12, %v8102_v31  ;;  %v7538_v15 = vpop.f32.mrb[48].mxu0  ;;  %v15410_v12 = vld [vmem:[#allocation15_spill] sm:$0xff] }
 0x583   : > { %v10371_v13 = vadd.f32 %v10370_v18, %v7538_v15  ;;  %v7540_v7 = vpop.f32.mrb[49].mxu0 }
 0x584   : > { %v10373_v51 = vadd.f32 %v10372_v22, %v7540_v7  ;;  %v7542_v37 = vpop.f32.mrb[50].mxu0  ;;  %10219 = vmatprep.mubr.msk.bf16.mxu1 %vm8544_vm0, %v8336_v30 }
 0x585   : > { %v10375_v54 = vadd.f32 %v10374_v20, %v7542_v37  ;;  %v7544_v33 = vpop.f32.mrb[51].mxu0  ;;  %8858 = vmatmul.mubr.bf16.gmra.mrb[44].mxu1 %v8335_v5  ;;  %v8105_v63 = vmax.f32 %v10371_v13, 0.0  ;;  %v10392_v5 = vadd.f32 %v15410_v12, %v14246_v46  ;;  %v10394_v20 = vadd.f32 %v15411_v50, %v14244_v49  ;;  %v15412_v37 = vld [vmem:[#allocation17_spill] sm:$0xff] }
 0x586   : > { %v10377_v27 = vadd.f32 %v10376_v26, %v7544_v33  ;;  %v8106_v34 = vmax.f32 %v10373_v51, 0.0  ;;  %v10396_v1 = vadd.f32 %v15412_v37, %v14246_v46  ;;  %v15413_v33 = vld [vmem:[#allocation18_spill] sm:$0xff] }
 0x587   : > { %v8107_v23 = vmax.f32 %v10375_v54, 0.0  ;;  %7807 = vmatmul.mubr.bf16.gmra.mrb[156].mxu0 %v12599_v32 }
 0x588   : > { %v8108_v57 = vmax.f32 %v10377_v27, 0.0  ;;  %7816 = vmatprep.mubr.bf16.mxu0 %v15213_v58  ;;  %v10398_v27 = vadd.f32 %v15413_v33, %v14244_v49  ;;  %v15423_v33 = vld [vmem:[#allocation28_spill] sm:$0xff] }
 0x589   : > { %v8337_v36 = vpack.c.bf16 %v8107_v23, %v8105_v63  ;;  %v12602_v63 = vld [vmem:[%s12816_s21 + $0xbf0] ss:$36 sps:$4 sm:$0xff]  }
 0x58a   : > { %v8338_v4 = vpack.c.bf16 %v8108_v57, %v8106_v34  ;;  %v7548_v52 = vpop.f32.mrb[52].mxu0  ;;  %v15414_v57 = vld [vmem:[#allocation19_spill] sm:$0xff] }
 0x58b   : > { %v10379_v62 = vadd.f32 %v10378_v38, %v7548_v52  ;;  %v7550_v0 = vpop.f32.mrb[53].mxu0 }
 0x58c   : > { %v10381_v14 = vadd.f32 %v10380_v11, %v7550_v0  ;;  %v7552_v60 = vpop.f32.mrb[54].mxu0  ;;  %10220 = vmatprep.mubr.msk.bf16.mxu1 %vm8544_vm0, %v8338_v4 }
 0x58d   : > { %v10383_v45 = vadd.f32 %v10382_v3, %v7552_v60  ;;  %v7554_v48 = vpop.f32.mrb[55].mxu0  ;;  %8866 = vmatmul.mubr.bf16.gmra.mrb[48].mxu1 %v8337_v36  ;;  %v8109_v35 = vmax.f32 %v10379_v62, 0.0  ;;  %v10400_v36 = vadd.f32 %v15414_v57, %v14246_v46  ;;  %v10402_v3 = vadd.f32 %v15415_v59, %v14244_v49  ;;  %v15416_v60 = vld [vmem:[#allocation21_spill] sm:$0xff] }
 0x58e   : > { %v10385_v2 = vadd.f32 %v10384_v24, %v7554_v48  ;;  %v8110_v53 = vmax.f32 %v10381_v14, 0.0  ;;  %v10404_v43 = vadd.f32 %v15416_v60, %v14246_v46  ;;  %v15417_v48 = vld [vmem:[#allocation22_spill] sm:$0xff] }
 0x58f   : > { %v8111_v40 = vmax.f32 %v10383_v45, 0.0  ;;  %7817 = vmatmul.mubr.bf16.gmra.mrb[160].mxu0 %v12600_v42 }
 0x590   : > { %v8112_v25 = vmax.f32 %v10385_v2, 0.0  ;;  %7826 = vmatprep.mubr.bf16.mxu0 %v15213_v58  ;;  %v10406_v2 = vadd.f32 %v15417_v48, %v14244_v49  ;;  %v15427_v48 = vld [vmem:[#allocation32_spill] sm:$0xff] }
 0x591   : > { %v8339_v9 = vpack.c.bf16 %v8111_v40, %v8109_v35  ;;  %v12603_v35 = vld [vmem:[%s12816_s21 + $0xc38] ss:$36 sps:$4 sm:$0xff]  }
 0x592   : > { %v8340_v6 = vpack.c.bf16 %v8112_v25, %v8110_v53  ;;  %v7558_v28 = vpop.f32.mrb[56].mxu0  ;;  %v15418_v25 = vld [vmem:[#allocation23_spill] sm:$0xff] }
 0x593   : > { %v10387_v21 = vadd.f32 %v10386_v41, %v7558_v28  ;;  %v7560_v29 = vpop.f32.mrb[57].mxu0 }
 0x594   : > { %v10389_v56 = vadd.f32 %v10388_v19, %v7560_v29  ;;  %v7562_v31 = vpop.f32.mrb[58].mxu0  ;;  %10221 = vmatprep.mubr.msk.bf16.mxu1 %vm8544_vm0, %v8340_v6 }
 0x595   : > { %v10391_v16 = vadd.f32 %v10390_v10, %v7562_v31  ;;  %v7564_v18 = vpop.f32.mrb[59].mxu0  ;;  %8874 = vmatmul.mubr.bf16.gmra.mrb[52].mxu1 %v8339_v9  ;;  %v8113_v15 = vmax.f32 %v10387_v21, 0.0  ;;  %v10408_v9 = vadd.f32 %v15418_v25, %v14246_v46  ;;  %v10410_v10 = vadd.f32 %v15419_v55, %v14244_v49  ;;  %v15420_v31 = vld [vmem:[#allocation25_spill] sm:$0xff] }
 0x596   : > { %v10393_v30 = vadd.f32 %v10392_v5, %v7564_v18  ;;  %v8114_v22 = vmax.f32 %v10389_v56, 0.0  ;;  %v10412_v12 = vadd.f32 %v15420_v31, %v14246_v46  ;;  %v15421_v18 = vld [vmem:[#allocation26_spill] sm:$0xff] }
 0x597   : > { %v8115_v17 = vmax.f32 %v10391_v16, 0.0  ;;  %7827 = vmatmul.mubr.bf16.gmra.mrb[164].mxu0 %v12601_v47 }
 0x598   : > { %v8116_v13 = vmax.f32 %v10393_v30, 0.0  ;;  %7836 = vmatprep.mubr.bf16.mxu0 %v15213_v58  ;;  %v10414_v30 = vadd.f32 %v15421_v18, %v14244_v49  ;;  %v15431_v18 = vld [vmem:[#allocation36_spill] sm:$0xff] }
 0x599   : > { %v8341_v7 = vpack.c.bf16 %v8115_v17, %v8113_v15  ;;  %v12604_v15 = vld [vmem:[%s12816_s21 + $0xc80] ss:$36 sps:$4 sm:$0xff]  }
 0x59a   : > { %v8342_v32 = vpack.c.bf16 %v8116_v13, %v8114_v22  ;;  %v7568_v51 = vpop.f32.mrb[60].mxu0  ;;  %v15422_v13 = vld [vmem:[#allocation27_spill] sm:$0xff] }
 0x59b   : > { %v10395_v26 = vadd.f32 %v10394_v20, %v7568_v51  ;;  %v7570_v54 = vpop.f32.mrb[61].mxu0 }
 0x59c   : > { %v10397_v23 = vadd.f32 %v10396_v1, %v7570_v54  ;;  %v7572_v34 = vpop.f32.mrb[62].mxu0  ;;  %10222 = vmatprep.mubr.msk.bf16.mxu1 %vm8544_vm0, %v8342_v32 }
 0x59d   : > { %v10399_v8 = vadd.f32 %v10398_v27, %v7572_v34  ;;  %v7574_v38 = vpop.f32.mrb[63].mxu0  ;;  %8882 = vmatmul.mubr.bf16.gmra.mrb[56].mxu1 %v8341_v7  ;;  %v8117_v52 = vmax.f32 %v10395_v26, 0.0  ;;  %v10416_v7 = vadd.f32 %v15422_v13, %v14246_v46  ;;  %v10418_v27 = vadd.f32 %v15423_v33, %v14244_v49  ;;  %v15424_v34 = vld [vmem:[#allocation29_spill] sm:$0xff] }
 0x59e   : > { %v10401_v4 = vadd.f32 %v10400_v36, %v7574_v38  ;;  %v8118_v11 = vmax.f32 %v10397_v23, 0.0  ;;  %v10420_v57 = vadd.f32 %v15424_v34, %v14246_v46  ;;  %v15425_v38 = vld [vmem:[#allocation30_spill] sm:$0xff] }
 0x59f   : > { %v8119_v39 = vmax.f32 %v10399_v8, 0.0  ;;  %7837 = vmatmul.mubr.bf16.gmra.mrb[168].mxu0 %v12602_v63 }
 0x5a0   : > { %v8120_v62 = vmax.f32 %v10401_v4, 0.0  ;;  %7846 = vmatprep.mubr.bf16.mxu0 %v15213_v58  ;;  %v10422_v4 = vadd.f32 %v15425_v38, %v14244_v49  ;;  %v15435_v38 = vld [vmem:[#allocation40_spill] sm:$0xff] }
 0x5a1   : > { %v8343_v0 = vpack.c.bf16 %v8119_v39, %v8117_v52  ;;  %v12605_v52 = vld [vmem:[%s12816_s21 + $0xcc8] ss:$36 sps:$4 sm:$0xff]  }
 0x5a2   : > { %v8344_v42 = vpack.c.bf16 %v8120_v62, %v8118_v11  ;;  %v7578_v14 = vpop.f32.mrb[64].mxu0  ;;  %v15426_v62 = vld [vmem:[#allocation31_spill] sm:$0xff] }
 0x5a3   : > { %v10403_v24 = vadd.f32 %v10402_v3, %v7578_v14  ;;  %v7580_v45 = vpop.f32.mrb[65].mxu0 }
 0x5a4   : > { %v10405_v40 = vadd.f32 %v10404_v43, %v7580_v45  ;;  %v7582_v53 = vpop.f32.mrb[66].mxu0  ;;  %10223 = vmatprep.mubr.msk.bf16.mxu1 %vm8544_vm0, %v8344_v42 }
 0x5a5   : > { %v10407_v61 = vadd.f32 %v10406_v2, %v7582_v53  ;;  %v7584_v41 = vpop.f32.mrb[67].mxu0  ;;  %8890 = vmatmul.mubr.bf16.gmra.mrb[60].mxu1 %v8343_v0  ;;  %v8121_v28 = vmax.f32 %v10403_v24, 0.0  ;;  %v10424_v0 = vadd.f32 %v15426_v62, %v14246_v46  ;;  %v10426_v2 = vadd.f32 %v15427_v48, %v14244_v49  ;;  %v15428_v53 = vld [vmem:[#allocation33_spill] sm:$0xff] }
 0x5a6   : > { %v10409_v6 = vadd.f32 %v10408_v9, %v7584_v41  ;;  %v8122_v19 = vmax.f32 %v10405_v40, 0.0  ;;  %v10428_v25 = vadd.f32 %v15428_v53, %v14246_v46  ;;  %v15429_v41 = vld [vmem:[#allocation34_spill] sm:$0xff] }
 0x5a7   : > { %v8123_v44 = vmax.f32 %v10407_v61, 0.0  ;;  %7847 = vmatmul.mubr.bf16.gmra.mrb[172].mxu0 %v12603_v35 }
 0x5a8   : > { %v8124_v21 = vmax.f32 %v10409_v6, 0.0  ;;  %7856 = vmatprep.mubr.bf16.mxu0 %v15213_v58  ;;  %v10430_v6 = vadd.f32 %v15429_v41, %v14244_v49  ;;  %v15439_v41 = vld [vmem:[#allocation44_spill] sm:$0xff] }
 0x5a9   : > { %v8345_v29 = vpack.c.bf16 %v8123_v44, %v8121_v28  ;;  %v12606_v28 = vld [vmem:[%s12816_s21 + $0xd10] ss:$36 sps:$4 sm:$0xff]  }
 0x5aa   : > { %v8346_v47 = vpack.c.bf16 %v8124_v21, %v8122_v19  ;;  %v7588_v56 = vpop.f32.mrb[68].mxu0  ;;  %v15430_v21 = vld [vmem:[#allocation35_spill] sm:$0xff] }
 0x5ab   : > { %v10411_v5 = vadd.f32 %v10410_v10, %v7588_v56  ;;  %v7590_v16 = vpop.f32.mrb[69].mxu0 }
 0x5ac   : > { %v10413_v17 = vadd.f32 %v10412_v12, %v7590_v16  ;;  %v7592_v22 = vpop.f32.mrb[70].mxu0  ;;  %10224 = vmatprep.mubr.msk.bf16.mxu1 %vm8544_vm0, %v8346_v47 }
 0x5ad   : > { %v10415_v50 = vadd.f32 %v10414_v30, %v7592_v22  ;;  %v7594_v20 = vpop.f32.mrb[71].mxu0  ;;  %8898 = vmatmul.mubr.bf16.gmra.mrb[64].mxu1 %v8345_v29  ;;  %v8125_v51 = vmax.f32 %v10411_v5, 0.0  ;;  %v10432_v29 = vadd.f32 %v15430_v21, %v14246_v46  ;;  %v10434_v30 = vadd.f32 %v15431_v18, %v14244_v49  ;;  %v15432_v22 = vld [vmem:[#allocation37_spill] sm:$0xff] }
 0x5ae   : > { %v10417_v32 = vadd.f32 %v10416_v7, %v7594_v20  ;;  %v8126_v1 = vmax.f32 %v10413_v17, 0.0  ;;  %v10436_v13 = vadd.f32 %v15432_v22, %v14246_v46  ;;  %v15433_v20 = vld [vmem:[#allocation38_spill] sm:$0xff] }
 0x5af   : > { %v8127_v37 = vmax.f32 %v10415_v50, 0.0  ;;  %7857 = vmatmul.mubr.bf16.gmra.mrb[176].mxu0 %v12604_v15 }
 0x5b0   : > { %v8128_v26 = vmax.f32 %v10417_v32, 0.0  ;;  %7866 = vmatprep.mubr.bf16.mxu0 %v15213_v58  ;;  %v10438_v32 = vadd.f32 %v15433_v20, %v14244_v49  ;;  %v15443_v20 = vld [vmem:[#allocation48_spill] sm:$0xff] }
 0x5b1   : > { %v8347_v54 = vpack.c.bf16 %v8127_v37, %v8125_v51  ;;  %v12607_v51 = vld [vmem:[%s12816_s21 + $0xd58] ss:$36 sps:$4 sm:$0xff]  }
 0x5b2   : > { %v8348_v63 = vpack.c.bf16 %v8128_v26, %v8126_v1  ;;  %v7598_v23 = vpop.f32.mrb[72].mxu0  ;;  %v15434_v26 = vld [vmem:[#allocation39_spill] sm:$0xff] }
 0x5b3   : > { %v10419_v36 = vadd.f32 %v10418_v27, %v7598_v23  ;;  %v7600_v8 = vpop.f32.mrb[73].mxu0 }
 0x5b4   : > { %v10421_v39 = vadd.f32 %v10420_v57, %v7600_v8  ;;  %v7602_v11 = vpop.f32.mrb[74].mxu0  ;;  %10225 = vmatprep.mubr.msk.bf16.mxu1 %vm8544_vm0, %v8348_v63 }
 0x5b5   : > { %v10423_v59 = vadd.f32 %v10422_v4, %v7602_v11  ;;  %v7604_v3 = vpop.f32.mrb[75].mxu0  ;;  %8906 = vmatmul.mubr.bf16.gmra.mrb[68].mxu1 %v8347_v54  ;;  %v8129_v14 = vmax.f32 %v10419_v36, 0.0  ;;  %v10440_v54 = vadd.f32 %v15434_v26, %v14246_v46  ;;  %v10442_v4 = vadd.f32 %v15435_v38, %v14244_v49  ;;  %v15436_v11 = vld [vmem:[#allocation41_spill] sm:$0xff] }
 0x5b6   : > { %v10425_v42 = vadd.f32 %v10424_v0, %v7604_v3  ;;  %v8130_v43 = vmax.f32 %v10421_v39, 0.0  ;;  %v10444_v62 = vadd.f32 %v15436_v11, %v14246_v46  ;;  %v15437_v3 = vld [vmem:[#allocation42_spill] sm:$0xff] }
 0x5b7   : > { %v8131_v60 = vmax.f32 %v10423_v59, 0.0  ;;  %7867 = vmatmul.mubr.bf16.gmra.mrb[180].mxu0 %v12605_v52 }
 0x5b8   : > { %v8132_v24 = vmax.f32 %v10425_v42, 0.0  ;;  %7876 = vmatprep.mubr.bf16.mxu0 %v15213_v58  ;;  %v10446_v42 = vadd.f32 %v15437_v3, %v14244_v49  ;;  %v15447_v3 = vld [vmem:[#allocation52_spill] sm:$0xff] }
 0x5b9   : > { %v8349_v45 = vpack.c.bf16 %v8131_v60, %v8129_v14  ;;  %v12608_v14 = vld [vmem:[%s12816_s21 + $0xda0] ss:$36 sps:$4 sm:$0xff]  }
 0x5ba   : > { %v8350_v35 = vpack.c.bf16 %v8132_v24, %v8130_v43  ;;  %v7608_v40 = vpop.f32.mrb[76].mxu0  ;;  %v15438_v24 = vld [vmem:[#allocation43_spill] sm:$0xff] }
 0x5bb   : > { %v10427_v9 = vadd.f32 %v10426_v2, %v7608_v40  ;;  %v7610_v61 = vpop.f32.mrb[77].mxu0 }
 0x5bc   : > { %v10429_v44 = vadd.f32 %v10428_v25, %v7610_v61  ;;  %v7612_v19 = vpop.f32.mrb[78].mxu0  ;;  %10226 = vmatprep.mubr.msk.bf16.mxu1 %vm8544_vm0, %v8350_v35 }
 0x5bd   : > { %v10431_v55 = vadd.f32 %v10430_v6, %v7612_v19  ;;  %v7614_v10 = vpop.f32.mrb[79].mxu0  ;;  %8914 = vmatmul.mubr.bf16.gmra.mrb[72].mxu1 %v8349_v45  ;;  %v8133_v56 = vmax.f32 %v10427_v9, 0.0  ;;  %v10448_v45 = vadd.f32 %v15438_v24, %v14246_v46  ;;  %v10450_v6 = vadd.f32 %v15439_v41, %v14244_v49  ;;  %v15440_v19 = vld [vmem:[#allocation45_spill] sm:$0xff] }
 0x5be   : > { %v10433_v47 = vadd.f32 %v10432_v29, %v7614_v10  ;;  %v8134_v12 = vmax.f32 %v10429_v44, 0.0  ;;  %v10452_v21 = vadd.f32 %v15440_v19, %v14246_v46  ;;  %v15441_v10 = vld [vmem:[#allocation46_spill] sm:$0xff] }
 0x5bf   : > { %v8135_v31 = vmax.f32 %v10431_v55, 0.0  ;;  %7877 = vmatmul.mubr.bf16.gmra.mrb[184].mxu0 %v12606_v28 }
 0x5c0   : > { %v8136_v5 = vmax.f32 %v10433_v47, 0.0  ;;  %7886 = vmatprep.mubr.bf16.mxu0 %v15213_v58  ;;  %v10454_v47 = vadd.f32 %v15441_v10, %v14244_v49  ;;  %v15451_v10 = vld [vmem:[#allocation56_spill] sm:$0xff] }
 0x5c1   : > { %v8351_v16 = vpack.c.bf16 %v8135_v31, %v8133_v56  ;;  %v12609_v56 = vld [vmem:[%s12816_s21 + $0xde8] ss:$36 sps:$4 sm:$0xff]  }
 0x5c2   : > { %v8352_v15 = vpack.c.bf16 %v8136_v5, %v8134_v12  ;;  %v7618_v17 = vpop.f32.mrb[80].mxu0  ;;  %v15442_v5 = vld [vmem:[#allocation47_spill] sm:$0xff] }
 0x5c3   : > { %v10435_v7 = vadd.f32 %v10434_v30, %v7618_v17  ;;  %v7620_v50 = vpop.f32.mrb[81].mxu0 }
 0x5c4   : > { %v10437_v37 = vadd.f32 %v10436_v13, %v7620_v50  ;;  %v7622_v1 = vpop.f32.mrb[82].mxu0  ;;  %10227 = vmatprep.mubr.msk.bf16.mxu1 %vm8544_vm0, %v8352_v15 }
 0x5c5   : > { %v10439_v33 = vadd.f32 %v10438_v32, %v7622_v1  ;;  %v7624_v27 = vpop.f32.mrb[83].mxu0  ;;  %8922 = vmatmul.mubr.bf16.gmra.mrb[76].mxu1 %v8351_v16  ;;  %v8137_v23 = vmax.f32 %v10435_v7, 0.0  ;;  %v10456_v16 = vadd.f32 %v15442_v5, %v14246_v46  ;;  %v10458_v32 = vadd.f32 %v15443_v20, %v14244_v49  ;;  %v15444_v1 = vld [vmem:[#allocation49_spill] sm:$0xff] }
 0x5c6   : > { %v10441_v63 = vadd.f32 %v10440_v54, %v7624_v27  ;;  %v8138_v57 = vmax.f32 %v10437_v37, 0.0  ;;  %v10460_v26 = vadd.f32 %v15444_v1, %v14246_v46  ;;  %v15445_v27 = vld [vmem:[#allocation50_spill] sm:$0xff] }
 0x5c7   : > { %v8139_v34 = vmax.f32 %v10439_v33, 0.0  ;;  %7887 = vmatmul.mubr.bf16.gmra.mrb[188].mxu0 %v12607_v51 }
 0x5c8   : > { %v8140_v36 = vmax.f32 %v10441_v63, 0.0  ;;  %7896 = vmatprep.mubr.bf16.mxu0 %v15213_v58  ;;  %v10462_v63 = vadd.f32 %v15445_v27, %v14244_v49  ;;  %v15455_v27 = vld [vmem:[#allocation60_spill] sm:$0xff] }
 0x5c9   : > { %v8353_v8 = vpack.c.bf16 %v8139_v34, %v8137_v23  ;;  %v12610_v23 = vld [vmem:[%s12816_s21 + $0xe30] ss:$36 sps:$4 sm:$0xff]  }
 0x5ca   : > { %v8354_v52 = vpack.c.bf16 %v8140_v36, %v8138_v57  ;;  %v7628_v39 = vpop.f32.mrb[84].mxu0  ;;  %v15446_v36 = vld [vmem:[#allocation51_spill] sm:$0xff] }
 0x5cb   : > { %v10443_v0 = vadd.f32 %v10442_v4, %v7628_v39  ;;  %v7630_v59 = vpop.f32.mrb[85].mxu0 }
 0x5cc   : > { %v10445_v60 = vadd.f32 %v10444_v62, %v7630_v59  ;;  %v7632_v43 = vpop.f32.mrb[86].mxu0  ;;  %10228 = vmatprep.mubr.msk.bf16.mxu1 %vm8544_vm0, %v8354_v52 }
 0x5cd   : > { %v10447_v48 = vadd.f32 %v10446_v42, %v7632_v43  ;;  %v7634_v2 = vpop.f32.mrb[87].mxu0  ;;  %8930 = vmatmul.mubr.bf16.gmra.mrb[80].mxu1 %v8353_v8  ;;  %v8141_v40 = vmax.f32 %v10443_v0, 0.0  ;;  %v10464_v8 = vadd.f32 %v15446_v36, %v14246_v46  ;;  %v10466_v42 = vadd.f32 %v15447_v3, %v14244_v49  ;;  %v15448_v43 = vld [vmem:[#allocation53_spill] sm:$0xff] }
 0x5ce   : > { %v10449_v35 = vadd.f32 %v10448_v45, %v7634_v2  ;;  %v8142_v25 = vmax.f32 %v10445_v60, 0.0  ;;  %v10468_v24 = vadd.f32 %v15448_v43, %v14246_v46  ;;  %v15449_v2 = vld [vmem:[#allocation54_spill] sm:$0xff] }
 0x5cf   : > { %v8143_v53 = vmax.f32 %v10447_v48, 0.0  ;;  %7897 = vmatmul.mubr.bf16.gmra.mrb[192].mxu0 %v12608_v14 }
 0x5d0   : > { %v8144_v9 = vmax.f32 %v10449_v35, 0.0  ;;  %7906 = vmatprep.mubr.bf16.mxu0 %v15213_v58  ;;  %v10470_v35 = vadd.f32 %v15449_v2, %v14244_v49  ;;  %v15459_v2 = vld [vmem:[#allocation64_spill] sm:$0xff] }
 0x5d1   : > { %v8355_v61 = vpack.c.bf16 %v8143_v53, %v8141_v40  ;;  %v12611_v40 = vld [vmem:[%s12816_s21 + $0xe78] ss:$36 sps:$4 sm:$0xff]  }
 0x5d2   : > { %v8356_v28 = vpack.c.bf16 %v8144_v9, %v8142_v25  ;;  %v7638_v44 = vpop.f32.mrb[88].mxu0  ;;  %v15450_v9 = vld [vmem:[#allocation55_spill] sm:$0xff] }
 0x5d3   : > { %v10451_v29 = vadd.f32 %v10450_v6, %v7638_v44  ;;  %v7640_v55 = vpop.f32.mrb[89].mxu0 }
 0x5d4   : > { %v10453_v31 = vadd.f32 %v10452_v21, %v7640_v55  ;;  %v7642_v12 = vpop.f32.mrb[90].mxu0  ;;  %10229 = vmatprep.mubr.msk.bf16.mxu1 %vm8544_vm0, %v8356_v28 }
 0x5d5   : > { %v10455_v18 = vadd.f32 %v10454_v47, %v7642_v12  ;;  %v7644_v30 = vpop.f32.mrb[91].mxu0  ;;  %8938 = vmatmul.mubr.bf16.gmra.mrb[84].mxu1 %v8355_v61  ;;  %v8145_v17 = vmax.f32 %v10451_v29, 0.0  ;;  %v10472_v61 = vadd.f32 %v15450_v9, %v14246_v46  ;;  %v10474_v47 = vadd.f32 %v15451_v10, %v14244_v49  ;;  %v15452_v12 = vld [vmem:[#allocation57_spill] sm:$0xff] }
 0x5d6   : > { %v10457_v15 = vadd.f32 %v10456_v16, %v7644_v30  ;;  %v8146_v13 = vmax.f32 %v10453_v31, 0.0  ;;  %v10476_v5 = vadd.f32 %v15452_v12, %v14246_v46  ;;  %v15453_v30 = vld [vmem:[#allocation58_spill] sm:$0xff] }
 0x5d7   : > { %v8147_v22 = vmax.f32 %v10455_v18, 0.0  ;;  %7907 = vmatmul.mubr.bf16.gmra.mrb[196].mxu0 %v12609_v56 }
 0x5d8   : > { %v8148_v7 = vmax.f32 %v10457_v15, 0.0  ;;  %7916 = vmatprep.mubr.bf16.mxu0 %v15213_v58  ;;  %v10478_v15 = vadd.f32 %v15453_v30, %v14244_v49 }
 0x5d9   : > { %v8357_v50 = vpack.c.bf16 %v8147_v22, %v8145_v17  ;;  %v12612_v17 = vld [vmem:[%s12816_s21 + $0xec0] ss:$36 sps:$4 sm:$0xff]  }
 0x5da   : > { %v8358_v51 = vpack.c.bf16 %v8148_v7, %v8146_v13  ;;  %v7648_v37 = vpop.f32.mrb[92].mxu0  ;;  %v15454_v7 = vld [vmem:[#allocation59_spill] sm:$0xff] }
 0x5db   : > { %v10459_v54 = vadd.f32 %v10458_v32, %v7648_v37  ;;  %v7650_v33 = vpop.f32.mrb[93].mxu0 }
 0x5dc   : > { %v10461_v34 = vadd.f32 %v10460_v26, %v7650_v33  ;;  %v7652_v57 = vpop.f32.mrb[94].mxu0  ;;  %10230 = vmatprep.mubr.msk.bf16.mxu1 %vm8544_vm0, %v8358_v51 }
 0x5dd   : > { %v10463_v38 = vadd.f32 %v10462_v63, %v7652_v57  ;;  %v7654_v4 = vpop.f32.mrb[95].mxu0  ;;  %8946 = vmatmul.mubr.bf16.gmra.mrb[88].mxu1 %v8357_v50  ;;  %v8149_v39 = vmax.f32 %v10459_v54, 0.0  ;;  %v10480_v50 = vadd.f32 %v15454_v7, %v14246_v46  ;;  %v10482_v63 = vadd.f32 %v15455_v27, %v14244_v49  ;;  %v15456_v57 = vld [vmem:[#allocation61_spill] sm:$0xff]  ;;  %v15465_v27 = vld [vmem:[#allocation70_spill] sm:$0xff] }
 0x5de   : > { %v10465_v52 = vadd.f32 %v10464_v8, %v7654_v4  ;;  %v8150_v62 = vmax.f32 %v10461_v34, 0.0  ;;  %v10484_v36 = vadd.f32 %v15456_v57, %v14246_v46  ;;  %v15457_v4 = vld [vmem:[#allocation62_spill] sm:$0xff] }
 0x5df   : > { %v8151_v11 = vmax.f32 %v10463_v38, 0.0  ;;  %7917 = vmatmul.mubr.bf16.gmra.mrb[200].mxu0 %v12610_v23 }
 0x5e0   : > { %v8152_v0 = vmax.f32 %v10465_v52, 0.0  ;;  %7926 = vmatprep.mubr.bf16.mxu0 %v15213_v58  ;;  %v10486_v52 = vadd.f32 %v15457_v4, %v14244_v49 }
 0x5e1   : > { %v8359_v59 = vpack.c.bf16 %v8151_v11, %v8149_v39  ;;  %v12613_v39 = vld [vmem:[%s12816_s21 + $0xf08] ss:$36 sps:$4 sm:$0xff]  }
 0x5e2   : > { %v8360_v14 = vpack.c.bf16 %v8152_v0, %v8150_v62  ;;  %v7658_v60 = vpop.f32.mrb[96].mxu0  ;;  %v15458_v0 = vld [vmem:[#allocation63_spill] sm:$0xff] }
 0x5e3   : > { %v10467_v45 = vadd.f32 %v10466_v42, %v7658_v60  ;;  %v7660_v48 = vpop.f32.mrb[97].mxu0 }
 0x5e4   : > { %v10469_v53 = vadd.f32 %v10468_v24, %v7660_v48  ;;  %v7662_v25 = vpop.f32.mrb[98].mxu0  ;;  %10231 = vmatprep.mubr.msk.bf16.mxu1 %vm8544_vm0, %v8360_v14 }
 0x5e5   : > { %v10471_v41 = vadd.f32 %v10470_v35, %v7662_v25  ;;  %v7664_v6 = vpop.f32.mrb[99].mxu0  ;;  %8954 = vmatmul.mubr.bf16.gmra.mrb[92].mxu1 %v8359_v59  ;;  %v8153_v44 = vmax.f32 %v10467_v45, 0.0  ;;  %v10488_v59 = vadd.f32 %v15458_v0, %v14246_v46  ;;  %v10490_v35 = vadd.f32 %v15459_v2, %v14244_v49  ;;  %v15460_v25 = vld [vmem:[#allocation65_spill] sm:$0xff] }
 0x5e6   : > { %v10473_v28 = vadd.f32 %v10472_v61, %v7664_v6  ;;  %v8154_v21 = vmax.f32 %v10469_v53, 0.0  ;;  %v10492_v9 = vadd.f32 %v15460_v25, %v14246_v46  ;;  %v15461_v6 = vld [vmem:[#allocation66_spill] sm:$0xff]  ;;  %v15468_v2 = vld [vmem:[#allocation73_spill] sm:$0xff] }
 0x5e7   : > { %v8155_v19 = vmax.f32 %v10471_v41, 0.0  ;;  %7927 = vmatmul.mubr.bf16.gmra.mrb[204].mxu0 %v12611_v40 }
 0x5e8   : > { %v8156_v29 = vmax.f32 %v10473_v28, 0.0  ;;  %7936 = vmatprep.mubr.bf16.mxu0 %v15213_v58  ;;  %v10494_v28 = vadd.f32 %v15461_v6, %v14244_v49  ;;  %v12616_v6 = vld [vmem:[%s12816_s21 + $0xfe0] ss:$36 sps:$4 sm:$0xff]  }
 0x5e9   : > { %v8361_v55 = vpack.c.bf16 %v8155_v19, %v8153_v44  ;;  %v12614_v44 = vld [vmem:[%s12816_s21 + $0xf50] ss:$36 sps:$4 sm:$0xff]  }
 0x5ea   : > { %v8362_v56 = vpack.c.bf16 %v8156_v29, %v8154_v21  ;;  %v7668_v31 = vpop.f32.mrb[100].mxu0  ;;  %v15462_v29 = vld [vmem:[#allocation67_spill] sm:$0xff] }
 0x5eb   : > { %v10475_v16 = vadd.f32 %v10474_v47, %v7668_v31  ;;  %v7670_v18 = vpop.f32.mrb[101].mxu0  ;;  %v14559_v31 = vld [vmem:[%s15182_s4] ss:$0 sm:$0xff] }
 0x5ec   : > { %v10477_v22 = vadd.f32 %v10476_v5, %v7670_v18  ;;  %v7672_v13 = vpop.f32.mrb[102].mxu0  ;;  %10232 = vmatprep.mubr.msk.bf16.mxu1 %vm8544_vm0, %v8362_v56 }
 0x5ed   : > { %v10479_v20 = vadd.f32 %v10478_v15, %v7672_v13  ;;  %v7674_v32 = vpop.f32.mrb[103].mxu0  ;;  %8962 = vmatmul.mubr.bf16.gmra.mrb[96].mxu1 %v8361_v55  ;;  %v8157_v37 = vmax.f32 %v10475_v16, 0.0  ;;  %v10496_v55 = vadd.f32 %v15462_v29, %v14246_v46  ;;  %v15463_v13 = vld [vmem:[#allocation68_spill] sm:$0xff] }
 0x5ee   : > { %v10481_v51 = vadd.f32 %v10480_v50, %v7674_v32  ;;  %v8158_v26 = vmax.f32 %v10477_v22, 0.0  ;;  %v10498_v7 = vadd.f32 %v15463_v13, %v14244_v49 }
 0x5ef   : > { %v8159_v1 = vmax.f32 %v10479_v20, 0.0  ;;  %7937 = vmatmul.mubr.bf16.gmra.mrb[208].mxu0 %v12612_v17 }
 0x5f0   : > { %v8160_v54 = vmax.f32 %v10481_v51, 0.0  ;;  %7946 = vmatprep.mubr.bf16.mxu0 %v15213_v58  ;;  %v15464_v51 = vld [vmem:[#allocation69_spill] sm:$0xff] }
 0x5f1   : > { %v8363_v33 = vpack.c.bf16 %v8159_v1, %v8157_v37  ;;  %v10500_v37 = vadd.f32 %v15464_v51, %v14246_v46 }
 0x5f2   : > { %v8364_v23 = vpack.c.bf16 %v8160_v54, %v8158_v26  ;;  %v7678_v34 = vpop.f32.mrb[104].mxu0 }
 0x5f3   : > { %v10483_v8 = vadd.f32 %v10482_v63, %v7678_v34  ;;  %v7680_v38 = vpop.f32.mrb[105].mxu0  ;;  %v10502_v63 = vadd.f32 %v15465_v27, %v14244_v49  ;;  %v12617_v27 = vld [vmem:[%s12816_s21 + $0x1028] ss:$36 sps:$4 sm:$0xff]  }
 0x5f4   : > { %v10485_v11 = vadd.f32 %v10484_v36, %v7680_v38  ;;  %v7682_v62 = vpop.f32.mrb[106].mxu0  ;;  %10233 = vmatprep.mubr.msk.bf16.mxu1 %vm8544_vm0, %v8364_v23  ;;  %v12615_v23 = vld [vmem:[%s12816_s21 + $0xf98] ss:$36 sps:$4 sm:$0xff]   ;;  %v15466_v36 = vld [vmem:[#allocation71_spill] sm:$0xff] }
 0x5f5   : > { %v10487_v3 = vadd.f32 %v10486_v52, %v7682_v62  ;;  %v7684_v42 = vpop.f32.mrb[107].mxu0  ;;  %8970 = vmatmul.mubr.bf16.gmra.mrb[100].mxu1 %v8363_v33  ;;  %v8161_v60 = vmax.f32 %v10483_v8, 0.0  ;;  %v10504_v8 = vadd.f32 %v15466_v36, %v14246_v46 }
 0x5f6   : > { %v10489_v14 = vadd.f32 %v10488_v59, %v7684_v42  ;;  %v8162_v24 = vmax.f32 %v10485_v11, 0.0 }
 0x5f7   : > { %v8163_v43 = vmax.f32 %v10487_v3, 0.0  ;;  %7947 = vmatmul.mubr.bf16.gmra.mrb[212].mxu0 %v12613_v39 }
 0x5f8   : > { %v8164_v45 = vmax.f32 %v10489_v14, 0.0  ;;  %7956 = vmatprep.mubr.bf16.mxu0 %v15213_v58 }
 0x5f9   : > { %v8365_v48 = vpack.c.bf16 %v8163_v43, %v8161_v60  ;;  %v15467_v60 = vld [vmem:[#allocation72_spill] sm:$0xff] }
 0x5fa   : > { %v8366_v40 = vpack.c.bf16 %v8164_v45, %v8162_v24  ;;  %v7688_v53 = vpop.f32.mrb[108].mxu0  ;;  %v10506_v43 = vadd.f32 %v15467_v60, %v14244_v49 }
 0x5fb   : > { %v10491_v61 = vadd.f32 %v10490_v35, %v7688_v53  ;;  %v7690_v41 = vpop.f32.mrb[109].mxu0  ;;  %v10508_v35 = vadd.f32 %v15468_v2, %v14246_v46 }
 0x5fc   : > { %v10493_v19 = vadd.f32 %v10492_v9, %v7690_v41  ;;  %v7692_v21 = vpop.f32.mrb[110].mxu0  ;;  %10234 = vmatprep.mubr.msk.bf16.mxu1 %vm8544_vm0, %v8366_v40 }
 0x5fd   : > { %v10495_v10 = vadd.f32 %v10494_v28, %v7692_v21  ;;  %v7694_v47 = vpop.f32.mrb[111].mxu0  ;;  %8978 = vmatmul.mubr.bf16.gmra.mrb[104].mxu1 %v8365_v48  ;;  %v8165_v12 = vmax.f32 %v10491_v61, 0.0  ;;  %v15469_v61 = vld [vmem:[#allocation74_spill] sm:$0xff] }
 0x5fe   : > { %v10497_v56 = vadd.f32 %v10496_v55, %v7694_v47  ;;  %v8166_v16 = vmax.f32 %v10493_v19, 0.0  ;;  %v10510_v41 = vadd.f32 %v15469_v61, %v14244_v49  ;;  %v15470_v19 = vld [vmem:[#allocation75_spill] sm:$0xff]  ;;  %v12618_v61 = vld [vmem:[%s12816_s21 + $0x1070] ss:$36 sps:$4 sm:$0xff]  }
 0x5ff   : > { %v8167_v5 = vmax.f32 %v10495_v10, 0.0  ;;  %7957 = vmatmul.mubr.bf16.gmra.mrb[216].mxu0 %v12614_v44  ;;  %v10512_v21 = vadd.f32 %v15470_v19, %v14246_v46 }
 0x600   : > { %v8168_v18 = vmax.f32 %v10497_v56, 0.0  ;;  %v8771_v30 = vpop.f32.mrb[0].mxu1  ;;  %7966 = vmatprep.mubr.bf16.mxu0 %v15213_v58 }
 0x601   : > { %v8367_v15 = vpack.c.bf16 %v8167_v5, %v8165_v12  ;;  %v8772_v17 = vadd.f32 %v14559_v31, %v8771_v30  ;;  %v8773_v22 = vpop.f32.mrb[1].mxu1 }
 0x602   : > { %v8368_v50 = vpack.c.bf16 %v8168_v18, %v8166_v16  ;;  %v7698_v20 = vpop.f32.mrb[112].mxu0  ;;  %v8774_v32 = vpop.f32.mrb[2].mxu1 }
 0x603   : > { %9282 = vst [vmem:[%s14564_s6] sm:$0xff] %v8772_v17  ;;  %v10499_v1 = vadd.f32 %v10498_v7, %v7698_v20  ;;  %v8775_v26 = vadd.f32 %v14559_v31, %v8774_v32  ;;  %v7700_v54 = vpop.f32.mrb[113].mxu0  ;;  %v8776_v33 = vpop.f32.mrb[3].mxu1  ;;  %v15471_v17 = vld [vmem:[#allocation76_spill] sm:$0xff]  ;;  %v15472_v20 = vld [vmem:[#allocation77_spill] sm:$0xff] }
 0x604   : > { %v10501_v34 = vadd.f32 %v10500_v37, %v7700_v54  ;;  %v7702_v57 = vpop.f32.mrb[114].mxu0  ;;  %10235 = vmatprep.mubr.msk.bf16.mxu1 %vm8544_vm0, %v8368_v50  ;;  %v10514_v22 = vadd.f32 %v15471_v17, %v14244_v49  ;;  %v10516_v32 = vadd.f32 %v15472_v20, %v14246_v46  ;;  %v15473_v54 = vld [vmem:[#allocation78_spill] sm:$0xff] }
 0x605   : > { %9283 = vst [vmem:[%s14564_s6 + $0x8] sm:$0xff] %v8775_v26  ;;  %v10503_v38 = vadd.f32 %v10502_v63, %v7702_v57  ;;  %v7704_v4 = vpop.f32.mrb[115].mxu0  ;;  %8986 = vmatmul.mubr.bf16.gmra.mrb[108].mxu1 %v8367_v15  ;;  %v8169_v39 = vmax.f32 %v10499_v1, 0.0  ;;  %v10518_v33 = vadd.f32 %v15473_v54, %v14244_v49  ;;  %v12619_v54 = vld [vmem:[%s12816_s21 + $0x10b8] ss:$36 sps:$4 sm:$0xff]  }
 0x606   : > { %v10505_v52 = vadd.f32 %v10504_v8, %v7704_v4  ;;  %v8170_v62 = vmax.f32 %v10501_v34, 0.0  ;;  %v15474_v34 = vld [vmem:[#allocation79_spill] sm:$0xff] }
 0x607   : > { %v8171_v11 = vmax.f32 %v10503_v38, 0.0  ;;  %7967 = vmatmul.mubr.bf16.gmra.mrb[220].mxu0 %v12615_v23  ;;  %v10520_v57 = vadd.f32 %v15474_v34, %v14246_v46 }
 0x608   : > { %v8172_v0 = vmax.f32 %v10505_v52, 0.0  ;;  %v8779_v59 = vpop.f32.mrb[4].mxu1  ;;  %7976 = vmatprep.mubr.bf16.mxu0 %v15213_v58 }
 0x609   : > { %v8369_v3 = vpack.c.bf16 %v8171_v11, %v8169_v39  ;;  %v8780_v42 = vadd.f32 %v14559_v31, %v8779_v59  ;;  %v8781_v14 = vpop.f32.mrb[5].mxu1 }
 0x60a   : > { %v8370_v24 = vpack.c.bf16 %v8172_v0, %v8170_v62  ;;  %v7708_v45 = vpop.f32.mrb[116].mxu0  ;;  %v8782_v48 = vpop.f32.mrb[6].mxu1 }
 0x60b   : > { %9284 = vst [vmem:[%s14564_s6 + $0x10] sm:$0xff] %v8780_v42  ;;  %v10507_v40 = vadd.f32 %v10506_v43, %v7708_v45  ;;  %v8783_v53 = vadd.f32 %v14559_v31, %v8782_v48  ;;  %v7710_v25 = vpop.f32.mrb[117].mxu0  ;;  %v8784_v9 = vpop.f32.mrb[7].mxu1  ;;  %v15475_v42 = vld [vmem:[#allocation80_spill] sm:$0xff]  ;;  %v15476_v45 = vld [vmem:[#allocation81_spill] sm:$0xff] }
 0x60c   : > { %v10509_v28 = vadd.f32 %v10508_v35, %v7710_v25  ;;  %v7712_v44 = vpop.f32.mrb[118].mxu0  ;;  %10236 = vmatprep.mubr.msk.bf16.mxu1 %vm8544_vm0, %v8370_v24  ;;  %v10522_v14 = vadd.f32 %v15475_v42, %v14244_v49  ;;  %v10524_v48 = vadd.f32 %v15476_v45, %v14246_v46  ;;  %v15477_v25 = vld [vmem:[#allocation82_spill] sm:$0xff] }
 0x60d   : > { %9285 = vst [vmem:[%s14564_s6 + $0x18] sm:$0xff] %v8783_v53  ;;  %v10511_v29 = vadd.f32 %v10510_v41, %v7712_v44  ;;  %v7714_v55 = vpop.f32.mrb[119].mxu0  ;;  %8994 = vmatmul.mubr.bf16.gmra.mrb[112].mxu1 %v8369_v3  ;;  %v8173_v47 = vmax.f32 %v10507_v40, 0.0  ;;  %v10526_v9 = vadd.f32 %v15477_v25, %v14244_v49  ;;  %v12620_v25 = vld [vmem:[%s12816_s21 + $0x1100] ss:$36 sps:$4 sm:$0xff]  }
 0x60e   : > { %v10513_v10 = vadd.f32 %v10512_v21, %v7714_v55  ;;  %v8174_v12 = vmax.f32 %v10509_v28, 0.0  ;;  %v15478_v28 = vld [vmem:[#allocation83_spill] sm:$0xff] }
 0x60f   : > { %v8175_v56 = vmax.f32 %v10511_v29, 0.0  ;;  %7977 = vmatmul.mubr.bf16.gmra.mrb[224].mxu0 %v12616_v6  ;;  %v10528_v44 = vadd.f32 %v15478_v28, %v14246_v46 }
 0x610   : > { %v8176_v5 = vmax.f32 %v10513_v10, 0.0  ;;  %v8787_v16 = vpop.f32.mrb[8].mxu1  ;;  %7986 = vmatprep.mubr.bf16.mxu0 %v15213_v58 }
 0x611   : > { %v8371_v18 = vpack.c.bf16 %v8175_v56, %v8173_v47  ;;  %v8788_v30 = vadd.f32 %v14559_v31, %v8787_v16  ;;  %v8789_v15 = vpop.f32.mrb[9].mxu1 }
 0x612   : > { %v8372_v13 = vpack.c.bf16 %v8176_v5, %v8174_v12  ;;  %v7718_v7 = vpop.f32.mrb[120].mxu0  ;;  %v8790_v50 = vpop.f32.mrb[10].mxu1 }
 0x613   : > { %9286 = vst [vmem:[%s14564_s6 + $0x20] sm:$0xff] %v8788_v30  ;;  %v10515_v51 = vadd.f32 %v10514_v22, %v7718_v7  ;;  %v8791_v37 = vadd.f32 %v14559_v31, %v8790_v50  ;;  %v7720_v1 = vpop.f32.mrb[121].mxu0  ;;  %v8792_v26 = vpop.f32.mrb[11].mxu1  ;;  %v15479_v30 = vld [vmem:[#allocation84_spill] sm:$0xff]  ;;  %v15480_v7 = vld [vmem:[#allocation85_spill] sm:$0xff] }
 0x614   : > { %v10517_v63 = vadd.f32 %v10516_v32, %v7720_v1  ;;  %v7722_v23 = vpop.f32.mrb[122].mxu0  ;;  %10237 = vmatprep.mubr.msk.bf16.mxu1 %vm8544_vm0, %v8372_v13  ;;  %v10530_v15 = vadd.f32 %v15479_v30, %v14244_v49  ;;  %v10532_v50 = vadd.f32 %v15480_v7, %v14246_v46  ;;  %v15481_v1 = vld [vmem:[#allocation86_spill] sm:$0xff] }
 0x615   : > { %9287 = vst [vmem:[%s14564_s6 + $0x28] sm:$0xff] %v8791_v37  ;;  %v10519_v36 = vadd.f32 %v10518_v33, %v7722_v23  ;;  %v7724_v8 = vpop.f32.mrb[123].mxu0  ;;  %9002 = vmatmul.mubr.bf16.gmra.mrb[116].mxu1 %v8371_v18  ;;  %v8177_v4 = vmax.f32 %v10515_v51, 0.0  ;;  %v10534_v26 = vadd.f32 %v15481_v1, %v14244_v49  ;;  %v12621_v1 = vld [vmem:[%s12816_s21 + $0x1148] ss:$36 sps:$4 sm:$0xff]  }
 0x616   : > { %v10521_v38 = vadd.f32 %v10520_v57, %v7724_v8  ;;  %v8178_v39 = vmax.f32 %v10517_v63, 0.0  ;;  %v15482_v63 = vld [vmem:[#allocation87_spill] sm:$0xff] }
 0x617   : > { %v8179_v52 = vmax.f32 %v10519_v36, 0.0  ;;  %7987 = vmatmul.mubr.bf16.gmra.mrb[228].mxu0 %v12617_v27  ;;  %v10536_v23 = vadd.f32 %v15482_v63, %v14246_v46 }
 0x618   : > { %v8180_v11 = vmax.f32 %v10521_v38, 0.0  ;;  %v8795_v62 = vpop.f32.mrb[12].mxu1  ;;  %7996 = vmatprep.mubr.bf16.mxu0 %v15213_v58 }
 0x619   : > { %v8373_v0 = vpack.c.bf16 %v8179_v52, %v8177_v4  ;;  %v8796_v59 = vadd.f32 %v14559_v31, %v8795_v62  ;;  %v8797_v3 = vpop.f32.mrb[13].mxu1 }
 0x61a   : > { %v8374_v60 = vpack.c.bf16 %v8180_v11, %v8178_v39  ;;  %v7728_v43 = vpop.f32.mrb[124].mxu0  ;;  %v8798_v24 = vpop.f32.mrb[14].mxu1 }
 0x61b   : > { %9288 = vst [vmem:[%s14564_s6 + $0x30] sm:$0xff] %v8796_v59  ;;  %v10523_v2 = vadd.f32 %v10522_v14, %v7728_v43  ;;  %v8799_v35 = vadd.f32 %v14559_v31, %v8798_v24  ;;  %v7730_v40 = vpop.f32.mrb[125].mxu0  ;;  %v8800_v53 = vpop.f32.mrb[15].mxu1  ;;  %v15483_v59 = vld [vmem:[#allocation88_spill] sm:$0xff]  ;;  %v15484_v43 = vld [vmem:[#allocation89_spill] sm:$0xff] }
 0x61c   : > { %v10525_v41 = vadd.f32 %v10524_v48, %v7730_v40  ;;  %v7732_v6 = vpop.f32.mrb[126].mxu0  ;;  %10238 = vmatprep.mubr.msk.bf16.mxu1 %vm8544_vm0, %v8374_v60  ;;  %v10538_v3 = vadd.f32 %v15483_v59, %v14244_v49  ;;  %v10540_v24 = vadd.f32 %v15484_v43, %v14246_v46  ;;  %v15485_v40 = vld [vmem:[#allocation90_spill] sm:$0xff] }
 0x61d   : > { %9289 = vst [vmem:[%s14564_s6 + $0x38] sm:$0xff] %v8799_v35  ;;  %v10527_v19 = vadd.f32 %v10526_v9, %v7732_v6  ;;  %v7734_v21 = vpop.f32.mrb[127].mxu0  ;;  %9010 = vmatmul.mubr.bf16.gmra.mrb[120].mxu1 %v8373_v0  ;;  %v8181_v55 = vmax.f32 %v10523_v2, 0.0  ;;  %v10542_v53 = vadd.f32 %v15485_v40, %v14244_v49  ;;  %v12622_v40 = vld [vmem:[%s12816_s21 + $0x1190] ss:$36 sps:$4 sm:$0xff]  }
 0x61e   : > { %v10529_v29 = vadd.f32 %v10528_v44, %v7734_v21  ;;  %v8182_v47 = vmax.f32 %v10525_v41, 0.0  ;;  %v15486_v41 = vld [vmem:[#allocation91_spill] sm:$0xff] }
 0x61f   : > { %v8183_v10 = vmax.f32 %v10527_v19, 0.0  ;;  %7997 = vmatmul.mubr.bf16.gmra.mrb[232].mxu0 %v12618_v61  ;;  %v10544_v6 = vadd.f32 %v15486_v41, %v14246_v46 }
 0x620   : > { %v8184_v56 = vmax.f32 %v10529_v29, 0.0  ;;  %v8803_v12 = vpop.f32.mrb[16].mxu1  ;;  %8006 = vmatprep.mubr.bf16.mxu0 %v15213_v58 }
 0x621   : > { %v8375_v5 = vpack.c.bf16 %v8183_v10, %v8181_v55  ;;  %v8804_v16 = vadd.f32 %v14559_v31, %v8803_v12  ;;  %v8805_v18 = vpop.f32.mrb[17].mxu1 }
 0x622   : > { %v8376_v17 = vpack.c.bf16 %v8184_v56, %v8182_v47  ;;  %v7738_v22 = vpop.f32.mrb[128].mxu0  ;;  %v8806_v13 = vpop.f32.mrb[18].mxu1 }
 0x623   : > { %9290 = vst [vmem:[%s14564_s6 + $0x40] sm:$0xff] %v8804_v16  ;;  %v10531_v20 = vadd.f32 %v10530_v15, %v7738_v22  ;;  %v8807_v32 = vadd.f32 %v14559_v31, %v8806_v13  ;;  %v7740_v51 = vpop.f32.mrb[129].mxu0  ;;  %v8808_v37 = vpop.f32.mrb[19].mxu1  ;;  %v15487_v16 = vld [vmem:[#allocation92_spill] sm:$0xff]  ;;  %v15488_v22 = vld [vmem:[#allocation93_spill] sm:$0xff] }
 0x624   : > { %v10533_v33 = vadd.f32 %v10532_v50, %v7740_v51  ;;  %v7742_v27 = vpop.f32.mrb[130].mxu0  ;;  %10239 = vmatprep.mubr.msk.bf16.mxu1 %vm8544_vm0, %v8376_v17  ;;  %v10546_v18 = vadd.f32 %v15487_v16, %v14244_v49  ;;  %v10548_v13 = vadd.f32 %v15488_v22, %v14246_v46  ;;  %v15489_v51 = vld [vmem:[#allocation94_spill] sm:$0xff] }
 0x625   : > { %9291 = vst [vmem:[%s14564_s6 + $0x48] sm:$0xff] %v8807_v32  ;;  %v10535_v34 = vadd.f32 %v10534_v26, %v7742_v27  ;;  %v7744_v57 = vpop.f32.mrb[131].mxu0  ;;  %9018 = vmatmul.mubr.bf16.gmra.mrb[124].mxu1 %v8375_v5  ;;  %v8185_v8 = vmax.f32 %v10531_v20, 0.0  ;;  %v10550_v37 = vadd.f32 %v15489_v51, %v14244_v49 }
 0x626   : > { %v10537_v36 = vadd.f32 %v10536_v23, %v7744_v57  ;;  %v8186_v4 = vmax.f32 %v10533_v33, 0.0  ;;  %v15490_v33 = vld [vmem:[#allocation95_spill] sm:$0xff] }
 0x627   : > { %v8187_v38 = vmax.f32 %v10535_v34, 0.0  ;;  %8007 = vmatmul.mubr.bf16.gmra.mrb[236].mxu0 %v12619_v54  ;;  %v10552_v27 = vadd.f32 %v15490_v33, %v14246_v46 }
 0x628   : > { %v8188_v52 = vmax.f32 %v10537_v36, 0.0  ;;  %v8811_v39 = vpop.f32.mrb[20].mxu1  ;;  %8016 = vmatprep.mubr.bf16.mxu0 %v15213_v58 }
 0x629   : > { %v8377_v11 = vpack.c.bf16 %v8187_v38, %v8185_v8  ;;  %v8812_v62 = vadd.f32 %v14559_v31, %v8811_v39  ;;  %v8813_v0 = vpop.f32.mrb[21].mxu1 }
 0x62a   : > { %v8378_v42 = vpack.c.bf16 %v8188_v52, %v8186_v4  ;;  %v7748_v14 = vpop.f32.mrb[132].mxu0  ;;  %v8814_v60 = vpop.f32.mrb[22].mxu1 }
 0x62b   : > { %9292 = vst [vmem:[%s14564_s6 + $0x50] sm:$0xff] %v8812_v62  ;;  %v10539_v45 = vadd.f32 %v10538_v3, %v7748_v14  ;;  %v8815_v48 = vadd.f32 %v14559_v31, %v8814_v60  ;;  %v7750_v2 = vpop.f32.mrb[133].mxu0  ;;  %v8816_v35 = vpop.f32.mrb[23].mxu1  ;;  %v15491_v62 = vld [vmem:[#allocation96_spill] sm:$0xff]  ;;  %v15492_v14 = vld [vmem:[#allocation97_spill] sm:$0xff] }
 0x62c   : > { %v10541_v9 = vadd.f32 %v10540_v24, %v7750_v2  ;;  %v7752_v61 = vpop.f32.mrb[134].mxu0  ;;  %10240 = vmatprep.mubr.msk.bf16.mxu1 %vm8544_vm0, %v8378_v42  ;;  %v10554_v0 = vadd.f32 %v15491_v62, %v14244_v49  ;;  %v10556_v60 = vadd.f32 %v15492_v14, %v14246_v46  ;;  %v15493_v2 = vld [vmem:[#allocation98_spill] sm:$0xff] }
 0x62d   : > { %9293 = vst [vmem:[%s14564_s6 + $0x58] sm:$0xff] %v8815_v48  ;;  %v10543_v28 = vadd.f32 %v10542_v53, %v7752_v61  ;;  %v7754_v44 = vpop.f32.mrb[135].mxu0  ;;  %9026 = vmatmul.mubr.bf16.gmra.mrb[128].mxu1 %v8377_v11  ;;  %v8189_v21 = vmax.f32 %v10539_v45, 0.0  ;;  %v10558_v35 = vadd.f32 %v15493_v2, %v14244_v49 }
 0x62e   : > { %v10545_v19 = vadd.f32 %v10544_v6, %v7754_v44  ;;  %v8190_v55 = vmax.f32 %v10541_v9, 0.0  ;;  %v15494_v9 = vld [vmem:[#allocation99_spill] sm:$0xff] }
 0x62f   : > { %v8191_v29 = vmax.f32 %v10543_v28, 0.0  ;;  %8017 = vmatmul.mubr.bf16.gmra.mrb[240].mxu0 %v12620_v25  ;;  %v10560_v61 = vadd.f32 %v15494_v9, %v14246_v46 }
 0x630   : > { %v8192_v10 = vmax.f32 %v10545_v19, 0.0  ;;  %v8819_v47 = vpop.f32.mrb[24].mxu1  ;;  %8026 = vmatprep.mubr.bf16.mxu0 %v15213_v58 }
 0x631   : > { %v8379_v56 = vpack.c.bf16 %v8191_v29, %v8189_v21  ;;  %v8820_v12 = vadd.f32 %v14559_v31, %v8819_v47  ;;  %v8821_v5 = vpop.f32.mrb[25].mxu1 }
 0x632   : > { %v8380_v30 = vpack.c.bf16 %v8192_v10, %v8190_v55  ;;  %v7758_v15 = vpop.f32.mrb[136].mxu0  ;;  %v8822_v17 = vpop.f32.mrb[26].mxu1 }
 0x633   : > { %9294 = vst [vmem:[%s14564_s6 + $0x60] sm:$0xff] %v8820_v12  ;;  %v10547_v7 = vadd.f32 %v10546_v18, %v7758_v15  ;;  %v8823_v50 = vadd.f32 %v14559_v31, %v8822_v17  ;;  %v7760_v20 = vpop.f32.mrb[137].mxu0  ;;  %v8824_v32 = vpop.f32.mrb[27].mxu1  ;;  %v15495_v12 = vld [vmem:[#allocation100_spill] sm:$0xff]  ;;  %v15496_v15 = vld [vmem:[#allocation101_spill] sm:$0xff] }
 0x634   : > { %v10549_v26 = vadd.f32 %v10548_v13, %v7760_v20  ;;  %v7762_v54 = vpop.f32.mrb[138].mxu0  ;;  %10241 = vmatprep.mubr.msk.bf16.mxu1 %vm8544_vm0, %v8380_v30  ;;  %v10562_v5 = vadd.f32 %v15495_v12, %v14244_v49  ;;  %v10564_v17 = vadd.f32 %v15496_v15, %v14246_v46  ;;  %v12623_v32 = vld [vmem:[%s12816_s21 + $0x11d8] ss:$36 sps:$4 sm:$0xff]  }
 0x635   : > { %9295 = vst [vmem:[%s14564_s6 + $0x68] sm:$0xff] %v8823_v50  ;;  %v10551_v63 = vadd.f32 %v10550_v37, %v7762_v54  ;;  %v7764_v23 = vpop.f32.mrb[139].mxu0  ;;  %9034 = vmatmul.mubr.bf16.gmra.mrb[132].mxu1 %v8379_v56  ;;  %v8193_v57 = vmax.f32 %v10547_v7, 0.0  ;;  %v15497_v50 = vld [vmem:[#allocation102_spill] sm:$0xff] }
 0x636   : > { %v10553_v34 = vadd.f32 %v10552_v27, %v7764_v23  ;;  %v8194_v8 = vmax.f32 %v10549_v26, 0.0  ;;  %v10566_v20 = vadd.f32 %v15497_v50, %v14244_v49  ;;  %v15506_v50 = vld [vmem:[#allocation111_spill] sm:$0xff] }
 0x637   : > { %v8195_v36 = vmax.f32 %v10551_v63, 0.0  ;;  %8027 = vmatmul.mubr.bf16.gmra.mrb[244].mxu0 %v12621_v1  ;;  %v15498_v1 = vld [vmem:[#allocation103_spill] sm:$0xff] }
 0x638   : > { %v8196_v38 = vmax.f32 %v10553_v34, 0.0  ;;  %v8827_v4 = vpop.f32.mrb[28].mxu1  ;;  %8036 = vmatprep.mubr.bf16.mxu0 %v15213_v58  ;;  %v10568_v26 = vadd.f32 %v15498_v1, %v14246_v46 }
 0x639   : > { %v8381_v52 = vpack.c.bf16 %v8195_v36, %v8193_v57  ;;  %v8828_v39 = vadd.f32 %v14559_v31, %v8827_v4  ;;  %v8829_v11 = vpop.f32.mrb[29].mxu1 }
 0x63a   : > { %v8382_v59 = vpack.c.bf16 %v8196_v38, %v8194_v8  ;;  %v7768_v3 = vpop.f32.mrb[140].mxu0  ;;  %v8830_v42 = vpop.f32.mrb[30].mxu1 }
 0x63b   : > { %9296 = vst [vmem:[%s14564_s6 + $0x70] sm:$0xff] %v8828_v39  ;;  %v10555_v43 = vadd.f32 %v10554_v0, %v7768_v3  ;;  %v8831_v24 = vadd.f32 %v14559_v31, %v8830_v42  ;;  %v7770_v45 = vpop.f32.mrb[141].mxu0  ;;  %v8832_v48 = vpop.f32.mrb[31].mxu1 }
 0x63c   : > { %v10557_v53 = vadd.f32 %v10556_v60, %v7770_v45  ;;  %v7772_v25 = vpop.f32.mrb[142].mxu0  ;;  %10242 = vmatprep.mubr.msk.bf16.mxu1 %vm8544_vm0, %v8382_v59  ;;  %v15500_v59 = vld [vmem:[#allocation105_spill] sm:$0xff] }
 0x63d   : > { %9297 = vst [vmem:[%s14564_s6 + $0x78] sm:$0xff] %v8831_v24  ;;  %v10559_v41 = vadd.f32 %v10558_v35, %v7772_v25  ;;  %v7774_v6 = vpop.f32.mrb[143].mxu0  ;;  %9042 = vmatmul.mubr.bf16.gmra.mrb[136].mxu1 %v8381_v52  ;;  %v8197_v44 = vmax.f32 %v10555_v43, 0.0  ;;  %v15499_v52 = vld [vmem:[#allocation104_spill] sm:$0xff]  ;;  %v10572_v3 = vadd.f32 %v15500_v59, %v14246_v46  ;;  %v15501_v24 = vld [vmem:[#allocation106_spill] sm:$0xff]  ;;  %v15502_v35 = vld [vmem:[#allocation107_spill] sm:$0xff] }
 0x63e   : > { %v10561_v28 = vadd.f32 %v10560_v61, %v7774_v6  ;;  %v8198_v21 = vmax.f32 %v10557_v53, 0.0  ;;  %v10570_v39 = vadd.f32 %v15499_v52, %v14244_v49  ;;  %v10574_v45 = vadd.f32 %v15501_v24, %v14244_v49  ;;  %v15508_v52 = vld [vmem:[#allocation113_spill] sm:$0xff] }
 0x63f   : > { %v8199_v19 = vmax.f32 %v10559_v41, 0.0  ;;  %8037 = vmatmul.mubr.bf16.gmra.mrb[248].mxu0 %v12622_v40  ;;  %v10576_v40 = vadd.f32 %v15502_v35, %v14246_v46 }
 0x640   : > { %v8200_v29 = vmax.f32 %v10561_v28, 0.0  ;;  %v8835_v55 = vpop.f32.mrb[32].mxu1  ;;  %8046 = vmatprep.mubr.bf16.mxu0 %v15213_v58 }
 0x641   : > { %v8383_v10 = vpack.c.bf16 %v8199_v19, %v8197_v44  ;;  %v8836_v47 = vadd.f32 %v14559_v31, %v8835_v55  ;;  %v8837_v56 = vpop.f32.mrb[33].mxu1  ;;  %v15503_v55 = vld [vmem:[#allocation108_spill] sm:$0xff] }
 0x642   : > { %v8384_v16 = vpack.c.bf16 %v8200_v29, %v8198_v21  ;;  %v7778_v18 = vpop.f32.mrb[144].mxu0  ;;  %v8838_v30 = vpop.f32.mrb[34].mxu1 }
 0x643   : > { %9298 = vst [vmem:[%s14564_s6 + $0x80] sm:$0xff] %v8836_v47  ;;  %v10563_v22 = vadd.f32 %v10562_v5, %v7778_v18  ;;  %v8839_v13 = vadd.f32 %v14559_v31, %v8838_v30  ;;  %v7780_v7 = vpop.f32.mrb[145].mxu0  ;;  %v8840_v58 = vpop.f32.mrb[35].mxu1  ;;  %v15504_v5 = vld [vmem:[#allocation109_spill] sm:$0xff] }
 0x644   : > { %v10565_v51 = vadd.f32 %v10564_v17, %v7780_v7  ;;  %v7782_v37 = vpop.f32.mrb[146].mxu0  ;;  %10243 = vmatprep.mubr.msk.bf16.mxu1 %vm8544_vm0, %v8384_v16  ;;  %v10580_v16 = vadd.f32 %v15504_v5, %v14246_v46 }
 0x645   : > { %9299 = vst [vmem:[%s14564_s6 + $0x88] sm:$0xff] %v8839_v13  ;;  %v10567_v54 = vadd.f32 %v10566_v20, %v7782_v37  ;;  %v7784_v33 = vpop.f32.mrb[147].mxu0  ;;  %9050 = vmatmul.mubr.bf16.gmra.mrb[140].mxu1 %v8383_v10  ;;  %v8201_v63 = vmax.f32 %v10563_v22, 0.0  ;;  %v10578_v10 = vadd.f32 %v15503_v55, %v14244_v49  ;;  %v15505_v22 = vld [vmem:[#allocation110_spill] sm:$0xff]  ;;  %v10584_v20 = vadd.f32 %v15506_v50, %v14246_v46  ;;  %v15512_v55 = vld [vmem:[#allocation117_spill] sm:$0xff] }
 0x646   : > { %v10569_v27 = vadd.f32 %v10568_v26, %v7784_v33  ;;  %v8202_v34 = vmax.f32 %v10565_v51, 0.0  ;;  %v10582_v13 = vadd.f32 %v15505_v22, %v14244_v49 }
 0x647   : > { %v8203_v23 = vmax.f32 %v10567_v54, 0.0  ;;  %8047 = vmatmul.mubr.bf16.gmra.mrb[252].mxu0 %v12623_v32 }
 0x648   : > { %v8204_v57 = vmax.f32 %v10569_v27, 0.0  ;;  %v8843_v36 = vpop.f32.mrb[36].mxu1 }
 0x649   : > { %v8385_v8 = vpack.c.bf16 %v8203_v23, %v8201_v63  ;;  %v8844_v38 = vadd.f32 %v14559_v31, %v8843_v36  ;;  %v8845_v4 = vpop.f32.mrb[37].mxu1 }
 0x64a   : > { %v8386_v11 = vpack.c.bf16 %v8204_v57, %v8202_v34  ;;  %v7788_v62 = vpop.f32.mrb[148].mxu0  ;;  %v8846_v0 = vpop.f32.mrb[38].mxu1  ;;  %v15507_v57 = vld [vmem:[#allocation112_spill] sm:$0xff] }
 0x64b   : > { %9300 = vst [vmem:[%s14564_s6 + $0x90] sm:$0xff] %v8844_v38  ;;  %v10571_v42 = vadd.f32 %v10570_v39, %v7788_v62  ;;  %v8847_v14 = vadd.f32 %v14559_v31, %v8846_v0  ;;  %v7790_v60 = vpop.f32.mrb[149].mxu0  ;;  %v8848_v43 = vpop.f32.mrb[39].mxu1  ;;  %v10586_v36 = vadd.f32 %v15507_v57, %v14244_v49  ;;  %v10588_v39 = vadd.f32 %v15508_v52, %v14246_v46  ;;  %v15516_v57 = vld [vmem:[#allocation121_spill] sm:$0xff] }
 0x64c   : > { %v10573_v48 = vadd.f32 %v10572_v3, %v7790_v60  ;;  %v7792_v2 = vpop.f32.mrb[150].mxu0  ;;  %10244 = vmatprep.mubr.msk.bf16.mxu1 %vm8544_vm0, %v8386_v11  ;;  %v15509_v3 = vld [vmem:[#allocation114_spill] sm:$0xff]  ;;  %v15510_v43 = vld [vmem:[#allocation115_spill] sm:$0xff] }
 0x64d   : > { %9301 = vst [vmem:[%s14564_s6 + $0x98] sm:$0xff] %v8847_v14  ;;  %v10575_v53 = vadd.f32 %v10574_v45, %v7792_v2  ;;  %v7794_v25 = vpop.f32.mrb[151].mxu0  ;;  %9058 = vmatmul.mubr.bf16.gmra.mrb[144].mxu1 %v8385_v8  ;;  %v8205_v61 = vmax.f32 %v10571_v42, 0.0  ;;  %v10590_v42 = vadd.f32 %v15509_v3, %v14244_v49  ;;  %v10592_v24 = vadd.f32 %v15510_v43, %v14246_v46 }
 0x64e   : > { %v10577_v9 = vadd.f32 %v10576_v40, %v7794_v25  ;;  %v8206_v6 = vmax.f32 %v10573_v48, 0.0 }
 0x64f   : > { %v8207_v41 = vmax.f32 %v10575_v53, 0.0 }
 0x650   : > { %v8208_v28 = vmax.f32 %v10577_v9, 0.0  ;;  %v8851_v44 = vpop.f32.mrb[40].mxu1 }
 0x651   : > { %v8387_v19 = vpack.c.bf16 %v8207_v41, %v8205_v61  ;;  %v8852_v21 = vadd.f32 %v14559_v31, %v8851_v44  ;;  %v8853_v29 = vpop.f32.mrb[41].mxu1 }
 0x652   : > { %v8388_v47 = vpack.c.bf16 %v8208_v28, %v8206_v6  ;;  %v7798_v56 = vpop.f32.mrb[152].mxu0  ;;  %v8854_v12 = vpop.f32.mrb[42].mxu1  ;;  %v15511_v28 = vld [vmem:[#allocation116_spill] sm:$0xff] }
 0x653   : > { %9302 = vst [vmem:[%s14564_s6 + $0xa0] sm:$0xff] %v8852_v21  ;;  %v10579_v18 = vadd.f32 %v10578_v10, %v7798_v56  ;;  %v8855_v30 = vadd.f32 %v14559_v31, %v8854_v12  ;;  %v7800_v15 = vpop.f32.mrb[153].mxu0  ;;  %v8856_v17 = vpop.f32.mrb[43].mxu1  ;;  %v10594_v44 = vadd.f32 %v15511_v28, %v14244_v49  ;;  %v10596_v10 = vadd.f32 %v15512_v55, %v14246_v46  ;;  %v15520_v28 = vld [vmem:[#allocation125_spill] sm:$0xff] }
 0x654   : > { %v10581_v7 = vadd.f32 %v10580_v16, %v7800_v15  ;;  %v7802_v58 = vpop.f32.mrb[154].mxu0  ;;  %10245 = vmatprep.mubr.msk.bf16.mxu1 %vm8544_vm0, %v8388_v47  ;;  %v15513_v16 = vld [vmem:[#allocation118_spill] sm:$0xff]  ;;  %v15514_v17 = vld [vmem:[#allocation119_spill] sm:$0xff] }
 0x655   : > { %9303 = vst [vmem:[%s14564_s6 + $0xa8] sm:$0xff] %v8855_v30  ;;  %v10583_v32 = vadd.f32 %v10582_v13, %v7802_v58  ;;  %v7804_v51 = vpop.f32.mrb[155].mxu0  ;;  %9066 = vmatmul.mubr.bf16.gmra.mrb[148].mxu1 %v8387_v19  ;;  %v8209_v1 = vmax.f32 %v10579_v18, 0.0  ;;  %v10598_v18 = vadd.f32 %v15513_v16, %v14244_v49  ;;  %v10600_v22 = vadd.f32 %v15514_v17, %v14246_v46 }
 0x656   : > { %v10585_v37 = vadd.f32 %v10584_v20, %v7804_v51  ;;  %v8210_v54 = vmax.f32 %v10581_v7, 0.0 }
 0x657   : > { %v8211_v26 = vmax.f32 %v10583_v32, 0.0 }
 0x658   : > { %v8212_v33 = vmax.f32 %v10585_v37, 0.0  ;;  %v8859_v27 = vpop.f32.mrb[44].mxu1 }
 0x659   : > { %v8389_v63 = vpack.c.bf16 %v8211_v26, %v8209_v1  ;;  %v8860_v23 = vadd.f32 %v14559_v31, %v8859_v27  ;;  %v8861_v34 = vpop.f32.mrb[45].mxu1 }
 0x65a   : > { %v8390_v8 = vpack.c.bf16 %v8212_v33, %v8210_v54  ;;  %v7808_v38 = vpop.f32.mrb[156].mxu0  ;;  %v8862_v4 = vpop.f32.mrb[46].mxu1  ;;  %v15515_v33 = vld [vmem:[#allocation120_spill] sm:$0xff] }
 0x65b   : > { %9304 = vst [vmem:[%s14564_s6 + $0xb0] sm:$0xff] %v8860_v23  ;;  %v10587_v11 = vadd.f32 %v10586_v36, %v7808_v38  ;;  %v8863_v62 = vadd.f32 %v14559_v31, %v8862_v4  ;;  %v7810_v0 = vpop.f32.mrb[157].mxu0  ;;  %v8864_v59 = vpop.f32.mrb[47].mxu1  ;;  %v10602_v27 = vadd.f32 %v15515_v33, %v14244_v49  ;;  %v10604_v36 = vadd.f32 %v15516_v57, %v14246_v46  ;;  %v15524_v33 = vld [vmem:[#allocation129_spill] sm:$0xff] }
 0x65c   : > { %v10589_v14 = vadd.f32 %v10588_v39, %v7810_v0  ;;  %v7812_v60 = vpop.f32.mrb[158].mxu0  ;;  %10246 = vmatprep.mubr.msk.bf16.mxu1 %vm8544_vm0, %v8390_v8  ;;  %v15517_v39 = vld [vmem:[#allocation122_spill] sm:$0xff]  ;;  %v15518_v59 = vld [vmem:[#allocation123_spill] sm:$0xff] }
 0x65d   : > { %9305 = vst [vmem:[%s14564_s6 + $0xb8] sm:$0xff] %v8863_v62  ;;  %v10591_v45 = vadd.f32 %v10590_v42, %v7812_v60  ;;  %v7814_v48 = vpop.f32.mrb[159].mxu0  ;;  %9074 = vmatmul.mubr.bf16.gmra.mrb[152].mxu1 %v8389_v63  ;;  %v8213_v35 = vmax.f32 %v10587_v11, 0.0  ;;  %v10606_v11 = vadd.f32 %v15517_v39, %v14244_v49  ;;  %v10608_v3 = vadd.f32 %v15518_v59, %v14246_v46 }
 0x65e   : > { %v10593_v2 = vadd.f32 %v10592_v24, %v7814_v48  ;;  %v8214_v53 = vmax.f32 %v10589_v14, 0.0 }
 0x65f   : > { %v8215_v40 = vmax.f32 %v10591_v45, 0.0 }
 0x660   : > { %v8216_v25 = vmax.f32 %v10593_v2, 0.0  ;;  %v8867_v9 = vpop.f32.mrb[48].mxu1 }
 0x661   : > { %v8391_v61 = vpack.c.bf16 %v8215_v40, %v8213_v35  ;;  %v8868_v41 = vadd.f32 %v14559_v31, %v8867_v9  ;;  %v8869_v6 = vpop.f32.mrb[49].mxu1 }
 0x662   : > { %v8392_v19 = vpack.c.bf16 %v8216_v25, %v8214_v53  ;;  %v7818_v21 = vpop.f32.mrb[160].mxu0  ;;  %v8870_v29 = vpop.f32.mrb[50].mxu1  ;;  %v15519_v25 = vld [vmem:[#allocation124_spill] sm:$0xff] }
 0x663   : > { %9306 = vst [vmem:[%s14564_s6 + $0xc0] sm:$0xff] %v8868_v41  ;;  %v10595_v47 = vadd.f32 %v10594_v44, %v7818_v21  ;;  %v8871_v56 = vadd.f32 %v14559_v31, %v8870_v29  ;;  %v7820_v12 = vpop.f32.mrb[161].mxu0  ;;  %v8872_v5 = vpop.f32.mrb[51].mxu1  ;;  %v10610_v9 = vadd.f32 %v15519_v25, %v14244_v49  ;;  %v10612_v44 = vadd.f32 %v15520_v28, %v14246_v46  ;;  %v15528_v25 = vld [vmem:[#allocation133_spill] sm:$0xff] }
 0x664   : > { %v10597_v30 = vadd.f32 %v10596_v10, %v7820_v12  ;;  %v7822_v15 = vpop.f32.mrb[162].mxu0  ;;  %10247 = vmatprep.mubr.msk.bf16.mxu1 %vm8544_vm0, %v8392_v19  ;;  %v15521_v10 = vld [vmem:[#allocation126_spill] sm:$0xff]  ;;  %v15522_v5 = vld [vmem:[#allocation127_spill] sm:$0xff] }
 0x665   : > { %9307 = vst [vmem:[%s14564_s6 + $0xc8] sm:$0xff] %v8871_v56  ;;  %v10599_v13 = vadd.f32 %v10598_v18, %v7822_v15  ;;  %v7824_v7 = vpop.f32.mrb[163].mxu0  ;;  %9082 = vmatmul.mubr.bf16.gmra.mrb[156].mxu1 %v8391_v61  ;;  %v8217_v50 = vmax.f32 %v10595_v47, 0.0  ;;  %v10614_v47 = vadd.f32 %v15521_v10, %v14244_v49  ;;  %v10616_v16 = vadd.f32 %v15522_v5, %v14246_v46 }
 0x666   : > { %v10601_v58 = vadd.f32 %v10600_v22, %v7824_v7  ;;  %v8218_v32 = vmax.f32 %v10597_v30, 0.0 }
 0x667   : > { %v8219_v20 = vmax.f32 %v10599_v13, 0.0 }
 0x668   : > { %v8220_v51 = vmax.f32 %v10601_v58, 0.0  ;;  %v8875_v37 = vpop.f32.mrb[52].mxu1 }
 0x669   : > { %v8393_v1 = vpack.c.bf16 %v8219_v20, %v8217_v50  ;;  %v8876_v26 = vadd.f32 %v14559_v31, %v8875_v37  ;;  %v8877_v54 = vpop.f32.mrb[53].mxu1 }
 0x66a   : > { %v8394_v63 = vpack.c.bf16 %v8220_v51, %v8218_v32  ;;  %v7828_v23 = vpop.f32.mrb[164].mxu0  ;;  %v8878_v34 = vpop.f32.mrb[54].mxu1  ;;  %v15523_v51 = vld [vmem:[#allocation128_spill] sm:$0xff] }
 0x66b   : > { %9308 = vst [vmem:[%s14564_s6 + $0xd0] sm:$0xff] %v8876_v26  ;;  %v10603_v8 = vadd.f32 %v10602_v27, %v7828_v23  ;;  %v8879_v38 = vadd.f32 %v14559_v31, %v8878_v34  ;;  %v7830_v4 = vpop.f32.mrb[165].mxu0  ;;  %v8880_v52 = vpop.f32.mrb[55].mxu1  ;;  %v10618_v37 = vadd.f32 %v15523_v51, %v14244_v49  ;;  %v10620_v27 = vadd.f32 %v15524_v33, %v14246_v46  ;;  %v15532_v51 = vld [vmem:[#allocation137_spill] sm:$0xff] }
 0x66c   : > { %v10605_v62 = vadd.f32 %v10604_v36, %v7830_v4  ;;  %v7832_v0 = vpop.f32.mrb[166].mxu0  ;;  %10248 = vmatprep.mubr.msk.bf16.mxu1 %vm8544_vm0, %v8394_v63  ;;  %v15525_v36 = vld [vmem:[#allocation130_spill] sm:$0xff]  ;;  %v15526_v52 = vld [vmem:[#allocation131_spill] sm:$0xff] }
 0x66d   : > { %9309 = vst [vmem:[%s14564_s6 + $0xd8] sm:$0xff] %v8879_v38  ;;  %v10607_v42 = vadd.f32 %v10606_v11, %v7832_v0  ;;  %v7834_v14 = vpop.f32.mrb[167].mxu0  ;;  %9090 = vmatmul.mubr.bf16.gmra.mrb[160].mxu1 %v8393_v1  ;;  %v8221_v43 = vmax.f32 %v10603_v8, 0.0  ;;  %v10622_v8 = vadd.f32 %v15525_v36, %v14244_v49  ;;  %v10624_v39 = vadd.f32 %v15526_v52, %v14246_v46 }
 0x66e   : > { %v10609_v60 = vadd.f32 %v10608_v3, %v7834_v14  ;;  %v8222_v45 = vmax.f32 %v10605_v62, 0.0 }
 0x66f   : > { %v8223_v24 = vmax.f32 %v10607_v42, 0.0 }
 0x670   : > { %v8224_v48 = vmax.f32 %v10609_v60, 0.0  ;;  %v8883_v2 = vpop.f32.mrb[56].mxu1 }
 0x671   : > { %v8395_v35 = vpack.c.bf16 %v8223_v24, %v8221_v43  ;;  %v8884_v40 = vadd.f32 %v14559_v31, %v8883_v2  ;;  %v8885_v53 = vpop.f32.mrb[57].mxu1 }
 0x672   : > { %v8396_v61 = vpack.c.bf16 %v8224_v48, %v8222_v45  ;;  %v7838_v41 = vpop.f32.mrb[168].mxu0  ;;  %v8886_v6 = vpop.f32.mrb[58].mxu1  ;;  %v15527_v48 = vld [vmem:[#allocation132_spill] sm:$0xff] }
 0x673   : > { %9310 = vst [vmem:[%s14564_s6 + $0xe0] sm:$0xff] %v8884_v40  ;;  %v10611_v19 = vadd.f32 %v10610_v9, %v7838_v41  ;;  %v8887_v21 = vadd.f32 %v14559_v31, %v8886_v6  ;;  %v7840_v29 = vpop.f32.mrb[169].mxu0  ;;  %v8888_v55 = vpop.f32.mrb[59].mxu1  ;;  %v10626_v2 = vadd.f32 %v15527_v48, %v14244_v49  ;;  %v10628_v9 = vadd.f32 %v15528_v25, %v14246_v46  ;;  %v15536_v48 = vld [vmem:[#allocation141_spill] sm:$0xff] }
 0x674   : > { %v10613_v56 = vadd.f32 %v10612_v44, %v7840_v29  ;;  %v7842_v12 = vpop.f32.mrb[170].mxu0  ;;  %10249 = vmatprep.mubr.msk.bf16.mxu1 %vm8544_vm0, %v8396_v61  ;;  %v15529_v44 = vld [vmem:[#allocation134_spill] sm:$0xff]  ;;  %v15530_v55 = vld [vmem:[#allocation135_spill] sm:$0xff] }
 0x675   : > { %9311 = vst [vmem:[%s14564_s6 + $0xe8] sm:$0xff] %v8887_v21  ;;  %v10615_v18 = vadd.f32 %v10614_v47, %v7842_v12  ;;  %v7844_v30 = vpop.f32.mrb[171].mxu0  ;;  %9098 = vmatmul.mubr.bf16.gmra.mrb[164].mxu1 %v8395_v35  ;;  %v8225_v17 = vmax.f32 %v10611_v19, 0.0  ;;  %v10630_v19 = vadd.f32 %v15529_v44, %v14244_v49  ;;  %v10632_v10 = vadd.f32 %v15530_v55, %v14246_v46 }
 0x676   : > { %v10617_v15 = vadd.f32 %v10616_v16, %v7844_v30  ;;  %v8226_v13 = vmax.f32 %v10613_v56, 0.0 }
 0x677   : > { %v8227_v22 = vmax.f32 %v10615_v18, 0.0 }
 0x678   : > { %v8228_v7 = vmax.f32 %v10617_v15, 0.0  ;;  %v8891_v58 = vpop.f32.mrb[60].mxu1 }
 0x679   : > { %v8397_v50 = vpack.c.bf16 %v8227_v22, %v8225_v17  ;;  %v8892_v20 = vadd.f32 %v14559_v31, %v8891_v58  ;;  %v8893_v32 = vpop.f32.mrb[61].mxu1  ;;  %v14808_v17 = vld [vmem:[%s15182_s4] ss:$0 sm:$0xff] }
 0x67a   : > { %v8398_v1 = vpack.c.bf16 %v8228_v7, %v8226_v13  ;;  %v7848_v26 = vpop.f32.mrb[172].mxu0  ;;  %v8894_v54 = vpop.f32.mrb[62].mxu1  ;;  %v15531_v7 = vld [vmem:[#allocation136_spill] sm:$0xff] }
 0x67b   : > { %9312 = vst [vmem:[%s14564_s6 + $0xf0] sm:$0xff] %v8892_v20  ;;  %v10619_v63 = vadd.f32 %v10618_v37, %v7848_v26  ;;  %v8895_v23 = vadd.f32 %v14559_v31, %v8894_v54  ;;  %v7850_v34 = vpop.f32.mrb[173].mxu0  ;;  %v8896_v57 = vpop.f32.mrb[63].mxu1  ;;  %v10634_v58 = vadd.f32 %v15531_v7, %v14244_v49  ;;  %v10636_v37 = vadd.f32 %v15532_v51, %v14246_v46  ;;  %v15540_v7 = vld [vmem:[#allocation145_spill] sm:$0xff] }
 0x67c   : > { %v10621_v38 = vadd.f32 %v10620_v27, %v7850_v34  ;;  %v7852_v4 = vpop.f32.mrb[174].mxu0  ;;  %10250 = vmatprep.mubr.msk.bf16.mxu1 %vm8544_vm0, %v8398_v1  ;;  %v15533_v27 = vld [vmem:[#allocation138_spill] sm:$0xff]  ;;  %v15534_v57 = vld [vmem:[#allocation139_spill] sm:$0xff] }
 0x67d   : > { %9313 = vst [vmem:[%s14564_s6 + $0xf8] sm:$0xff] %v8895_v23  ;;  %v10623_v11 = vadd.f32 %v10622_v8, %v7852_v4  ;;  %v7854_v62 = vpop.f32.mrb[175].mxu0  ;;  %9106 = vmatmul.mubr.bf16.gmra.mrb[168].mxu1 %v8397_v50  ;;  %v8229_v59 = vmax.f32 %v10619_v63, 0.0  ;;  %v10638_v63 = vadd.f32 %v15533_v27, %v14244_v49  ;;  %v10640_v36 = vadd.f32 %v15534_v57, %v14246_v46 }
 0x67e   : > { %v10625_v0 = vadd.f32 %v10624_v39, %v7854_v62  ;;  %v8230_v42 = vmax.f32 %v10621_v38, 0.0 }
 0x67f   : > { %v8231_v3 = vmax.f32 %v10623_v11, 0.0 }
 0x680   : > { %v8232_v14 = vmax.f32 %v10625_v0, 0.0  ;;  %v8899_v60 = vpop.f32.mrb[64].mxu1 }
 0x681   : > { %v8399_v43 = vpack.c.bf16 %v8231_v3, %v8229_v59  ;;  %v8900_v24 = vadd.f32 %v14559_v31, %v8899_v60  ;;  %v8901_v45 = vpop.f32.mrb[65].mxu1 }
 0x682   : > { %v8400_v35 = vpack.c.bf16 %v8232_v14, %v8230_v42  ;;  %v7858_v40 = vpop.f32.mrb[176].mxu0  ;;  %v8902_v53 = vpop.f32.mrb[66].mxu1  ;;  %v15535_v14 = vld [vmem:[#allocation140_spill] sm:$0xff] }
 0x683   : > { %9314 = vst [vmem:[%s14564_s6 + $0x100] sm:$0xff] %v8900_v24  ;;  %v10627_v61 = vadd.f32 %v10626_v2, %v7858_v40  ;;  %v8903_v41 = vadd.f32 %v14559_v31, %v8902_v53  ;;  %v7860_v6 = vpop.f32.mrb[177].mxu0  ;;  %v8904_v28 = vpop.f32.mrb[67].mxu1  ;;  %v10642_v60 = vadd.f32 %v15535_v14, %v14244_v49  ;;  %v10644_v2 = vadd.f32 %v15536_v48, %v14246_v46  ;;  %v15544_v14 = vld [vmem:[#allocation149_spill] sm:$0xff] }
 0x684   : > { %v10629_v21 = vadd.f32 %v10628_v9, %v7860_v6  ;;  %v7862_v29 = vpop.f32.mrb[178].mxu0  ;;  %10251 = vmatprep.mubr.msk.bf16.mxu1 %vm8544_vm0, %v8400_v35  ;;  %v15537_v9 = vld [vmem:[#allocation142_spill] sm:$0xff]  ;;  %v15538_v28 = vld [vmem:[#allocation143_spill] sm:$0xff] }
 0x685   : > { %9315 = vst [vmem:[%s14564_s6 + $0x108] sm:$0xff] %v8903_v41  ;;  %v10631_v47 = vadd.f32 %v10630_v19, %v7862_v29  ;;  %v7864_v56 = vpop.f32.mrb[179].mxu0  ;;  %9114 = vmatmul.mubr.bf16.gmra.mrb[172].mxu1 %v8399_v43  ;;  %v8233_v5 = vmax.f32 %v10627_v61, 0.0  ;;  %v10646_v61 = vadd.f32 %v15537_v9, %v14244_v49  ;;  %v10648_v44 = vadd.f32 %v15538_v28, %v14246_v46 }
 0x686   : > { %v10633_v12 = vadd.f32 %v10632_v10, %v7864_v56  ;;  %v8234_v16 = vmax.f32 %v10629_v21, 0.0 }
 0x687   : > { %v8235_v31 = vmax.f32 %v10631_v47, 0.0 }
 0x688   : > { %v8236_v18 = vmax.f32 %v10633_v12, 0.0  ;;  %v8907_v30 = vpop.f32.mrb[68].mxu1 }
 0x689   : > { %v8401_v15 = vpack.c.bf16 %v8235_v31, %v8233_v5  ;;  %v8908_v22 = vadd.f32 %v14808_v17, %v8907_v30  ;;  %v8909_v13 = vpop.f32.mrb[69].mxu1 }
 0x68a   : > { %v8402_v50 = vpack.c.bf16 %v8236_v18, %v8234_v16  ;;  %v7868_v20 = vpop.f32.mrb[180].mxu0  ;;  %v8910_v32 = vpop.f32.mrb[70].mxu1  ;;  %v15539_v18 = vld [vmem:[#allocation144_spill] sm:$0xff] }
 0x68b   : > { %9316 = vst [vmem:[%s14564_s6 + $0x110] sm:$0xff] %v8908_v22  ;;  %v10635_v1 = vadd.f32 %v10634_v58, %v7868_v20  ;;  %v8911_v26 = vadd.f32 %v14808_v17, %v8910_v32  ;;  %v7870_v54 = vpop.f32.mrb[181].mxu0  ;;  %v8912_v33 = vpop.f32.mrb[71].mxu1  ;;  %v10650_v30 = vadd.f32 %v15539_v18, %v14244_v49  ;;  %v10652_v58 = vadd.f32 %v15540_v7, %v14246_v46  ;;  %v15548_v18 = vld [vmem:[#allocation153_spill] sm:$0xff] }
 0x68c   : > { %v10637_v23 = vadd.f32 %v10636_v37, %v7870_v54  ;;  %v7872_v34 = vpop.f32.mrb[182].mxu0  ;;  %10252 = vmatprep.mubr.msk.bf16.mxu1 %vm8544_vm0, %v8402_v50  ;;  %v15541_v37 = vld [vmem:[#allocation146_spill] sm:$0xff]  ;;  %v15542_v33 = vld [vmem:[#allocation147_spill] sm:$0xff] }
 0x68d   : > { %9317 = vst [vmem:[%s14564_s6 + $0x118] sm:$0xff] %v8911_v26  ;;  %v10639_v8 = vadd.f32 %v10638_v63, %v7872_v34  ;;  %v7874_v38 = vpop.f32.mrb[183].mxu0  ;;  %9122 = vmatmul.mubr.bf16.gmra.mrb[176].mxu1 %v8401_v15  ;;  %v8237_v52 = vmax.f32 %v10635_v1, 0.0  ;;  %v10654_v1 = vadd.f32 %v15541_v37, %v14244_v49  ;;  %v10656_v27 = vadd.f32 %v15542_v33, %v14246_v46 }
 0x68e   : > { %v10641_v4 = vadd.f32 %v10640_v36, %v7874_v38  ;;  %v8238_v11 = vmax.f32 %v10637_v23, 0.0 }
 0x68f   : > { %v8239_v39 = vmax.f32 %v10639_v8, 0.0 }
 0x690   : > { %v8240_v62 = vmax.f32 %v10641_v4, 0.0  ;;  %v8915_v0 = vpop.f32.mrb[72].mxu1 }
 0x691   : > { %v8403_v59 = vpack.c.bf16 %v8239_v39, %v8237_v52  ;;  %v8916_v3 = vadd.f32 %v14808_v17, %v8915_v0  ;;  %v8917_v42 = vpop.f32.mrb[73].mxu1 }
 0x692   : > { %v8404_v43 = vpack.c.bf16 %v8240_v62, %v8238_v11  ;;  %v7878_v24 = vpop.f32.mrb[184].mxu0  ;;  %v8918_v45 = vpop.f32.mrb[74].mxu1  ;;  %v15543_v62 = vld [vmem:[#allocation148_spill] sm:$0xff] }
 0x693   : > { %9318 = vst [vmem:[%s14564_s6 + $0x120] sm:$0xff] %v8916_v3  ;;  %v10643_v35 = vadd.f32 %v10642_v60, %v7878_v24  ;;  %v8919_v40 = vadd.f32 %v14808_v17, %v8918_v45  ;;  %v7880_v53 = vpop.f32.mrb[185].mxu0  ;;  %v8920_v25 = vpop.f32.mrb[75].mxu1  ;;  %v10658_v0 = vadd.f32 %v15543_v62, %v14244_v49  ;;  %v10660_v60 = vadd.f32 %v15544_v14, %v14246_v46  ;;  %v15552_v62 = vld [vmem:[#allocation157_spill] sm:$0xff] }
 0x694   : > { %v10645_v41 = vadd.f32 %v10644_v2, %v7880_v53  ;;  %v7882_v6 = vpop.f32.mrb[186].mxu0  ;;  %10253 = vmatprep.mubr.msk.bf16.mxu1 %vm8544_vm0, %v8404_v43  ;;  %v15545_v2 = vld [vmem:[#allocation150_spill] sm:$0xff]  ;;  %v15546_v25 = vld [vmem:[#allocation151_spill] sm:$0xff] }
 0x695   : > { %9319 = vst [vmem:[%s14564_s6 + $0x128] sm:$0xff] %v8919_v40  ;;  %v10647_v19 = vadd.f32 %v10646_v61, %v7882_v6  ;;  %v7884_v21 = vpop.f32.mrb[187].mxu0  ;;  %9130 = vmatmul.mubr.bf16.gmra.mrb[180].mxu1 %v8403_v59  ;;  %v8241_v55 = vmax.f32 %v10643_v35, 0.0  ;;  %v10662_v35 = vadd.f32 %v15545_v2, %v14244_v49  ;;  %v10664_v9 = vadd.f32 %v15546_v25, %v14246_v46 }
 0x696   : > { %v10649_v29 = vadd.f32 %v10648_v44, %v7884_v21  ;;  %v8242_v47 = vmax.f32 %v10645_v41, 0.0 }
 0x697   : > { %v8243_v10 = vmax.f32 %v10647_v19, 0.0 }
 0x698   : > { %v8244_v56 = vmax.f32 %v10649_v29, 0.0  ;;  %v8923_v12 = vpop.f32.mrb[76].mxu1 }
 0x699   : > { %v8405_v5 = vpack.c.bf16 %v8243_v10, %v8241_v55  ;;  %v8924_v31 = vadd.f32 %v14808_v17, %v8923_v12  ;;  %v8925_v16 = vpop.f32.mrb[77].mxu1 }
 0x69a   : > { %v8406_v15 = vpack.c.bf16 %v8244_v56, %v8242_v47  ;;  %v7888_v22 = vpop.f32.mrb[188].mxu0  ;;  %v8926_v13 = vpop.f32.mrb[78].mxu1  ;;  %v15547_v56 = vld [vmem:[#allocation152_spill] sm:$0xff] }
 0x69b   : > { %9320 = vst [vmem:[%s14564_s6 + $0x130] sm:$0xff] %v8924_v31  ;;  %v10651_v50 = vadd.f32 %v10650_v30, %v7888_v22  ;;  %v8927_v20 = vadd.f32 %v14808_v17, %v8926_v13  ;;  %v7890_v32 = vpop.f32.mrb[189].mxu0  ;;  %v8928_v51 = vpop.f32.mrb[79].mxu1  ;;  %v10666_v12 = vadd.f32 %v15547_v56, %v14244_v49  ;;  %v10668_v30 = vadd.f32 %v15548_v18, %v14246_v46  ;;  %v15556_v56 = vld [vmem:[#allocation161_spill] sm:$0xff] }
 0x69c   : > { %v10653_v26 = vadd.f32 %v10652_v58, %v7890_v32  ;;  %v7892_v54 = vpop.f32.mrb[190].mxu0  ;;  %10254 = vmatprep.mubr.msk.bf16.mxu1 %vm8544_vm0, %v8406_v15  ;;  %v15549_v58 = vld [vmem:[#allocation154_spill] sm:$0xff]  ;;  %v15550_v51 = vld [vmem:[#allocation155_spill] sm:$0xff] }
 0x69d   : > { %9321 = vst [vmem:[%s14564_s6 + $0x138] sm:$0xff] %v8927_v20  ;;  %v10655_v63 = vadd.f32 %v10654_v1, %v7892_v54  ;;  %v7894_v23 = vpop.f32.mrb[191].mxu0  ;;  %9138 = vmatmul.mubr.bf16.gmra.mrb[184].mxu1 %v8405_v5  ;;  %v8245_v57 = vmax.f32 %v10651_v50, 0.0  ;;  %v10670_v50 = vadd.f32 %v15549_v58, %v14244_v49  ;;  %v10672_v37 = vadd.f32 %v15550_v51, %v14246_v46 }
 0x69e   : > { %v10657_v34 = vadd.f32 %v10656_v27, %v7894_v23  ;;  %v8246_v8 = vmax.f32 %v10653_v26, 0.0 }
 0x69f   : > { %v8247_v36 = vmax.f32 %v10655_v63, 0.0 }
 0x6a0   : > { %v8248_v38 = vmax.f32 %v10657_v34, 0.0  ;;  %v8931_v4 = vpop.f32.mrb[80].mxu1 }
 0x6a1   : > { %v8407_v52 = vpack.c.bf16 %v8247_v36, %v8245_v57  ;;  %v8932_v39 = vadd.f32 %v14808_v17, %v8931_v4  ;;  %v8933_v11 = vpop.f32.mrb[81].mxu1 }
 0x6a2   : > { %v8408_v59 = vpack.c.bf16 %v8248_v38, %v8246_v8  ;;  %v7898_v3 = vpop.f32.mrb[192].mxu0  ;;  %v8934_v42 = vpop.f32.mrb[82].mxu1  ;;  %v15551_v38 = vld [vmem:[#allocation156_spill] sm:$0xff] }
 0x6a3   : > { %9322 = vst [vmem:[%s14564_s6 + $0x140] sm:$0xff] %v8932_v39  ;;  %v10659_v43 = vadd.f32 %v10658_v0, %v7898_v3  ;;  %v8935_v24 = vadd.f32 %v14808_v17, %v8934_v42  ;;  %v7900_v45 = vpop.f32.mrb[193].mxu0  ;;  %v8936_v48 = vpop.f32.mrb[83].mxu1  ;;  %v10674_v4 = vadd.f32 %v15551_v38, %v14244_v49  ;;  %v10676_v0 = vadd.f32 %v15552_v62, %v14246_v46  ;;  %v15560_v38 = vld [vmem:[#allocation165_spill] sm:$0xff] }
 0x6a4   : > { %v10661_v40 = vadd.f32 %v10660_v60, %v7900_v45  ;;  %v7902_v53 = vpop.f32.mrb[194].mxu0  ;;  %10255 = vmatprep.mubr.msk.bf16.mxu1 %vm8544_vm0, %v8408_v59  ;;  %v15553_v60 = vld [vmem:[#allocation158_spill] sm:$0xff]  ;;  %v15554_v48 = vld [vmem:[#allocation159_spill] sm:$0xff] }
 0x6a5   : > { %9323 = vst [vmem:[%s14564_s6 + $0x148] sm:$0xff] %v8935_v24  ;;  %v10663_v61 = vadd.f32 %v10662_v35, %v7902_v53  ;;  %v7904_v41 = vpop.f32.mrb[195].mxu0  ;;  %9146 = vmatmul.mubr.bf16.gmra.mrb[188].mxu1 %v8407_v52  ;;  %v8249_v28 = vmax.f32 %v10659_v43, 0.0  ;;  %v10678_v43 = vadd.f32 %v15553_v60, %v14244_v49  ;;  %v10680_v2 = vadd.f32 %v15554_v48, %v14246_v46 }
 0x6a6   : > { %v10665_v6 = vadd.f32 %v10664_v9, %v7904_v41  ;;  %v8250_v19 = vmax.f32 %v10661_v40, 0.0 }
 0x6a7   : > { %v8251_v44 = vmax.f32 %v10663_v61, 0.0 }
 0x6a8   : > { %v8252_v21 = vmax.f32 %v10665_v6, 0.0  ;;  %v8939_v29 = vpop.f32.mrb[84].mxu1 }
 0x6a9   : > { %v8409_v55 = vpack.c.bf16 %v8251_v44, %v8249_v28  ;;  %v8940_v10 = vadd.f32 %v14808_v17, %v8939_v29  ;;  %v8941_v47 = vpop.f32.mrb[85].mxu1 }
 0x6aa   : > { %v8410_v5 = vpack.c.bf16 %v8252_v21, %v8250_v19  ;;  %v7908_v31 = vpop.f32.mrb[196].mxu0  ;;  %v8942_v16 = vpop.f32.mrb[86].mxu1  ;;  %v15555_v21 = vld [vmem:[#allocation160_spill] sm:$0xff] }
 0x6ab   : > { %9324 = vst [vmem:[%s14564_s6 + $0x150] sm:$0xff] %v8940_v10  ;;  %v10667_v15 = vadd.f32 %v10666_v12, %v7908_v31  ;;  %v8943_v22 = vadd.f32 %v14808_v17, %v8942_v16  ;;  %v7910_v13 = vpop.f32.mrb[197].mxu0  ;;  %v8944_v7 = vpop.f32.mrb[87].mxu1  ;;  %v10682_v29 = vadd.f32 %v15555_v21, %v14244_v49  ;;  %v10684_v12 = vadd.f32 %v15556_v56, %v14246_v46  ;;  %v15564_v21 = vld [vmem:[#allocation169_spill] sm:$0xff] }
 0x6ac   : > { %v10669_v20 = vadd.f32 %v10668_v30, %v7910_v13  ;;  %v7912_v32 = vpop.f32.mrb[198].mxu0  ;;  %10256 = vmatprep.mubr.msk.bf16.mxu1 %vm8544_vm0, %v8410_v5  ;;  %v15557_v30 = vld [vmem:[#allocation162_spill] sm:$0xff]  ;;  %v15558_v7 = vld [vmem:[#allocation163_spill] sm:$0xff] }
 0x6ad   : > { %9325 = vst [vmem:[%s14564_s6 + $0x158] sm:$0xff] %v8943_v22  ;;  %v10671_v1 = vadd.f32 %v10670_v50, %v7912_v32  ;;  %v7914_v26 = vpop.f32.mrb[199].mxu0  ;;  %9154 = vmatmul.mubr.bf16.gmra.mrb[192].mxu1 %v8409_v55  ;;  %v8253_v33 = vmax.f32 %v10667_v15, 0.0  ;;  %v10686_v15 = vadd.f32 %v15557_v30, %v14244_v49  ;;  %v10688_v58 = vadd.f32 %v15558_v7, %v14246_v46 }
 0x6ae   : > { %v10673_v54 = vadd.f32 %v10672_v37, %v7914_v26  ;;  %v8254_v63 = vmax.f32 %v10669_v20, 0.0 }
 0x6af   : > { %v8255_v27 = vmax.f32 %v10671_v1, 0.0 }
 0x6b0   : > { %v8256_v23 = vmax.f32 %v10673_v54, 0.0  ;;  %v8947_v34 = vpop.f32.mrb[88].mxu1 }
 0x6b1   : > { %v8411_v57 = vpack.c.bf16 %v8255_v27, %v8253_v33  ;;  %v8948_v36 = vadd.f32 %v14808_v17, %v8947_v34  ;;  %v8949_v8 = vpop.f32.mrb[89].mxu1 }
 0x6b2   : > { %v8412_v52 = vpack.c.bf16 %v8256_v23, %v8254_v63  ;;  %v7918_v39 = vpop.f32.mrb[200].mxu0  ;;  %v8950_v11 = vpop.f32.mrb[90].mxu1  ;;  %v15559_v23 = vld [vmem:[#allocation164_spill] sm:$0xff] }
 0x6b3   : > { %9326 = vst [vmem:[%s14564_s6 + $0x160] sm:$0xff] %v8948_v36  ;;  %v10675_v59 = vadd.f32 %v10674_v4, %v7918_v39  ;;  %v8951_v3 = vadd.f32 %v14808_v17, %v8950_v11  ;;  %v7920_v42 = vpop.f32.mrb[201].mxu0  ;;  %v8952_v14 = vpop.f32.mrb[91].mxu1  ;;  %v10690_v34 = vadd.f32 %v15559_v23, %v14244_v49  ;;  %v10692_v4 = vadd.f32 %v15560_v38, %v14246_v46  ;;  %v15568_v23 = vld [vmem:[#allocation173_spill] sm:$0xff] }
 0x6b4   : > { %v10677_v24 = vadd.f32 %v10676_v0, %v7920_v42  ;;  %v7922_v45 = vpop.f32.mrb[202].mxu0  ;;  %10257 = vmatprep.mubr.msk.bf16.mxu1 %vm8544_vm0, %v8412_v52  ;;  %v15561_v0 = vld [vmem:[#allocation166_spill] sm:$0xff]  ;;  %v15562_v14 = vld [vmem:[#allocation167_spill] sm:$0xff] }
 0x6b5   : > { %9327 = vst [vmem:[%s14564_s6 + $0x168] sm:$0xff] %v8951_v3  ;;  %v10679_v35 = vadd.f32 %v10678_v43, %v7922_v45  ;;  %v7924_v40 = vpop.f32.mrb[203].mxu0  ;;  %9162 = vmatmul.mubr.bf16.gmra.mrb[196].mxu1 %v8411_v57  ;;  %v8257_v25 = vmax.f32 %v10675_v59, 0.0  ;;  %v10694_v59 = vadd.f32 %v15561_v0, %v14244_v49  ;;  %v10696_v60 = vadd.f32 %v15562_v14, %v14246_v46 }
 0x6b6   : > { %v10681_v53 = vadd.f32 %v10680_v2, %v7924_v40  ;;  %v8258_v61 = vmax.f32 %v10677_v24, 0.0 }
 0x6b7   : > { %v8259_v9 = vmax.f32 %v10679_v35, 0.0 }
 0x6b8   : > { %v8260_v41 = vmax.f32 %v10681_v53, 0.0  ;;  %v8955_v6 = vpop.f32.mrb[92].mxu1 }
 0x6b9   : > { %v8413_v28 = vpack.c.bf16 %v8259_v9, %v8257_v25  ;;  %v8956_v44 = vadd.f32 %v14808_v17, %v8955_v6  ;;  %v8957_v19 = vpop.f32.mrb[93].mxu1 }
 0x6ba   : > { %v8414_v55 = vpack.c.bf16 %v8260_v41, %v8258_v61  ;;  %v7928_v10 = vpop.f32.mrb[204].mxu0  ;;  %v8958_v47 = vpop.f32.mrb[94].mxu1  ;;  %v15563_v41 = vld [vmem:[#allocation168_spill] sm:$0xff] }
 0x6bb   : > { %9328 = vst [vmem:[%s14564_s6 + $0x170] sm:$0xff] %v8956_v44  ;;  %v10683_v5 = vadd.f32 %v10682_v29, %v7928_v10  ;;  %v8959_v31 = vadd.f32 %v14808_v17, %v8958_v47  ;;  %v7930_v16 = vpop.f32.mrb[205].mxu0  ;;  %v8960_v18 = vpop.f32.mrb[95].mxu1  ;;  %v10698_v6 = vadd.f32 %v15563_v41, %v14244_v49  ;;  %v10700_v29 = vadd.f32 %v15564_v21, %v14246_v46  ;;  %v15572_v41 = vld [vmem:[#allocation177_spill] sm:$0xff] }
 0x6bc   : > { %v10685_v22 = vadd.f32 %v10684_v12, %v7930_v16  ;;  %v7932_v13 = vpop.f32.mrb[206].mxu0  ;;  %10258 = vmatprep.mubr.msk.bf16.mxu1 %vm8544_vm0, %v8414_v55  ;;  %v15565_v12 = vld [vmem:[#allocation170_spill] sm:$0xff]  ;;  %v15566_v18 = vld [vmem:[#allocation171_spill] sm:$0xff] }
 0x6bd   : > { %9329 = vst [vmem:[%s14564_s6 + $0x178] sm:$0xff] %v8959_v31  ;;  %v10687_v50 = vadd.f32 %v10686_v15, %v7932_v13  ;;  %v7934_v20 = vpop.f32.mrb[207].mxu0  ;;  %9170 = vmatmul.mubr.bf16.gmra.mrb[200].mxu1 %v8413_v28  ;;  %v8261_v51 = vmax.f32 %v10683_v5, 0.0  ;;  %v10702_v5 = vadd.f32 %v15565_v12, %v14244_v49  ;;  %v10704_v30 = vadd.f32 %v15566_v18, %v14246_v46 }
 0x6be   : > { %v10689_v32 = vadd.f32 %v10688_v58, %v7934_v20  ;;  %v8262_v1 = vmax.f32 %v10685_v22, 0.0 }
 0x6bf   : > { %v8263_v37 = vmax.f32 %v10687_v50, 0.0 }
 0x6c0   : > { %v8264_v26 = vmax.f32 %v10689_v32, 0.0  ;;  %v8963_v54 = vpop.f32.mrb[96].mxu1 }
 0x6c1   : > { %v8415_v33 = vpack.c.bf16 %v8263_v37, %v8261_v51  ;;  %v8964_v27 = vadd.f32 %v14808_v17, %v8963_v54  ;;  %v8965_v63 = vpop.f32.mrb[97].mxu1 }
 0x6c2   : > { %v8416_v57 = vpack.c.bf16 %v8264_v26, %v8262_v1  ;;  %v7938_v36 = vpop.f32.mrb[208].mxu0  ;;  %v8966_v8 = vpop.f32.mrb[98].mxu1  ;;  %v15567_v26 = vld [vmem:[#allocation172_spill] sm:$0xff] }
 0x6c3   : > { %9330 = vst [vmem:[%s14564_s6 + $0x180] sm:$0xff] %v8964_v27  ;;  %v10691_v52 = vadd.f32 %v10690_v34, %v7938_v36  ;;  %v8967_v39 = vadd.f32 %v14808_v17, %v8966_v8  ;;  %v7940_v11 = vpop.f32.mrb[209].mxu0  ;;  %v8968_v62 = vpop.f32.mrb[99].mxu1  ;;  %v10706_v54 = vadd.f32 %v15567_v26, %v14244_v49  ;;  %v10708_v34 = vadd.f32 %v15568_v23, %v14246_v46  ;;  %v15576_v26 = vld [vmem:[#allocation181_spill] sm:$0xff] }
 0x6c4   : > { %v10693_v3 = vadd.f32 %v10692_v4, %v7940_v11  ;;  %v7942_v42 = vpop.f32.mrb[210].mxu0  ;;  %10259 = vmatprep.mubr.msk.bf16.mxu1 %vm8544_vm0, %v8416_v57  ;;  %v15569_v4 = vld [vmem:[#allocation174_spill] sm:$0xff]  ;;  %v15570_v62 = vld [vmem:[#allocation175_spill] sm:$0xff] }
 0x6c5   : > { %9331 = vst [vmem:[%s14564_s6 + $0x188] sm:$0xff] %v8967_v39  ;;  %v10695_v43 = vadd.f32 %v10694_v59, %v7942_v42  ;;  %v7944_v24 = vpop.f32.mrb[211].mxu0  ;;  %9178 = vmatmul.mubr.bf16.gmra.mrb[204].mxu1 %v8415_v33  ;;  %v8265_v48 = vmax.f32 %v10691_v52, 0.0  ;;  %v10710_v52 = vadd.f32 %v15569_v4, %v14244_v49  ;;  %v10712_v0 = vadd.f32 %v15570_v62, %v14246_v46 }
 0x6c6   : > { %v10697_v45 = vadd.f32 %v10696_v60, %v7944_v24  ;;  %v8266_v35 = vmax.f32 %v10693_v3, 0.0 }
 0x6c7   : > { %v8267_v2 = vmax.f32 %v10695_v43, 0.0 }
 0x6c8   : > { %v8268_v40 = vmax.f32 %v10697_v45, 0.0  ;;  %v8971_v53 = vpop.f32.mrb[100].mxu1 }
 0x6c9   : > { %v8417_v25 = vpack.c.bf16 %v8267_v2, %v8265_v48  ;;  %v8972_v9 = vadd.f32 %v14808_v17, %v8971_v53  ;;  %v8973_v61 = vpop.f32.mrb[101].mxu1 }
 0x6ca   : > { %v8418_v28 = vpack.c.bf16 %v8268_v40, %v8266_v35  ;;  %v7948_v44 = vpop.f32.mrb[212].mxu0  ;;  %v8974_v19 = vpop.f32.mrb[102].mxu1  ;;  %v15571_v40 = vld [vmem:[#allocation176_spill] sm:$0xff] }
 0x6cb   : > { %9332 = vst [vmem:[%s14564_s6 + $0x190] sm:$0xff] %v8972_v9  ;;  %v10699_v55 = vadd.f32 %v10698_v6, %v7948_v44  ;;  %v8975_v10 = vadd.f32 %v14808_v17, %v8974_v19  ;;  %v7950_v47 = vpop.f32.mrb[213].mxu0  ;;  %v8976_v56 = vpop.f32.mrb[103].mxu1  ;;  %v10714_v53 = vadd.f32 %v15571_v40, %v14244_v49  ;;  %v10716_v6 = vadd.f32 %v15572_v41, %v14246_v46  ;;  %v15580_v40 = vld [vmem:[#allocation185_spill] sm:$0xff] }
 0x6cc   : > { %v10701_v31 = vadd.f32 %v10700_v29, %v7950_v47  ;;  %v7952_v16 = vpop.f32.mrb[214].mxu0  ;;  %10260 = vmatprep.mubr.msk.bf16.mxu1 %vm8544_vm0, %v8418_v28  ;;  %v15573_v29 = vld [vmem:[#allocation178_spill] sm:$0xff]  ;;  %v15574_v56 = vld [vmem:[#allocation179_spill] sm:$0xff] }
 0x6cd   : > { %9333 = vst [vmem:[%s14564_s6 + $0x198] sm:$0xff] %v8975_v10  ;;  %v10703_v15 = vadd.f32 %v10702_v5, %v7952_v16  ;;  %v7954_v22 = vpop.f32.mrb[215].mxu0  ;;  %9186 = vmatmul.mubr.bf16.gmra.mrb[208].mxu1 %v8417_v25  ;;  %v8269_v7 = vmax.f32 %v10699_v55, 0.0  ;;  %v10718_v55 = vadd.f32 %v15573_v29, %v14244_v49  ;;  %v10720_v12 = vadd.f32 %v15574_v56, %v14246_v46 }
 0x6ce   : > { %v10705_v13 = vadd.f32 %v10704_v30, %v7954_v22  ;;  %v8270_v50 = vmax.f32 %v10701_v31, 0.0 }
 0x6cf   : > { %v8271_v58 = vmax.f32 %v10703_v15, 0.0 }
 0x6d0   : > { %v8272_v20 = vmax.f32 %v10705_v13, 0.0  ;;  %v8979_v32 = vpop.f32.mrb[104].mxu1 }
 0x6d1   : > { %v8419_v51 = vpack.c.bf16 %v8271_v58, %v8269_v7  ;;  %v8980_v37 = vadd.f32 %v14808_v17, %v8979_v32  ;;  %v8981_v1 = vpop.f32.mrb[105].mxu1 }
 0x6d2   : > { %v8420_v33 = vpack.c.bf16 %v8272_v20, %v8270_v50  ;;  %v7958_v27 = vpop.f32.mrb[216].mxu0  ;;  %v8982_v63 = vpop.f32.mrb[106].mxu1  ;;  %v15575_v20 = vld [vmem:[#allocation180_spill] sm:$0xff] }
 0x6d3   : > { %9334 = vst [vmem:[%s14564_s6 + $0x1a0] sm:$0xff] %v8980_v37  ;;  %v10707_v57 = vadd.f32 %v10706_v54, %v7958_v27  ;;  %v8983_v36 = vadd.f32 %v14808_v17, %v8982_v63  ;;  %v7960_v8 = vpop.f32.mrb[217].mxu0  ;;  %v8984_v38 = vpop.f32.mrb[107].mxu1  ;;  %v10722_v32 = vadd.f32 %v15575_v20, %v14244_v49  ;;  %v10724_v54 = vadd.f32 %v15576_v26, %v14246_v46  ;;  %v15584_v20 = vld [vmem:[#allocation189_spill] sm:$0xff] }
 0x6d4   : > { %v10709_v39 = vadd.f32 %v10708_v34, %v7960_v8  ;;  %v7962_v11 = vpop.f32.mrb[218].mxu0  ;;  %10261 = vmatprep.mubr.msk.bf16.mxu1 %vm8544_vm0, %v8420_v33  ;;  %v15577_v34 = vld [vmem:[#allocation182_spill] sm:$0xff]  ;;  %v15578_v38 = vld [vmem:[#allocation183_spill] sm:$0xff] }
 0x6d5   : > { %9335 = vst [vmem:[%s14564_s6 + $0x1a8] sm:$0xff] %v8983_v36  ;;  %v10711_v59 = vadd.f32 %v10710_v52, %v7962_v11  ;;  %v7964_v3 = vpop.f32.mrb[219].mxu0  ;;  %9194 = vmatmul.mubr.bf16.gmra.mrb[212].mxu1 %v8419_v51  ;;  %v8273_v14 = vmax.f32 %v10707_v57, 0.0  ;;  %v10726_v57 = vadd.f32 %v15577_v34, %v14244_v49  ;;  %v10728_v4 = vadd.f32 %v15578_v38, %v14246_v46 }
 0x6d6   : > { %v10713_v42 = vadd.f32 %v10712_v0, %v7964_v3  ;;  %v8274_v43 = vmax.f32 %v10709_v39, 0.0 }
 0x6d7   : > { %v8275_v60 = vmax.f32 %v10711_v59, 0.0 }
 0x6d8   : > { %v8276_v24 = vmax.f32 %v10713_v42, 0.0  ;;  %v8987_v45 = vpop.f32.mrb[108].mxu1 }
 0x6d9   : > { %v8421_v48 = vpack.c.bf16 %v8275_v60, %v8273_v14  ;;  %v8988_v2 = vadd.f32 %v14808_v17, %v8987_v45  ;;  %v8989_v35 = vpop.f32.mrb[109].mxu1 }
 0x6da   : > { %v8422_v25 = vpack.c.bf16 %v8276_v24, %v8274_v43  ;;  %v7968_v9 = vpop.f32.mrb[220].mxu0  ;;  %v8990_v61 = vpop.f32.mrb[110].mxu1  ;;  %v15579_v24 = vld [vmem:[#allocation184_spill] sm:$0xff] }
 0x6db   : > { %9336 = vst [vmem:[%s14564_s6 + $0x1b0] sm:$0xff] %v8988_v2  ;;  %v10715_v28 = vadd.f32 %v10714_v53, %v7968_v9  ;;  %v8991_v44 = vadd.f32 %v14808_v17, %v8990_v61  ;;  %v7970_v19 = vpop.f32.mrb[221].mxu0  ;;  %v8992_v21 = vpop.f32.mrb[111].mxu1  ;;  %v10730_v45 = vadd.f32 %v15579_v24, %v14244_v49  ;;  %v10732_v53 = vadd.f32 %v15580_v40, %v14246_v46  ;;  %v15588_v24 = vld [vmem:[#allocation193_spill] sm:$0xff] }
 0x6dc   : > { %v10717_v10 = vadd.f32 %v10716_v6, %v7970_v19  ;;  %v7972_v47 = vpop.f32.mrb[222].mxu0  ;;  %10262 = vmatprep.mubr.msk.bf16.mxu1 %vm8544_vm0, %v8422_v25  ;;  %v15581_v6 = vld [vmem:[#allocation186_spill] sm:$0xff]  ;;  %v15582_v21 = vld [vmem:[#allocation187_spill] sm:$0xff] }
 0x6dd   : > { %9337 = vst [vmem:[%s14564_s6 + $0x1b8] sm:$0xff] %v8991_v44  ;;  %v10719_v5 = vadd.f32 %v10718_v55, %v7972_v47  ;;  %v7974_v31 = vpop.f32.mrb[223].mxu0  ;;  %9202 = vmatmul.mubr.bf16.gmra.mrb[216].mxu1 %v8421_v48  ;;  %v8277_v18 = vmax.f32 %v10715_v28, 0.0  ;;  %v10734_v28 = vadd.f32 %v15581_v6, %v14244_v49  ;;  %v10736_v29 = vadd.f32 %v15582_v21, %v14246_v46 }
 0x6de   : > { %v10721_v16 = vadd.f32 %v10720_v12, %v7974_v31  ;;  %v8278_v15 = vmax.f32 %v10717_v10, 0.0 }
 0x6df   : > { %v8279_v30 = vmax.f32 %v10719_v5, 0.0 }
 0x6e0   : > { %v8280_v22 = vmax.f32 %v10721_v16, 0.0  ;;  %v8995_v13 = vpop.f32.mrb[112].mxu1 }
 0x6e1   : > { %v8423_v7 = vpack.c.bf16 %v8279_v30, %v8277_v18  ;;  %v8996_v58 = vadd.f32 %v14808_v17, %v8995_v13  ;;  %v8997_v50 = vpop.f32.mrb[113].mxu1 }
 0x6e2   : > { %v8424_v51 = vpack.c.bf16 %v8280_v22, %v8278_v15  ;;  %v7978_v37 = vpop.f32.mrb[224].mxu0  ;;  %v8998_v1 = vpop.f32.mrb[114].mxu1  ;;  %v15583_v22 = vld [vmem:[#allocation188_spill] sm:$0xff] }
 0x6e3   : > { %9338 = vst [vmem:[%s14564_s6 + $0x1c0] sm:$0xff] %v8996_v58  ;;  %v10723_v33 = vadd.f32 %v10722_v32, %v7978_v37  ;;  %v8999_v27 = vadd.f32 %v14808_v17, %v8998_v1  ;;  %v7980_v63 = vpop.f32.mrb[225].mxu0  ;;  %v9000_v23 = vpop.f32.mrb[115].mxu1  ;;  %v10738_v13 = vadd.f32 %v15583_v22, %v14244_v49  ;;  %v10740_v32 = vadd.f32 %v15584_v20, %v14246_v46  ;;  %v15592_v22 = vld [vmem:[#allocation197_spill] sm:$0xff] }
 0x6e4   : > { %v10725_v36 = vadd.f32 %v10724_v54, %v7980_v63  ;;  %v7982_v8 = vpop.f32.mrb[226].mxu0  ;;  %10263 = vmatprep.mubr.msk.bf16.mxu1 %vm8544_vm0, %v8424_v51  ;;  %v15585_v54 = vld [vmem:[#allocation190_spill] sm:$0xff]  ;;  %v15586_v23 = vld [vmem:[#allocation191_spill] sm:$0xff] }
 0x6e5   : > { %9339 = vst [vmem:[%s14564_s6 + $0x1c8] sm:$0xff] %v8999_v27  ;;  %v10727_v52 = vadd.f32 %v10726_v57, %v7982_v8  ;;  %v7984_v39 = vpop.f32.mrb[227].mxu0  ;;  %9210 = vmatmul.mubr.bf16.gmra.mrb[220].mxu1 %v8423_v7  ;;  %v8281_v62 = vmax.f32 %v10723_v33, 0.0  ;;  %v10742_v33 = vadd.f32 %v15585_v54, %v14244_v49  ;;  %v10744_v34 = vadd.f32 %v15586_v23, %v14246_v46 }
 0x6e6   : > { %v10729_v11 = vadd.f32 %v10728_v4, %v7984_v39  ;;  %v8282_v59 = vmax.f32 %v10725_v36, 0.0 }
 0x6e7   : > { %v8283_v0 = vmax.f32 %v10727_v52, 0.0 }
 0x6e8   : > { %v8284_v3 = vmax.f32 %v10729_v11, 0.0  ;;  %v9003_v42 = vpop.f32.mrb[116].mxu1 }
 0x6e9   : > { %v8425_v14 = vpack.c.bf16 %v8283_v0, %v8281_v62  ;;  %v9004_v60 = vadd.f32 %v14808_v17, %v9003_v42  ;;  %v9005_v43 = vpop.f32.mrb[117].mxu1 }
 0x6ea   : > { %v8426_v48 = vpack.c.bf16 %v8284_v3, %v8282_v59  ;;  %v7988_v2 = vpop.f32.mrb[228].mxu0  ;;  %v9006_v35 = vpop.f32.mrb[118].mxu1  ;;  %v15587_v3 = vld [vmem:[#allocation192_spill] sm:$0xff] }
 0x6eb   : > { %9340 = vst [vmem:[%s14564_s6 + $0x1d0] sm:$0xff] %v9004_v60  ;;  %v10731_v25 = vadd.f32 %v10730_v45, %v7988_v2  ;;  %v9007_v9 = vadd.f32 %v14808_v17, %v9006_v35  ;;  %v7990_v61 = vpop.f32.mrb[229].mxu0  ;;  %v9008_v41 = vpop.f32.mrb[119].mxu1  ;;  %v10746_v42 = vadd.f32 %v15587_v3, %v14244_v49  ;;  %v10748_v45 = vadd.f32 %v15588_v24, %v14246_v46  ;;  %v15596_v3 = vld [vmem:[#allocation201_spill] sm:$0xff] }
 0x6ec   : > { %v10733_v44 = vadd.f32 %v10732_v53, %v7990_v61  ;;  %v7992_v19 = vpop.f32.mrb[230].mxu0  ;;  %10264 = vmatprep.mubr.msk.bf16.mxu1 %vm8544_vm0, %v8426_v48  ;;  %v15589_v53 = vld [vmem:[#allocation194_spill] sm:$0xff]  ;;  %v15590_v41 = vld [vmem:[#allocation195_spill] sm:$0xff] }
 0x6ed   : > { %9341 = vst [vmem:[%s14564_s6 + $0x1d8] sm:$0xff] %v9007_v9  ;;  %v10735_v55 = vadd.f32 %v10734_v28, %v7992_v19  ;;  %v7994_v10 = vpop.f32.mrb[231].mxu0  ;;  %9218 = vmatmul.mubr.bf16.gmra.mrb[224].mxu1 %v8425_v14  ;;  %v8285_v56 = vmax.f32 %v10731_v25, 0.0  ;;  %v10750_v25 = vadd.f32 %v15589_v53, %v14244_v49  ;;  %v10752_v6 = vadd.f32 %v15590_v41, %v14246_v46 }
 0x6ee   : > { %v10737_v47 = vadd.f32 %v10736_v29, %v7994_v10  ;;  %v8286_v5 = vmax.f32 %v10733_v44, 0.0 }
 0x6ef   : > { %v8287_v12 = vmax.f32 %v10735_v55, 0.0 }
 0x6f0   : > { %v8288_v31 = vmax.f32 %v10737_v47, 0.0  ;;  %v9011_v16 = vpop.f32.mrb[120].mxu1 }
 0x6f1   : > { %v8427_v18 = vpack.c.bf16 %v8287_v12, %v8285_v56  ;;  %v9012_v30 = vadd.f32 %v14808_v17, %v9011_v16  ;;  %v9013_v15 = vpop.f32.mrb[121].mxu1 }
 0x6f2   : > { %v8428_v7 = vpack.c.bf16 %v8288_v31, %v8286_v5  ;;  %v7998_v58 = vpop.f32.mrb[232].mxu0  ;;  %v9014_v50 = vpop.f32.mrb[122].mxu1  ;;  %v15591_v31 = vld [vmem:[#allocation196_spill] sm:$0xff] }
 0x6f3   : > { %9342 = vst [vmem:[%s14564_s6 + $0x1e0] sm:$0xff] %v9012_v30  ;;  %v10739_v51 = vadd.f32 %v10738_v13, %v7998_v58  ;;  %v9015_v37 = vadd.f32 %v14808_v17, %v9014_v50  ;;  %v8000_v1 = vpop.f32.mrb[233].mxu0  ;;  %v9016_v26 = vpop.f32.mrb[123].mxu1  ;;  %v10754_v16 = vadd.f32 %v15591_v31, %v14244_v49  ;;  %v10756_v13 = vadd.f32 %v15592_v22, %v14246_v46  ;;  %v15600_v31 = vld [vmem:[#allocation205_spill] sm:$0xff] }
 0x6f4   : > { %v10741_v27 = vadd.f32 %v10740_v32, %v8000_v1  ;;  %v8002_v63 = vpop.f32.mrb[234].mxu0  ;;  %10265 = vmatprep.mubr.msk.bf16.mxu1 %vm8544_vm0, %v8428_v7  ;;  %v15593_v32 = vld [vmem:[#allocation198_spill] sm:$0xff]  ;;  %v15594_v26 = vld [vmem:[#allocation199_spill] sm:$0xff] }
 0x6f5   : > { %9343 = vst [vmem:[%s14564_s6 + $0x1e8] sm:$0xff] %v9015_v37  ;;  %v10743_v57 = vadd.f32 %v10742_v33, %v8002_v63  ;;  %v8004_v36 = vpop.f32.mrb[235].mxu0  ;;  %9226 = vmatmul.mubr.bf16.gmra.mrb[228].mxu1 %v8427_v18  ;;  %v8289_v38 = vmax.f32 %v10739_v51, 0.0  ;;  %v10758_v51 = vadd.f32 %v15593_v32, %v14244_v49  ;;  %v10760_v54 = vadd.f32 %v15594_v26, %v14246_v46 }
 0x6f6   : > { %v10745_v8 = vadd.f32 %v10744_v34, %v8004_v36  ;;  %v8290_v52 = vmax.f32 %v10741_v27, 0.0 }
 0x6f7   : > { %v8291_v4 = vmax.f32 %v10743_v57, 0.0 }
 0x6f8   : > { %v8292_v39 = vmax.f32 %v10745_v8, 0.0  ;;  %v9019_v11 = vpop.f32.mrb[124].mxu1 }
 0x6f9   : > { %v8429_v62 = vpack.c.bf16 %v8291_v4, %v8289_v38  ;;  %v9020_v0 = vadd.f32 %v14808_v17, %v9019_v11  ;;  %v9021_v59 = vpop.f32.mrb[125].mxu1 }
 0x6fa   : > { %v8430_v14 = vpack.c.bf16 %v8292_v39, %v8290_v52  ;;  %v8008_v60 = vpop.f32.mrb[236].mxu0  ;;  %v9022_v43 = vpop.f32.mrb[126].mxu1  ;;  %v15595_v39 = vld [vmem:[#allocation200_spill] sm:$0xff] }
 0x6fb   : > { %9344 = vst [vmem:[%s14564_s6 + $0x1f0] sm:$0xff] %v9020_v0  ;;  %v10747_v48 = vadd.f32 %v10746_v42, %v8008_v60  ;;  %v9023_v2 = vadd.f32 %v14808_v17, %v9022_v43  ;;  %v8010_v35 = vpop.f32.mrb[237].mxu0  ;;  %v9024_v40 = vpop.f32.mrb[127].mxu1  ;;  %v10762_v11 = vadd.f32 %v15595_v39, %v14244_v49  ;;  %v10764_v42 = vadd.f32 %v15596_v3, %v14246_v46  ;;  %v15604_v39 = vld [vmem:[#allocation209_spill] sm:$0xff] }
 0x6fc   : > { %v10749_v9 = vadd.f32 %v10748_v45, %v8010_v35  ;;  %v8012_v61 = vpop.f32.mrb[238].mxu0  ;;  %10266 = vmatprep.mubr.msk.bf16.mxu1 %vm8544_vm0, %v8430_v14  ;;  %v15597_v45 = vld [vmem:[#allocation202_spill] sm:$0xff]  ;;  %v15598_v40 = vld [vmem:[#allocation203_spill] sm:$0xff] }
 0x6fd   : > { %9345 = vst [vmem:[%s14564_s6 + $0x1f8] sm:$0xff] %v9023_v2  ;;  %v10751_v28 = vadd.f32 %v10750_v25, %v8012_v61  ;;  %v8014_v44 = vpop.f32.mrb[239].mxu0  ;;  %9234 = vmatmul.mubr.bf16.gmra.mrb[232].mxu1 %v8429_v62  ;;  %v8293_v21 = vmax.f32 %v10747_v48, 0.0  ;;  %v10766_v48 = vadd.f32 %v15597_v45, %v14244_v49  ;;  %v10768_v53 = vadd.f32 %v15598_v40, %v14246_v46 }
 0x6fe   : > { %v10753_v19 = vadd.f32 %v10752_v6, %v8014_v44  ;;  %v8294_v55 = vmax.f32 %v10749_v9, 0.0 }
 0x6ff   : > { %v8295_v29 = vmax.f32 %v10751_v28, 0.0 }
 0x700   : > { %v8296_v10 = vmax.f32 %v10753_v19, 0.0  ;;  %v9027_v47 = vpop.f32.mrb[128].mxu1 }
 0x701   : > { %v8431_v56 = vpack.c.bf16 %v8295_v29, %v8293_v21  ;;  %v9028_v12 = vadd.f32 %v14808_v17, %v9027_v47  ;;  %v9029_v5 = vpop.f32.mrb[129].mxu1 }
 0x702   : > { %v8432_v18 = vpack.c.bf16 %v8296_v10, %v8294_v55  ;;  %v8018_v30 = vpop.f32.mrb[240].mxu0  ;;  %v9030_v15 = vpop.f32.mrb[130].mxu1  ;;  %v15599_v10 = vld [vmem:[#allocation204_spill] sm:$0xff] }
 0x703   : > { %9346 = vst [vmem:[%s14564_s6 + $0x200] sm:$0xff] %v9028_v12  ;;  %v10755_v7 = vadd.f32 %v10754_v16, %v8018_v30  ;;  %v9031_v58 = vadd.f32 %v14808_v17, %v9030_v15  ;;  %v8020_v50 = vpop.f32.mrb[241].mxu0  ;;  %v9032_v20 = vpop.f32.mrb[131].mxu1  ;;  %v10770_v47 = vadd.f32 %v15599_v10, %v14244_v49  ;;  %v10772_v16 = vadd.f32 %v15600_v31, %v14246_v46 }
 0x704   : > { %v10757_v37 = vadd.f32 %v10756_v13, %v8020_v50  ;;  %v8022_v1 = vpop.f32.mrb[242].mxu0  ;;  %10267 = vmatprep.mubr.msk.bf16.mxu1 %vm8544_vm0, %v8432_v18  ;;  %v15601_v13 = vld [vmem:[#allocation206_spill] sm:$0xff]  ;;  %v15602_v20 = vld [vmem:[#allocation207_spill] sm:$0xff] }
 0x705   : > { %9347 = vst [vmem:[%s14564_s6 + $0x208] sm:$0xff] %v9031_v58  ;;  %v10759_v33 = vadd.f32 %v10758_v51, %v8022_v1  ;;  %v8024_v27 = vpop.f32.mrb[243].mxu0  ;;  %9242 = vmatmul.mubr.bf16.gmra.mrb[236].mxu1 %v8431_v56  ;;  %v8297_v23 = vmax.f32 %v10755_v7, 0.0  ;;  %v10774_v7 = vadd.f32 %v15601_v13, %v14244_v49  ;;  %v10776_v32 = vadd.f32 %v15602_v20, %v14246_v46 }
 0x706   : > { %v10761_v63 = vadd.f32 %v10760_v54, %v8024_v27  ;;  %v8298_v57 = vmax.f32 %v10757_v37, 0.0 }
 0x707   : > { %v8299_v34 = vmax.f32 %v10759_v33, 0.0 }
 0x708   : > { %v8300_v36 = vmax.f32 %v10761_v63, 0.0  ;;  %v9035_v8 = vpop.f32.mrb[132].mxu1 }
 0x709   : > { %v8433_v38 = vpack.c.bf16 %v8299_v34, %v8297_v23  ;;  %v9036_v4 = vadd.f32 %v14808_v17, %v9035_v8  ;;  %v9037_v52 = vpop.f32.mrb[133].mxu1 }
 0x70a   : > { %v8434_v62 = vpack.c.bf16 %v8300_v36, %v8298_v57  ;;  %v8028_v0 = vpop.f32.mrb[244].mxu0  ;;  %v9038_v59 = vpop.f32.mrb[134].mxu1  ;;  %v15603_v36 = vld [vmem:[#allocation208_spill] sm:$0xff] }
 0x70b   : > { %9348 = vst [vmem:[%s14564_s6 + $0x210] sm:$0xff] %v9036_v4  ;;  %v10763_v14 = vadd.f32 %v10762_v11, %v8028_v0  ;;  %v9039_v60 = vadd.f32 %v14808_v17, %v9038_v59  ;;  %v8030_v43 = vpop.f32.mrb[245].mxu0  ;;  %v9040_v24 = vpop.f32.mrb[135].mxu1  ;;  %v10778_v8 = vadd.f32 %v15603_v36, %v14244_v49  ;;  %v10780_v11 = vadd.f32 %v15604_v39, %v14246_v46  ;;  %v15053_v0 = vld [vmem:[%s15182_s4] ss:$0 sm:$0xff] }
 0x70c   : > { %v10765_v2 = vadd.f32 %v10764_v42, %v8030_v43  ;;  %v8032_v35 = vpop.f32.mrb[246].mxu0  ;;  %10268 = vmatprep.mubr.msk.bf16.mxu1 %vm8544_vm0, %v8434_v62  ;;  %v15605_v42 = vld [vmem:[#allocation210_spill] sm:$0xff]  ;;  %v15606_v24 = vld [vmem:[#allocation211_spill] sm:$0xff] }
 0x70d   : > { %9349 = vst [vmem:[%s14564_s6 + $0x218] sm:$0xff] %v9039_v60  ;;  %v10767_v25 = vadd.f32 %v10766_v48, %v8032_v35  ;;  %v8034_v9 = vpop.f32.mrb[247].mxu0  ;;  %9250 = vmatmul.mubr.bf16.gmra.mrb[240].mxu1 %v8433_v38  ;;  %v8301_v41 = vmax.f32 %v10763_v14, 0.0  ;;  %v10782_v14 = vadd.f32 %v15605_v42, %v14244_v49  ;;  %v10784_v45 = vadd.f32 %v15606_v24, %v14246_v46 }
 0x70e   : > { %v10769_v61 = vadd.f32 %v10768_v53, %v8034_v9  ;;  %v8302_v28 = vmax.f32 %v10765_v2, 0.0 }
 0x70f   : > { %v8303_v6 = vmax.f32 %v10767_v25, 0.0 }
 0x710   : > { %v8304_v44 = vmax.f32 %v10769_v61, 0.0  ;;  %v9043_v19 = vpop.f32.mrb[136].mxu1 }
 0x711   : > { %v8435_v21 = vpack.c.bf16 %v8303_v6, %v8301_v41  ;;  %v9044_v29 = vadd.f32 %v14808_v17, %v9043_v19  ;;  %v9045_v55 = vpop.f32.mrb[137].mxu1 }
 0x712   : > { %v8436_v56 = vpack.c.bf16 %v8304_v44, %v8302_v28  ;;  %v8038_v12 = vpop.f32.mrb[248].mxu0  ;;  %v9046_v5 = vpop.f32.mrb[138].mxu1 }
 0x713   : > { %9350 = vst [vmem:[%s14564_s6 + $0x220] sm:$0xff] %v9044_v29  ;;  %v10771_v18 = vadd.f32 %v10770_v47, %v8038_v12  ;;  %v9047_v30 = vadd.f32 %v14808_v17, %v9046_v5  ;;  %v8040_v15 = vpop.f32.mrb[249].mxu0  ;;  %v9048_v22 = vpop.f32.mrb[139].mxu1 }
 0x714   : > { %v10773_v58 = vadd.f32 %v10772_v16, %v8040_v15  ;;  %v8042_v50 = vpop.f32.mrb[250].mxu0  ;;  %10269 = vmatprep.mubr.msk.bf16.mxu1 %vm8544_vm0, %v8436_v56 }
 0x715   : > { %9351 = vst [vmem:[%s14564_s6 + $0x228] sm:$0xff] %v9047_v30  ;;  %v10775_v51 = vadd.f32 %v10774_v7, %v8042_v50  ;;  %v8044_v37 = vpop.f32.mrb[251].mxu0  ;;  %9258 = vmatmul.mubr.bf16.gmra.mrb[244].mxu1 %v8435_v21  ;;  %v8305_v26 = vmax.f32 %v10771_v18, 0.0 }
 0x716   : > { %v10777_v1 = vadd.f32 %v10776_v32, %v8044_v37  ;;  %v8306_v33 = vmax.f32 %v10773_v58, 0.0 }
 0x717   : > { %v8307_v54 = vmax.f32 %v10775_v51, 0.0 }
 0x718   : > { %v8308_v27 = vmax.f32 %v10777_v1, 0.0  ;;  %v9051_v63 = vpop.f32.mrb[140].mxu1 }
 0x719   : > { %v8437_v23 = vpack.c.bf16 %v8307_v54, %v8305_v26  ;;  %v9052_v34 = vadd.f32 %v14808_v17, %v9051_v63  ;;  %v9053_v57 = vpop.f32.mrb[141].mxu1 }
 0x71a   : > { %v8438_v38 = vpack.c.bf16 %v8308_v27, %v8306_v33  ;;  %v8048_v4 = vpop.f32.mrb[252].mxu0  ;;  %v9054_v52 = vpop.f32.mrb[142].mxu1 }
 0x71b   : > { %9352 = vst [vmem:[%s14564_s6 + $0x230] sm:$0xff] %v9052_v34  ;;  %v10779_v62 = vadd.f32 %v10778_v8, %v8048_v4  ;;  %v9055_v17 = vadd.f32 %v15053_v0, %v9054_v52  ;;  %v8050_v59 = vpop.f32.mrb[253].mxu0  ;;  %v9056_v3 = vpop.f32.mrb[143].mxu1 }
 0x71c   : > { %v10781_v60 = vadd.f32 %v10780_v11, %v8050_v59  ;;  %v8052_v43 = vpop.f32.mrb[254].mxu0  ;;  %10270 = vmatprep.mubr.msk.bf16.mxu1 %vm8544_vm0, %v8438_v38 }
 0x71d   : > { %9353 = vst [vmem:[%s14564_s6 + $0x238] sm:$0xff] %v9055_v17  ;;  %v10783_v48 = vadd.f32 %v10782_v14, %v8052_v43  ;;  %v8054_v2 = vpop.f32.mrb[255].mxu0  ;;  %9266 = vmatmul.mubr.bf16.gmra.mrb[248].mxu1 %v8437_v23  ;;  %v8309_v40 = vmax.f32 %v10779_v62, 0.0 }
 0x71e   : > { %v10785_v35 = vadd.f32 %v10784_v45, %v8054_v2  ;;  %v8310_v25 = vmax.f32 %v10781_v60, 0.0 }
 0x71f   : > { %v8311_v53 = vmax.f32 %v10783_v48, 0.0 }
 0x720   : > { %v8312_v9 = vmax.f32 %v10785_v35, 0.0  ;;  %v9059_v61 = vpop.f32.mrb[144].mxu1 }
 0x721   : > { %v8439_v49 = vpack.c.bf16 %v8311_v53, %v8309_v40  ;;  %v9060_v41 = vadd.f32 %v15053_v0, %v9059_v61  ;;  %v9061_v6 = vpop.f32.mrb[145].mxu1 }
 0x722   : > { %v8440_v28 = vpack.c.bf16 %v8312_v9, %v8310_v25  ;;  %v9062_v46 = vpop.f32.mrb[146].mxu1 }
 0x723   : > { %9354 = vst [vmem:[%s14564_s6 + $0x240] sm:$0xff] %v9060_v41  ;;  %v9063_v44 = vadd.f32 %v15053_v0, %v9062_v46  ;;  %v9064_v19 = vpop.f32.mrb[147].mxu1 }
 0x724   : > { %10271 = vmatprep.mubr.msk.bf16.mxu1 %vm8544_vm0, %v8440_v28 }
 0x725   : > { %9355 = vst [vmem:[%s14564_s6 + $0x248] sm:$0xff] %v9063_v44  ;;  %9274 = vmatmul.mubr.bf16.gmra.mrb[252].mxu1 %v8439_v49 }
 0x728   : > { %v9067_v21 = vpop.f32.mrb[148].mxu1 }
 0x729   : > { %v9068_v29 = vadd.f32 %v15053_v0, %v9067_v21  ;;  %v9069_v55 = vpop.f32.mrb[149].mxu1 }
 0x72a   : > { %v9070_v10 = vpop.f32.mrb[150].mxu1 }
 0x72b   : > { %9356 = vst [vmem:[%s14564_s6 + $0x250] sm:$0xff] %v9068_v29  ;;  %v9071_v47 = vadd.f32 %v15053_v0, %v9070_v10  ;;  %v9072_v56 = vpop.f32.mrb[151].mxu1 }
 0x72d   : > { %9357 = vst [vmem:[%s14564_s6 + $0x258] sm:$0xff] %v9071_v47 }
 0x730   : > { %v9075_v12 = vpop.f32.mrb[152].mxu1 }
 0x731   : > { %v9076_v5 = vadd.f32 %v15053_v0, %v9075_v12  ;;  %v9077_v31 = vpop.f32.mrb[153].mxu1 }
 0x732   : > { %v9078_v16 = vpop.f32.mrb[154].mxu1 }
 0x733   : > { %9358 = vst [vmem:[%s14564_s6 + $0x260] sm:$0xff] %v9076_v5  ;;  %v9079_v18 = vadd.f32 %v15053_v0, %v9078_v16  ;;  %v9080_v30 = vpop.f32.mrb[155].mxu1 }
 0x735   : > { %9359 = vst [vmem:[%s14564_s6 + $0x268] sm:$0xff] %v9079_v18 }
 0x738   : > { %v9083_v15 = vpop.f32.mrb[156].mxu1 }
 0x739   : > { %v9084_v22 = vadd.f32 %v15053_v0, %v9083_v15  ;;  %v9085_v13 = vpop.f32.mrb[157].mxu1 }
 0x73a   : > { %v9086_v7 = vpop.f32.mrb[158].mxu1 }
 0x73b   : > { %9360 = vst [vmem:[%s14564_s6 + $0x270] sm:$0xff] %v9084_v22  ;;  %v9087_v58 = vadd.f32 %v15053_v0, %v9086_v7  ;;  %v9088_v50 = vpop.f32.mrb[159].mxu1 }
 0x73d   : > { %9361 = vst [vmem:[%s14564_s6 + $0x278] sm:$0xff] %v9087_v58 }
 0x740   : > { %v9091_v20 = vpop.f32.mrb[160].mxu1 }
 0x741   : > { %v9092_v32 = vadd.f32 %v15053_v0, %v9091_v20  ;;  %v9093_v51 = vpop.f32.mrb[161].mxu1 }
 0x742   : > { %v9094_v37 = vpop.f32.mrb[162].mxu1 }
 0x743   : > { %9362 = vst [vmem:[%s14564_s6 + $0x280] sm:$0xff] %v9092_v32  ;;  %v9095_v1 = vadd.f32 %v15053_v0, %v9094_v37  ;;  %v9096_v26 = vpop.f32.mrb[163].mxu1 }
 0x745   : > { %9363 = vst [vmem:[%s14564_s6 + $0x288] sm:$0xff] %v9095_v1 }
 0x748   : > { %v9099_v54 = vpop.f32.mrb[164].mxu1 }
 0x749   : > { %v9100_v33 = vadd.f32 %v15053_v0, %v9099_v54  ;;  %v9101_v27 = vpop.f32.mrb[165].mxu1 }
 0x74a   : > { %v9102_v63 = vpop.f32.mrb[166].mxu1 }
 0x74b   : > { %9364 = vst [vmem:[%s14564_s6 + $0x290] sm:$0xff] %v9100_v33  ;;  %v9103_v23 = vadd.f32 %v15053_v0, %v9102_v63  ;;  %v9104_v34 = vpop.f32.mrb[167].mxu1 }
 0x74d   : > { %9365 = vst [vmem:[%s14564_s6 + $0x298] sm:$0xff] %v9103_v23 }
 0x750   : > { %v9107_v57 = vpop.f32.mrb[168].mxu1 }
 0x751   : > { %v9108_v36 = vadd.f32 %v15053_v0, %v9107_v57  ;;  %v9109_v8 = vpop.f32.mrb[169].mxu1 }
 0x752   : > { %v9110_v38 = vpop.f32.mrb[170].mxu1 }
 0x753   : > { %9366 = vst [vmem:[%s14564_s6 + $0x2a0] sm:$0xff] %v9108_v36  ;;  %v9111_v4 = vadd.f32 %v15053_v0, %v9110_v38  ;;  %v9112_v52 = vpop.f32.mrb[171].mxu1 }
 0x755   : > { %9367 = vst [vmem:[%s14564_s6 + $0x2a8] sm:$0xff] %v9111_v4 }
 0x758   : > { %v9115_v39 = vpop.f32.mrb[172].mxu1 }
 0x759   : > { %v9116_v11 = vadd.f32 %v15053_v0, %v9115_v39  ;;  %v9117_v62 = vpop.f32.mrb[173].mxu1 }
 0x75a   : > { %v9118_v17 = vpop.f32.mrb[174].mxu1 }
 0x75b   : > { %9368 = vst [vmem:[%s14564_s6 + $0x2b0] sm:$0xff] %v9116_v11  ;;  %v9119_v59 = vadd.f32 %v15053_v0, %v9118_v17  ;;  %v9120_v3 = vpop.f32.mrb[175].mxu1 }
 0x75d   : > { %9369 = vst [vmem:[%s14564_s6 + $0x2b8] sm:$0xff] %v9119_v59 }
 0x760   : > { %v9123_v42 = vpop.f32.mrb[176].mxu1 }
 0x761   : > { %v9124_v14 = vadd.f32 %v15053_v0, %v9123_v42  ;;  %v9125_v60 = vpop.f32.mrb[177].mxu1 }
 0x762   : > { %v9126_v43 = vpop.f32.mrb[178].mxu1 }
 0x763   : > { %9370 = vst [vmem:[%s14564_s6 + $0x2c0] sm:$0xff] %v9124_v14  ;;  %v9127_v24 = vadd.f32 %v15053_v0, %v9126_v43  ;;  %v9128_v45 = vpop.f32.mrb[179].mxu1 }
 0x765   : > { %9371 = vst [vmem:[%s14564_s6 + $0x2c8] sm:$0xff] %v9127_v24 }
 0x768   : > { %v9131_v48 = vpop.f32.mrb[180].mxu1 }
 0x769   : > { %v9132_v2 = vadd.f32 %v15053_v0, %v9131_v48  ;;  %v9133_v35 = vpop.f32.mrb[181].mxu1 }
 0x76a   : > { %v9134_v40 = vpop.f32.mrb[182].mxu1 }
 0x76b   : > { %9372 = vst [vmem:[%s14564_s6 + $0x2d0] sm:$0xff] %v9132_v2  ;;  %v9135_v53 = vadd.f32 %v15053_v0, %v9134_v40  ;;  %v9136_v25 = vpop.f32.mrb[183].mxu1 }
 0x76d   : > { %9373 = vst [vmem:[%s14564_s6 + $0x2d8] sm:$0xff] %v9135_v53 }
 0x770   : > { %v9139_v9 = vpop.f32.mrb[184].mxu1 }
 0x771   : > { %v9140_v61 = vadd.f32 %v15053_v0, %v9139_v9  ;;  %v9141_v49 = vpop.f32.mrb[185].mxu1 }
 0x772   : > { %v9142_v41 = vpop.f32.mrb[186].mxu1 }
 0x773   : > { %9374 = vst [vmem:[%s14564_s6 + $0x2e0] sm:$0xff] %v9140_v61  ;;  %v9143_v6 = vadd.f32 %v15053_v0, %v9142_v41  ;;  %v9144_v28 = vpop.f32.mrb[187].mxu1 }
 0x775   : > { %9375 = vst [vmem:[%s14564_s6 + $0x2e8] sm:$0xff] %v9143_v6 }
 0x778   : > { %v9147_v46 = vpop.f32.mrb[188].mxu1 }
 0x779   : > { %v9148_v44 = vadd.f32 %v15053_v0, %v9147_v46  ;;  %v9149_v19 = vpop.f32.mrb[189].mxu1 }
 0x77a   : > { %v9150_v21 = vpop.f32.mrb[190].mxu1 }
 0x77b   : > { %9376 = vst [vmem:[%s14564_s6 + $0x2f0] sm:$0xff] %v9148_v44  ;;  %v9151_v29 = vadd.f32 %v15053_v0, %v9150_v21  ;;  %v9152_v55 = vpop.f32.mrb[191].mxu1 }
 0x77d   : > { %9377 = vst [vmem:[%s14564_s6 + $0x2f8] sm:$0xff] %v9151_v29 }
 0x780   : > { %v9155_v10 = vpop.f32.mrb[192].mxu1 }
 0x781   : > { %v9156_v47 = vadd.f32 %v15053_v0, %v9155_v10  ;;  %v9157_v56 = vpop.f32.mrb[193].mxu1 }
 0x782   : > { %v9158_v12 = vpop.f32.mrb[194].mxu1 }
 0x783   : > { %9378 = vst [vmem:[%s14564_s6 + $0x300] sm:$0xff] %v9156_v47  ;;  %v9159_v5 = vadd.f32 %v15053_v0, %v9158_v12  ;;  %v9160_v31 = vpop.f32.mrb[195].mxu1 }
 0x785   : > { %9379 = vst [vmem:[%s14564_s6 + $0x308] sm:$0xff] %v9159_v5 }
 0x788   : > { %v9163_v16 = vpop.f32.mrb[196].mxu1 }
 0x789   : > { %v9164_v18 = vadd.f32 %v15053_v0, %v9163_v16  ;;  %v9165_v30 = vpop.f32.mrb[197].mxu1 }
 0x78a   : > { %v9166_v15 = vpop.f32.mrb[198].mxu1 }
 0x78b   : > { %9380 = vst [vmem:[%s14564_s6 + $0x310] sm:$0xff] %v9164_v18  ;;  %v9167_v22 = vadd.f32 %v15053_v0, %v9166_v15  ;;  %v9168_v13 = vpop.f32.mrb[199].mxu1 }
 0x78d   : > { %9381 = vst [vmem:[%s14564_s6 + $0x318] sm:$0xff] %v9167_v22 }
 0x790   : > { %v9171_v7 = vpop.f32.mrb[200].mxu1 }
 0x791   : > { %v9172_v58 = vadd.f32 %v15053_v0, %v9171_v7  ;;  %v9173_v50 = vpop.f32.mrb[201].mxu1 }
 0x792   : > { %v9174_v20 = vpop.f32.mrb[202].mxu1 }
 0x793   : > { %9382 = vst [vmem:[%s14564_s6 + $0x320] sm:$0xff] %v9172_v58  ;;  %v9175_v32 = vadd.f32 %v15053_v0, %v9174_v20  ;;  %v9176_v51 = vpop.f32.mrb[203].mxu1 }
 0x795   : > { %9383 = vst [vmem:[%s14564_s6 + $0x328] sm:$0xff] %v9175_v32 }
 0x798   : > { %v9179_v37 = vpop.f32.mrb[204].mxu1 }
 0x799   : > { %v9180_v1 = vadd.f32 %v15053_v0, %v9179_v37  ;;  %v9181_v26 = vpop.f32.mrb[205].mxu1 }
 0x79a   : > { %v9182_v54 = vpop.f32.mrb[206].mxu1 }
 0x79b   : > { %9384 = vst [vmem:[%s14564_s6 + $0x330] sm:$0xff] %v9180_v1  ;;  %v9183_v33 = vadd.f32 %v15053_v0, %v9182_v54  ;;  %v9184_v27 = vpop.f32.mrb[207].mxu1 }
 0x79d   : > { %9385 = vst [vmem:[%s14564_s6 + $0x338] sm:$0xff] %v9183_v33 }
 0x7a0   : > { %v9187_v63 = vpop.f32.mrb[208].mxu1 }
 0x7a1   : > { %v9188_v23 = vadd.f32 %v15053_v0, %v9187_v63  ;;  %v9189_v34 = vpop.f32.mrb[209].mxu1 }
 0x7a2   : > { %v9190_v57 = vpop.f32.mrb[210].mxu1 }
 0x7a3   : > { %9386 = vst [vmem:[%s14564_s6 + $0x340] sm:$0xff] %v9188_v23  ;;  %v9191_v36 = vadd.f32 %v15053_v0, %v9190_v57  ;;  %v9192_v8 = vpop.f32.mrb[211].mxu1 }
 0x7a5   : > { %9387 = vst [vmem:[%s14564_s6 + $0x348] sm:$0xff] %v9191_v36 }
 0x7a8   : > { %v9195_v38 = vpop.f32.mrb[212].mxu1 }
 0x7a9   : > { %v9196_v4 = vadd.f32 %v15053_v0, %v9195_v38  ;;  %v9197_v52 = vpop.f32.mrb[213].mxu1 }
 0x7aa   : > { %v9198_v39 = vpop.f32.mrb[214].mxu1 }
 0x7ab   : > { %9388 = vst [vmem:[%s14564_s6 + $0x350] sm:$0xff] %v9196_v4  ;;  %v9199_v11 = vadd.f32 %v15053_v0, %v9198_v39  ;;  %v9200_v62 = vpop.f32.mrb[215].mxu1 }
 0x7ad   : > { %9389 = vst [vmem:[%s14564_s6 + $0x358] sm:$0xff] %v9199_v11 }
 0x7b0   : > { %v9203_v17 = vpop.f32.mrb[216].mxu1 }
 0x7b1   : > { %v9204_v59 = vadd.f32 %v15053_v0, %v9203_v17  ;;  %v9205_v3 = vpop.f32.mrb[217].mxu1 }
 0x7b2   : > { %v9206_v42 = vpop.f32.mrb[218].mxu1 }
 0x7b3   : > { %9390 = vst [vmem:[%s14564_s6 + $0x360] sm:$0xff] %v9204_v59  ;;  %v9207_v14 = vadd.f32 %v15053_v0, %v9206_v42  ;;  %v9208_v60 = vpop.f32.mrb[219].mxu1 }
 0x7b5   : > { %9391 = vst [vmem:[%s14564_s6 + $0x368] sm:$0xff] %v9207_v14 }
 0x7b8   : > { %v9211_v43 = vpop.f32.mrb[220].mxu1 }
 0x7b9   : > { %v9212_v24 = vadd.f32 %v15053_v0, %v9211_v43  ;;  %v9213_v45 = vpop.f32.mrb[221].mxu1 }
 0x7ba   : > { %v9214_v48 = vpop.f32.mrb[222].mxu1 }
 0x7bb   : > { %9392 = vst [vmem:[%s14564_s6 + $0x370] sm:$0xff] %v9212_v24  ;;  %v9215_v2 = vadd.f32 %v15053_v0, %v9214_v48  ;;  %v9216_v35 = vpop.f32.mrb[223].mxu1 }
 0x7bd   : > { %9393 = vst [vmem:[%s14564_s6 + $0x378] sm:$0xff] %v9215_v2 }
 0x7c0   : > { %v9219_v40 = vpop.f32.mrb[224].mxu1 }
 0x7c1   : > { %v9220_v53 = vadd.f32 %v15053_v0, %v9219_v40  ;;  %v9221_v25 = vpop.f32.mrb[225].mxu1 }
 0x7c2   : > { %v9222_v9 = vpop.f32.mrb[226].mxu1 }
 0x7c3   : > { %9394 = vst [vmem:[%s14564_s6 + $0x380] sm:$0xff] %v9220_v53  ;;  %v9223_v61 = vadd.f32 %v15053_v0, %v9222_v9  ;;  %v9224_v49 = vpop.f32.mrb[227].mxu1 }
 0x7c5   : > { %9395 = vst [vmem:[%s14564_s6 + $0x388] sm:$0xff] %v9223_v61 }
 0x7c8   : > { %v9227_v41 = vpop.f32.mrb[228].mxu1 }
 0x7c9   : > { %v9228_v6 = vadd.f32 %v15053_v0, %v9227_v41  ;;  %v9229_v28 = vpop.f32.mrb[229].mxu1 }
 0x7ca   : > { %v9230_v46 = vpop.f32.mrb[230].mxu1 }
 0x7cb   : > { %9396 = vst [vmem:[%s14564_s6 + $0x390] sm:$0xff] %v9228_v6  ;;  %v9231_v44 = vadd.f32 %v15053_v0, %v9230_v46  ;;  %v9232_v19 = vpop.f32.mrb[231].mxu1 }
 0x7cd   : > { %9397 = vst [vmem:[%s14564_s6 + $0x398] sm:$0xff] %v9231_v44 }
 0x7d0   : > { %v9235_v21 = vpop.f32.mrb[232].mxu1 }
 0x7d1   : > { %v9236_v29 = vadd.f32 %v15053_v0, %v9235_v21  ;;  %v9237_v55 = vpop.f32.mrb[233].mxu1 }
 0x7d2   : > { %v9238_v10 = vpop.f32.mrb[234].mxu1 }
 0x7d3   : > { %9398 = vst [vmem:[%s14564_s6 + $0x3a0] sm:$0xff] %v9236_v29  ;;  %v9239_v47 = vadd.f32 %v15053_v0, %v9238_v10  ;;  %v9240_v56 = vpop.f32.mrb[235].mxu1 }
 0x7d5   : > { %9399 = vst [vmem:[%s14564_s6 + $0x3a8] sm:$0xff] %v9239_v47 }
 0x7d8   : > { %v9243_v12 = vpop.f32.mrb[236].mxu1 }
 0x7d9   : > { %v9244_v5 = vadd.f32 %v15053_v0, %v9243_v12  ;;  %v9245_v31 = vpop.f32.mrb[237].mxu1 }
 0x7da   : > { %v9246_v16 = vpop.f32.mrb[238].mxu1 }
 0x7db   : > { %9400 = vst [vmem:[%s14564_s6 + $0x3b0] sm:$0xff] %v9244_v5  ;;  %v9247_v18 = vadd.f32 %v15053_v0, %v9246_v16  ;;  %v9248_v30 = vpop.f32.mrb[239].mxu1 }
 0x7dd   : > { %9401 = vst [vmem:[%s14564_s6 + $0x3b8] sm:$0xff] %v9247_v18 }
 0x7e0   : > { %v9251_v15 = vpop.f32.mrb[240].mxu1 }
 0x7e1   : > { %v9252_v22 = vadd.f32 %v15053_v0, %v9251_v15  ;;  %v9253_v13 = vpop.f32.mrb[241].mxu1 }
 0x7e2   : > { %v9254_v7 = vpop.f32.mrb[242].mxu1 }
 0x7e3   : > { %9402 = vst [vmem:[%s14564_s6 + $0x3c0] sm:$0xff] %v9252_v22  ;;  %v9255_v58 = vadd.f32 %v15053_v0, %v9254_v7  ;;  %v9256_v50 = vpop.f32.mrb[243].mxu1 }
 0x7e5   : > { %9403 = vst [vmem:[%s14564_s6 + $0x3c8] sm:$0xff] %v9255_v58 }
 0x7e8   : > { %v9259_v20 = vpop.f32.mrb[244].mxu1 }
 0x7e9   : > { %v9260_v32 = vadd.f32 %v15053_v0, %v9259_v20  ;;  %v9261_v51 = vpop.f32.mrb[245].mxu1 }
 0x7ea   : > { %v9262_v37 = vpop.f32.mrb[246].mxu1 }
 0x7eb   : > { %9404 = vst [vmem:[%s14564_s6 + $0x3d0] sm:$0xff] %v9260_v32  ;;  %v9263_v1 = vadd.f32 %v15053_v0, %v9262_v37  ;;  %v9264_v26 = vpop.f32.mrb[247].mxu1 }
 0x7ed   : > { %9405 = vst [vmem:[%s14564_s6 + $0x3d8] sm:$0xff] %v9263_v1 }
 0x7f0   : > { %v9267_v54 = vpop.f32.mrb[248].mxu1 }
 0x7f1   : > { %v9268_v33 = vadd.f32 %v15053_v0, %v9267_v54  ;;  %v9269_v27 = vpop.f32.mrb[249].mxu1 }
 0x7f2   : > { %v9270_v63 = vpop.f32.mrb[250].mxu1 }
 0x7f3   : > { %9406 = vst [vmem:[%s14564_s6 + $0x3e0] sm:$0xff] %v9268_v33  ;;  %v9271_v23 = vadd.f32 %v15053_v0, %v9270_v63  ;;  %v9272_v34 = vpop.f32.mrb[251].mxu1 }
 0x7f5   : > { %9407 = vst [vmem:[%s14564_s6 + $0x3e8] sm:$0xff] %v9271_v23 }
 0x7f8   : > { %v9275_v57 = vpop.f32.mrb[252].mxu1 }
 0x7f9   : > { %v9276_v36 = vadd.f32 %v15053_v0, %v9275_v57  ;;  %v9277_v8 = vpop.f32.mrb[253].mxu1 }
 0x7fa   : > { %v9278_v38 = vpop.f32.mrb[254].mxu1 }
 0x7fb   : > { %9408 = vst [vmem:[%s14564_s6 + $0x3f0] sm:$0xff] %v9276_v36  ;;  %v9279_v4 = vadd.f32 %v15053_v0, %v9278_v38  ;;  %v9280_v52 = vpop.f32.mrb[255].mxu1 }
 0x7fd   : > { %9409 = vst [vmem:[%s14564_s6 + $0x3f8] sm:$0xff] %v9279_v4 }
 0x7fe PF: > { %s15_s18 = sadd.s32 1, %s12632_s18  }
 0x7ff   : > { %p12_p4 = scmp.ge.s32.totalorder %s15_s18, 4  }
 0x801   :  { %14 = sbr.rel (!%p12_p4) target bundleno = 1 (0x1), region = 70 }

</bundles_post_ra>
